<compile_context>
chip_gen: v7x
topology: tpu7x:2x2x1
jax: 0.10.0
libtpu: 0.0.40
codegen_flags: <defaults>
</compile_context>

<pallas_src>
import functools
import math

import jax
import jax.numpy as jnp
from jax import lax
from jax.experimental import pallas as pl
from jax.experimental.pallas import tpu as pltpu


# --------------------------------------------------------------------------
# Fused conv-tower kernel:  stacked (conv3x3 + ReLU) layers + 3x3 head conv.
# --------------------------------------------------------------------------
def _tower_kernel(xp_ref, xc_ref, xn_ref,
                  wf_ref, bf_ref, wm_ref, bm_ref, wh_ref, bh_ref,
                  o_ref,
                  in0, bufa, bufb, acc_f, acc_h,
                  *, TH, W, Cin, F, Cout_pad, stacked):
    """Refs:
      xp/xc/xn : (1, TH, W, Cin) prev / current / next input row blocks (f32)
      wf, bf   : (9, Cin, F) bf16, (1, F) f32        first stacked conv
      wm, bm   : (nm, 9, F, F) bf16, (nm, 1, F) f32  remaining stacked convs
      wh, bh   : (9, F, Cout_pad) bf16, (1, Cout_pad) f32  head conv
      o_ref    : (1, TH, W, Cout_pad) f32 output block
      in0      : (TH+2L, W+2, Cin) bf16 scratch  (raw-input window, zero-padded)
      bufa/b   : (TH+2(L-1), W+2, F) bf16 scratch (activation ping-pong)
      acc_f/h  : f32 VMEM scratch accumulators (flattened rows*W x Cout)
    """
    L = stacked + 1            # total fused conv layers (stacked + head)
    halo = L                   # rows of halo needed per side on the raw input
    bf16 = jnp.bfloat16
    t = pl.program_id(1)
    last_t = pl.num_programs(1) - 1

    # ---- zero the left/right "same"-padding columns of all working buffers ---
    for buf in (in0, bufa, bufb):
        z = jnp.zeros((buf.shape[0], 1, buf.shape[2]), buf.dtype)
        buf[:, 0:1, :] = z
        buf[:, W + 1:W + 2, :] = z

    # ---- assemble the raw-input row window (TH + 2*halo rows), cast to bf16 --
    in0[0:halo, 1:W + 1, :] = xp_ref[0, TH - halo:TH, :, :].astype(bf16)
    in0[halo:halo + TH, 1:W + 1, :] = xc_ref[0].astype(bf16)
    in0[halo + TH:TH + 2 * halo, 1:W + 1, :] = xn_ref[0, 0:halo, :, :].astype(bf16)

    # rows that fall outside the image are zero padding (in-kernel "same" pad)
    @pl.when(t == 0)
    def _():
        in0[0:halo, :, :] = jnp.zeros((halo, W + 2, Cin), bf16)

    @pl.when(t == last_t)
    def _():
        in0[halo + TH:TH + 2 * halo, :, :] = jnp.zeros((halo, W + 2, Cin), bf16)

    def conv3x3(src_ref, rows_in, cin, get_w, bias, acc_ref, cout, relu):
        """3x3 'same' conv on rows [0, rows_in) of src_ref (width W+2 with zero
        side columns).  Accumulates the 9 taps in an f32 VMEM scratch and
        returns the (rows_in - 2, W, cout) f32 result (bias added, opt. ReLU)."""
        rows_out = rows_in - 2
        M = rows_out * W
        first = True
        for kh in range(3):
            for kw in range(3):
                patch = src_ref[kh:kh + rows_out, kw:kw + W, :]       # bf16
                contrib = jnp.dot(patch.reshape(M, cin),
                                  get_w(kh * 3 + kw),
                                  preferred_element_type=jnp.float32)
                if first:
                    acc_ref[0:M, :] = contrib
                    first = False
                else:
                    acc_ref[0:M, :] = acc_ref[0:M, :] + contrib
        r = acc_ref[0:M, :] + bias                                    # (M, cout)
        if relu:
            r = jnp.maximum(r, 0.0)
        return r.reshape(rows_out, W, cout)

    # ---- stacked ConvModule layers (conv3x3 + ReLU); activations stay in VMEM
    src, rows_in, cin = in0, TH + 2 * halo, Cin
    for i in range(1, stacked + 1):
        rows_out = rows_in - 2
        if i == 1:
            get_w = lambda k: wf_ref[k]
            bias = bf_ref[...]
        else:
            li = i - 2
            get_w = lambda k, li=li: wm_ref[li, k]
            bias = bm_ref[li]
        dst = bufa if (i % 2 == 1) else bufb
        out = conv3x3(src, rows_in, cin, get_w, bias, acc_f, F, relu=True)
        dst[0:rows_out, 1:W + 1, :] = out.astype(bf16)

        # per-layer "same" zero padding along H at the image boundaries
        pad = L - i

        @pl.when(t == 0)
        def _(dst=dst, pad=pad):
            dst[0:pad, :, :] = jnp.zeros((pad, W + 2, F), bf16)

        @pl.when(t == last_t)
        def _(dst=dst, pad=pad, rows_out=rows_out):
            dst[rows_out - pad:rows_out, :, :] = jnp.zeros((pad, W + 2, F), bf16)

        src, rows_in, cin = dst, rows_out, F

    # ---- head conv (no ReLU), lane-dense padded Cout, straight to the output
    out = conv3x3(src, rows_in, F, lambda k: wh_ref[k], bh_ref[...],
                  acc_h, Cout_pad, relu=False)
    o_ref[0] = out.astype(o_ref.dtype)


# --------------------------------------------------------------------------
# Wrapper: one fused tower = one pallas_call
# --------------------------------------------------------------------------
def _round_up(x, m):
    return ((x + m - 1) // m) * m


def _pick_tile_h(H, n_layers, target):
    """Largest divisor of H that is >= n_layers (halo fits in one adjacent
    block) and <= target; fall back to the smallest valid divisor."""
    divs = [d for d in range(1, H + 1) if H % d == 0 and d >= n_layers]
    assert divs, (
        f"feature map height {H} too small for {n_layers} fused 3x3 layers")
    small = [d for d in divs if d <= target]
    return max(small) if small else min(divs)


def _bytes(shape, itemsize):
    n = 1
    for s in shape:
        n *= s
    return n * itemsize


def conv_tower(x_nhwc, pack, *, th_target=8):
    """Run one fused conv tower (stacked 3x3+ReLU convs + 3x3 head conv).

    x_nhwc: (N, H, W, Cin) float32.  Returns (N, H, W, cout) float32.
    NOTE: th_target should be swept upward (16-64) for large feature maps on
    v5e/v6e; 8 keeps every generation (incl. v7x's 64 MiB VMEM) comfortable.
    """
    N, H, W, Cin = x_nhwc.shape
    w_first, b_first = pack["w_first"], pack["b_first"]
    w_mid, b_mid = pack["w_mid"], pack["b_mid"]
    w_head, b_head = pack["w_head"], pack["b_head"]
    F = w_first.shape[-1]
    Cout_pad = w_head.shape[-1]
    stacked = pack["stacked"]
    L = stacked + 1
    halo = L

    TH = _pick_tile_h(H, L, th_target)
    T = H // TH

    kernel = functools.partial(
        _tower_kernel, TH=TH, W=W, Cin=Cin, F=F, Cout_pad=Cout_pad,
        stacked=stacked)

    in_specs = [
        # prev / current / next row blocks of the same input (halo source)
        pl.BlockSpec((1, TH, W, Cin),
                     lambda n, t: (n, jnp.maximum(t - 1, 0), 0, 0)),
        pl.BlockSpec((1, TH, W, Cin), lambda n, t: (n, t, 0, 0)),
        pl.BlockSpec((1, TH, W, Cin),
                     lambda n, t, T=T: (n, jnp.minimum(t + 1, T - 1), 0, 0)),
        # weights / biases: VMEM-resident, broadcast across the grid
        pl.BlockSpec(w_first.shape, lambda n, t: (0, 0, 0)),
        pl.BlockSpec(b_first.shape, lambda n, t: (0, 0)),
        pl.BlockSpec(w_mid.shape, lambda n, t: (0, 0, 0, 0)),
        pl.BlockSpec(b_mid.shape, lambda n, t: (0, 0, 0)),
        pl.BlockSpec(w_head.shape, lambda n, t: (0, 0, 0)),
        pl.BlockSpec(b_head.shape, lambda n, t: (0, 0)),
    ]
    out_specs = pl.BlockSpec((1, TH, W, Cout_pad), lambda n, t: (n, t, 0, 0))

    scratch_shapes = [
        pltpu.VMEM((TH + 2 * halo, W + 2, Cin), jnp.bfloat16),      # raw window
        pltpu.VMEM((TH + 2 * (L - 1), W + 2, F), jnp.bfloat16),     # ping
        pltpu.VMEM((TH + 2 * (L - 1), W + 2, F), jnp.bfloat16),     # pong
        pltpu.VMEM(((TH + 2 * (L - 1)) * W, F), jnp.float32),       # acc stacked
        pltpu.VMEM((TH * W, Cout_pad), jnp.float32),                # acc head
    ]

    # explicit VMEM budget: double-buffered blocks + scratch (+margin)
    est = 3 * 2 * _bytes((1, TH, W, Cin), 4)
    est += 2 * sum(a.size * a.dtype.itemsize
                   for a in (w_first, b_first, w_mid, b_mid, w_head, b_head))
    est += 2 * _bytes((1, TH, W, Cout_pad), 4)
    est += _bytes((TH + 2 * halo, W + 2, Cin), 2)
    est += 2 * _bytes((TH + 2 * (L - 1), W + 2, F), 2)
    est += _bytes(((TH + 2 * (L - 1)) * W, F), 4)
    est += _bytes((TH * W, Cout_pad), 4)
    vmem_limit = int(min(max(2 * est, 16 * 1024 * 1024), 48 * 1024 * 1024))

    out = pl.pallas_call(
        kernel,
        out_shape=jax.ShapeDtypeStruct((N, H, W, Cout_pad), jnp.float32),
        grid=(N, T),
        in_specs=in_specs,
        out_specs=out_specs,
        scratch_shapes=scratch_shapes,
        compiler_params=pltpu.CompilerParams(
            dimension_semantics=("parallel", "parallel"),
            vmem_limit_bytes=vmem_limit),
    )(x_nhwc, x_nhwc, x_nhwc,
      w_first, b_first, w_mid, b_mid, w_head, b_head)

    return out[..., :pack["cout"]]


# --------------------------------------------------------------------------
# PPDetHead (with_deform=False) — parameters + forward
# --------------------------------------------------------------------------
class PPDetHeadPallas:
    def __init__(self, num_classes, in_channels, feat_channels=256,
                 stacked_convs=4, seed=0):
        assert stacked_convs >= 1
        self.num_classes = num_classes
        self.cls_out_channels = num_classes - 1
        self.in_channels = in_channels
        self.feat_channels = feat_channels
        self.stacked_convs = stacked_convs
        # TODO(synk): with_deform=True path (FeatureAlign / DeformConv v1) is
        # not implemented; only the default with_deform=False forward is.
        self._init_params(seed)
        self.reg_pack = self._pack_tower(self.reg_convs,
                                         self.ppdet_reg_w, self.ppdet_reg_b)
        self.cls_pack = self._pack_tower(self.cls_convs,
                                         self.ppdet_cls_w, self.ppdet_cls_b)

    # raw f32 parameters (also used by the pure-JAX reference)
    def _init_params(self, seed):
        key = jax.random.PRNGKey(seed)

        def normal(key, shape, std):
            return std * jax.random.normal(key, shape, jnp.float32)

        self.reg_convs = []   # list of (w_hwio, b) — conv3x3 + ReLU
        self.cls_convs = []
        for i in range(self.stacked_convs):
            chn = self.in_channels if i == 0 else self.feat_channels
            key, k1, k2 = jax.random.split(key, 3)
            self.reg_convs.append(
                (normal(k1, (3, 3, chn, self.feat_channels), 0.01),
                 jnp.zeros((self.feat_channels,), jnp.float32)))
            self.cls_convs.append(
                (normal(k2, (3, 3, chn, self.feat_channels), 0.01),
                 jnp.zeros((self.feat_channels,), jnp.float32)))

        key, k_reg, k_cls = jax.random.split(key, 3)
        self.ppdet_reg_w = normal(k_reg, (3, 3, self.feat_channels, 4), 0.01)
        self.ppdet_reg_b = jnp.zeros((4,), jnp.float32)

        bias_cls = -math.log((1.0 - 0.01) / 0.01)   # bias_init_with_prob(0.01)
        self.ppdet_cls_w = normal(
            k_cls, (3, 3, self.feat_channels, self.cls_out_channels), 0.01)
        self.ppdet_cls_b = jnp.full(
            (self.cls_out_channels,), bias_cls, jnp.float32)

    # pre-pack a tower: tap-major bf16 weights, lane-padded head channels
    def _pack_tower(self, convs, w_head, b_head):
        F = self.feat_channels
        cin = convs[0][0].shape[2]
        cout = w_head.shape[-1]
        cout_pad = _round_up(cout, 128)

        w_first = convs[0][0].reshape(9, cin, F).astype(jnp.bfloat16)
        b_first = convs[0][1].reshape(1, F).astype(jnp.float32)
        if len(convs) > 1:
            w_mid = jnp.stack([w.reshape(9, F, F) for (w, _) in convs[1:]]
                              ).astype(jnp.bfloat16)
            b_mid = jnp.stack([b.reshape(1, F) for (_, b) in convs[1:]]
                              ).astype(jnp.float32)
        else:                       # dummy (unused) mid-layer slot
            w_mid = jnp.zeros((1, 9, F, F), jnp.bfloat16)
            b_mid = jnp.zeros((1, 1, F), jnp.float32)

        wh = jnp.zeros((9, F, cout_pad), jnp.float32)
        wh = wh.at[:, :, :cout].set(w_head.reshape(9, F, cout))
        bh = jnp.zeros((1, cout_pad), jnp.float32)
        bh = bh.at[:, :cout].set(b_head.reshape(1, cout))

        return dict(w_first=w_first, b_first=b_first,
                    w_mid=w_mid, b_mid=b_mid,
                    w_head=wh.astype(jnp.bfloat16), b_head=bh,
                    stacked=len(convs), cout=cout)

    def forward_single(self, x_nchw):
        """x_nchw: (N, C_in, H, W) float32 → (cls_score, bbox_pred), NCHW."""
        x = jnp.transpose(x_nchw, (0, 2, 3, 1)).astype(jnp.float32)  # -> NHWC
        bbox_pred = conv_tower(x, self.reg_pack)    # fused reg tower + head
        cls_score = conv_tower(x, self.cls_pack)    # fused cls tower + head
        return (jnp.transpose(cls_score, (0, 3, 1, 2)),
                jnp.transpose(bbox_pred, (0, 3, 1, 2)))

    def forward(self, feats):
        results = [self.forward_single(f) for f in feats]
        cls_scores = [r[0] for r in results]
        bbox_preds = [r[1] for r in results]
        return cls_scores, bbox_preds


# --------------------------------------------------------------------------
# Pure-JAX reference (f32) for the correctness sanity check
# --------------------------------------------------------------------------
def _ref_conv3x3(x_nhwc, w_hwio, b, relu):
    out = lax.conv_general_dilated(
        x_nhwc, w_hwio, window_strides=(1, 1), padding="SAME",
        dimension_numbers=("NHWC", "HWIO", "NHWC"))
    out = out + b.reshape(1, 1, 1, -1)
    if relu:
        out = jnp.maximum(out, 0.0)
    return out


def _ref_forward_single(head, x_nchw):
    x = jnp.transpose(x_nchw, (0, 2, 3, 1))
    reg_feat = x
    for (w, b) in head.reg_convs:
        reg_feat = _ref_conv3x3(reg_feat, w, b, True)
    bbox_pred = _ref_conv3x3(reg_feat, head.ppdet_reg_w, head.ppdet_reg_b, False)
    cls_feat = x
    for (w, b) in head.cls_convs:
        cls_feat = _ref_conv3x3(cls_feat, w, b, True)
    cls_score = _ref_conv3x3(cls_feat, head.ppdet_cls_w, head.ppdet_cls_b, False)
    return (jnp.transpose(cls_score, (0, 3, 1, 2)),
            jnp.transpose(bbox_pred, (0, 3, 1, 2)))


# --------------------------------------------------------------------------
if __name__ == "__main__":
    key = jax.random.PRNGKey(0)

    num_classes = 5          # -> cls_out_channels = 4
    in_channels = 4
    feat_channels = 32
    stacked_convs = 2

    head = PPDetHeadPallas(num_classes, in_channels,
                           feat_channels=feat_channels,
                           stacked_convs=stacked_convs, seed=0)

    # two small "FPN" levels, NCHW as in PyTorch
    k1, k2 = jax.random.split(key)
    feats = [
        jax.random.normal(k1, (2, in_channels, 16, 16), jnp.float32),
        jax.random.normal(k2, (2, in_channels, 8, 8), jnp.float32),
    ]

    cls_scores, bbox_preds = head.forward(feats)
    jax.block_until_ready(cls_scores)
    jax.block_until_ready(bbox_preds)

    # sanity check against the pure-JAX f32 reference (bf16 MXU -> loose tol)
    ok = True
    for lvl, x in enumerate(feats):
        ref_cls, ref_bbox = _ref_forward_single(head, x)
        ok &= bool(jnp.allclose(cls_scores[lvl], ref_cls, atol=1e-2, rtol=1e-2))
        ok &= bool(jnp.allclose(bbox_preds[lvl], ref_bbox, atol=1e-2, rtol=1e-2))
        assert cls_scores[lvl].shape == (x.shape[0], num_classes - 1,
                                         x.shape[2], x.shape[3])
        assert bbox_preds[lvl].shape == (x.shape[0], 4, x.shape[2], x.shape[3])

    if ok:
        print("KERNEL_OK")
    else:
        print("MISMATCH")
</pallas_src>

<mosaic_0001>
module attributes {stable_mosaic.version = 11 : i64} {
  func.func @_tower_kernel(%arg0: i32, %arg1: i32, %arg2: memref<1x8x16x4xf32, #tpu.memory_space<vmem>>, %arg3: memref<1x8x16x4xf32, #tpu.memory_space<vmem>>, %arg4: memref<1x8x16x4xf32, #tpu.memory_space<vmem>>, %arg5: memref<9x4x32xbf16, #tpu.memory_space<vmem>>, %arg6: memref<1x32xf32, #tpu.memory_space<vmem>>, %arg7: memref<1x9x32x32xbf16, #tpu.memory_space<vmem>>, %arg8: memref<1x1x32xf32, #tpu.memory_space<vmem>>, %arg9: memref<9x32x128xbf16, #tpu.memory_space<vmem>>, %arg10: memref<1x128xf32, #tpu.memory_space<vmem>>, %arg11: memref<1x8x16x128xf32, #tpu.memory_space<vmem>>, %arg12: memref<14x18x4xbf16, #tpu.memory_space<vmem>>, %arg13: memref<12x18x32xbf16, #tpu.memory_space<vmem>>, %arg14: memref<12x18x32xbf16, #tpu.memory_space<vmem>>, %arg15: memref<192x32xf32, #tpu.memory_space<vmem>>, %arg16: memref<128x128xf32, #tpu.memory_space<vmem>>) attributes {dimension_semantics = [#tpu.dimension_semantics<parallel>, #tpu.dimension_semantics<parallel>], iteration_bounds = array<i64: 2, 2>, scalar_prefetch = 0 : i64, scratch_operands = 5 : i64, tpu.core_type = #tpu.core_type<tc>, window_params = [{transform_indices = @transform_0, window_bounds = array<i64: 1, 8, 16, 4>}, {transform_indices = @transform_1, window_bounds = array<i64: 1, 8, 16, 4>}, {transform_indices = @transform_2, window_bounds = array<i64: 1, 8, 16, 4>}, {pipeline_mode = #tpu.pipeline_mode<synchronous>, transform_indices = @transform_3, window_bounds = array<i64: 9, 4, 32>}, {pipeline_mode = #tpu.pipeline_mode<synchronous>, transform_indices = @transform_4, window_bounds = array<i64: 1, 32>}, {pipeline_mode = #tpu.pipeline_mode<synchronous>, transform_indices = @transform_5, window_bounds = array<i64: 1, 9, 32, 32>}, {pipeline_mode = #tpu.pipeline_mode<synchronous>, transform_indices = @transform_6, window_bounds = array<i64: 1, 1, 32>}, {pipeline_mode = #tpu.pipeline_mode<synchronous>, transform_indices = @transform_7, window_bounds = array<i64: 9, 32, 128>}, {pipeline_mode = #tpu.pipeline_mode<synchronous>, transform_indices = @transform_8, window_bounds = array<i64: 1, 128>}, {transform_indices = @transform_9, window_bounds = array<i64: 1, 8, 16, 128>}]} {
    %cst = arith.constant 0.000000e+00 : bf16
    %0 = vector.broadcast %cst : bf16 to vector<14x1x4xbf16>
    %c0 = arith.constant 0 : index
    %c0_0 = arith.constant 0 : index
    %c0_1 = arith.constant 0 : index
    %1 = vector.load %arg12[%c0, %c0_0, %c0_1] : memref<14x18x4xbf16, #tpu.memory_space<vmem>>, vector<14x1x4xbf16>
    tpu.vector_store %arg12[%c0, %c0_0, %c0_1], %0 {strides = array<i32>} : memref<14x18x4xbf16, #tpu.memory_space<vmem>>, vector<14x1x4xbf16>,
    %c0_2 = arith.constant 0 : index
    %c17 = arith.constant 17 : index
    %c0_3 = arith.constant 0 : index
    %2 = vector.load %arg12[%c0_2, %c17, %c0_3] : memref<14x18x4xbf16, #tpu.memory_space<vmem>>, vector<14x1x4xbf16>
    tpu.vector_store %arg12[%c0_2, %c17, %c0_3], %0 {strides = array<i32>} : memref<14x18x4xbf16, #tpu.memory_space<vmem>>, vector<14x1x4xbf16>,
    %cst_4 = arith.constant 0.000000e+00 : bf16
    %3 = vector.broadcast %cst_4 : bf16 to vector<12x1x32xbf16>
    %c0_5 = arith.constant 0 : index
    %c0_6 = arith.constant 0 : index
    %c0_7 = arith.constant 0 : index
    %4 = vector.load %arg13[%c0_5, %c0_6, %c0_7] : memref<12x18x32xbf16, #tpu.memory_space<vmem>>, vector<12x1x32xbf16>
    tpu.vector_store %arg13[%c0_5, %c0_6, %c0_7], %3 {strides = array<i32>} : memref<12x18x32xbf16, #tpu.memory_space<vmem>>, vector<12x1x32xbf16>,
    %c0_8 = arith.constant 0 : index
    %c17_9 = arith.constant 17 : index
    %c0_10 = arith.constant 0 : index
    %5 = vector.load %arg13[%c0_8, %c17_9, %c0_10] : memref<12x18x32xbf16, #tpu.memory_space<vmem>>, vector<12x1x32xbf16>
    tpu.vector_store %arg13[%c0_8, %c17_9, %c0_10], %3 {strides = array<i32>} : memref<12x18x32xbf16, #tpu.memory_space<vmem>>, vector<12x1x32xbf16>,
    %cst_11 = arith.constant 0.000000e+00 : bf16
    %6 = vector.broadcast %cst_11 : bf16 to vector<12x1x32xbf16>
    %c0_12 = arith.constant 0 : index
    %c0_13 = arith.constant 0 : index
    %c0_14 = arith.constant 0 : index
    %7 = vector.load %arg14[%c0_12, %c0_13, %c0_14] : memref<12x18x32xbf16, #tpu.memory_space<vmem>>, vector<12x1x32xbf16>
    tpu.vector_store %arg14[%c0_12, %c0_13, %c0_14], %6 {strides = array<i32>} : memref<12x18x32xbf16, #tpu.memory_space<vmem>>, vector<12x1x32xbf16>,
    %c0_15 = arith.constant 0 : index
    %c17_16 = arith.constant 17 : index
    %c0_17 = arith.constant 0 : index
    %8 = vector.load %arg14[%c0_15, %c17_16, %c0_17] : memref<12x18x32xbf16, #tpu.memory_space<vmem>>, vector<12x1x32xbf16>
    tpu.vector_store %arg14[%c0_15, %c17_16, %c0_17], %6 {strides = array<i32>} : memref<12x18x32xbf16, #tpu.memory_space<vmem>>, vector<12x1x32xbf16>,
    %c0_18 = arith.constant 0 : index
    %c5 = arith.constant 5 : index
    %c0_19 = arith.constant 0 : index
    %c0_20 = arith.constant 0 : index
    %9 = vector.load %arg2[%c0_18, %c5, %c0_19, %c0_20] : memref<1x8x16x4xf32, #tpu.memory_space<vmem>>, vector<1x3x16x4xf32>
    %10 = vector.shape_cast %9 : vector<1x3x16x4xf32> to vector<3x16x4xf32>
    %11 = arith.truncf %10 : vector<3x16x4xf32> to vector<3x16x4xbf16>
    %c0_21 = arith.constant 0 : index
    %c1 = arith.constant 1 : index
    %c0_22 = arith.constant 0 : index
    %12 = vector.load %arg12[%c0_21, %c1, %c0_22] : memref<14x18x4xbf16, #tpu.memory_space<vmem>>, vector<3x16x4xbf16>
    tpu.vector_store %arg12[%c0_21, %c1, %c0_22], %11 {strides = array<i32>} : memref<14x18x4xbf16, #tpu.memory_space<vmem>>, vector<3x16x4xbf16>,
    %c0_23 = arith.constant 0 : index
    %c0_24 = arith.constant 0 : index
    %c0_25 = arith.constant 0 : index
    %c0_26 = arith.constant 0 : index
    %13 = vector.load %arg3[%c0_23, %c0_24, %c0_25, %c0_26] : memref<1x8x16x4xf32, #tpu.memory_space<vmem>>, vector<1x8x16x4xf32>
    %14 = vector.shape_cast %13 : vector<1x8x16x4xf32> to vector<8x16x4xf32>
    %15 = arith.truncf %14 : vector<8x16x4xf32> to vector<8x16x4xbf16>
    %c3 = arith.constant 3 : index
    %c1_27 = arith.constant 1 : index
    %c0_28 = arith.constant 0 : index
    %16 = vector.load %arg12[%c3, %c1_27, %c0_28] : memref<14x18x4xbf16, #tpu.memory_space<vmem>>, vector<8x16x4xbf16>
    tpu.vector_store %arg12[%c3, %c1_27, %c0_28], %15 {strides = array<i32>} : memref<14x18x4xbf16, #tpu.memory_space<vmem>>, vector<8x16x4xbf16>,
    %c0_29 = arith.constant 0 : index
    %c0_30 = arith.constant 0 : index
    %c0_31 = arith.constant 0 : index
    %c0_32 = arith.constant 0 : index
    %17 = vector.load %arg4[%c0_29, %c0_30, %c0_31, %c0_32] : memref<1x8x16x4xf32, #tpu.memory_space<vmem>>, vector<1x3x16x4xf32>
    %18 = vector.shape_cast %17 : vector<1x3x16x4xf32> to vector<3x16x4xf32>
    %19 = arith.truncf %18 : vector<3x16x4xf32> to vector<3x16x4xbf16>
    %c11 = arith.constant 11 : index
    %c1_33 = arith.constant 1 : index
    %c0_34 = arith.constant 0 : index
    %20 = vector.load %arg12[%c11, %c1_33, %c0_34] : memref<14x18x4xbf16, #tpu.memory_space<vmem>>, vector<3x16x4xbf16>
    tpu.vector_store %arg12[%c11, %c1_33, %c0_34], %19 {strides = array<i32>} : memref<14x18x4xbf16, #tpu.memory_space<vmem>>, vector<3x16x4xbf16>,
    %c0_i32 = arith.constant 0 : i32
    %21 = arith.cmpi eq, %arg1, %c0_i32 : i32
    %22 = arith.extui %21 : i1 to i32
    %c0_i32_35 = arith.constant 0 : i32
    %23 = arith.cmpi ne, %22, %c0_i32_35 : i32
    scf.if %23 {
      %cst_365 = arith.constant 0.000000e+00 : bf16
      %276 = vector.broadcast %cst_365 : bf16 to vector<3x18x4xbf16>
      %c0_366 = arith.constant 0 : index
      %c0_367 = arith.constant 0 : index
      %c0_368 = arith.constant 0 : index
      %277 = vector.load %arg12[%c0_366, %c0_367, %c0_368] : memref<14x18x4xbf16, #tpu.memory_space<vmem>>, vector<3x18x4xbf16>
      tpu.vector_store %arg12[%c0_366, %c0_367, %c0_368], %276 {strides = array<i32>} : memref<14x18x4xbf16, #tpu.memory_space<vmem>>, vector<3x18x4xbf16>,
    } else {
    }
    %c1_i32 = arith.constant 1 : i32
    %24 = arith.cmpi eq, %arg1, %c1_i32 : i32
    %25 = arith.extui %24 : i1 to i32
    %c0_i32_36 = arith.constant 0 : i32
    %26 = arith.cmpi ne, %25, %c0_i32_36 : i32
    scf.if %26 {
      %cst_365 = arith.constant 0.000000e+00 : bf16
      %276 = vector.broadcast %cst_365 : bf16 to vector<3x18x4xbf16>
      %c11_366 = arith.constant 11 : index
      %c0_367 = arith.constant 0 : index
      %c0_368 = arith.constant 0 : index
      %277 = vector.load %arg12[%c11_366, %c0_367, %c0_368] : memref<14x18x4xbf16, #tpu.memory_space<vmem>>, vector<3x18x4xbf16>
      tpu.vector_store %arg12[%c11_366, %c0_367, %c0_368], %276 {strides = array<i32>} : memref<14x18x4xbf16, #tpu.memory_space<vmem>>, vector<3x18x4xbf16>,
    } else {
    }
    %c0_37 = arith.constant 0 : index
    %c0_38 = arith.constant 0 : index
    %27 = vector.load %arg6[%c0_37, %c0_38] : memref<1x32xf32, #tpu.memory_space<vmem>>, vector<1x32xf32>
    %c0_39 = arith.constant 0 : index
    %c0_40 = arith.constant 0 : index
    %c0_41 = arith.constant 0 : index
    %28 = vector.load %arg12[%c0_39, %c0_40, %c0_41] : memref<14x18x4xbf16, #tpu.memory_space<vmem>>, vector<12x16x4xbf16>
    %29 = vector.shape_cast %28 : vector<12x16x4xbf16> to vector<192x4xbf16>
    %c0_42 = arith.constant 0 : index
    %c0_43 = arith.constant 0 : index
    %c0_44 = arith.constant 0 : index
    %30 = vector.load %arg5[%c0_42, %c0_43, %c0_44] : memref<9x4x32xbf16, #tpu.memory_space<vmem>>, vector<1x4x32xbf16>
    %31 = vector.shape_cast %30 : vector<1x4x32xbf16> to vector<4x32xbf16>
    %cst_45 = arith.constant dense<0.000000e+00> : vector<192x32xf32>
    %32 = tpu.matmul %29, %31, %cst_45 {dimension_numbers = #tpu.dot_dimension_numbers<[1], [0], [0], [1], [0, 0, 1, 1], [], []>} : vector<192x4xbf16>, vector<4x32xbf16>, vector<192x32xf32> -> vector<192x32xf32>
    %c0_46 = arith.constant 0 : index
    %c0_47 = arith.constant 0 : index
    %33 = vector.load %arg15[%c0_46, %c0_47] : memref<192x32xf32, #tpu.memory_space<vmem>>, vector<192x32xf32>
    tpu.vector_store %arg15[%c0_46, %c0_47], %32 {strides = array<i32>} : memref<192x32xf32, #tpu.memory_space<vmem>>, vector<192x32xf32>,
    %c0_48 = arith.constant 0 : index
    %c1_49 = arith.constant 1 : index
    %c0_50 = arith.constant 0 : index
    %34 = vector.load %arg12[%c0_48, %c1_49, %c0_50] : memref<14x18x4xbf16, #tpu.memory_space<vmem>>, vector<12x16x4xbf16>
    %35 = vector.shape_cast %34 : vector<12x16x4xbf16> to vector<192x4xbf16>
    %c1_51 = arith.constant 1 : index
    %c0_52 = arith.constant 0 : index
    %c0_53 = arith.constant 0 : index
    %36 = vector.load %arg5[%c1_51, %c0_52, %c0_53] : memref<9x4x32xbf16, #tpu.memory_space<vmem>>, vector<1x4x32xbf16>
    %37 = vector.shape_cast %36 : vector<1x4x32xbf16> to vector<4x32xbf16>
    %cst_54 = arith.constant dense<0.000000e+00> : vector<192x32xf32>
    %38 = tpu.matmul %35, %37, %cst_54 {dimension_numbers = #tpu.dot_dimension_numbers<[1], [0], [0], [1], [0, 0, 1, 1], [], []>} : vector<192x4xbf16>, vector<4x32xbf16>, vector<192x32xf32> -> vector<192x32xf32>
    %c0_55 = arith.constant 0 : index
    %c0_56 = arith.constant 0 : index
    %39 = vector.load %arg15[%c0_55, %c0_56] : memref<192x32xf32, #tpu.memory_space<vmem>>, vector<192x32xf32>
    %40 = arith.addf %39, %38 : vector<192x32xf32>
    %c0_57 = arith.constant 0 : index
    %c0_58 = arith.constant 0 : index
    %41 = vector.load %arg15[%c0_57, %c0_58] : memref<192x32xf32, #tpu.memory_space<vmem>>, vector<192x32xf32>
    tpu.vector_store %arg15[%c0_57, %c0_58], %40 {strides = array<i32>} : memref<192x32xf32, #tpu.memory_space<vmem>>, vector<192x32xf32>,
    %c0_59 = arith.constant 0 : index
    %c2 = arith.constant 2 : index
    %c0_60 = arith.constant 0 : index
    %42 = vector.load %arg12[%c0_59, %c2, %c0_60] : memref<14x18x4xbf16, #tpu.memory_space<vmem>>, vector<12x16x4xbf16>
    %43 = vector.shape_cast %42 : vector<12x16x4xbf16> to vector<192x4xbf16>
    %c2_61 = arith.constant 2 : index
    %c0_62 = arith.constant 0 : index
    %c0_63 = arith.constant 0 : index
    %44 = vector.load %arg5[%c2_61, %c0_62, %c0_63] : memref<9x4x32xbf16, #tpu.memory_space<vmem>>, vector<1x4x32xbf16>
    %45 = vector.shape_cast %44 : vector<1x4x32xbf16> to vector<4x32xbf16>
    %cst_64 = arith.constant dense<0.000000e+00> : vector<192x32xf32>
    %46 = tpu.matmul %43, %45, %cst_64 {dimension_numbers = #tpu.dot_dimension_numbers<[1], [0], [0], [1], [0, 0, 1, 1], [], []>} : vector<192x4xbf16>, vector<4x32xbf16>, vector<192x32xf32> -> vector<192x32xf32>
    %c0_65 = arith.constant 0 : index
    %c0_66 = arith.constant 0 : index
    %47 = vector.load %arg15[%c0_65, %c0_66] : memref<192x32xf32, #tpu.memory_space<vmem>>, vector<192x32xf32>
    %48 = arith.addf %47, %46 : vector<192x32xf32>
    %c0_67 = arith.constant 0 : index
    %c0_68 = arith.constant 0 : index
    %49 = vector.load %arg15[%c0_67, %c0_68] : memref<192x32xf32, #tpu.memory_space<vmem>>, vector<192x32xf32>
    tpu.vector_store %arg15[%c0_67, %c0_68], %48 {strides = array<i32>} : memref<192x32xf32, #tpu.memory_space<vmem>>, vector<192x32xf32>,
    %c1_69 = arith.constant 1 : index
    %c0_70 = arith.constant 0 : index
    %c0_71 = arith.constant 0 : index
    %50 = vector.load %arg12[%c1_69, %c0_70, %c0_71] : memref<14x18x4xbf16, #tpu.memory_space<vmem>>, vector<12x16x4xbf16>
    %51 = vector.shape_cast %50 : vector<12x16x4xbf16> to vector<192x4xbf16>
    %c3_72 = arith.constant 3 : index
    %c0_73 = arith.constant 0 : index
    %c0_74 = arith.constant 0 : index
    %52 = vector.load %arg5[%c3_72, %c0_73, %c0_74] : memref<9x4x32xbf16, #tpu.memory_space<vmem>>, vector<1x4x32xbf16>
    %53 = vector.shape_cast %52 : vector<1x4x32xbf16> to vector<4x32xbf16>
    %cst_75 = arith.constant dense<0.000000e+00> : vector<192x32xf32>
    %54 = tpu.matmul %51, %53, %cst_75 {dimension_numbers = #tpu.dot_dimension_numbers<[1], [0], [0], [1], [0, 0, 1, 1], [], []>} : vector<192x4xbf16>, vector<4x32xbf16>, vector<192x32xf32> -> vector<192x32xf32>
    %c0_76 = arith.constant 0 : index
    %c0_77 = arith.constant 0 : index
    %55 = vector.load %arg15[%c0_76, %c0_77] : memref<192x32xf32, #tpu.memory_space<vmem>>, vector<192x32xf32>
    %56 = arith.addf %55, %54 : vector<192x32xf32>
    %c0_78 = arith.constant 0 : index
    %c0_79 = arith.constant 0 : index
    %57 = vector.load %arg15[%c0_78, %c0_79] : memref<192x32xf32, #tpu.memory_space<vmem>>, vector<192x32xf32>
    tpu.vector_store %arg15[%c0_78, %c0_79], %56 {strides = array<i32>} : memref<192x32xf32, #tpu.memory_space<vmem>>, vector<192x32xf32>,
    %c1_80 = arith.constant 1 : index
    %c1_81 = arith.constant 1 : index
    %c0_82 = arith.constant 0 : index
    %58 = vector.load %arg12[%c1_80, %c1_81, %c0_82] : memref<14x18x4xbf16, #tpu.memory_space<vmem>>, vector<12x16x4xbf16>
    %59 = vector.shape_cast %58 : vector<12x16x4xbf16> to vector<192x4xbf16>
    %c4 = arith.constant 4 : index
    %c0_83 = arith.constant 0 : index
    %c0_84 = arith.constant 0 : index
    %60 = vector.load %arg5[%c4, %c0_83, %c0_84] : memref<9x4x32xbf16, #tpu.memory_space<vmem>>, vector<1x4x32xbf16>
    %61 = vector.shape_cast %60 : vector<1x4x32xbf16> to vector<4x32xbf16>
    %cst_85 = arith.constant dense<0.000000e+00> : vector<192x32xf32>
    %62 = tpu.matmul %59, %61, %cst_85 {dimension_numbers = #tpu.dot_dimension_numbers<[1], [0], [0], [1], [0, 0, 1, 1], [], []>} : vector<192x4xbf16>, vector<4x32xbf16>, vector<192x32xf32> -> vector<192x32xf32>
    %c0_86 = arith.constant 0 : index
    %c0_87 = arith.constant 0 : index
    %63 = vector.load %arg15[%c0_86, %c0_87] : memref<192x32xf32, #tpu.memory_space<vmem>>, vector<192x32xf32>
    %64 = arith.addf %63, %62 : vector<192x32xf32>
    %c0_88 = arith.constant 0 : index
    %c0_89 = arith.constant 0 : index
    %65 = vector.load %arg15[%c0_88, %c0_89] : memref<192x32xf32, #tpu.memory_space<vmem>>, vector<192x32xf32>
    tpu.vector_store %arg15[%c0_88, %c0_89], %64 {strides = array<i32>} : memref<192x32xf32, #tpu.memory_space<vmem>>, vector<192x32xf32>,
    %c1_90 = arith.constant 1 : index
    %c2_91 = arith.constant 2 : index
    %c0_92 = arith.constant 0 : index
    %66 = vector.load %arg12[%c1_90, %c2_91, %c0_92] : memref<14x18x4xbf16, #tpu.memory_space<vmem>>, vector<12x16x4xbf16>
    %67 = vector.shape_cast %66 : vector<12x16x4xbf16> to vector<192x4xbf16>
    %c5_93 = arith.constant 5 : index
    %c0_94 = arith.constant 0 : index
    %c0_95 = arith.constant 0 : index
    %68 = vector.load %arg5[%c5_93, %c0_94, %c0_95] : memref<9x4x32xbf16, #tpu.memory_space<vmem>>, vector<1x4x32xbf16>
    %69 = vector.shape_cast %68 : vector<1x4x32xbf16> to vector<4x32xbf16>
    %cst_96 = arith.constant dense<0.000000e+00> : vector<192x32xf32>
    %70 = tpu.matmul %67, %69, %cst_96 {dimension_numbers = #tpu.dot_dimension_numbers<[1], [0], [0], [1], [0, 0, 1, 1], [], []>} : vector<192x4xbf16>, vector<4x32xbf16>, vector<192x32xf32> -> vector<192x32xf32>
    %c0_97 = arith.constant 0 : index
    %c0_98 = arith.constant 0 : index
    %71 = vector.load %arg15[%c0_97, %c0_98] : memref<192x32xf32, #tpu.memory_space<vmem>>, vector<192x32xf32>
    %72 = arith.addf %71, %70 : vector<192x32xf32>
    %c0_99 = arith.constant 0 : index
    %c0_100 = arith.constant 0 : index
    %73 = vector.load %arg15[%c0_99, %c0_100] : memref<192x32xf32, #tpu.memory_space<vmem>>, vector<192x32xf32>
    tpu.vector_store %arg15[%c0_99, %c0_100], %72 {strides = array<i32>} : memref<192x32xf32, #tpu.memory_space<vmem>>, vector<192x32xf32>,
    %c2_101 = arith.constant 2 : index
    %c0_102 = arith.constant 0 : index
    %c0_103 = arith.constant 0 : index
    %74 = vector.load %arg12[%c2_101, %c0_102, %c0_103] : memref<14x18x4xbf16, #tpu.memory_space<vmem>>, vector<12x16x4xbf16>
    %75 = vector.shape_cast %74 : vector<12x16x4xbf16> to vector<192x4xbf16>
    %c6 = arith.constant 6 : index
    %c0_104 = arith.constant 0 : index
    %c0_105 = arith.constant 0 : index
    %76 = vector.load %arg5[%c6, %c0_104, %c0_105] : memref<9x4x32xbf16, #tpu.memory_space<vmem>>, vector<1x4x32xbf16>
    %77 = vector.shape_cast %76 : vector<1x4x32xbf16> to vector<4x32xbf16>
    %cst_106 = arith.constant dense<0.000000e+00> : vector<192x32xf32>
    %78 = tpu.matmul %75, %77, %cst_106 {dimension_numbers = #tpu.dot_dimension_numbers<[1], [0], [0], [1], [0, 0, 1, 1], [], []>} : vector<192x4xbf16>, vector<4x32xbf16>, vector<192x32xf32> -> vector<192x32xf32>
    %c0_107 = arith.constant 0 : index
    %c0_108 = arith.constant 0 : index
    %79 = vector.load %arg15[%c0_107, %c0_108] : memref<192x32xf32, #tpu.memory_space<vmem>>, vector<192x32xf32>
    %80 = arith.addf %79, %78 : vector<192x32xf32>
    %c0_109 = arith.constant 0 : index
    %c0_110 = arith.constant 0 : index
    %81 = vector.load %arg15[%c0_109, %c0_110] : memref<192x32xf32, #tpu.memory_space<vmem>>, vector<192x32xf32>
    tpu.vector_store %arg15[%c0_109, %c0_110], %80 {strides = array<i32>} : memref<192x32xf32, #tpu.memory_space<vmem>>, vector<192x32xf32>,
    %c2_111 = arith.constant 2 : index
    %c1_112 = arith.constant 1 : index
    %c0_113 = arith.constant 0 : index
    %82 = vector.load %arg12[%c2_111, %c1_112, %c0_113] : memref<14x18x4xbf16, #tpu.memory_space<vmem>>, vector<12x16x4xbf16>
    %83 = vector.shape_cast %82 : vector<12x16x4xbf16> to vector<192x4xbf16>
    %c7 = arith.constant 7 : index
    %c0_114 = arith.constant 0 : index
    %c0_115 = arith.constant 0 : index
    %84 = vector.load %arg5[%c7, %c0_114, %c0_115] : memref<9x4x32xbf16, #tpu.memory_space<vmem>>, vector<1x4x32xbf16>
    %85 = vector.shape_cast %84 : vector<1x4x32xbf16> to vector<4x32xbf16>
    %cst_116 = arith.constant dense<0.000000e+00> : vector<192x32xf32>
    %86 = tpu.matmul %83, %85, %cst_116 {dimension_numbers = #tpu.dot_dimension_numbers<[1], [0], [0], [1], [0, 0, 1, 1], [], []>} : vector<192x4xbf16>, vector<4x32xbf16>, vector<192x32xf32> -> vector<192x32xf32>
    %c0_117 = arith.constant 0 : index
    %c0_118 = arith.constant 0 : index
    %87 = vector.load %arg15[%c0_117, %c0_118] : memref<192x32xf32, #tpu.memory_space<vmem>>, vector<192x32xf32>
    %88 = arith.addf %87, %86 : vector<192x32xf32>
    %c0_119 = arith.constant 0 : index
    %c0_120 = arith.constant 0 : index
    %89 = vector.load %arg15[%c0_119, %c0_120] : memref<192x32xf32, #tpu.memory_space<vmem>>, vector<192x32xf32>
    tpu.vector_store %arg15[%c0_119, %c0_120], %88 {strides = array<i32>} : memref<192x32xf32, #tpu.memory_space<vmem>>, vector<192x32xf32>,
    %c2_121 = arith.constant 2 : index
    %c2_122 = arith.constant 2 : index
    %c0_123 = arith.constant 0 : index
    %90 = vector.load %arg12[%c2_121, %c2_122, %c0_123] : memref<14x18x4xbf16, #tpu.memory_space<vmem>>, vector<12x16x4xbf16>
    %91 = vector.shape_cast %90 : vector<12x16x4xbf16> to vector<192x4xbf16>
    %c8 = arith.constant 8 : index
    %c0_124 = arith.constant 0 : index
    %c0_125 = arith.constant 0 : index
    %92 = vector.load %arg5[%c8, %c0_124, %c0_125] : memref<9x4x32xbf16, #tpu.memory_space<vmem>>, vector<1x4x32xbf16>
    %93 = vector.shape_cast %92 : vector<1x4x32xbf16> to vector<4x32xbf16>
    %cst_126 = arith.constant dense<0.000000e+00> : vector<192x32xf32>
    %94 = tpu.matmul %91, %93, %cst_126 {dimension_numbers = #tpu.dot_dimension_numbers<[1], [0], [0], [1], [0, 0, 1, 1], [], []>} : vector<192x4xbf16>, vector<4x32xbf16>, vector<192x32xf32> -> vector<192x32xf32>
    %c0_127 = arith.constant 0 : index
    %c0_128 = arith.constant 0 : index
    %95 = vector.load %arg15[%c0_127, %c0_128] : memref<192x32xf32, #tpu.memory_space<vmem>>, vector<192x32xf32>
    %96 = arith.addf %95, %94 : vector<192x32xf32>
    %c0_129 = arith.constant 0 : index
    %c0_130 = arith.constant 0 : index
    %97 = vector.load %arg15[%c0_129, %c0_130] : memref<192x32xf32, #tpu.memory_space<vmem>>, vector<192x32xf32>
    tpu.vector_store %arg15[%c0_129, %c0_130], %96 {strides = array<i32>} : memref<192x32xf32, #tpu.memory_space<vmem>>, vector<192x32xf32>,
    %c0_131 = arith.constant 0 : index
    %c0_132 = arith.constant 0 : index
    %98 = vector.load %arg15[%c0_131, %c0_132] : memref<192x32xf32, #tpu.memory_space<vmem>>, vector<192x32xf32>
    %99 = vector.broadcast %27 : vector<1x32xf32> to vector<192x32xf32>
    %100 = arith.addf %98, %99 : vector<192x32xf32>
    %cst_133 = arith.constant 0.000000e+00 : f32
    %101 = vector.broadcast %cst_133 : f32 to vector<192x32xf32>
    %102 = arith.maximumf %100, %101 : vector<192x32xf32>
    %103 = vector.shape_cast %102 : vector<192x32xf32> to vector<12x16x32xf32>
    %104 = arith.truncf %103 : vector<12x16x32xf32> to vector<12x16x32xbf16>
    %c0_134 = arith.constant 0 : index
    %c1_135 = arith.constant 1 : index
    %c0_136 = arith.constant 0 : index
    %105 = vector.load %arg13[%c0_134, %c1_135, %c0_136] : memref<12x18x32xbf16, #tpu.memory_space<vmem>>, vector<12x16x32xbf16>
    tpu.vector_store %arg13[%c0_134, %c1_135, %c0_136], %104 {strides = array<i32>} : memref<12x18x32xbf16, #tpu.memory_space<vmem>>, vector<12x16x32xbf16>,
    %c0_i32_137 = arith.constant 0 : i32
    %106 = arith.cmpi eq, %arg1, %c0_i32_137 : i32
    %107 = arith.extui %106 : i1 to i32
    %c0_i32_138 = arith.constant 0 : i32
    %108 = arith.cmpi ne, %107, %c0_i32_138 : i32
    scf.if %108 {
      %cst_365 = arith.constant 0.000000e+00 : bf16
      %276 = vector.broadcast %cst_365 : bf16 to vector<2x18x32xbf16>
      %c0_366 = arith.constant 0 : index
      %c0_367 = arith.constant 0 : index
      %c0_368 = arith.constant 0 : index
      %277 = vector.load %arg13[%c0_366, %c0_367, %c0_368] : memref<12x18x32xbf16, #tpu.memory_space<vmem>>, vector<2x18x32xbf16>
      tpu.vector_store %arg13[%c0_366, %c0_367, %c0_368], %276 {strides = array<i32>} : memref<12x18x32xbf16, #tpu.memory_space<vmem>>, vector<2x18x32xbf16>,
    } else {
    }
    %c1_i32_139 = arith.constant 1 : i32
    %109 = arith.cmpi eq, %arg1, %c1_i32_139 : i32
    %110 = arith.extui %109 : i1 to i32
    %c0_i32_140 = arith.constant 0 : i32
    %111 = arith.cmpi ne, %110, %c0_i32_140 : i32
    scf.if %111 {
      %cst_365 = arith.constant 0.000000e+00 : bf16
      %276 = vector.broadcast %cst_365 : bf16 to vector<2x18x32xbf16>
      %c10 = arith.constant 10 : index
      %c0_366 = arith.constant 0 : index
      %c0_367 = arith.constant 0 : index
      %277 = vector.load %arg13[%c10, %c0_366, %c0_367] : memref<12x18x32xbf16, #tpu.memory_space<vmem>>, vector<2x18x32xbf16>
      tpu.vector_store %arg13[%c10, %c0_366, %c0_367], %276 {strides = array<i32>} : memref<12x18x32xbf16, #tpu.memory_space<vmem>>, vector<2x18x32xbf16>,
    } else {
    }
    %c0_141 = arith.constant 0 : index
    %c0_142 = arith.constant 0 : index
    %c0_143 = arith.constant 0 : index
    %112 = vector.load %arg8[%c0_141, %c0_142, %c0_143] : memref<1x1x32xf32, #tpu.memory_space<vmem>>, vector<1x1x32xf32>
    %113 = vector.shape_cast %112 : vector<1x1x32xf32> to vector<1x32xf32>
    %c0_144 = arith.constant 0 : index
    %c0_145 = arith.constant 0 : index
    %c0_146 = arith.constant 0 : index
    %114 = vector.load %arg13[%c0_144, %c0_145, %c0_146] : memref<12x18x32xbf16, #tpu.memory_space<vmem>>, vector<10x16x32xbf16>
    %115 = vector.shape_cast %114 : vector<10x16x32xbf16> to vector<160x32xbf16>
    %c0_147 = arith.constant 0 : index
    %c0_148 = arith.constant 0 : index
    %c0_149 = arith.constant 0 : index
    %c0_150 = arith.constant 0 : index
    %116 = vector.load %arg7[%c0_147, %c0_148, %c0_149, %c0_150] : memref<1x9x32x32xbf16, #tpu.memory_space<vmem>>, vector<1x1x32x32xbf16>
    %117 = vector.shape_cast %116 : vector<1x1x32x32xbf16> to vector<32x32xbf16>
    %cst_151 = arith.constant dense<0.000000e+00> : vector<160x32xf32>
    %118 = tpu.matmul %115, %117, %cst_151 {dimension_numbers = #tpu.dot_dimension_numbers<[1], [0], [0], [1], [0, 0, 1, 1], [], []>} : vector<160x32xbf16>, vector<32x32xbf16>, vector<160x32xf32> -> vector<160x32xf32>
    %c0_152 = arith.constant 0 : index
    %c0_153 = arith.constant 0 : index
    %119 = vector.load %arg15[%c0_152, %c0_153] : memref<192x32xf32, #tpu.memory_space<vmem>>, vector<160x32xf32>
    tpu.vector_store %arg15[%c0_152, %c0_153], %118 {strides = array<i32>} : memref<192x32xf32, #tpu.memory_space<vmem>>, vector<160x32xf32>,
    %c0_154 = arith.constant 0 : index
    %c1_155 = arith.constant 1 : index
    %c0_156 = arith.constant 0 : index
    %120 = vector.load %arg13[%c0_154, %c1_155, %c0_156] : memref<12x18x32xbf16, #tpu.memory_space<vmem>>, vector<10x16x32xbf16>
    %121 = vector.shape_cast %120 : vector<10x16x32xbf16> to vector<160x32xbf16>
    %c0_157 = arith.constant 0 : index
    %c1_158 = arith.constant 1 : index
    %c0_159 = arith.constant 0 : index
    %c0_160 = arith.constant 0 : index
    %122 = vector.load %arg7[%c0_157, %c1_158, %c0_159, %c0_160] : memref<1x9x32x32xbf16, #tpu.memory_space<vmem>>, vector<1x1x32x32xbf16>
    %123 = vector.shape_cast %122 : vector<1x1x32x32xbf16> to vector<32x32xbf16>
    %cst_161 = arith.constant dense<0.000000e+00> : vector<160x32xf32>
    %124 = tpu.matmul %121, %123, %cst_161 {dimension_numbers = #tpu.dot_dimension_numbers<[1], [0], [0], [1], [0, 0, 1, 1], [], []>} : vector<160x32xbf16>, vector<32x32xbf16>, vector<160x32xf32> -> vector<160x32xf32>
    %c0_162 = arith.constant 0 : index
    %c0_163 = arith.constant 0 : index
    %125 = vector.load %arg15[%c0_162, %c0_163] : memref<192x32xf32, #tpu.memory_space<vmem>>, vector<160x32xf32>
    %126 = arith.addf %125, %124 : vector<160x32xf32>
    %c0_164 = arith.constant 0 : index
    %c0_165 = arith.constant 0 : index
    %127 = vector.load %arg15[%c0_164, %c0_165] : memref<192x32xf32, #tpu.memory_space<vmem>>, vector<160x32xf32>
    tpu.vector_store %arg15[%c0_164, %c0_165], %126 {strides = array<i32>} : memref<192x32xf32, #tpu.memory_space<vmem>>, vector<160x32xf32>,
    %c0_166 = arith.constant 0 : index
    %c2_167 = arith.constant 2 : index
    %c0_168 = arith.constant 0 : index
    %128 = vector.load %arg13[%c0_166, %c2_167, %c0_168] : memref<12x18x32xbf16, #tpu.memory_space<vmem>>, vector<10x16x32xbf16>
    %129 = vector.shape_cast %128 : vector<10x16x32xbf16> to vector<160x32xbf16>
    %c0_169 = arith.constant 0 : index
    %c2_170 = arith.constant 2 : index
    %c0_171 = arith.constant 0 : index
    %c0_172 = arith.constant 0 : index
    %130 = vector.load %arg7[%c0_169, %c2_170, %c0_171, %c0_172] : memref<1x9x32x32xbf16, #tpu.memory_space<vmem>>, vector<1x1x32x32xbf16>
    %131 = vector.shape_cast %130 : vector<1x1x32x32xbf16> to vector<32x32xbf16>
    %cst_173 = arith.constant dense<0.000000e+00> : vector<160x32xf32>
    %132 = tpu.matmul %129, %131, %cst_173 {dimension_numbers = #tpu.dot_dimension_numbers<[1], [0], [0], [1], [0, 0, 1, 1], [], []>} : vector<160x32xbf16>, vector<32x32xbf16>, vector<160x32xf32> -> vector<160x32xf32>
    %c0_174 = arith.constant 0 : index
    %c0_175 = arith.constant 0 : index
    %133 = vector.load %arg15[%c0_174, %c0_175] : memref<192x32xf32, #tpu.memory_space<vmem>>, vector<160x32xf32>
    %134 = arith.addf %133, %132 : vector<160x32xf32>
    %c0_176 = arith.constant 0 : index
    %c0_177 = arith.constant 0 : index
    %135 = vector.load %arg15[%c0_176, %c0_177] : memref<192x32xf32, #tpu.memory_space<vmem>>, vector<160x32xf32>
    tpu.vector_store %arg15[%c0_176, %c0_177], %134 {strides = array<i32>} : memref<192x32xf32, #tpu.memory_space<vmem>>, vector<160x32xf32>,
    %c1_178 = arith.constant 1 : index
    %c0_179 = arith.constant 0 : index
    %c0_180 = arith.constant 0 : index
    %136 = vector.load %arg13[%c1_178, %c0_179, %c0_180] : memref<12x18x32xbf16, #tpu.memory_space<vmem>>, vector<10x16x32xbf16>
    %137 = vector.shape_cast %136 : vector<10x16x32xbf16> to vector<160x32xbf16>
    %c0_181 = arith.constant 0 : index
    %c3_182 = arith.constant 3 : index
    %c0_183 = arith.constant 0 : index
    %c0_184 = arith.constant 0 : index
    %138 = vector.load %arg7[%c0_181, %c3_182, %c0_183, %c0_184] : memref<1x9x32x32xbf16, #tpu.memory_space<vmem>>, vector<1x1x32x32xbf16>
    %139 = vector.shape_cast %138 : vector<1x1x32x32xbf16> to vector<32x32xbf16>
    %cst_185 = arith.constant dense<0.000000e+00> : vector<160x32xf32>
    %140 = tpu.matmul %137, %139, %cst_185 {dimension_numbers = #tpu.dot_dimension_numbers<[1], [0], [0], [1], [0, 0, 1, 1], [], []>} : vector<160x32xbf16>, vector<32x32xbf16>, vector<160x32xf32> -> vector<160x32xf32>
    %c0_186 = arith.constant 0 : index
    %c0_187 = arith.constant 0 : index
    %141 = vector.load %arg15[%c0_186, %c0_187] : memref<192x32xf32, #tpu.memory_space<vmem>>, vector<160x32xf32>
    %142 = arith.addf %141, %140 : vector<160x32xf32>
    %c0_188 = arith.constant 0 : index
    %c0_189 = arith.constant 0 : index
    %143 = vector.load %arg15[%c0_188, %c0_189] : memref<192x32xf32, #tpu.memory_space<vmem>>, vector<160x32xf32>
    tpu.vector_store %arg15[%c0_188, %c0_189], %142 {strides = array<i32>} : memref<192x32xf32, #tpu.memory_space<vmem>>, vector<160x32xf32>,
    %c1_190 = arith.constant 1 : index
    %c1_191 = arith.constant 1 : index
    %c0_192 = arith.constant 0 : index
    %144 = vector.load %arg13[%c1_190, %c1_191, %c0_192] : memref<12x18x32xbf16, #tpu.memory_space<vmem>>, vector<10x16x32xbf16>
    %145 = vector.shape_cast %144 : vector<10x16x32xbf16> to vector<160x32xbf16>
    %c0_193 = arith.constant 0 : index
    %c4_194 = arith.constant 4 : index
    %c0_195 = arith.constant 0 : index
    %c0_196 = arith.constant 0 : index
    %146 = vector.load %arg7[%c0_193, %c4_194, %c0_195, %c0_196] : memref<1x9x32x32xbf16, #tpu.memory_space<vmem>>, vector<1x1x32x32xbf16>
    %147 = vector.shape_cast %146 : vector<1x1x32x32xbf16> to vector<32x32xbf16>
    %cst_197 = arith.constant dense<0.000000e+00> : vector<160x32xf32>
    %148 = tpu.matmul %145, %147, %cst_197 {dimension_numbers = #tpu.dot_dimension_numbers<[1], [0], [0], [1], [0, 0, 1, 1], [], []>} : vector<160x32xbf16>, vector<32x32xbf16>, vector<160x32xf32> -> vector<160x32xf32>
    %c0_198 = arith.constant 0 : index
    %c0_199 = arith.constant 0 : index
    %149 = vector.load %arg15[%c0_198, %c0_199] : memref<192x32xf32, #tpu.memory_space<vmem>>, vector<160x32xf32>
    %150 = arith.addf %149, %148 : vector<160x32xf32>
    %c0_200 = arith.constant 0 : index
    %c0_201 = arith.constant 0 : index
    %151 = vector.load %arg15[%c0_200, %c0_201] : memref<192x32xf32, #tpu.memory_space<vmem>>, vector<160x32xf32>
    tpu.vector_store %arg15[%c0_200, %c0_201], %150 {strides = array<i32>} : memref<192x32xf32, #tpu.memory_space<vmem>>, vector<160x32xf32>,
    %c1_202 = arith.constant 1 : index
    %c2_203 = arith.constant 2 : index
    %c0_204 = arith.constant 0 : index
    %152 = vector.load %arg13[%c1_202, %c2_203, %c0_204] : memref<12x18x32xbf16, #tpu.memory_space<vmem>>, vector<10x16x32xbf16>
    %153 = vector.shape_cast %152 : vector<10x16x32xbf16> to vector<160x32xbf16>
    %c0_205 = arith.constant 0 : index
    %c5_206 = arith.constant 5 : index
    %c0_207 = arith.constant 0 : index
    %c0_208 = arith.constant 0 : index
    %154 = vector.load %arg7[%c0_205, %c5_206, %c0_207, %c0_208] : memref<1x9x32x32xbf16, #tpu.memory_space<vmem>>, vector<1x1x32x32xbf16>
    %155 = vector.shape_cast %154 : vector<1x1x32x32xbf16> to vector<32x32xbf16>
    %cst_209 = arith.constant dense<0.000000e+00> : vector<160x32xf32>
    %156 = tpu.matmul %153, %155, %cst_209 {dimension_numbers = #tpu.dot_dimension_numbers<[1], [0], [0], [1], [0, 0, 1, 1], [], []>} : vector<160x32xbf16>, vector<32x32xbf16>, vector<160x32xf32> -> vector<160x32xf32>
    %c0_210 = arith.constant 0 : index
    %c0_211 = arith.constant 0 : index
    %157 = vector.load %arg15[%c0_210, %c0_211] : memref<192x32xf32, #tpu.memory_space<vmem>>, vector<160x32xf32>
    %158 = arith.addf %157, %156 : vector<160x32xf32>
    %c0_212 = arith.constant 0 : index
    %c0_213 = arith.constant 0 : index
    %159 = vector.load %arg15[%c0_212, %c0_213] : memref<192x32xf32, #tpu.memory_space<vmem>>, vector<160x32xf32>
    tpu.vector_store %arg15[%c0_212, %c0_213], %158 {strides = array<i32>} : memref<192x32xf32, #tpu.memory_space<vmem>>, vector<160x32xf32>,
    %c2_214 = arith.constant 2 : index
    %c0_215 = arith.constant 0 : index
    %c0_216 = arith.constant 0 : index
    %160 = vector.load %arg13[%c2_214, %c0_215, %c0_216] : memref<12x18x32xbf16, #tpu.memory_space<vmem>>, vector<10x16x32xbf16>
    %161 = vector.shape_cast %160 : vector<10x16x32xbf16> to vector<160x32xbf16>
    %c0_217 = arith.constant 0 : index
    %c6_218 = arith.constant 6 : index
    %c0_219 = arith.constant 0 : index
    %c0_220 = arith.constant 0 : index
    %162 = vector.load %arg7[%c0_217, %c6_218, %c0_219, %c0_220] : memref<1x9x32x32xbf16, #tpu.memory_space<vmem>>, vector<1x1x32x32xbf16>
    %163 = vector.shape_cast %162 : vector<1x1x32x32xbf16> to vector<32x32xbf16>
    %cst_221 = arith.constant dense<0.000000e+00> : vector<160x32xf32>
    %164 = tpu.matmul %161, %163, %cst_221 {dimension_numbers = #tpu.dot_dimension_numbers<[1], [0], [0], [1], [0, 0, 1, 1], [], []>} : vector<160x32xbf16>, vector<32x32xbf16>, vector<160x32xf32> -> vector<160x32xf32>
    %c0_222 = arith.constant 0 : index
    %c0_223 = arith.constant 0 : index
    %165 = vector.load %arg15[%c0_222, %c0_223] : memref<192x32xf32, #tpu.memory_space<vmem>>, vector<160x32xf32>
    %166 = arith.addf %165, %164 : vector<160x32xf32>
    %c0_224 = arith.constant 0 : index
    %c0_225 = arith.constant 0 : index
    %167 = vector.load %arg15[%c0_224, %c0_225] : memref<192x32xf32, #tpu.memory_space<vmem>>, vector<160x32xf32>
    tpu.vector_store %arg15[%c0_224, %c0_225], %166 {strides = array<i32>} : memref<192x32xf32, #tpu.memory_space<vmem>>, vector<160x32xf32>,
    %c2_226 = arith.constant 2 : index
    %c1_227 = arith.constant 1 : index
    %c0_228 = arith.constant 0 : index
    %168 = vector.load %arg13[%c2_226, %c1_227, %c0_228] : memref<12x18x32xbf16, #tpu.memory_space<vmem>>, vector<10x16x32xbf16>
    %169 = vector.shape_cast %168 : vector<10x16x32xbf16> to vector<160x32xbf16>
    %c0_229 = arith.constant 0 : index
    %c7_230 = arith.constant 7 : index
    %c0_231 = arith.constant 0 : index
    %c0_232 = arith.constant 0 : index
    %170 = vector.load %arg7[%c0_229, %c7_230, %c0_231, %c0_232] : memref<1x9x32x32xbf16, #tpu.memory_space<vmem>>, vector<1x1x32x32xbf16>
    %171 = vector.shape_cast %170 : vector<1x1x32x32xbf16> to vector<32x32xbf16>
    %cst_233 = arith.constant dense<0.000000e+00> : vector<160x32xf32>
    %172 = tpu.matmul %169, %171, %cst_233 {dimension_numbers = #tpu.dot_dimension_numbers<[1], [0], [0], [1], [0, 0, 1, 1], [], []>} : vector<160x32xbf16>, vector<32x32xbf16>, vector<160x32xf32> -> vector<160x32xf32>
    %c0_234 = arith.constant 0 : index
    %c0_235 = arith.constant 0 : index
    %173 = vector.load %arg15[%c0_234, %c0_235] : memref<192x32xf32, #tpu.memory_space<vmem>>, vector<160x32xf32>
    %174 = arith.addf %173, %172 : vector<160x32xf32>
    %c0_236 = arith.constant 0 : index
    %c0_237 = arith.constant 0 : index
    %175 = vector.load %arg15[%c0_236, %c0_237] : memref<192x32xf32, #tpu.memory_space<vmem>>, vector<160x32xf32>
    tpu.vector_store %arg15[%c0_236, %c0_237], %174 {strides = array<i32>} : memref<192x32xf32, #tpu.memory_space<vmem>>, vector<160x32xf32>,
    %c2_238 = arith.constant 2 : index
    %c2_239 = arith.constant 2 : index
    %c0_240 = arith.constant 0 : index
    %176 = vector.load %arg13[%c2_238, %c2_239, %c0_240] : memref<12x18x32xbf16, #tpu.memory_space<vmem>>, vector<10x16x32xbf16>
    %177 = vector.shape_cast %176 : vector<10x16x32xbf16> to vector<160x32xbf16>
    %c0_241 = arith.constant 0 : index
    %c8_242 = arith.constant 8 : index
    %c0_243 = arith.constant 0 : index
    %c0_244 = arith.constant 0 : index
    %178 = vector.load %arg7[%c0_241, %c8_242, %c0_243, %c0_244] : memref<1x9x32x32xbf16, #tpu.memory_space<vmem>>, vector<1x1x32x32xbf16>
    %179 = vector.shape_cast %178 : vector<1x1x32x32xbf16> to vector<32x32xbf16>
    %cst_245 = arith.constant dense<0.000000e+00> : vector<160x32xf32>
    %180 = tpu.matmul %177, %179, %cst_245 {dimension_numbers = #tpu.dot_dimension_numbers<[1], [0], [0], [1], [0, 0, 1, 1], [], []>} : vector<160x32xbf16>, vector<32x32xbf16>, vector<160x32xf32> -> vector<160x32xf32>
    %c0_246 = arith.constant 0 : index
    %c0_247 = arith.constant 0 : index
    %181 = vector.load %arg15[%c0_246, %c0_247] : memref<192x32xf32, #tpu.memory_space<vmem>>, vector<160x32xf32>
    %182 = arith.addf %181, %180 : vector<160x32xf32>
    %c0_248 = arith.constant 0 : index
    %c0_249 = arith.constant 0 : index
    %183 = vector.load %arg15[%c0_248, %c0_249] : memref<192x32xf32, #tpu.memory_space<vmem>>, vector<160x32xf32>
    tpu.vector_store %arg15[%c0_248, %c0_249], %182 {strides = array<i32>} : memref<192x32xf32, #tpu.memory_space<vmem>>, vector<160x32xf32>,
    %c0_250 = arith.constant 0 : index
    %c0_251 = arith.constant 0 : index
    %184 = vector.load %arg15[%c0_250, %c0_251] : memref<192x32xf32, #tpu.memory_space<vmem>>, vector<160x32xf32>
    %185 = vector.broadcast %113 : vector<1x32xf32> to vector<160x32xf32>
    %186 = arith.addf %184, %185 : vector<160x32xf32>
    %cst_252 = arith.constant 0.000000e+00 : f32
    %187 = vector.broadcast %cst_252 : f32 to vector<160x32xf32>
    %188 = arith.maximumf %186, %187 : vector<160x32xf32>
    %189 = vector.shape_cast %188 : vector<160x32xf32> to vector<10x16x32xf32>
    %190 = arith.truncf %189 : vector<10x16x32xf32> to vector<10x16x32xbf16>
    %c0_253 = arith.constant 0 : index
    %c1_254 = arith.constant 1 : index
    %c0_255 = arith.constant 0 : index
    %191 = vector.load %arg14[%c0_253, %c1_254, %c0_255] : memref<12x18x32xbf16, #tpu.memory_space<vmem>>, vector<10x16x32xbf16>
    tpu.vector_store %arg14[%c0_253, %c1_254, %c0_255], %190 {strides = array<i32>} : memref<12x18x32xbf16, #tpu.memory_space<vmem>>, vector<10x16x32xbf16>,
    %c0_i32_256 = arith.constant 0 : i32
    %192 = arith.cmpi eq, %arg1, %c0_i32_256 : i32
    %193 = arith.extui %192 : i1 to i32
    %c0_i32_257 = arith.constant 0 : i32
    %194 = arith.cmpi ne, %193, %c0_i32_257 : i32
    scf.if %194 {
      %cst_365 = arith.constant 0.000000e+00 : bf16
      %276 = vector.broadcast %cst_365 : bf16 to vector<1x18x32xbf16>
      %c0_366 = arith.constant 0 : index
      %c0_367 = arith.constant 0 : index
      %c0_368 = arith.constant 0 : index
      %277 = vector.load %arg14[%c0_366, %c0_367, %c0_368] : memref<12x18x32xbf16, #tpu.memory_space<vmem>>, vector<1x18x32xbf16>
      tpu.vector_store %arg14[%c0_366, %c0_367, %c0_368], %276 {strides = array<i32>} : memref<12x18x32xbf16, #tpu.memory_space<vmem>>, vector<1x18x32xbf16>,
    } else {
    }
    %c1_i32_258 = arith.constant 1 : i32
    %195 = arith.cmpi eq, %arg1, %c1_i32_258 : i32
    %196 = arith.extui %195 : i1 to i32
    %c0_i32_259 = arith.constant 0 : i32
    %197 = arith.cmpi ne, %196, %c0_i32_259 : i32
    scf.if %197 {
      %cst_365 = arith.constant 0.000000e+00 : bf16
      %276 = vector.broadcast %cst_365 : bf16 to vector<1x18x32xbf16>
      %c9 = arith.constant 9 : index
      %c0_366 = arith.constant 0 : index
      %c0_367 = arith.constant 0 : index
      %277 = vector.load %arg14[%c9, %c0_366, %c0_367] : memref<12x18x32xbf16, #tpu.memory_space<vmem>>, vector<1x18x32xbf16>
      tpu.vector_store %arg14[%c9, %c0_366, %c0_367], %276 {strides = array<i32>} : memref<12x18x32xbf16, #tpu.memory_space<vmem>>, vector<1x18x32xbf16>,
    } else {
    }
    %c0_260 = arith.constant 0 : index
    %c0_261 = arith.constant 0 : index
    %198 = vector.load %arg10[%c0_260, %c0_261] : memref<1x128xf32, #tpu.memory_space<vmem>>, vector<1x128xf32>
    %c0_262 = arith.constant 0 : index
    %c0_263 = arith.constant 0 : index
    %c0_264 = arith.constant 0 : index
    %199 = vector.load %arg14[%c0_262, %c0_263, %c0_264] : memref<12x18x32xbf16, #tpu.memory_space<vmem>>, vector<8x16x32xbf16>
    %200 = vector.shape_cast %199 : vector<8x16x32xbf16> to vector<128x32xbf16>
    %c0_265 = arith.constant 0 : index
    %c0_266 = arith.constant 0 : index
    %c0_267 = arith.constant 0 : index
    %201 = vector.load %arg9[%c0_265, %c0_266, %c0_267] : memref<9x32x128xbf16, #tpu.memory_space<vmem>>, vector<1x32x128xbf16>
    %202 = vector.shape_cast %201 : vector<1x32x128xbf16> to vector<32x128xbf16>
    %cst_268 = arith.constant dense<0.000000e+00> : vector<128x128xf32>
    %203 = tpu.matmul %200, %202, %cst_268 {dimension_numbers = #tpu.dot_dimension_numbers<[1], [0], [0], [1], [0, 0, 1, 1], [], []>} : vector<128x32xbf16>, vector<32x128xbf16>, vector<128x128xf32> -> vector<128x128xf32>
    %c0_269 = arith.constant 0 : index
    %c0_270 = arith.constant 0 : index
    %204 = vector.load %arg16[%c0_269, %c0_270] : memref<128x128xf32, #tpu.memory_space<vmem>>, vector<128x128xf32>
    tpu.vector_store %arg16[%c0_269, %c0_270], %203 {strides = array<i32>} : memref<128x128xf32, #tpu.memory_space<vmem>>, vector<128x128xf32>,
    %c0_271 = arith.constant 0 : index
    %c1_272 = arith.constant 1 : index
    %c0_273 = arith.constant 0 : index
    %205 = vector.load %arg14[%c0_271, %c1_272, %c0_273] : memref<12x18x32xbf16, #tpu.memory_space<vmem>>, vector<8x16x32xbf16>
    %206 = vector.shape_cast %205 : vector<8x16x32xbf16> to vector<128x32xbf16>
    %c1_274 = arith.constant 1 : index
    %c0_275 = arith.constant 0 : index
    %c0_276 = arith.constant 0 : index
    %207 = vector.load %arg9[%c1_274, %c0_275, %c0_276] : memref<9x32x128xbf16, #tpu.memory_space<vmem>>, vector<1x32x128xbf16>
    %208 = vector.shape_cast %207 : vector<1x32x128xbf16> to vector<32x128xbf16>
    %cst_277 = arith.constant dense<0.000000e+00> : vector<128x128xf32>
    %209 = tpu.matmul %206, %208, %cst_277 {dimension_numbers = #tpu.dot_dimension_numbers<[1], [0], [0], [1], [0, 0, 1, 1], [], []>} : vector<128x32xbf16>, vector<32x128xbf16>, vector<128x128xf32> -> vector<128x128xf32>
    %c0_278 = arith.constant 0 : index
    %c0_279 = arith.constant 0 : index
    %210 = vector.load %arg16[%c0_278, %c0_279] : memref<128x128xf32, #tpu.memory_space<vmem>>, vector<128x128xf32>
    %211 = arith.addf %210, %209 : vector<128x128xf32>
    %c0_280 = arith.constant 0 : index
    %c0_281 = arith.constant 0 : index
    %212 = vector.load %arg16[%c0_280, %c0_281] : memref<128x128xf32, #tpu.memory_space<vmem>>, vector<128x128xf32>
    tpu.vector_store %arg16[%c0_280, %c0_281], %211 {strides = array<i32>} : memref<128x128xf32, #tpu.memory_space<vmem>>, vector<128x128xf32>,
    %c0_282 = arith.constant 0 : index
    %c2_283 = arith.constant 2 : index
    %c0_284 = arith.constant 0 : index
    %213 = vector.load %arg14[%c0_282, %c2_283, %c0_284] : memref<12x18x32xbf16, #tpu.memory_space<vmem>>, vector<8x16x32xbf16>
    %214 = vector.shape_cast %213 : vector<8x16x32xbf16> to vector<128x32xbf16>
    %c2_285 = arith.constant 2 : index
    %c0_286 = arith.constant 0 : index
    %c0_287 = arith.constant 0 : index
    %215 = vector.load %arg9[%c2_285, %c0_286, %c0_287] : memref<9x32x128xbf16, #tpu.memory_space<vmem>>, vector<1x32x128xbf16>
    %216 = vector.shape_cast %215 : vector<1x32x128xbf16> to vector<32x128xbf16>
    %cst_288 = arith.constant dense<0.000000e+00> : vector<128x128xf32>
    %217 = tpu.matmul %214, %216, %cst_288 {dimension_numbers = #tpu.dot_dimension_numbers<[1], [0], [0], [1], [0, 0, 1, 1], [], []>} : vector<128x32xbf16>, vector<32x128xbf16>, vector<128x128xf32> -> vector<128x128xf32>
    %c0_289 = arith.constant 0 : index
    %c0_290 = arith.constant 0 : index
    %218 = vector.load %arg16[%c0_289, %c0_290] : memref<128x128xf32, #tpu.memory_space<vmem>>, vector<128x128xf32>
    %219 = arith.addf %218, %217 : vector<128x128xf32>
    %c0_291 = arith.constant 0 : index
    %c0_292 = arith.constant 0 : index
    %220 = vector.load %arg16[%c0_291, %c0_292] : memref<128x128xf32, #tpu.memory_space<vmem>>, vector<128x128xf32>
    tpu.vector_store %arg16[%c0_291, %c0_292], %219 {strides = array<i32>} : memref<128x128xf32, #tpu.memory_space<vmem>>, vector<128x128xf32>,
    %c1_293 = arith.constant 1 : index
    %c0_294 = arith.constant 0 : index
    %c0_295 = arith.constant 0 : index
    %221 = vector.load %arg14[%c1_293, %c0_294, %c0_295] : memref<12x18x32xbf16, #tpu.memory_space<vmem>>, vector<8x16x32xbf16>
    %222 = vector.shape_cast %221 : vector<8x16x32xbf16> to vector<128x32xbf16>
    %c3_296 = arith.constant 3 : index
    %c0_297 = arith.constant 0 : index
    %c0_298 = arith.constant 0 : index
    %223 = vector.load %arg9[%c3_296, %c0_297, %c0_298] : memref<9x32x128xbf16, #tpu.memory_space<vmem>>, vector<1x32x128xbf16>
    %224 = vector.shape_cast %223 : vector<1x32x128xbf16> to vector<32x128xbf16>
    %cst_299 = arith.constant dense<0.000000e+00> : vector<128x128xf32>
    %225 = tpu.matmul %222, %224, %cst_299 {dimension_numbers = #tpu.dot_dimension_numbers<[1], [0], [0], [1], [0, 0, 1, 1], [], []>} : vector<128x32xbf16>, vector<32x128xbf16>, vector<128x128xf32> -> vector<128x128xf32>
    %c0_300 = arith.constant 0 : index
    %c0_301 = arith.constant 0 : index
    %226 = vector.load %arg16[%c0_300, %c0_301] : memref<128x128xf32, #tpu.memory_space<vmem>>, vector<128x128xf32>
    %227 = arith.addf %226, %225 : vector<128x128xf32>
    %c0_302 = arith.constant 0 : index
    %c0_303 = arith.constant 0 : index
    %228 = vector.load %arg16[%c0_302, %c0_303] : memref<128x128xf32, #tpu.memory_space<vmem>>, vector<128x128xf32>
    tpu.vector_store %arg16[%c0_302, %c0_303], %227 {strides = array<i32>} : memref<128x128xf32, #tpu.memory_space<vmem>>, vector<128x128xf32>,
    %c1_304 = arith.constant 1 : index
    %c1_305 = arith.constant 1 : index
    %c0_306 = arith.constant 0 : index
    %229 = vector.load %arg14[%c1_304, %c1_305, %c0_306] : memref<12x18x32xbf16, #tpu.memory_space<vmem>>, vector<8x16x32xbf16>
    %230 = vector.shape_cast %229 : vector<8x16x32xbf16> to vector<128x32xbf16>
    %c4_307 = arith.constant 4 : index
    %c0_308 = arith.constant 0 : index
    %c0_309 = arith.constant 0 : index
    %231 = vector.load %arg9[%c4_307, %c0_308, %c0_309] : memref<9x32x128xbf16, #tpu.memory_space<vmem>>, vector<1x32x128xbf16>
    %232 = vector.shape_cast %231 : vector<1x32x128xbf16> to vector<32x128xbf16>
    %cst_310 = arith.constant dense<0.000000e+00> : vector<128x128xf32>
    %233 = tpu.matmul %230, %232, %cst_310 {dimension_numbers = #tpu.dot_dimension_numbers<[1], [0], [0], [1], [0, 0, 1, 1], [], []>} : vector<128x32xbf16>, vector<32x128xbf16>, vector<128x128xf32> -> vector<128x128xf32>
    %c0_311 = arith.constant 0 : index
    %c0_312 = arith.constant 0 : index
    %234 = vector.load %arg16[%c0_311, %c0_312] : memref<128x128xf32, #tpu.memory_space<vmem>>, vector<128x128xf32>
    %235 = arith.addf %234, %233 : vector<128x128xf32>
    %c0_313 = arith.constant 0 : index
    %c0_314 = arith.constant 0 : index
    %236 = vector.load %arg16[%c0_313, %c0_314] : memref<128x128xf32, #tpu.memory_space<vmem>>, vector<128x128xf32>
    tpu.vector_store %arg16[%c0_313, %c0_314], %235 {strides = array<i32>} : memref<128x128xf32, #tpu.memory_space<vmem>>, vector<128x128xf32>,
    %c1_315 = arith.constant 1 : index
    %c2_316 = arith.constant 2 : index
    %c0_317 = arith.constant 0 : index
    %237 = vector.load %arg14[%c1_315, %c2_316, %c0_317] : memref<12x18x32xbf16, #tpu.memory_space<vmem>>, vector<8x16x32xbf16>
    %238 = vector.shape_cast %237 : vector<8x16x32xbf16> to vector<128x32xbf16>
    %c5_318 = arith.constant 5 : index
    %c0_319 = arith.constant 0 : index
    %c0_320 = arith.constant 0 : index
    %239 = vector.load %arg9[%c5_318, %c0_319, %c0_320] : memref<9x32x128xbf16, #tpu.memory_space<vmem>>, vector<1x32x128xbf16>
    %240 = vector.shape_cast %239 : vector<1x32x128xbf16> to vector<32x128xbf16>
    %cst_321 = arith.constant dense<0.000000e+00> : vector<128x128xf32>
    %241 = tpu.matmul %238, %240, %cst_321 {dimension_numbers = #tpu.dot_dimension_numbers<[1], [0], [0], [1], [0, 0, 1, 1], [], []>} : vector<128x32xbf16>, vector<32x128xbf16>, vector<128x128xf32> -> vector<128x128xf32>
    %c0_322 = arith.constant 0 : index
    %c0_323 = arith.constant 0 : index
    %242 = vector.load %arg16[%c0_322, %c0_323] : memref<128x128xf32, #tpu.memory_space<vmem>>, vector<128x128xf32>
    %243 = arith.addf %242, %241 : vector<128x128xf32>
    %c0_324 = arith.constant 0 : index
    %c0_325 = arith.constant 0 : index
    %244 = vector.load %arg16[%c0_324, %c0_325] : memref<128x128xf32, #tpu.memory_space<vmem>>, vector<128x128xf32>
    tpu.vector_store %arg16[%c0_324, %c0_325], %243 {strides = array<i32>} : memref<128x128xf32, #tpu.memory_space<vmem>>, vector<128x128xf32>,
    %c2_326 = arith.constant 2 : index
    %c0_327 = arith.constant 0 : index
    %c0_328 = arith.constant 0 : index
    %245 = vector.load %arg14[%c2_326, %c0_327, %c0_328] : memref<12x18x32xbf16, #tpu.memory_space<vmem>>, vector<8x16x32xbf16>
    %246 = vector.shape_cast %245 : vector<8x16x32xbf16> to vector<128x32xbf16>
    %c6_329 = arith.constant 6 : index
    %c0_330 = arith.constant 0 : index
    %c0_331 = arith.constant 0 : index
    %247 = vector.load %arg9[%c6_329, %c0_330, %c0_331] : memref<9x32x128xbf16, #tpu.memory_space<vmem>>, vector<1x32x128xbf16>
    %248 = vector.shape_cast %247 : vector<1x32x128xbf16> to vector<32x128xbf16>
    %cst_332 = arith.constant dense<0.000000e+00> : vector<128x128xf32>
    %249 = tpu.matmul %246, %248, %cst_332 {dimension_numbers = #tpu.dot_dimension_numbers<[1], [0], [0], [1], [0, 0, 1, 1], [], []>} : vector<128x32xbf16>, vector<32x128xbf16>, vector<128x128xf32> -> vector<128x128xf32>
    %c0_333 = arith.constant 0 : index
    %c0_334 = arith.constant 0 : index
    %250 = vector.load %arg16[%c0_333, %c0_334] : memref<128x128xf32, #tpu.memory_space<vmem>>, vector<128x128xf32>
    %251 = arith.addf %250, %249 : vector<128x128xf32>
    %c0_335 = arith.constant 0 : index
    %c0_336 = arith.constant 0 : index
    %252 = vector.load %arg16[%c0_335, %c0_336] : memref<128x128xf32, #tpu.memory_space<vmem>>, vector<128x128xf32>
    tpu.vector_store %arg16[%c0_335, %c0_336], %251 {strides = array<i32>} : memref<128x128xf32, #tpu.memory_space<vmem>>, vector<128x128xf32>,
    %c2_337 = arith.constant 2 : index
    %c1_338 = arith.constant 1 : index
    %c0_339 = arith.constant 0 : index
    %253 = vector.load %arg14[%c2_337, %c1_338, %c0_339] : memref<12x18x32xbf16, #tpu.memory_space<vmem>>, vector<8x16x32xbf16>
    %254 = vector.shape_cast %253 : vector<8x16x32xbf16> to vector<128x32xbf16>
    %c7_340 = arith.constant 7 : index
    %c0_341 = arith.constant 0 : index
    %c0_342 = arith.constant 0 : index
    %255 = vector.load %arg9[%c7_340, %c0_341, %c0_342] : memref<9x32x128xbf16, #tpu.memory_space<vmem>>, vector<1x32x128xbf16>
    %256 = vector.shape_cast %255 : vector<1x32x128xbf16> to vector<32x128xbf16>
    %cst_343 = arith.constant dense<0.000000e+00> : vector<128x128xf32>
    %257 = tpu.matmul %254, %256, %cst_343 {dimension_numbers = #tpu.dot_dimension_numbers<[1], [0], [0], [1], [0, 0, 1, 1], [], []>} : vector<128x32xbf16>, vector<32x128xbf16>, vector<128x128xf32> -> vector<128x128xf32>
    %c0_344 = arith.constant 0 : index
    %c0_345 = arith.constant 0 : index
    %258 = vector.load %arg16[%c0_344, %c0_345] : memref<128x128xf32, #tpu.memory_space<vmem>>, vector<128x128xf32>
    %259 = arith.addf %258, %257 : vector<128x128xf32>
    %c0_346 = arith.constant 0 : index
    %c0_347 = arith.constant 0 : index
    %260 = vector.load %arg16[%c0_346, %c0_347] : memref<128x128xf32, #tpu.memory_space<vmem>>, vector<128x128xf32>
    tpu.vector_store %arg16[%c0_346, %c0_347], %259 {strides = array<i32>} : memref<128x128xf32, #tpu.memory_space<vmem>>, vector<128x128xf32>,
    %c2_348 = arith.constant 2 : index
    %c2_349 = arith.constant 2 : index
    %c0_350 = arith.constant 0 : index
    %261 = vector.load %arg14[%c2_348, %c2_349, %c0_350] : memref<12x18x32xbf16, #tpu.memory_space<vmem>>, vector<8x16x32xbf16>
    %262 = vector.shape_cast %261 : vector<8x16x32xbf16> to vector<128x32xbf16>
    %c8_351 = arith.constant 8 : index
    %c0_352 = arith.constant 0 : index
    %c0_353 = arith.constant 0 : index
    %263 = vector.load %arg9[%c8_351, %c0_352, %c0_353] : memref<9x32x128xbf16, #tpu.memory_space<vmem>>, vector<1x32x128xbf16>
    %264 = vector.shape_cast %263 : vector<1x32x128xbf16> to vector<32x128xbf16>
    %cst_354 = arith.constant dense<0.000000e+00> : vector<128x128xf32>
    %265 = tpu.matmul %262, %264, %cst_354 {dimension_numbers = #tpu.dot_dimension_numbers<[1], [0], [0], [1], [0, 0, 1, 1], [], []>} : vector<128x32xbf16>, vector<32x128xbf16>, vector<128x128xf32> -> vector<128x128xf32>
    %c0_355 = arith.constant 0 : index
    %c0_356 = arith.constant 0 : index
    %266 = vector.load %arg16[%c0_355, %c0_356] : memref<128x128xf32, #tpu.memory_space<vmem>>, vector<128x128xf32>
    %267 = arith.addf %266, %265 : vector<128x128xf32>
    %c0_357 = arith.constant 0 : index
    %c0_358 = arith.constant 0 : index
    %268 = vector.load %arg16[%c0_357, %c0_358] : memref<128x128xf32, #tpu.memory_space<vmem>>, vector<128x128xf32>
    tpu.vector_store %arg16[%c0_357, %c0_358], %267 {strides = array<i32>} : memref<128x128xf32, #tpu.memory_space<vmem>>, vector<128x128xf32>,
    %c0_359 = arith.constant 0 : index
    %c0_360 = arith.constant 0 : index
    %269 = vector.load %arg16[%c0_359, %c0_360] : memref<128x128xf32, #tpu.memory_space<vmem>>, vector<128x128xf32>
    %270 = vector.broadcast %198 : vector<1x128xf32> to vector<128x128xf32>
    %271 = arith.addf %269, %270 : vector<128x128xf32>
    %272 = vector.shape_cast %271 : vector<128x128xf32> to vector<8x16x128xf32>
    %c0_361 = arith.constant 0 : index
    %c0_362 = arith.constant 0 : index
    %c0_363 = arith.constant 0 : index
    %c0_364 = arith.constant 0 : index
    %273 = vector.load %arg11[%c0_361, %c0_362, %c0_363, %c0_364] : memref<1x8x16x128xf32, #tpu.memory_space<vmem>>, vector<1x8x16x128xf32>
    %274 = vector.shape_cast %273 : vector<1x8x16x128xf32> to vector<8x16x128xf32>
    %275 = vector.shape_cast %272 : vector<8x16x128xf32> to vector<1x8x16x128xf32>
    tpu.vector_store %arg11[%c0_361, %c0_362, %c0_363, %c0_364], %275 {strides = array<i32>} : memref<1x8x16x128xf32, #tpu.memory_space<vmem>>, vector<1x8x16x128xf32>,
    return
  }
  func.func @transform_0(%arg0: i32, %arg1: i32) -> (i32, i32, i32, i32) {
    %c1_i32 = arith.constant 1 : i32
    %0 = arith.subi %arg1, %c1_i32 : i32
    %c0_i32 = arith.constant 0 : i32
    %1 = arith.maxsi %0, %c0_i32 : i32
    %c0_i32_0 = arith.constant 0 : i32
    %c0_i32_1 = arith.constant 0 : i32
    %c0_i32_2 = arith.constant 0 : i32
    return %arg0, %1, %c0_i32_0, %c0_i32_1 : i32, i32, i32, i32
  }
  func.func @transform_1(%arg0: i32, %arg1: i32) -> (i32, i32, i32, i32) {
    %c0_i32 = arith.constant 0 : i32
    %c0_i32_0 = arith.constant 0 : i32
    %c0_i32_1 = arith.constant 0 : i32
    return %arg0, %arg1, %c0_i32, %c0_i32_0 : i32, i32, i32, i32
  }
  func.func @transform_2(%arg0: i32, %arg1: i32) -> (i32, i32, i32, i32) {
    %c1_i32 = arith.constant 1 : i32
    %0 = arith.addi %arg1, %c1_i32 : i32
    %c1_i32_0 = arith.constant 1 : i32
    %1 = arith.minsi %0, %c1_i32_0 : i32
    %c0_i32 = arith.constant 0 : i32
    %c0_i32_1 = arith.constant 0 : i32
    %c0_i32_2 = arith.constant 0 : i32
    return %arg0, %1, %c0_i32, %c0_i32_1 : i32, i32, i32, i32
  }
  func.func @transform_3(%arg0: i32, %arg1: i32) -> (i32, i32, i32) {
    %c0_i32 = arith.constant 0 : i32
    %c0_i32_0 = arith.constant 0 : i32
    %c0_i32_1 = arith.constant 0 : i32
    %c0_i32_2 = arith.constant 0 : i32
    return %c0_i32, %c0_i32_0, %c0_i32_1 : i32, i32, i32
  }
  func.func @transform_4(%arg0: i32, %arg1: i32) -> (i32, i32) {
    %c0_i32 = arith.constant 0 : i32
    %c0_i32_0 = arith.constant 0 : i32
    %c0_i32_1 = arith.constant 0 : i32
    return %c0_i32, %c0_i32_0 : i32, i32
  }
  func.func @transform_5(%arg0: i32, %arg1: i32) -> (i32, i32, i32, i32) {
    %c0_i32 = arith.constant 0 : i32
    %c0_i32_0 = arith.constant 0 : i32
    %c0_i32_1 = arith.constant 0 : i32
    %c0_i32_2 = arith.constant 0 : i32
    %c0_i32_3 = arith.constant 0 : i32
    return %c0_i32, %c0_i32_0, %c0_i32_1, %c0_i32_2 : i32, i32, i32, i32
  }
  func.func @transform_6(%arg0: i32, %arg1: i32) -> (i32, i32, i32) {
    %c0_i32 = arith.constant 0 : i32
    %c0_i32_0 = arith.constant 0 : i32
    %c0_i32_1 = arith.constant 0 : i32
    %c0_i32_2 = arith.constant 0 : i32
    return %c0_i32, %c0_i32_0, %c0_i32_1 : i32, i32, i32
  }
  func.func @transform_7(%arg0: i32, %arg1: i32) -> (i32, i32, i32) {
    %c0_i32 = arith.constant 0 : i32
    %c0_i32_0 = arith.constant 0 : i32
    %c0_i32_1 = arith.constant 0 : i32
    %c0_i32_2 = arith.constant 0 : i32
    return %c0_i32, %c0_i32_0, %c0_i32_1 : i32, i32, i32
  }
  func.func @transform_8(%arg0: i32, %arg1: i32) -> (i32, i32) {
    %c0_i32 = arith.constant 0 : i32
    %c0_i32_0 = arith.constant 0 : i32
    %c0_i32_1 = arith.constant 0 : i32
    return %c0_i32, %c0_i32_0 : i32, i32
  }
  func.func @transform_9(%arg0: i32, %arg1: i32) -> (i32, i32, i32, i32) {
    %c0_i32 = arith.constant 0 : i32
    %c0_i32_0 = arith.constant 0 : i32
    %c0_i32_1 = arith.constant 0 : i32
    return %arg0, %arg1, %c0_i32, %c0_i32_0 : i32, i32, i32, i32
  }
}

</mosaic_0001>

<bundles_post_ra>
// kernel: tpu_custom_call.1
= control target key start
LH: loop header
LB: loop body
LE: loop exit
PB: predicated region body
PF: predicated region fallthrough
CT: control target
= control target key end

     0   :  { %14 = vsyncpa [#allocation8], 0  ;;  %s18183_s0 = inlined_call_operand.vmem [shape: f32[2,16,16,4], index: 0, kind: input, shape index: {}]   ;;  %s18184_s1 = inlined_call_operand.vmem [shape: f32[2,16,16,4], index: 1, kind: input, shape index: {}]   ;;  %s18185_s2 = inlined_call_operand.vmem [shape: f32[2,16,16,4], index: 2, kind: input, shape index: {}]   ;;  %s18186_s3 = inlined_call_operand.vmem [shape: bf16[9,4,32], index: 3, kind: input, shape index: {}]   ;;  %s18187_s4 = inlined_call_operand.vmem [shape: f32[1,32], index: 4, kind: input, shape index: {}]   ;;  %s18188_s5 = inlined_call_operand.vmem [shape: bf16[1,9,32,32], index: 5, kind: input, shape index: {}]   ;;  %s18189_s6 = inlined_call_operand.vmem [shape: f32[1,1,32], index: 6, kind: input, shape index: {}]   ;;  %s18190_s7 = inlined_call_operand.vmem [shape: bf16[9,32,128], index: 7, kind: input, shape index: {}]   ;;  %s18191_s8 = inlined_call_operand.vmem [shape: f32[1,128], index: 8, kind: input, shape index: {}]   ;;  %s18192_s9 = inlined_call_operand.hbm [shape: f32[2,16,16,128], index: 9, kind: output, shape index: {}]  }
   0x1   :  { %16 = vsyncpa [#allocation8 + $0x1], 0  ;;  %s15220_s30 = smov 0   ;;  %s15222_s10 = smov 0  }
   0x2   :  { %s15224_s11 = smov 0   ;;  %s15226_s12 = smov 0  }
   0x3   :  { %s15228_s13 = smov 0   ;;  %s15230_s14 = smov 0  }
   0x4   :  { %s15232_s15 = smov 0   ;;  %s15234_s16 = smov 0  }
   0x5 LB: > { %18199 = sst [smem:[#allocation10_spill]] %s15139_s11  ;;  %s12852_s17 = sadd.s32 4294967295, %s15159_s16   ;;  %s15159_s16 = sphi %s15234_s16, %s22_s16   ;;  %s15155_s15 = sphi %s15232_s15, %s18233_s15   ;;  %s15151_s14 = sphi %s15230_s14, %s18236_s14   ;;  %s15147_s13 = sphi %s15228_s13, %s18231_s13   ;;  %s15143_s12 = sphi %s15226_s12, %s18230_s12   ;;  %s15139_s11 = sphi %s15224_s11, %s18229_s11   ;;  %s15135_s10 = sphi %s15222_s10, %s18235_s10   ;;  %s15131_s30 = sphi %s15220_s30, %s18234_s30  }
   0x6   : > { %18200 = sst [smem:[#allocation11_spill]] %s15151_s14  ;;  %s12853_s18 = sadd.s32 4294967294, %s15159_s16  }
   0x7   : > { %18201 = sst [smem:[#allocation12_spill]] %s15155_s15  ;;  %s31_s19 = sadd.s32 1, %s15151_s14 }
   0x8   : > { %p32_p0 = scmp.ge.s32.totalorder %s31_s19, 2  ;;  %s34_s20 = sadd.s32 1, %s15155_s15 }
   0x9   : > { %p275_p1 = scmp.ne.s32.totalorder %s15139_s11, %s15135_s10  ;;  %p276_p2 = scmp.eq.s32.totalorder %s12852_s17, 3 }
   0xa   : > { %s18238_s19 = smov (%p32_p0, %s31_s19), 0  ;;  %s18240_s20 = smov (!%p32_p0, %s34_s20), %s15155_s15 }
   0xb   : > { %18202 = sst [smem:[#allocation13_spill]] %s18238_s19  ;;  %s261_s21 = ssub.s32 %s15151_s14, %s18238_s19 }
   0xc   : > { %p15271_p3 = por %p276_p2, %p275_p1  ;;  %p36_p4 = scmp.ge.s32.totalorder %s18240_s20, 2 }
   0xd   : > { %p281_p5 = scmp.ne.s32.totalorder %s15135_s10, %s15131_s30  ;;  %p282_p6 = scmp.eq.s32.totalorder %s12853_s18, 3 }
   0xe   : > { %p12858_p7 = scmp.ge.s32.totalorder %s15159_s16, 1  ;;  %s18242_s20 = smov (%p36_p4, %s18240_s20), 0 }
   0xf   : > { %18204 = sst [smem:[#allocation14_spill]] %s18242_s20  ;;  %p15280_p8 = por %p282_p6, %p281_p5 }
  0x10   : > { %p372_p9 = scmp.lt.s32.totalorder %s15159_s16, 5  ;;  %s260_s24 = ssub.s32 %s15155_s15, %s18242_s20 }
  0x11   : > { %s265_s25 = sadd.s32 1, %s15139_s11  ;;  %s262_s26 = sor.u32 %s261_s21, %s260_s24 }
  0x12   : > { %p373_p10 = pnand %p12858_p7, %p372_p9  ;;  %p263_p11 = scmp.eq.s32.totalorder %s262_s26, 0 }
  0x13   : > { %s18193_s28 = sand.u32 (!%p373_p10), 1, %s15135_s10   ;;  %vm486_vm0 = vcmask (!%p373_p10), 24576   ;;  %vm487_vm1 = vsmask.f32 (!%p373_p10), 256  ;;  %v489_v0 = vld [vmem:[#allocation2] sm:$0x1] (!%p373_p10) }
  0x14   : > { %s15289_s27 = scalar_select %p263_p11, %s15139_s11, %s265_s25  }
  0x15   : > { %376 = sbr.rel (%p373_p10) target bundleno = 1794 (0x702), region = 56  ;;  %s15294_s29 = sshll.u32 (!%p373_p10), %s18193_s28, 7  ;;  %vm15298_vm2 = vmand (!%p373_p10), %vm486_vm0, %vm487_vm1  ;;  %v492_v2 = vld [vmem:[#allocation2 + $0xc] sm:$0x1] (!%p373_p10)  ;;  %v495_v3 = vld [vmem:[#allocation2 + $0x18] sm:$0x1] (!%p373_p10) }
  0x16   : > { %18206 = sst [smem:[#allocation15_spill]] %s15289_s27  ;;  %v490_v4 = vsel (!%p373_p10), %vm15298_vm2, 0, %v489_v0  ;;  %v493_v5 = vsel (!%p373_p10), %vm15298_vm2, 0, %v492_v2  ;;  %v496_v6 = vsel (!%p373_p10), %vm15298_vm2, 0, %v495_v3  ;;  %v498_v7 = vld [vmem:[#allocation2 + $0x24] sm:$0x1] (!%p373_p10) }
  0x17   : > { %491 = vst [vmem:[#allocation2] sm:$0x1] (!%p373_p10), %v490_v4  ;;  %494 = vst [vmem:[#allocation2 + $0xc] sm:$0x1] (!%p373_p10), %v493_v5  ;;  %v499_v8 = vsel (!%p373_p10), %vm15298_vm2, 0, %v498_v7  ;;  %vm575_vm3 = vcmask (!%p373_p10), 253952  }
  0x18   : > { %497 = vst [vmem:[#allocation2 + $0x18] sm:$0x1] (!%p373_p10), %v496_v6  ;;  %v501_v9 = vld [vmem:[#allocation2 + $0x30] sm:$0x1] (!%p373_p10)  ;;  %v504_v10 = vld [vmem:[#allocation2 + $0x3c] sm:$0x1] (!%p373_p10)  ;;  %vm15363_vm6 = vmand (!%p373_p10), %vm575_vm3, %vm487_vm1 }
  0x19   : > { %s12860_s17 = sadd.s32 (!%p373_p10), 4294967295, %s15143_s12  ;;  %500 = vst [vmem:[#allocation2 + $0x24] sm:$0x1] (!%p373_p10), %v499_v8  ;;  %v502_v11 = vsel (!%p373_p10), %vm15298_vm2, 0, %v501_v9  ;;  %v505_v12 = vsel (!%p373_p10), %vm15298_vm2, 0, %v504_v10  ;;  %p443_p13 = scmp.lt.s32.totalorder (!%p373_p10), %s15147_s13, 1 }
  0x1a   : > { %v507_v13 = vld [vmem:[#allocation2 + $0x48] sm:$0x1] (!%p373_p10)  ;;  %v510_v14 = vld [vmem:[#allocation2 + $0x54] sm:$0x1] (!%p373_p10)  ;;  %503 = vst [vmem:[#allocation2 + $0x30] sm:$0x1] (!%p373_p10), %v502_v11 }
  0x1b   : > { %506 = vst [vmem:[#allocation2 + $0x3c] sm:$0x1] (!%p373_p10), %v505_v12  ;;  %v508_v15 = vsel (!%p373_p10), %vm15298_vm2, 0, %v507_v13  ;;  %v511_v16 = vsel (!%p373_p10), %vm15298_vm2, 0, %v510_v14  ;;  %v513_v17 = vld [vmem:[#allocation2 + $0x60] sm:$0x1] (!%p373_p10) }
  0x1c   : > { %v516_v18 = vld [vmem:[#allocation2 + $0x6c] sm:$0x1]  ;;  %509 = vst [vmem:[#allocation2 + $0x48] sm:$0x1] %v508_v15  ;;  %512 = vst [vmem:[#allocation2 + $0x54] sm:$0x1] %v511_v16 }
  0x1d   : > { %v514_v19 = vsel %vm15298_vm2, 0, %v513_v17  ;;  %v517_v20 = vsel %vm15298_vm2, 0, %v516_v18  ;;  %v519_v21 = vld [vmem:[#allocation2 + $0x78] sm:$0x1]  ;;  %v522_v22 = vld [vmem:[#allocation2 + $0x84] sm:$0x1] }
  0x1e   : > { %515 = vst [vmem:[#allocation2 + $0x60] sm:$0x1] %v514_v19  ;;  %518 = vst [vmem:[#allocation2 + $0x6c] sm:$0x1] %v517_v20  ;;  %v520_v23 = vsel %vm15298_vm2, 0, %v519_v21  ;;  %v523_v24 = vsel %vm15298_vm2, 0, %v522_v22 }
  0x1f   : > { %v525_v25 = vld [vmem:[#allocation2 + $0x90] sm:$0x1]  ;;  %v528_v26 = vld [vmem:[#allocation2 + $0x9c] sm:$0x1]  ;;  %521 = vst [vmem:[#allocation2 + $0x78] sm:$0x1] %v520_v23 }
  0x20   : > { %524 = vst [vmem:[#allocation2 + $0x84] sm:$0x1] %v523_v24  ;;  %v526_v27 = vsel %vm15298_vm2, 0, %v525_v25  ;;  %v529_v28 = vsel %vm15298_vm2, 0, %v528_v26  ;;  %vm531_vm4 = vsmask.f32 7938 }
  0x21   : > { %v533_v29 = vld [vmem:[#allocation2 + $0x8] sm:$0x1]  ;;  %527 = vst [vmem:[#allocation2 + $0x90] sm:$0x1] %v526_v27  ;;  %530 = vst [vmem:[#allocation2 + $0x9c] sm:$0x1] %v529_v28 }
  0x22   : > { %vm15333_vm5 = vmand %vm486_vm0, %vm531_vm4  ;;  %v536_v31 = vld [vmem:[#allocation2 + $0x14] sm:$0x1]  ;;  %v539_v32 = vld [vmem:[#allocation2 + $0x20] sm:$0x1]  ;;  %p440_p12 = scmp.gt.s32.totalorder %s12860_s17, 0  ;;  %s12865_s18 = sshll.u32 %s15143_s12, 3 }
  0x23   : > { %v534_v33 = vsel %vm15333_vm5, 0, %v533_v29  ;;  %v537_v34 = vsel %vm15333_vm5, 0, %v536_v31  ;;  %v540_v35 = vsel %vm15333_vm5, 0, %v539_v32  ;;  %v542_v36 = vld [vmem:[#allocation2 + $0x2c] sm:$0x1]  ;;  %vm15393_vm7 = vmand %vm575_vm3, %vm531_vm4  ;;  %p459_p0 = scmp.lt.s32.totalorder %s12865_s18, 15 }
  0x24   : > { %535 = vst [vmem:[#allocation2 + $0x8] sm:$0x1] %v534_v33  ;;  %538 = vst [vmem:[#allocation2 + $0x14] sm:$0x1] %v537_v34  ;;  %v543_v37 = vsel %vm15333_vm5, 0, %v542_v36  ;;  %s18244_s17 = smov (!%p440_p12, %s12860_s17), 0 }
  0x25   : > { %541 = vst [vmem:[#allocation2 + $0x20] sm:$0x1] %v540_v35  ;;  %v545_v38 = vld [vmem:[#allocation2 + $0x38] sm:$0x1]  ;;  %v548_v39 = vld [vmem:[#allocation2 + $0x44] sm:$0x1] }
  0x26   : > { %544 = vst [vmem:[#allocation2 + $0x2c] sm:$0x1] %v543_v37  ;;  %v546_v40 = vsel %vm15333_vm5, 0, %v545_v38  ;;  %v549_v41 = vsel %vm15333_vm5, 0, %v548_v39  ;;  %v551_v42 = vld [vmem:[#allocation2 + $0x50] sm:$0x1] }
  0x27   : > { %v554_v43 = vld [vmem:[#allocation2 + $0x5c] sm:$0x1]  ;;  %547 = vst [vmem:[#allocation2 + $0x38] sm:$0x1] %v546_v40  ;;  %550 = vst [vmem:[#allocation2 + $0x44] sm:$0x1] %v549_v41 }
  0x28   : > { %v552_v44 = vsel %vm15333_vm5, 0, %v551_v42  ;;  %v555_v45 = vsel %vm15333_vm5, 0, %v554_v43  ;;  %v557_v46 = vld [vmem:[#allocation2 + $0x68] sm:$0x1]  ;;  %v560_v47 = vld [vmem:[#allocation2 + $0x74] sm:$0x1] }
  0x29   : > { %553 = vst [vmem:[#allocation2 + $0x50] sm:$0x1] %v552_v44  ;;  %556 = vst [vmem:[#allocation2 + $0x5c] sm:$0x1] %v555_v45  ;;  %v558_v49 = vsel %vm15333_vm5, 0, %v557_v46  ;;  %v561_v50 = vsel %vm15333_vm5, 0, %v560_v47 }
  0x2a   : > { %v563_v51 = vld [vmem:[#allocation2 + $0x80] sm:$0x1]  ;;  %v566_v52 = vld [vmem:[#allocation2 + $0x8c] sm:$0x1]  ;;  %559 = vst [vmem:[#allocation2 + $0x68] sm:$0x1] %v558_v49 }
  0x2b   : > { %562 = vst [vmem:[#allocation2 + $0x74] sm:$0x1] %v561_v50  ;;  %v564_v53 = vsel %vm15333_vm5, 0, %v563_v51  ;;  %v567_v54 = vsel %vm15333_vm5, 0, %v566_v52  ;;  %v569_v55 = vld [vmem:[#allocation2 + $0x98] sm:$0x1] }
  0x2c   : > { %v572_v56 = vld [vmem:[#allocation2 + $0xa4] sm:$0x1]  ;;  %565 = vst [vmem:[#allocation2 + $0x80] sm:$0x1] %v564_v53  ;;  %568 = vst [vmem:[#allocation2 + $0x8c] sm:$0x1] %v567_v54 }
  0x2d   : > { %v570_v57 = vsel %vm15333_vm5, 0, %v569_v55  ;;  %v573_v58 = vsel %vm15333_vm5, 0, %v572_v56  ;;  %v577_v59 = vld [vmem:[#allocation3] sm:$0x1]  ;;  %v580_v60 = vld [vmem:[#allocation3 + $0xc] sm:$0x1] }
  0x2e   : > { %571 = vst [vmem:[#allocation2 + $0x98] sm:$0x1] %v570_v57  ;;  %574 = vst [vmem:[#allocation2 + $0xa4] sm:$0x1] %v573_v58  ;;  %v578_v61 = vsel %vm15363_vm6, 0, %v577_v59  ;;  %v581_v62 = vsel %vm15363_vm6, 0, %v580_v60 }
  0x2f   : > { %v583_v63 = vld [vmem:[#allocation3 + $0x18] sm:$0x1]  ;;  %v586_v0 = vld [vmem:[#allocation3 + $0x24] sm:$0x1]  ;;  %579 = vst [vmem:[#allocation3] sm:$0x1] %v578_v61 }
  0x30   : > { %582 = vst [vmem:[#allocation3 + $0xc] sm:$0x1] %v581_v62  ;;  %v584_v2 = vsel %vm15363_vm6, 0, %v583_v63  ;;  %v587_v3 = vsel %vm15363_vm6, 0, %v586_v0  ;;  %v589_v4 = vld [vmem:[#allocation3 + $0x30] sm:$0x1] }
  0x31   : > { %v592_v5 = vld [vmem:[#allocation3 + $0x3c] sm:$0x1]  ;;  %585 = vst [vmem:[#allocation3 + $0x18] sm:$0x1] %v584_v2  ;;  %588 = vst [vmem:[#allocation3 + $0x24] sm:$0x1] %v587_v3 }
  0x32   : > { %v590_v6 = vsel %vm15363_vm6, 0, %v589_v4  ;;  %v593_v7 = vsel %vm15363_vm6, 0, %v592_v5  ;;  %v595_v8 = vld [vmem:[#allocation3 + $0x48] sm:$0x1]  ;;  %v598_v9 = vld [vmem:[#allocation3 + $0x54] sm:$0x1] }
  0x33   : > { %591 = vst [vmem:[#allocation3 + $0x30] sm:$0x1] %v590_v6  ;;  %594 = vst [vmem:[#allocation3 + $0x3c] sm:$0x1] %v593_v7  ;;  %v596_v11 = vsel %vm15363_vm6, 0, %v595_v8  ;;  %v599_v12 = vsel %vm15363_vm6, 0, %v598_v9 }
  0x34   : > { %v601_v13 = vld [vmem:[#allocation3 + $0x60] sm:$0x1]  ;;  %v604_v14 = vld [vmem:[#allocation3 + $0x6c] sm:$0x1]  ;;  %597 = vst [vmem:[#allocation3 + $0x48] sm:$0x1] %v596_v11 }
  0x35   : > { %600 = vst [vmem:[#allocation3 + $0x54] sm:$0x1] %v599_v12  ;;  %v602_v15 = vsel %vm15363_vm6, 0, %v601_v13  ;;  %v605_v16 = vsel %vm15363_vm6, 0, %v604_v14  ;;  %v607_v17 = vld [vmem:[#allocation3 + $0x78] sm:$0x1] }
  0x36   : > { %v610_v18 = vld [vmem:[#allocation3 + $0x84] sm:$0x1]  ;;  %603 = vst [vmem:[#allocation3 + $0x60] sm:$0x1] %v602_v15  ;;  %606 = vst [vmem:[#allocation3 + $0x6c] sm:$0x1] %v605_v16 }
  0x37   : > { %v608_v19 = vsel %vm15363_vm6, 0, %v607_v17  ;;  %v611_v20 = vsel %vm15363_vm6, 0, %v610_v18  ;;  %v614_v21 = vld [vmem:[#allocation3 + $0x8] sm:$0x1]  ;;  %v617_v22 = vld [vmem:[#allocation3 + $0x14] sm:$0x1] }
  0x38   : > { %609 = vst [vmem:[#allocation3 + $0x78] sm:$0x1] %v608_v19  ;;  %612 = vst [vmem:[#allocation3 + $0x84] sm:$0x1] %v611_v20  ;;  %v615_v23 = vsel %vm15393_vm7, 0, %v614_v21  ;;  %v618_v24 = vsel %vm15393_vm7, 0, %v617_v22 }
  0x39   : > { %v620_v25 = vld [vmem:[#allocation3 + $0x20] sm:$0x1]  ;;  %v623_v26 = vld [vmem:[#allocation3 + $0x2c] sm:$0x1]  ;;  %616 = vst [vmem:[#allocation3 + $0x8] sm:$0x1] %v615_v23 }
  0x3a   : > { %619 = vst [vmem:[#allocation3 + $0x14] sm:$0x1] %v618_v24  ;;  %v621_v27 = vsel %vm15393_vm7, 0, %v620_v25  ;;  %v624_v28 = vsel %vm15393_vm7, 0, %v623_v26  ;;  %v626_v29 = vld [vmem:[#allocation3 + $0x38] sm:$0x1] }
  0x3b   : > { %v629_v30 = vld [vmem:[#allocation3 + $0x44] sm:$0x1]  ;;  %622 = vst [vmem:[#allocation3 + $0x20] sm:$0x1] %v621_v27  ;;  %625 = vst [vmem:[#allocation3 + $0x2c] sm:$0x1] %v624_v28 }
  0x3c   : > { %v627_v31 = vsel %vm15393_vm7, 0, %v626_v29  ;;  %v630_v32 = vsel %vm15393_vm7, 0, %v629_v30  ;;  %v632_v33 = vld [vmem:[#allocation3 + $0x50] sm:$0x1]  ;;  %v635_v34 = vld [vmem:[#allocation3 + $0x5c] sm:$0x1] }
  0x3d   : > { %628 = vst [vmem:[#allocation3 + $0x38] sm:$0x1] %v627_v31  ;;  %631 = vst [vmem:[#allocation3 + $0x44] sm:$0x1] %v630_v32  ;;  %v633_v35 = vsel %vm15393_vm7, 0, %v632_v33  ;;  %v636_v36 = vsel %vm15393_vm7, 0, %v635_v34 }
  0x3e   : > { %v638_v37 = vld [vmem:[#allocation3 + $0x68] sm:$0x1]  ;;  %v641_v38 = vld [vmem:[#allocation3 + $0x74] sm:$0x1]  ;;  %634 = vst [vmem:[#allocation3 + $0x50] sm:$0x1] %v633_v35 }
  0x3f   : > { %637 = vst [vmem:[#allocation3 + $0x5c] sm:$0x1] %v636_v36  ;;  %v639_v39 = vsel %vm15393_vm7, 0, %v638_v37  ;;  %v642_v40 = vsel %vm15393_vm7, 0, %v641_v38  ;;  %v644_v41 = vld [vmem:[#allocation3 + $0x80] sm:$0x1] }
  0x40   : > { %v647_v42 = vld [vmem:[#allocation3 + $0x8c] sm:$0x1]  ;;  %640 = vst [vmem:[#allocation3 + $0x68] sm:$0x1] %v639_v39  ;;  %643 = vst [vmem:[#allocation3 + $0x74] sm:$0x1] %v642_v40 }
  0x41   : > { %v645_v43 = vsel %vm15393_vm7, 0, %v644_v41  ;;  %v648_v44 = vsel %vm15393_vm7, 0, %v647_v42  ;;  %v650_v45 = vld [vmem:[#allocation4] sm:$0x1]  ;;  %v653_v46 = vld [vmem:[#allocation4 + $0xc] sm:$0x1] }
  0x42   : > { %646 = vst [vmem:[#allocation3 + $0x80] sm:$0x1] %v645_v43  ;;  %649 = vst [vmem:[#allocation3 + $0x8c] sm:$0x1] %v648_v44  ;;  %v651_v47 = vsel %vm15363_vm6, 0, %v650_v45  ;;  %v654_v49 = vsel %vm15363_vm6, 0, %v653_v46 }
  0x43   : > { %v656_v50 = vld [vmem:[#allocation4 + $0x18] sm:$0x1]  ;;  %v659_v51 = vld [vmem:[#allocation4 + $0x24] sm:$0x1]  ;;  %652 = vst [vmem:[#allocation4] sm:$0x1] %v651_v47 }
  0x44   : > { %655 = vst [vmem:[#allocation4 + $0xc] sm:$0x1] %v654_v49  ;;  %v657_v52 = vsel %vm15363_vm6, 0, %v656_v50  ;;  %v660_v53 = vsel %vm15363_vm6, 0, %v659_v51  ;;  %v662_v54 = vld [vmem:[#allocation4 + $0x30] sm:$0x1] }
  0x45   : > { %v665_v55 = vld [vmem:[#allocation4 + $0x3c] sm:$0x1]  ;;  %658 = vst [vmem:[#allocation4 + $0x18] sm:$0x1] %v657_v52  ;;  %661 = vst [vmem:[#allocation4 + $0x24] sm:$0x1] %v660_v53 }
  0x46   : > { %v663_v56 = vsel %vm15363_vm6, 0, %v662_v54  ;;  %v666_v57 = vsel %vm15363_vm6, 0, %v665_v55  ;;  %v668_v58 = vld [vmem:[#allocation4 + $0x48] sm:$0x1]  ;;  %v671_v59 = vld [vmem:[#allocation4 + $0x54] sm:$0x1] }
  0x47   : > { %664 = vst [vmem:[#allocation4 + $0x30] sm:$0x1] %v663_v56  ;;  %667 = vst [vmem:[#allocation4 + $0x3c] sm:$0x1] %v666_v57  ;;  %v669_v60 = vsel %vm15363_vm6, 0, %v668_v58  ;;  %v672_v61 = vsel %vm15363_vm6, 0, %v671_v59 }
  0x48   : > { %v674_v62 = vld [vmem:[#allocation4 + $0x60] sm:$0x1]  ;;  %v677_v63 = vld [vmem:[#allocation4 + $0x6c] sm:$0x1]  ;;  %670 = vst [vmem:[#allocation4 + $0x48] sm:$0x1] %v669_v60 }
  0x49   : > { %673 = vst [vmem:[#allocation4 + $0x54] sm:$0x1] %v672_v61  ;;  %v675_v0 = vsel %vm15363_vm6, 0, %v674_v62  ;;  %v678_v2 = vsel %vm15363_vm6, 0, %v677_v63  ;;  %v680_v3 = vld [vmem:[#allocation4 + $0x78] sm:$0x1] }
  0x4a   : > { %v683_v4 = vld [vmem:[#allocation4 + $0x84] sm:$0x1]  ;;  %676 = vst [vmem:[#allocation4 + $0x60] sm:$0x1] %v675_v0  ;;  %679 = vst [vmem:[#allocation4 + $0x6c] sm:$0x1] %v678_v2 }
  0x4b   : > { %v681_v5 = vsel %vm15363_vm6, 0, %v680_v3  ;;  %v684_v6 = vsel %vm15363_vm6, 0, %v683_v4  ;;  %v686_v7 = vld [vmem:[#allocation4 + $0x8] sm:$0x1]  ;;  %v689_v8 = vld [vmem:[#allocation4 + $0x14] sm:$0x1] }
  0x4c   : > { %682 = vst [vmem:[#allocation4 + $0x78] sm:$0x1] %v681_v5  ;;  %685 = vst [vmem:[#allocation4 + $0x84] sm:$0x1] %v684_v6  ;;  %v687_v9 = vsel %vm15393_vm7, 0, %v686_v7  ;;  %v690_v11 = vsel %vm15393_vm7, 0, %v689_v8 }
  0x4d   : > { %v692_v12 = vld [vmem:[#allocation4 + $0x20] sm:$0x1]  ;;  %v695_v13 = vld [vmem:[#allocation4 + $0x2c] sm:$0x1]  ;;  %688 = vst [vmem:[#allocation4 + $0x8] sm:$0x1] %v687_v9 }
  0x4e   : > { %691 = vst [vmem:[#allocation4 + $0x14] sm:$0x1] %v690_v11  ;;  %v693_v14 = vsel %vm15393_vm7, 0, %v692_v12  ;;  %v696_v15 = vsel %vm15393_vm7, 0, %v695_v13  ;;  %v698_v16 = vld [vmem:[#allocation4 + $0x38] sm:$0x1] }
  0x4f   : > { %v701_v17 = vld [vmem:[#allocation4 + $0x44] sm:$0x1]  ;;  %694 = vst [vmem:[#allocation4 + $0x20] sm:$0x1] %v693_v14  ;;  %697 = vst [vmem:[#allocation4 + $0x2c] sm:$0x1] %v696_v15 }
  0x50   : > { %v699_v18 = vsel %vm15393_vm7, 0, %v698_v16  ;;  %v702_v19 = vsel %vm15393_vm7, 0, %v701_v17  ;;  %v704_v20 = vld [vmem:[#allocation4 + $0x50] sm:$0x1]  ;;  %v707_v21 = vld [vmem:[#allocation4 + $0x5c] sm:$0x1] }
  0x51   : > { %700 = vst [vmem:[#allocation4 + $0x38] sm:$0x1] %v699_v18  ;;  %703 = vst [vmem:[#allocation4 + $0x44] sm:$0x1] %v702_v19  ;;  %v705_v22 = vsel %vm15393_vm7, 0, %v704_v20  ;;  %v708_v23 = vsel %vm15393_vm7, 0, %v707_v21 }
  0x52   : > { %v710_v24 = vld [vmem:[#allocation4 + $0x68] sm:$0x1]  ;;  %v713_v25 = vld [vmem:[#allocation4 + $0x74] sm:$0x1]  ;;  %706 = vst [vmem:[#allocation4 + $0x50] sm:$0x1] %v705_v22 }
  0x53   : > { %709 = vst [vmem:[#allocation4 + $0x5c] sm:$0x1] %v708_v23  ;;  %v711_v26 = vsel %vm15393_vm7, 0, %v710_v24  ;;  %v714_v27 = vsel %vm15393_vm7, 0, %v713_v25  ;;  %v716_v28 = vld [vmem:[#allocation4 + $0x80] sm:$0x1] }
  0x54   : > { %v719_v29 = vld [vmem:[#allocation4 + $0x8c] sm:$0x1]  ;;  %712 = vst [vmem:[#allocation4 + $0x68] sm:$0x1] %v711_v26  ;;  %715 = vst [vmem:[#allocation4 + $0x74] sm:$0x1] %v714_v27 }
  0x55   : > { %v717_v30 = vsel %vm15393_vm7, 0, %v716_v28  ;;  %v720_v31 = vsel %vm15393_vm7, 0, %v719_v29  ;;  %s12861_s21 = sshll.u32 %s18244_s17, 3  ;;  %s18248_s18 = smov (!%p459_p0, %s12865_s18), 15  ;;  %vm809_vm8 = vcmask 27648  }
  0x56   : > { %718 = vst [vmem:[#allocation4 + $0x80] sm:$0x1] %v717_v30  ;;  %721 = vst [vmem:[#allocation4 + $0x8c] sm:$0x1] %v720_v31  ;;  %s444_s24 = scalar_select %p443_p13, %s15147_s13, 1 }
  0x57   : > { %p445_p1 = scmp.lt.s32.totalorder %s12861_s21, 15  ;;  %s12866_s20 = sshll.u32 %s18248_s18, 1  ;;  %vm747_vm9 = vsmask.f32 4368  ;;  %v811_v47 = vld [vmem:[#allocation2] sm:$0xf]  ;;  %vm15510_vm10 = vmand %vm809_vm8, %vm531_vm4 }
  0x58   : > { %s15487_s25 = sshll.u32 %s444_s24, 5  ;;  %s467_s15 = sadd.s32 1, %s15143_s12  ;;  %v816_v56 = vld [vmem:[#allocation2 + $0x8] sm:$0x1]  ;;  %vm15516_vm11 = vmor %vm487_vm1, %vm747_vm9  ;;  %v819_v5 = vld [vmem:[#allocation2 + $0xc] sm:$0xf] }
  0x59   : > { %s18246_s21 = smov (!%p445_p1, %s12861_s21), 15  ;;  %s463_s11 = sadd.s32 %s12866_s20, %s15487_s25  ;;  %v823_v6 = vld [vmem:[#allocation2 + $0x14] sm:$0x1]  ;;  %v826_v23 = vld [vmem:[#allocation2 + $0x18] sm:$0xf] }
  0x5a   : > { %s12862_s26 = sshll.u32 %s18246_s21, 1  ;;  %s12868_s21 = sshll.u32 %s463_s11, 3  ;;  %v830_v27 = vld [vmem:[#allocation2 + $0x20] sm:$0x1] }
  0x5b   : > { %s449_s28 = sadd.s32 %s15487_s25, %s12862_s26  ;;  %p15499_p2 = scmp.lt.s32.totalorder %s467_s15, 1 }
  0x5c   : > { %s12864_s19 = sshll.u32 %s449_s28, 3  ;;  %s15506_s20 = scalar_lea.vmem %s18184_s1, %s12868_s21 }
  0x5d   : > { %s451_s27 = scalar_lea.vmem %s18183_s0, %s12864_s19  ;;  %s18250_s15 = smov (!%p15499_p2, %s467_s15), 1  ;;  %v833_v12 = vld [vmem:[%s15506_s20] sm:$0xff]  ;;  %v834_v13 = vld [vmem:[%s15506_s20 + $0x8] sm:$0xff]  ;;  %v835_v18 = vld [vmem:[%s15506_s20 + $0x10] sm:$0xff] }
  0x5e   : > { %v12873_v10 = vld [vmem:[%s451_s27 + $0x50] sm:$0xff]  ;;  %v12874_v32 = vld [vmem:[%s451_s27 + $0x58] sm:$0xff]  ;;  %v12875_v33 = vld [vmem:[%s451_s27 + $0x60] sm:$0xff]  ;;  %v13711_v28 = vpack.c.bf16 %v833_v12, %v833_v12  ;;  %v13712_v29 = vpack.c.bf16 %v834_v13, %v834_v13  ;;  %s15670_s21 = scalar_lea.vmem [#allocation7], %s15294_s29  ;;  %p12907_p5 = scmp.ne.s32.totalorder %s15143_s12, 0 }
  0x5f   : > { %v13705_v34 = vpack.c.bf16 %v12873_v10, %v12873_v10  ;;  %v13706_v35 = vpack.c.bf16 %v12874_v32, %v12874_v32  ;;  %v13707_v36 = vpack.c.bf16 %v12875_v33, %v12875_v33  ;;  %v12876_v37 = vld [vmem:[%s451_s27 + $0x68] sm:$0xff]  ;;  %v12877_v38 = vld [vmem:[%s451_s27 + $0x70] sm:$0xff]  ;;  %v12878_v39 = vld [vmem:[%s451_s27 + $0x78] sm:$0xff]  ;;  %s12869_s27 = sshll.u32 %s18250_s15, 3  ;;  %v13713_v10 = vpack.c.bf16 %v835_v18, %v835_v18 }
  0x60   : > { %v13708_v40 = vpack.c.bf16 %v12876_v37, %v12876_v37  ;;  %v13709_v41 = vpack.c.bf16 %v12877_v38, %v12877_v38  ;;  %v13710_v42 = vpack.c.bf16 %v12878_v39, %v12878_v39  ;;  %v836_v19 = vld [vmem:[%s15506_s20 + $0x18] sm:$0xff]  ;;  %p15547_p4 = scmp.lt.s32.totalorder %s12869_s27, 15  ;;  %v837_v37 = vld [vmem:[%s15506_s20 + $0x20] sm:$0xff]  ;;  %v838_v38 = vld [vmem:[%s15506_s20 + $0x28] sm:$0xff]  ;;  %v15161_v54 = vmov (!%p12907_p5), 0  }
  0x61   : > { %v750_v43 = vshrl.u32 %v13705_v34, 16  ;;  %v753_v44 = vshll.u32 %v13705_v34, 16  ;;  %v758_v45 = vshrl.u32 %v13706_v35, 16  ;;  %v761_v46 = vshll.u32 %v13706_v35, 16 }
  0x62   : > { %v767_v49 = vshrl.u32 %v13707_v36, 16  ;;  %v770_v50 = vshll.u32 %v13707_v36, 16  ;;  %v775_v51 = vshrl.u32 %v13708_v40, 16  ;;  %v778_v52 = vshll.u32 %v13708_v40, 16  ;;  %s18252_s27 = smov (!%p15547_p4, %s12869_s27), 15 }
  0x63   : > { %v752_v53 = vrot.slane %v750_v43, 7  ;;  %v760_v55 = vrot.slane %v758_v45, 7  ;;  %v784_v57 = vshrl.u32 %v13709_v41, 16  ;;  %v787_v58 = vshll.u32 %v13709_v41, 16  ;;  %s12870_s15 = sshll.u32 %s18252_s27, 1 }
  0x64   : > { %v769_v60 = vrot.slane %v767_v49, 7  ;;  %v777_v61 = vrot.slane %v775_v51, 7  ;;  %v792_v62 = vshrl.u32 %v13710_v42, 16  ;;  %v795_v63 = vshll.u32 %v13710_v42, 16  ;;  %v1062_v49 = vld [vmem:[#allocation2 + $0x2c] sm:$0x1]  ;;  %s15586_s18 = sadd.s32 %s12870_s15, %s15487_s25 }
  0x65   : > { %v755_v0 = vor.u32 %v753_v44, %v752_v53  ;;  %v756_v2 = vrot.slane %v752_v53, 4  ;;  %v763_v3 = vor.u32 %v761_v46, %v760_v55  ;;  %v765_v4 = vrot.slane %v760_v55, 4  ;;  %v1058_v44 = vld [vmem:[#allocation2 + $0x24] sm:$0xf]  ;;  %s12872_s24 = sshll.u32 %s15586_s18, 3 }
  0x66   : > { %v772_v7 = vor.u32 %v770_v50, %v769_v60  ;;  %v773_v8 = vrot.slane %v769_v60, 4  ;;  %v780_v9 = vor.u32 %v778_v52, %v777_v61  ;;  %v782_v11 = vrot.slane %v777_v61, 4  ;;  %v1065_v60 = vld [vmem:[#allocation2 + $0x30] sm:$0xf]  ;;  %s15604_s17 = scalar_lea.vmem %s18185_s2, %s12872_s24 }
  0x67   : > { %v812_v14 = vsel %vm15510_vm10, %v755_v0, %v811_v47  ;;  %v764_v15 = vsel %vm15516_vm11, %v756_v2, %v763_v3  ;;  %v817_v16 = vsel %vm15298_vm2, %v765_v4, %v816_v56  ;;  %v786_v17 = vrot.slane %v784_v57, 7  ;;  %v839_v2 = vld [vmem:[%s15506_s20 + $0x30] sm:$0xff]  ;;  %v840_v3 = vld [vmem:[%s15506_s20 + $0x38] sm:$0xff] }
  0x68   : > { %813 = vst [vmem:[#allocation2] sm:$0xf] %v812_v14  ;;  %815 = vst.msk [vmem:[#allocation2 + $0x4] sm:$0xf] %vm809_vm8, %v764_v15  ;;  %v820_v20 = vsel %vm15510_vm10, %v772_v7, %v819_v5  ;;  %v781_v21 = vsel %vm15516_vm11, %v773_v8, %v780_v9  ;;  %v824_v22 = vsel %vm15298_vm2, %v782_v11, %v823_v6  ;;  %v794_v24 = vrot.slane %v792_v62, 7 }
  0x69   : > { %818 = vst [vmem:[#allocation2 + $0x8] sm:$0x1] %v817_v16  ;;  %821 = vst [vmem:[#allocation2 + $0xc] sm:$0xf] %v820_v20  ;;  %v789_v25 = vor.u32 %v787_v58, %v786_v17  ;;  %v790_v26 = vrot.slane %v786_v17, 4  ;;  %v13714_v32 = vpack.c.bf16 %v836_v19, %v836_v19  ;;  %v898_v34 = vshrl.u32 %v13711_v28, 16 }
  0x6a   : > { %822 = vst.msk [vmem:[#allocation2 + $0x10] sm:$0xf] %vm809_vm8, %v781_v21  ;;  %825 = vst [vmem:[#allocation2 + $0x14] sm:$0x1] %v824_v22  ;;  %v797_v30 = vor.u32 %v795_v63, %v794_v24  ;;  %v799_v31 = vrot.slane %v794_v24, 4  ;;  %v901_v35 = vshll.u32 %v13711_v28, 16  ;;  %v13715_v52 = vpack.c.bf16 %v837_v37, %v837_v37 }
  0x6b   : > { %v827_v33 = vsel %vm15510_vm10, %v789_v25, %v826_v23  ;;  %v906_v36 = vshrl.u32 %v13712_v29, 16  ;;  %v909_v41 = vshll.u32 %v13712_v29, 16  ;;  %v915_v42 = vshrl.u32 %v13713_v10, 16  ;;  %v1069_v7 = vld [vmem:[#allocation2 + $0x38] sm:$0x1]  ;;  %v841_v19 = vld [vmem:[%s15506_s20 + $0x40] sm:$0xff] }
  0x6c   : > { %828 = vst [vmem:[#allocation2 + $0x18] sm:$0xf] %v827_v33  ;;  %v798_v39 = vsel %vm15516_vm11, %v790_v26, %v797_v30  ;;  %v831_v40 = vsel %vm15298_vm2, %v799_v31, %v830_v27  ;;  %v900_v43 = vrot.slane %v898_v34, 7  ;;  %v918_v46 = vshll.u32 %v13713_v10, 16  ;;  %v1072_v14 = vld [vmem:[#allocation2 + $0x3c] sm:$0xf] }
  0x6d   : > { %829 = vst.msk [vmem:[#allocation2 + $0x1c] sm:$0xf] %vm809_vm8, %v798_v39  ;;  %832 = vst [vmem:[#allocation2 + $0x20] sm:$0x1] %v831_v40  ;;  %v908_v45 = vrot.slane %v906_v36, 7  ;;  %v923_v47 = vshrl.u32 %v13714_v32, 16  ;;  %v13716_v53 = vpack.c.bf16 %v838_v38, %v838_v38  ;;  %v13717_v17 = vpack.c.bf16 %v839_v2, %v839_v2 }
  0x6e   : > { %v917_v50 = vrot.slane %v915_v42, 7  ;;  %v926_v51 = vshll.u32 %v13714_v32, 16  ;;  %v903_v55 = vor.u32 %v901_v35, %v900_v43  ;;  %v904_v56 = vrot.slane %v900_v43, 4  ;;  %v842_v20 = vld [vmem:[%s15506_s20 + $0x48] sm:$0xff]  ;;  %v1076_v30 = vld [vmem:[#allocation2 + $0x44] sm:$0x1] }
  0x6f   : > { %v911_v57 = vor.u32 %v909_v41, %v908_v45  ;;  %v913_v58 = vrot.slane %v908_v45, 4  ;;  %v925_v63 = vrot.slane %v923_v47, 7  ;;  %v932_v0 = vshrl.u32 %v13715_v52, 16  ;;  %v1079_v31 = vld [vmem:[#allocation2 + $0x48] sm:$0xf]  ;;  %v843_v38 = vld [vmem:[%s15506_s20 + $0x50] sm:$0xff] }
  0x70   : > { %v920_v61 = vor.u32 %v918_v46, %v917_v50  ;;  %v921_v62 = vrot.slane %v917_v50, 4  ;;  %v1059_v4 = vsel %vm15510_vm10, %v903_v55, %v1058_v44  ;;  %v935_v8 = vshll.u32 %v13715_v52, 16  ;;  %v844_v39 = vld [vmem:[%s15506_s20 + $0x58] sm:$0xff]  ;;  %v845_v44 = vld [vmem:[%s15506_s20 + $0x60] sm:$0xff]  ;;  %v1083_v50 = vld [vmem:[#allocation2 + $0x50] sm:$0x1] }
  0x71   : > { %v912_v5 = vsel %vm15516_vm11, %v904_v56, %v911_v57  ;;  %v1063_v6 = vsel %vm15298_vm2, %v913_v58, %v1062_v49  ;;  %1060 = vst [vmem:[#allocation2 + $0x24] sm:$0xf] %v1059_v4  ;;  %v928_v11 = vor.u32 %v926_v51, %v925_v63  ;;  %v930_v12 = vrot.slane %v925_v63, 4  ;;  %v1086_v57 = vld [vmem:[#allocation2 + $0x54] sm:$0xf] }
  0x72   : > { %1061 = vst.msk [vmem:[#allocation2 + $0x28] sm:$0xf] %vm809_vm8, %v912_v5  ;;  %1064 = vst [vmem:[#allocation2 + $0x2c] sm:$0x1] %v1063_v6  ;;  %v1066_v9 = vsel %vm15510_vm10, %v920_v61, %v1065_v60  ;;  %v934_v13 = vrot.slane %v932_v0, 7  ;;  %v940_v15 = vshrl.u32 %v13716_v53, 16  ;;  %v13718_v18 = vpack.c.bf16 %v840_v3, %v840_v3 }
  0x73   : > { %1067 = vst [vmem:[#allocation2 + $0x30] sm:$0xf] %v1066_v9  ;;  %v943_v16 = vshll.u32 %v13716_v53, 16  ;;  %v929_v21 = vsel %vm15516_vm11, %v921_v62, %v928_v11  ;;  %v1070_v22 = vsel %vm15298_vm2, %v930_v12, %v1069_v7  ;;  %v949_v26 = vshrl.u32 %v13717_v17, 16  ;;  %v1090_v3 = vld [vmem:[#allocation2 + $0x5c] sm:$0x1] }
  0x74   : > { %v937_v23 = vor.u32 %v935_v8, %v934_v13  ;;  %v938_v24 = vrot.slane %v934_v13, 4  ;;  %1068 = vst.msk [vmem:[#allocation2 + $0x34] sm:$0xf] %vm809_vm8, %v929_v21  ;;  %1071 = vst [vmem:[#allocation2 + $0x38] sm:$0x1] %v1070_v22  ;;  %v942_v25 = vrot.slane %v940_v15, 7  ;;  %v13719_v32 = vpack.c.bf16 %v841_v19, %v841_v19 }
  0x75   : > { %v952_v27 = vshll.u32 %v13717_v17, 16  ;;  %v957_v28 = vshrl.u32 %v13718_v18, 16  ;;  %v960_v10 = vshll.u32 %v13718_v18, 16  ;;  %v13720_v33 = vpack.c.bf16 %v842_v20, %v842_v20  ;;  %v846_v8 = vld [vmem:[%s15506_s20 + $0x68] sm:$0xff]  ;;  %v847_v9 = vld [vmem:[%s15506_s20 + $0x70] sm:$0xff]  ;;  %v848_v15 = vld [vmem:[%s15506_s20 + $0x78] sm:$0xff] }
  0x76   : > { %v1073_v29 = vsel %vm15510_vm10, %v937_v23, %v1072_v14  ;;  %v945_v34 = vor.u32 %v943_v16, %v942_v25  ;;  %v947_v35 = vrot.slane %v942_v25, 4  ;;  %v951_v36 = vrot.slane %v949_v26, 7  ;;  %v1114_v16 = vld [vmem:[%s15604_s17] sm:$0xff]  ;;  %1224 = vst.msk [vmem:[#allocation2] sm:$0xf] (!%p12907_p5), %vm809_vm8, %v15161_v54 }
  0x77   : > { %1074 = vst [vmem:[#allocation2 + $0x3c] sm:$0xf] %v1073_v29  ;;  %v959_v37 = vrot.slane %v957_v28, 7  ;;  %v966_v40 = vshrl.u32 %v13719_v32, 16  ;;  %v969_v41 = vshll.u32 %v13719_v32, 16  ;;  %v974_v42 = vshrl.u32 %v13720_v33, 16 }
  0x78   : > { %v977_v43 = vshll.u32 %v13720_v33, 16  ;;  %v946_v45 = vsel %vm15516_vm11, %v938_v24, %v945_v34  ;;  %v1077_v46 = vsel %vm15298_vm2, %v947_v35, %v1076_v30  ;;  %v954_v47 = vor.u32 %v952_v27, %v951_v36  ;;  %v1093_v21 = vld [vmem:[#allocation2 + $0x60] sm:$0xf]  ;;  %v1097_v28 = vld [vmem:[#allocation2 + $0x68] sm:$0x1] }
  0x79   : > { %v955_v49 = vrot.slane %v951_v36, 4  ;;  %1075 = vst.msk [vmem:[#allocation2 + $0x40] sm:$0xf] %vm809_vm8, %v946_v45  ;;  %1078 = vst [vmem:[#allocation2 + $0x44] sm:$0x1] %v1077_v46  ;;  %v962_v51 = vor.u32 %v960_v10, %v959_v37  ;;  %v964_v52 = vrot.slane %v959_v37, 4  ;;  %v13721_v58 = vpack.c.bf16 %v843_v38, %v843_v38 }
  0x7a   : > { %v968_v53 = vrot.slane %v966_v40, 7  ;;  %v976_v55 = vrot.slane %v974_v42, 7  ;;  %v1080_v56 = vsel %vm15510_vm10, %v954_v47, %v1079_v31  ;;  %v13722_v60 = vpack.c.bf16 %v844_v39, %v844_v39  ;;  %v1100_v29 = vld [vmem:[#allocation2 + $0x6c] sm:$0xf]  ;;  %v1116_v40 = vld [vmem:[%s15604_s17 + $0x10] sm:$0xff] }
  0x7b   : > { %v13723_v61 = vpack.c.bf16 %v845_v44, %v845_v44  ;;  %1081 = vst [vmem:[#allocation2 + $0x48] sm:$0xf] %v1080_v56  ;;  %v963_v62 = vsel %vm15516_vm11, %v955_v49, %v962_v51  ;;  %v1084_v63 = vsel %vm15298_vm2, %v964_v52, %v1083_v50  ;;  %v983_v6 = vshrl.u32 %v13721_v58, 16  ;;  %v1115_v39 = vld [vmem:[%s15604_s17 + $0x8] sm:$0xff]  ;;  %v1104_v50 = vld [vmem:[#allocation2 + $0x74] sm:$0x1] }
  0x7c   : > { %v971_v0 = vor.u32 %v969_v41, %v968_v53  ;;  %v972_v2 = vrot.slane %v968_v53, 4  ;;  %1082 = vst.msk [vmem:[#allocation2 + $0x4c] sm:$0xf] %vm809_vm8, %v963_v62  ;;  %1085 = vst [vmem:[#allocation2 + $0x50] sm:$0x1] %v1084_v63  ;;  %v979_v4 = vor.u32 %v977_v43, %v976_v55  ;;  %v981_v5 = vrot.slane %v976_v55, 4 }
  0x7d   : > { %v986_v7 = vshll.u32 %v13721_v58, 16  ;;  %v991_v12 = vshrl.u32 %v13722_v60, 16  ;;  %v994_v13 = vshll.u32 %v13722_v60, 16  ;;  %v1000_v14 = vshrl.u32 %v13723_v61, 16  ;;  %v1107_v51 = vld [vmem:[#allocation2 + $0x78] sm:$0xf] }
  0x7e   : > { %v1087_v11 = vsel %vm15510_vm10, %v971_v0, %v1086_v57  ;;  %v980_v17 = vsel %vm15516_vm11, %v972_v2, %v979_v4  ;;  %v1091_v18 = vsel %vm15298_vm2, %v981_v5, %v1090_v3  ;;  %v985_v19 = vrot.slane %v983_v6, 7  ;;  %v1117_v3 = vld [vmem:[%s15604_s17 + $0x18] sm:$0xff]  ;;  %1225 = vst.msk [vmem:[#allocation2 + $0x4] sm:$0xf] (!%p12907_p5), %vm809_vm8, %v15161_v54  ;;  %1228 = vst.msk [vmem:[#allocation2 + $0xc] sm:$0xf] (!%p12907_p5), %vm809_vm8, %v15161_v54 }
  0x7f   : > { %1088 = vst [vmem:[#allocation2 + $0x54] sm:$0xf] %v1087_v11  ;;  %v1003_v20 = vshll.u32 %v13723_v61, 16  ;;  %1089 = vst.msk [vmem:[#allocation2 + $0x58] sm:$0xf] %vm809_vm8, %v980_v17  ;;  %v993_v22 = vrot.slane %v991_v12, 7  ;;  %v13724_v24 = vpack.c.bf16 %v846_v8, %v846_v8  ;;  %v13725_v25 = vpack.c.bf16 %v847_v9, %v847_v9 }
  0x80   : > { %1092 = vst [vmem:[#allocation2 + $0x5c] sm:$0x1] %v1091_v18  ;;  %v1002_v23 = vrot.slane %v1000_v14, 7  ;;  %v988_v26 = vor.u32 %v986_v7, %v985_v19  ;;  %v989_v27 = vrot.slane %v985_v19, 4  ;;  %v13726_v30 = vpack.c.bf16 %v848_v15, %v848_v15  ;;  %v1111_v7 = vld [vmem:[#allocation2 + $0x80] sm:$0x1] }
  0x81   : > { %v13727_v31 = vpack.c.bf16 %v1114_v16, %v1114_v16  ;;  %v996_v10 = vor.u32 %v994_v13, %v993_v22  ;;  %v998_v32 = vrot.slane %v993_v22, 4  ;;  %v1008_v36 = vshrl.u32 %v13724_v24, 16  ;;  %v1199_v8 = vld [vmem:[#allocation2 + $0x84] sm:$0xf]  ;;  %1227 = vst.msk [vmem:[#allocation2 + $0x8] sm:$0x1] (!%p12907_p5), %vm486_vm0, %v15161_v54 }
  0x82   : > { %v1005_v33 = vor.u32 %v1003_v20, %v1002_v23  ;;  %v1006_v34 = vrot.slane %v1002_v23, 4  ;;  %v1094_v35 = vsel %vm15510_vm10, %v988_v26, %v1093_v21  ;;  %v1011_v37 = vshll.u32 %v13724_v24, 16  ;;  %v1118_v11 = vld [vmem:[%s15604_s17 + $0x20] sm:$0xff]  ;;  %v1203_v23 = vld [vmem:[#allocation2 + $0x8c] sm:$0x1] }
  0x83   : > { %v1017_v38 = vshrl.u32 %v13725_v25, 16  ;;  %1095 = vst [vmem:[#allocation2 + $0x60] sm:$0xf] %v1094_v35  ;;  %v997_v41 = vsel %vm15516_vm11, %v989_v27, %v996_v10  ;;  %v1098_v42 = vsel %vm15298_vm2, %v998_v32, %v1097_v28  ;;  %v1020_v44 = vshll.u32 %v13725_v25, 16  ;;  %v1206_v24 = vld [vmem:[#allocation2 + $0x90] sm:$0xf] }
  0x84   : > { %v1101_v43 = vsel %vm15510_vm10, %v1005_v33, %v1100_v29  ;;  %1096 = vst.msk [vmem:[#allocation2 + $0x64] sm:$0xf] %vm809_vm8, %v997_v41  ;;  %1099 = vst [vmem:[#allocation2 + $0x68] sm:$0x1] %v1098_v42  ;;  %v1010_v45 = vrot.slane %v1008_v36, 7  ;;  %v1025_v47 = vshrl.u32 %v13726_v30, 16  ;;  %v13728_v55 = vpack.c.bf16 %v1115_v39, %v1115_v39 }
  0x85   : > { %1102 = vst [vmem:[#allocation2 + $0x6c] sm:$0xf] %v1101_v43  ;;  %v1019_v46 = vrot.slane %v1017_v38, 7  ;;  %v1028_v49 = vshll.u32 %v13726_v30, 16  ;;  %v1139_v52 = vshrl.u32 %v13727_v31, 16  ;;  %v1142_v53 = vshll.u32 %v13727_v31, 16 }
  0x86   : > { %v13729_v56 = vpack.c.bf16 %v1116_v40, %v1116_v40  ;;  %v1013_v57 = vor.u32 %v1011_v37, %v1010_v45  ;;  %v1015_v58 = vrot.slane %v1010_v45, 4  ;;  %v1027_v62 = vrot.slane %v1025_v47, 7  ;;  %v1119_v26 = vld [vmem:[%s15604_s17 + $0x28] sm:$0xff]  ;;  %v1210_v40 = vld [vmem:[#allocation2 + $0x98] sm:$0x1] }
  0x87   : > { %v1022_v60 = vor.u32 %v1020_v44, %v1019_v46  ;;  %v1023_v61 = vrot.slane %v1019_v46, 4  ;;  %v1141_v63 = vrot.slane %v1139_v52, 7  ;;  %v1147_v0 = vshrl.u32 %v13728_v55, 16  ;;  %v1213_v41 = vld [vmem:[#allocation2 + $0x9c] sm:$0xf] }
  0x88   : > { %v1150_v2 = vshll.u32 %v13728_v55, 16  ;;  %v1014_v4 = vsel %vm15516_vm11, %v1006_v34, %v1013_v57  ;;  %v1105_v5 = vsel %vm15298_vm2, %v1015_v58, %v1104_v50  ;;  %v1156_v9 = vshrl.u32 %v13729_v56, 16  ;;  %1229 = vst.msk [vmem:[#allocation2 + $0x10] sm:$0xf] (!%p12907_p5), %vm809_vm8, %v15161_v54  ;;  %1231 = vst.msk [vmem:[#allocation2 + $0x18] sm:$0xf] (!%p12907_p5), %vm809_vm8, %v15161_v54 }
  0x89   : > { %v1108_v6 = vsel %vm15510_vm10, %v1022_v60, %v1107_v51  ;;  %1103 = vst.msk [vmem:[#allocation2 + $0x70] sm:$0xf] %vm809_vm8, %v1014_v4  ;;  %1106 = vst [vmem:[#allocation2 + $0x74] sm:$0x1] %v1105_v5  ;;  %v1030_v12 = vor.u32 %v1028_v49, %v1027_v62  ;;  %v1032_v13 = vrot.slane %v1027_v62, 4  ;;  %v1144_v14 = vor.u32 %v1142_v53, %v1141_v63 }
  0x8a   : > { %1109 = vst [vmem:[#allocation2 + $0x78] sm:$0xf] %v1108_v6  ;;  %v1145_v15 = vrot.slane %v1141_v63, 4  ;;  %v1149_v16 = vrot.slane %v1147_v0, 7  ;;  %v1158_v17 = vrot.slane %v1156_v9, 7  ;;  %v1159_v18 = vshll.u32 %v13729_v56, 16 }
  0x8b   : > { %v13730_v19 = vpack.c.bf16 %v1117_v3, %v1117_v3  ;;  %v1031_v20 = vsel %vm15516_vm11, %v1023_v61, %v1030_v12  ;;  %v1112_v21 = vsel %vm15298_vm2, %v1032_v13, %v1111_v7  ;;  %v1200_v22 = vsel %vm15510_vm10, %v1144_v14, %v1199_v8  ;;  %v1217_v53 = vld [vmem:[#allocation2 + $0xa4] sm:$0x1]  ;;  %1230 = vst.msk [vmem:[#allocation2 + $0x14] sm:$0x1] (!%p12907_p5), %vm486_vm0, %v15161_v54 }
  0x8c   : > { %v13731_v25 = vpack.c.bf16 %v1118_v11, %v1118_v11  ;;  %1110 = vst.msk [vmem:[#allocation2 + $0x7c] sm:$0xf] %vm809_vm8, %v1031_v20  ;;  %1113 = vst [vmem:[#allocation2 + $0x80] sm:$0x1] %v1112_v21  ;;  %v1152_v27 = vor.u32 %v1150_v2, %v1149_v16  ;;  %v1154_v28 = vrot.slane %v1149_v16, 4  ;;  %v1161_v29 = vor.u32 %v1159_v18, %v1158_v17 }
  0x8d   : > { %1201 = vst [vmem:[#allocation2 + $0x84] sm:$0xf] %v1200_v22  ;;  %v1164_v30 = vshrl.u32 %v13730_v19, 16  ;;  %v1167_v31 = vshll.u32 %v13730_v19, 16  ;;  %v13732_v36 = vpack.c.bf16 %v1119_v26, %v1119_v26  ;;  %v1162_v37 = vrot.slane %v1158_v17, 4 }
  0x8e   : > { %v1173_v10 = vshrl.u32 %v13731_v25, 16  ;;  %v1176_v32 = vshll.u32 %v13731_v25, 16  ;;  %v1153_v33 = vsel %vm15516_vm11, %v1145_v15, %v1152_v27  ;;  %v1204_v34 = vsel %vm15298_vm2, %v1154_v28, %v1203_v23  ;;  %1232 = vst.msk [vmem:[#allocation2 + $0x1c] sm:$0xf] (!%p12907_p5), %vm809_vm8, %v15161_v54 }
  0x8f   : > { %v1207_v35 = vsel %vm15510_vm10, %v1161_v29, %v1206_v24  ;;  %1202 = vst.msk [vmem:[#allocation2 + $0x88] sm:$0xf] %vm809_vm8, %v1153_v33  ;;  %1205 = vst [vmem:[#allocation2 + $0x8c] sm:$0x1] %v1204_v34  ;;  %v1166_v38 = vrot.slane %v1164_v30, 7  ;;  %v1181_v42 = vshrl.u32 %v13732_v36, 16 }
  0x90   : > { %1208 = vst [vmem:[#allocation2 + $0x90] sm:$0xf] %v1207_v35  ;;  %v1175_v39 = vrot.slane %v1173_v10, 7  ;;  %v1184_v43 = vshll.u32 %v13732_v36, 16  ;;  %1223 = sbr.rel (%p12907_p5) target bundleno = 151 (0x97), region = 60 }
  0x91   : > { %v1169_v44 = vor.u32 %v1167_v31, %v1166_v38  ;;  %v1171_v45 = vrot.slane %v1166_v38, 4  ;;  %v1183_v49 = vrot.slane %v1181_v42, 7  ;;  %1233 = vst.msk [vmem:[#allocation2 + $0x20] sm:$0x1] (!%p12907_p5), %vm486_vm0, %v15161_v54 }
  0x92   : > { %v1178_v46 = vor.u32 %v1176_v32, %v1175_v39  ;;  %v1179_v47 = vrot.slane %v1175_v39, 4 }
  0x93   : > { %v1170_v50 = vsel %vm15516_vm11, %v1162_v37, %v1169_v44  ;;  %v1211_v51 = vsel %vm15298_vm2, %v1171_v45, %v1210_v40  ;;  %v1186_v55 = vor.u32 %v1184_v43, %v1183_v49  ;;  %v1188_v56 = vrot.slane %v1183_v49, 4 }
  0x94   : > { %v1214_v52 = vsel %vm15510_vm10, %v1178_v46, %v1213_v41  ;;  %1209 = vst.msk [vmem:[#allocation2 + $0x94] sm:$0xf] %vm809_vm8, %v1170_v50  ;;  %1212 = vst [vmem:[#allocation2 + $0x98] sm:$0x1] %v1211_v51 }
  0x95   : > { %1215 = vst [vmem:[#allocation2 + $0x9c] sm:$0xf] %v1214_v52  ;;  %v1187_v57 = vsel %vm15516_vm11, %v1179_v47, %v1186_v55  ;;  %v1218_v58 = vsel %vm15298_vm2, %v1188_v56, %v1217_v53 }
  0x96   : > { %1216 = vst.msk [vmem:[#allocation2 + $0xa0] sm:$0xf] %vm809_vm8, %v1187_v57  ;;  %1219 = vst [vmem:[#allocation2 + $0xa4] sm:$0x1] %v1218_v58 }
  0x97 PF: > { %p12908_p6 = scmp.ne.s32.totalorder %s15143_s12, 1 }
  0x98   : > { %v15162_v1 = vmov (!%p12908_p6), 0  }
  0x99   : > { %1237 = sbr.rel (%p12908_p6) target bundleno = 160 (0xa0), region = 64  ;;  %1238 = vst.msk [vmem:[#allocation2 + $0x84] sm:$0xf] (!%p12908_p6), %vm809_vm8, %v15162_v1  ;;  %1239 = vst.msk [vmem:[#allocation2 + $0x88] sm:$0xf] (!%p12908_p6), %vm809_vm8, %v15162_v1 }
  0x9a   : > { %1241 = vst.msk [vmem:[#allocation2 + $0x8c] sm:$0x1] (!%p12908_p6), %vm486_vm0, %v15162_v1  ;;  %1244 = vst.msk [vmem:[#allocation2 + $0x98] sm:$0x1] (!%p12908_p6), %vm486_vm0, %v15162_v1 }
  0x9b   : > { %1242 = vst.msk [vmem:[#allocation2 + $0x90] sm:$0xf] (!%p12908_p6), %vm809_vm8, %v15162_v1  ;;  %1243 = vst.msk [vmem:[#allocation2 + $0x94] sm:$0xf] (!%p12908_p6), %vm809_vm8, %v15162_v1 }
  0x9c   : > { %1245 = vst.msk [vmem:[#allocation2 + $0x9c] sm:$0xf] (!%p12908_p6), %vm809_vm8, %v15162_v1  ;;  %1246 = vst.msk [vmem:[#allocation2 + $0xa0] sm:$0xf] (!%p12908_p6), %vm809_vm8, %v15162_v1 }
  0x9d   : > { %1247 = vst.msk [vmem:[#allocation2 + $0xa4] sm:$0x1] (!%p12908_p6), %vm486_vm0, %v15162_v1 }
  0xa0 PF: > { %v1273_v60 = vld [vmem:[%s18186_s3] sm:$0x3]  ;;  %vm1371_vm12 = vcmask 1041408   ;;  %vm1334_vm13 = vcmask 31744   ;;  %v14940_v63 = vld [vmem:[#allocation2 + $0xc] sm:$0xff]   ;;  %v14941_v3 = vld [vmem:[#allocation2 + $0x18] sm:$0xff]  }
  0xa1   : > { %v14939_v61 = vld [vmem:[#allocation2] sm:$0xff]   ;;  %14851 = vmatprep.subr.msk.bf16.mxu0 %vm1371_vm12, %v1273_v60  ;;  %v1373_v62 = vsel %vm1371_vm12, %v1273_v60, 0  ;;  %v14943_v5 = vld [vmem:[#allocation2 + $0x30] sm:$0xff]   ;;  %v14945_v11 = vld [vmem:[#allocation2 + $0x48] sm:$0xff]   ;;  %vm1565_vm14 = vsmask.f32 3328 }
  0xa2   : > { %14094 = vmatpush3.bf16.msra.mxu0 %v1373_v62  ;;  %14095 = vmatprep.mubr.msk.bf16.mxu0 %vm1334_vm13, %v14939_v61  ;;  %v12933_v0 = vld [vmem:[%s18186_s3 + $0x2] sm:$0x3]  ;;  %v14942_v4 = vld [vmem:[#allocation2 + $0x24] sm:$0xff]   ;;  %v1532_v16 = vld [vmem:[#allocation2 + $0xc] sm:$0xf]  ;;  %vm2206_vm1 = vcmask 1042432  }
  0xa3   : > { %14852 = vmatprep.subr.msk.bf16.mxu0 %vm1371_vm12, %v12933_v0  ;;  %v1931_v2 = vsel %vm1371_vm12, %v12933_v0, 0  ;;  %v14944_v6 = vld [vmem:[#allocation2 + $0x3c] sm:$0xff]   ;;  %v1530_v8 = vld [vmem:[#allocation2 + $0x4] sm:$0xf]  ;;  %v1533_v17 = vld [vmem:[#allocation2 + $0x10] sm:$0xf] }
  0xa4   : > { %v1529_v7 = vld [vmem:[#allocation2] sm:$0xf]  ;;  %v15714_v9 = vld [vmem:[%s18186_s3 + $0x4] sm:$0x3]  ;;  %v1578_v14 = vshll.u32 %v1530_v8, 16  ;;  %v1582_v15 = vshrl.u32 %v1530_v8, 16 }
  0xa5   : > { %14096 = vmatmul.mubr.msk.bf16.vlgmr.msra.gmra.mrb[0].mxu0 %vm1334_vm13, %v14940_v63  ;;  %v1569_v12 = vshrl.u32 %v1529_v7, 16  ;;  %v1572_v13 = vshll.u32 %v1529_v7, 16  ;;  %v14946_v18 = vld [vmem:[#allocation2 + $0x54] sm:$0xff]   ;;  %v1531_v19 = vld [vmem:[#allocation2 + $0x8] sm:$0x1]  ;;  %v1593_v25 = vshrl.u32 %v1532_v16, 16 }
  0xa6   : > { %14120 = vmatpush3.bf16.msra.mxu0 %v1931_v2  ;;  %14099 = vmatprep.mubr.msk.bf16.mxu0 %vm1334_vm13, %v14941_v3  ;;  %v15720_v22 = vrot.slane %v1578_v14, 5  ;;  %v1584_v23 = vrot.slane %v1582_v15, 4  ;;  %v1535_v24 = vld [vmem:[#allocation2 + $0x18] sm:$0xf]  ;;  %v1596_v26 = vshll.u32 %v1532_v16, 16  ;;  %v1602_v27 = vshll.u32 %v1533_v17, 16 }
  0xa7   : > { %14853 = vmatprep.subr.msk.bf16.mxu0 %vm1371_vm12, %v15714_v9  ;;  %v1571_v20 = vrot.slane %v1569_v12, 4  ;;  %v1574_v21 = vrot.slane %v1572_v13, 5  ;;  %v1606_v28 = vshrl.u32 %v1533_v17, 16  ;;  %v1536_v29 = vld [vmem:[#allocation2 + $0x1c] sm:$0xf]  ;;  %v14947_v30 = vld [vmem:[#allocation2 + $0x60] sm:$0xff]  }
  0xa8   : > { %v1588_v31 = vshll.u32 %v1531_v19, 16  ;;  %v1534_v10 = vld [vmem:[#allocation2 + $0x14] sm:$0x1]  ;;  %v1617_v32 = vshrl.u32 %v1535_v24, 16  ;;  %v1620_v33 = vshll.u32 %v1535_v24, 16  ;;  %v1585_v35 = vor.u32 %v1584_v23, %v15720_v22  ;;  %v14948_v47 = vld [vmem:[#allocation2 + $0x6c] sm:$0xff]  }
  0xa9   : > { %v1575_v34 = vor.u32 %v1574_v21, %v1571_v20  ;;  %v1626_v36 = vshll.u32 %v1536_v29, 16  ;;  %v1630_v37 = vshrl.u32 %v1536_v29, 16  ;;  %v1595_v38 = vrot.slane %v1593_v25, 4  ;;  %v1538_v45 = vld [vmem:[#allocation2 + $0x24] sm:$0xf]  ;;  %v14949_v1 = vld [vmem:[#allocation2 + $0x78] sm:$0xff]  }
  0xaa   : > { %v1598_v39 = vrot.slane %v1596_v26, 5  ;;  %v15724_v40 = vrot.slane %v1602_v27, 5  ;;  %v1608_v41 = vrot.slane %v1606_v28, 4  ;;  %vm1566_vm15 = vsmask.f32 7440 }
  0xab   : > { %v1612_v42 = vshll.u32 %v1534_v10, 16  ;;  %v1619_v43 = vrot.slane %v1617_v32, 4  ;;  %v1622_v44 = vrot.slane %v1620_v33, 5  ;;  %v1539_v46 = vld [vmem:[#allocation2 + $0x28] sm:$0xf]  ;;  %v1590_v49 = vrot.slane %v1588_v31, 5  ;;  %vm15732_vm0 = vmor %vm1565_vm14, %vm1566_vm15 }
  0xac   : > { %v15727_v50 = vrot.slane %v1626_v36, 5  ;;  %v1632_v51 = vrot.slane %v1630_v37, 4  ;;  %v1541_v52 = vld [vmem:[#allocation2 + $0x30] sm:$0xf]  ;;  %v1576_v53 = vrot.slane %v1575_v34, 4  ;;  %v1586_v55 = vrot.slane %v1585_v35, 4 }
  0xad   : > { %14100 = vmatmul.mubr.msk.bf16.gmra.mrb[4].mxu0 %vm1334_vm13, %v14942_v4  ;;  %v1599_v56 = vor.u32 %v1598_v39, %v1595_v38  ;;  %v1609_v57 = vor.u32 %v1608_v41, %v15724_v40  ;;  %v1537_v58 = vld [vmem:[#allocation2 + $0x20] sm:$0x1]  ;;  %v1542_v54 = vld [vmem:[#allocation2 + $0x34] sm:$0xf]  ;;  %v1641_v61 = vshrl.u32 %v1538_v45, 16  ;;  %v1644_v62 = vshll.u32 %v1538_v45, 16 }
  0xae   : > { %14103 = vmatprep.mubr.msk.bf16.mxu0 %vm1334_vm13, %v14943_v5  ;;  %v1650_v63 = vshll.u32 %v1539_v46, 16  ;;  %v1654_v0 = vshrl.u32 %v1539_v46, 16  ;;  %v1614_v2 = vrot.slane %v1612_v42, 5  ;;  %v1623_v3 = vor.u32 %v1622_v44, %v1619_v43  ;;  %v1540_v16 = vld [vmem:[#allocation2 + $0x2c] sm:$0x1] }
  0xaf   : > { %v1665_v4 = vshrl.u32 %v1541_v52, 16  ;;  %v1668_v5 = vshll.u32 %v1541_v52, 16  ;;  %v1636_v7 = vshll.u32 %v1537_v58, 16  ;;  %v1674_v8 = vshll.u32 %v1542_v54, 16  ;;  %v1544_v25 = vld [vmem:[#allocation2 + $0x3c] sm:$0xf] }
  0xb0   : > { %v1581_v12 = vsel %vm15732_vm0, %v1576_v53, %v15720_v22  ;;  %v1591_v13 = vsel %vm15732_vm0, %v1586_v55, %v1590_v49  ;;  %v1600_v14 = vrot.slane %v1599_v56, 4  ;;  %v1610_v15 = vrot.slane %v1609_v57, 4  ;;  %v1545_v29 = vld [vmem:[#allocation2 + $0x40] sm:$0xf]  ;;  %v1543_v33 = vld [vmem:[#allocation2 + $0x38] sm:$0x1] }
  0xb1   : > { %v1643_v17 = vrot.slane %v1641_v61, 4  ;;  %v15744_v19 = vrot.slane %v1650_v63, 5  ;;  %v1656_v20 = vrot.slane %v1654_v0, 4  ;;  %v1624_v21 = vrot.slane %v1623_v3, 4  ;;  %v1547_v38 = vld [vmem:[#allocation2 + $0x48] sm:$0xf] }
  0xb2   : > { %v1667_v23 = vrot.slane %v1665_v4, 4  ;;  %v1670_v24 = vrot.slane %v1668_v5, 5  ;;  %v1638_v27 = vrot.slane %v1636_v7, 5  ;;  %v15746_v22 = vrot.slane %v1674_v8, 5  ;;  %v1548_v39 = vld [vmem:[#allocation2 + $0x4c] sm:$0xf] }
  0xb3   : > { %v12934_v31 = vcombine.low %v1581_v12, %v1591_v13  ;;  %v1605_v10 = vsel %vm15732_vm0, %v1600_v14, %v15724_v40  ;;  %v1615_v32 = vsel %vm15732_vm0, %v1610_v15, %v1614_v2  ;;  %v1657_v35 = vor.u32 %v1656_v20, %v15744_v19  ;;  %v1546_v2 = vld [vmem:[#allocation2 + $0x44] sm:$0x1]  ;;  %v1549_v3 = vld [vmem:[#allocation2 + $0x50] sm:$0x1]  ;;  %v1550_v8 = vld [vmem:[#allocation2 + $0x54] sm:$0xf] }
  0xb4   : > { %v1660_v36 = vshll.u32 %v1540_v16, 16  ;;  %v1689_v37 = vshrl.u32 %v1544_v25, 16  ;;  %v1671_v41 = vor.u32 %v1670_v24, %v1667_v23  ;;  %v1692_v42 = vshll.u32 %v1544_v25, 16  ;;  %v1551_v15 = vld [vmem:[#allocation2 + $0x58] sm:$0xf] }
  0xb5   : > { %14104 = vmatmul.mubr.msk.bf16.gmra.mrb[8].mxu0 %vm1334_vm13, %v14944_v6  ;;  %v1633_v6 = vor.u32 %v1632_v51, %v15727_v50  ;;  %v1698_v43 = vshll.u32 %v1545_v29, 16  ;;  %v1702_v44 = vshrl.u32 %v1545_v29, 16  ;;  %v1629_v45 = vsel %vm15732_vm0, %v1624_v21, %v15727_v50  ;;  %v1553_v21 = vld [vmem:[#allocation2 + $0x60] sm:$0xf]  ;;  %v1554_v23 = vld [vmem:[#allocation2 + $0x64] sm:$0xf] }
  0xb6   : > { %14107 = vmatprep.mubr.msk.bf16.mxu0 %vm1334_vm13, %v14945_v11  ;;  %v1678_v11 = vshrl.u32 %v1542_v54, 16  ;;  %v1713_v49 = vshrl.u32 %v1547_v38, 16  ;;  %v1716_v51 = vshll.u32 %v1547_v38, 16  ;;  %v1722_v52 = vshll.u32 %v1548_v39, 16 }
  0xb7   : > { %v1634_v26 = vrot.slane %v1633_v6, 4  ;;  %v1726_v53 = vshrl.u32 %v1548_v39, 16  ;;  %v1658_v56 = vrot.slane %v1657_v35, 4  ;;  %v1662_v57 = vrot.slane %v1660_v36, 5 }
  0xb8   : > { %v1680_v28 = vrot.slane %v1678_v11, 4  ;;  %v1691_v58 = vrot.slane %v1689_v37, 4  ;;  %v1672_v54 = vrot.slane %v1671_v41, 4  ;;  %v1694_v50 = vrot.slane %v1692_v42, 5  ;;  %v1556_v42 = vld [vmem:[#allocation2 + $0x6c] sm:$0xf] }
  0xb9   : > { %v1639_v40 = vsel %vm15732_vm0, %v1634_v26, %v1638_v27  ;;  %v1704_v61 = vrot.slane %v1702_v44, 4  ;;  %v1715_v4 = vrot.slane %v1713_v49, 4  ;;  %v1718_v5 = vrot.slane %v1716_v51, 5  ;;  %v15782_v26 = vld [vmem:[%s18186_s3 + $0x6] sm:$0x3] }
  0xba   : > { %v1681_v46 = vor.u32 %v1680_v28, %v15746_v22  ;;  %v15764_v6 = vrot.slane %v1722_v52, 5  ;;  %v1728_v7 = vrot.slane %v1726_v53, 4  ;;  %v2368_v11 = vsel %vm1371_vm12, %v15714_v9, 0 }
  0xbb   : > { %v12936_v12 = vcombine.low %v1629_v45, %v1639_v40  ;;  %v1663_v14 = vsel %vm15732_vm0, %v1658_v56, %v1662_v57  ;;  %v1677_v16 = vsel %vm15732_vm0, %v1672_v54, %v15746_v22  ;;  %v1708_v20 = vshll.u32 %v1546_v2, 16  ;;  %v1555_v57 = vld [vmem:[#allocation2 + $0x68] sm:$0x1] }
  0xbc   : > { %v1682_v63 = vrot.slane %v1681_v46, 4  ;;  %v1732_v24 = vshll.u32 %v1549_v3, 16  ;;  %v1737_v25 = vshrl.u32 %v1550_v8, 16  ;;  %v1719_v27 = vor.u32 %v1718_v5, %v1715_v4  ;;  %v1557_v46 = vld [vmem:[#allocation2 + $0x70] sm:$0xf] }
  0xbd   : > { %14108 = vmatmul.mubr.msk.bf16.gmra.mrb[12].mxu0 %vm1334_vm13, %v14946_v18  ;;  %v1646_v18 = vrot.slane %v1644_v62, 5  ;;  %v12935_v62 = vcombine.low %v1605_v10, %v1615_v32  ;;  %v1729_v22 = vor.u32 %v1728_v7, %v15764_v6  ;;  %v1746_v28 = vshll.u32 %v1551_v15, 16 }
  0xbe   : > { %14111 = vmatprep.mubr.msk.bf16.mxu0 %vm1334_vm13, %v14947_v30  ;;  %v14950_v30 = vld [vmem:[#allocation2 + $0x84] sm:$0xff]   ;;  %v1750_v29 = vshrl.u32 %v1551_v15, 16  ;;  %v1770_v10 = vshll.u32 %v1554_v23, 16  ;;  %v1774_v32 = vshrl.u32 %v1554_v23, 16  ;;  %v1710_v36 = vrot.slane %v1708_v20, 5 }
  0xbf   : > { %v1647_v34 = vor.u32 %v1646_v18, %v1643_v17  ;;  %v1695_v17 = vor.u32 %v1694_v50, %v1691_v58  ;;  %v1734_v38 = vrot.slane %v1732_v24, 5  ;;  %v1739_v39 = vrot.slane %v1737_v25, 4  ;;  %v1559_v58 = vld [vmem:[#allocation2 + $0x78] sm:$0xf] }
  0xc0   : > { %v1730_v44 = vrot.slane %v1729_v22, 4  ;;  %v15789_v45 = vrot.slane %v1746_v28, 5  ;;  %v1752_v40 = vrot.slane %v1750_v29, 4  ;;  %v15791_v52 = vrot.slane %v1770_v10, 5  ;;  %v1562_v22 = vld [vmem:[#allocation2 + $0x84] sm:$0xf] }
  0xc1   : > { %v1648_v55 = vrot.slane %v1647_v34, 4  ;;  %v1696_v34 = vrot.slane %v1695_v17, 4  ;;  %v1776_v53 = vrot.slane %v1774_v32, 4  ;;  %v1785_v54 = vshrl.u32 %v1556_v42, 16  ;;  %v1563_v10 = vld [vmem:[#allocation2 + $0x88] sm:$0xf] }
  0xc2   : > { %v1788_v50 = vshll.u32 %v1556_v42, 16  ;;  %v1753_v3 = vor.u32 %v1752_v40, %v15789_v45  ;;  %v1735_v4 = vsel %vm15732_vm0, %v1730_v44, %v1734_v38  ;;  %v1836_v38 = vshll.u32 %v1562_v22, 16 }
  0xc3   : > { %v1653_v13 = vsel %vm15732_vm0, %v1648_v55, %v15744_v19  ;;  %v1740_v19 = vshll.u32 %v1550_v8, 16  ;;  %v1777_v7 = vor.u32 %v1776_v53, %v15791_v52  ;;  %v1780_v8 = vshll.u32 %v1555_v57, 16 }
  0xc4   : > { %v1787_v15 = vrot.slane %v1785_v54, 4  ;;  %v1754_v24 = vrot.slane %v1753_v3, 4  ;;  %v1842_v42 = vshll.u32 %v1563_v10, 16  ;;  %v1838_v57 = vrot.slane %v1836_v38, 5 }
  0xc5   : > { %14112 = vmatmul.mubr.msk.bf16.gmra.mrb[16].mxu0 %vm1334_vm13, %v14948_v47  ;;  %v1684_v47 = vshll.u32 %v1543_v33, 16  ;;  %v12937_v33 = vcombine.low %v1653_v13, %v1663_v14  ;;  %v1742_v41 = vrot.slane %v1740_v19, 5  ;;  %v1778_v19 = vrot.slane %v1777_v7, 4 }
  0xc6   : > { %14115 = vmatprep.mubr.msk.bf16.mxu0 %vm1334_vm13, %v14949_v1  ;;  %v15762_v1 = vrot.slane %v1698_v43, 5  ;;  %v1720_v43 = vrot.slane %v1719_v27, 4  ;;  %v1782_v27 = vrot.slane %v1780_v8, 5  ;;  %v1844_v54 = vrot.slane %v1842_v42, 5  ;;  %v2147_v42 = vld [vmem:[#allocation2 + $0x34] sm:$0xf] }
  0xc7   : > { %v1686_v0 = vrot.slane %v1684_v47, 5  ;;  %v1552_v47 = vld [vmem:[#allocation2 + $0x5c] sm:$0x1]  ;;  %v1743_v2 = vor.u32 %v1742_v41, %v1739_v39  ;;  %vm2207_vm2 = vcmask 1046532   ;;  %vm1504_vm7 = vcmask 261120  }
  0xc8   : > { %v1705_v18 = vor.u32 %v1704_v61, %v15762_v1  ;;  %v1701_v55 = vsel %vm15732_vm0, %v1696_v34, %v15762_v1  ;;  %v1794_v61 = vshll.u32 %v1557_v46, 16  ;;  %v1756_v1 = vshll.u32 %v1552_v47, 16  ;;  %vm15834_vm5 = vmor %vm2206_vm1, %vm2207_vm2 }
  0xc9   : > { %v1687_v9 = vsel %vm15732_vm0, %v1682_v63, %v1686_v0  ;;  %v1560_v63 = vld [vmem:[#allocation2 + $0x7c] sm:$0xf]  ;;  %v1725_v0 = vsel %vm15732_vm0, %v1720_v43, %v15764_v6  ;;  %v1846_v43 = vshrl.u32 %v1563_v10, 16  ;;  %v1783_v44 = vsel %vm15732_vm0, %v1778_v19, %v1782_v27  ;;  %v2142_v10 = vld [vmem:[#allocation2 + $0x20] sm:$0x1] }
  0xca   : > { %v1706_v35 = vrot.slane %v1705_v18, 4  ;;  %v12938_v37 = vcombine.low %v1677_v16, %v1687_v9  ;;  %v1818_v13 = vshll.u32 %v1560_v63, 16  ;;  %v1822_v14 = vshrl.u32 %v1560_v63, 16  ;;  %v1558_v9 = vld [vmem:[#allocation2 + $0x74] sm:$0x1] }
  0xcb   : > { %v1790_v16 = vrot.slane %v1788_v50, 5  ;;  %v15807_v6 = vrot.slane %v1794_v61, 5  ;;  %v12940_v20 = vcombine.low %v1725_v0, %v1735_v4  ;;  %v1758_v23 = vrot.slane %v1756_v1, 5  ;;  %v2135_v63 = vld [vmem:[#allocation2 + $0x4] sm:$0xf] }
  0xcc   : > { %v1711_v56 = vsel %vm15732_vm0, %v1706_v35, %v1710_v36  ;;  %v1804_v34 = vshll.u32 %v1558_v9, 16  ;;  %v1561_v35 = vld [vmem:[#allocation2 + $0x80] sm:$0x1]  ;;  %v1848_v50 = vrot.slane %v1846_v43, 4  ;;  %v2141_v9 = vld [vmem:[#allocation2 + $0x1c] sm:$0xf] }
  0xcd   : > { %14116 = vmatmul.mubr.msk.bf16.gmra.mrb[20].mxu0 %vm1334_vm13, %v14950_v30  ;;  %v1761_v30 = vshrl.u32 %v1553_v21, 16  ;;  %v12939_v18 = vcombine.low %v1701_v55, %v1711_v56  ;;  %v1791_v32 = vor.u32 %v1790_v16, %v1787_v15  ;;  %v1759_v39 = vsel %vm15732_vm0, %v1754_v24, %v1758_v23  ;;  %v1564_v55 = vld [vmem:[#allocation2 + $0x8c] sm:$0x1]  ;;  %v2138_v15 = vld [vmem:[#allocation2 + $0x10] sm:$0xf] }
  0xce   : > { %14121 = vmatprep.mubr.msk.bf16.mxu0 %vm1334_vm13, %v12934_v31  ;;  %v1764_v31 = vshll.u32 %v1553_v21, 16  ;;  %v1744_v21 = vrot.slane %v1743_v2, 4  ;;  %v1828_v47 = vshll.u32 %v1561_v35, 16  ;;  %v1849_v1 = vor.u32 %v1848_v50, %v1844_v54 }
  0xcf   : > { %v1763_v49 = vrot.slane %v1761_v30, 4  ;;  %v1820_v30 = vrot.slane %v1818_v13, 5  ;;  %v1852_v4 = vshll.u32 %v1564_v55, 16  ;;  %v2218_v19 = vrot.slane %v2138_v15, 5  ;;  %v2148_v55 = vld [vmem:[#allocation2 + $0x38] sm:$0x1] }
  0xd0   : > { %v1766_v51 = vrot.slane %v1764_v31, 5  ;;  %v1824_v31 = vrot.slane %v1822_v14, 4  ;;  %v1749_v36 = vsel %vm15732_vm0, %v1744_v21, %v15789_v45  ;;  %v1792_v45 = vrot.slane %v1791_v32, 4  ;;  %v2156_v15 = vld [vmem:[#allocation2 + $0x58] sm:$0xf] }
  0xd1   : > { %v12941_v53 = vcombine.low %v1749_v36, %v1759_v39  ;;  %v2220_v35 = vrot.slane %v2218_v19, 4  ;;  %v2228_v39 = vrot.slane %v2142_v10, 5  ;;  %vm5687_vm8 = vcmask 257024  }
  0xd2   : > { %v1767_v5 = vor.u32 %v1766_v51, %v1763_v49  ;;  %v1806_v51 = vrot.slane %v1804_v34, 5  ;;  %v1797_v0 = vsel %vm15732_vm0, %v1792_v45, %v15807_v6  ;;  %v2143_v45 = vld [vmem:[#allocation2 + $0x24] sm:$0xe]  ;;  %vm16714_vm9 = vmand %vm5687_vm8, %vm531_vm4 }
  0xd4   : > { %v1768_v25 = vrot.slane %v1767_v5, 4  ;;  %v2134_v5 = vld [vmem:[#allocation2] sm:$0xe] }
  0xd5   : > { %14122 = vmatmul.mubr.msk.bf16.vlgmr.msra.gmra.mrb[24].mxu0 %vm1334_vm13, %v12935_v62  ;;  %v1798_v62 = vshrl.u32 %v1557_v46, 16  ;;  %v1825_v46 = vor.u32 %v1824_v31, %v1820_v30  ;;  %v12958_v14 = vrot.slane %v2134_v5, 9  ;;  %v2140_v31 = vld [vmem:[#allocation2 + $0x18] sm:$0xe] }
  0xd6   : > { %14146 = vmatpush3.bf16.msra.mxu0 %v2368_v11  ;;  %14125 = vmatprep.mubr.msk.bf16.mxu0 %vm1334_vm13, %v12936_v12  ;;  %v1809_v11 = vshrl.u32 %v1559_v58, 16  ;;  %v1812_v12 = vshll.u32 %v1559_v58, 16  ;;  %v1773_v41 = vsel %vm15732_vm0, %v1768_v25, %v15791_v52 }
  0xd7   : > { %14854 = vmatprep.subr.msk.bf16.mxu0 %vm1371_vm12, %v15782_v26  ;;  %v1800_v17 = vrot.slane %v1798_v62, 4  ;;  %v12942_v58 = vcombine.low %v1773_v41, %v1783_v44  ;;  %v1826_v52 = vrot.slane %v1825_v46, 4  ;;  %v1830_v62 = vrot.slane %v1828_v47, 5  ;;  %v2144_v41 = vld [vmem:[#allocation2 + $0x28] sm:$0xf] }
  0xd8   : > { %v1811_v28 = vrot.slane %v1809_v11, 4  ;;  %v1814_v29 = vrot.slane %v1812_v12, 5  ;;  %v2211_v11 = vrot.slane %v2135_v63, 5  ;;  %v2136_v12 = vld [vmem:[#allocation2 + $0x8] sm:$0x1]  ;;  %v2242_v63 = vrot.slane %v2148_v55, 5 }
  0xd9   : > { %v1831_v8 = vsel %vm15732_vm0, %v1826_v52, %v1830_v62  ;;  %v2214_v23 = vrot.slane %v2136_v12, 5  ;;  %v2152_v12 = vld [vmem:[#allocation2 + $0x48] sm:$0xe]  ;;  %v2166_v55 = vld [vmem:[#allocation2 + $0x80] sm:$0x1] }
  0xda   : > { %v1815_v40 = vor.u32 %v1814_v29, %v1811_v28  ;;  %v2213_v21 = vrot.slane %v2211_v11, 4  ;;  %v2212_v27 = vsel %vm15834_vm5, %v12958_v14, %v2211_v11  ;;  %v2137_v28 = vld [vmem:[#allocation2 + $0xc] sm:$0xe]  ;;  %v2139_v29 = vld [vmem:[#allocation2 + $0x14] sm:$0x1] }
  0xdb   : > { %v12959_v34 = vrot.slane %v2137_v28, 9  ;;  %v2221_v36 = vrot.slane %v2139_v29, 5  ;;  %v2151_v11 = vld [vmem:[#allocation2 + $0x44] sm:$0x1]  ;;  %v2154_v14 = vld [vmem:[#allocation2 + $0x50] sm:$0x1] }
  0xdc   : > { %v1816_v61 = vrot.slane %v1815_v40, 4  ;;  %v2232_v40 = vrot.slane %v2144_v41, 5  ;;  %v2158_v28 = vld [vmem:[#allocation2 + $0x60] sm:$0xe]  ;;  %v2161_v41 = vld [vmem:[#allocation2 + $0x6c] sm:$0xe] }
  0xdd   : > { %14126 = vmatmul.mubr.msk.bf16.gmra.mrb[28].mxu0 %vm1334_vm13, %v12937_v33  ;;  %v1801_v33 = vor.u32 %v1800_v17, %v15807_v6  ;;  %v1850_v17 = vrot.slane %v1849_v1, 4  ;;  %v2219_v43 = vsel %vm15834_vm5, %v12959_v34, %v2218_v19  ;;  %v2222_v44 = vsel %vm15834_vm5, %v2220_v35, %v2221_v36  ;;  %v2155_v19 = vld [vmem:[#allocation2 + $0x54] sm:$0xe]  ;;  %v2165_v35 = vld [vmem:[#allocation2 + $0x7c] sm:$0xf] }
  0xde   : > { %14129 = vmatprep.mubr.msk.bf16.mxu0 %vm1334_vm13, %v12938_v37  ;;  %v1833_v37 = vshrl.u32 %v1562_v22, 16  ;;  %v1821_v7 = vsel %vm15732_vm0, %v1816_v61, %v1820_v30  ;;  %v2215_v22 = vsel %vm15834_vm5, %v2213_v21, %v2214_v23  ;;  %v2225_v30 = vrot.slane %v2141_v9, 5 }
  0xdf   : > { %v1802_v49 = vrot.slane %v1801_v33, 4  ;;  %v12944_v16 = vcombine.low %v1821_v7, %v1831_v8  ;;  %v12971_v33 = vcombine.low %v2212_v27, %v2215_v22  ;;  %v2695_v61 = vsel %vm1371_vm12, %v15782_v26, 0  ;;  %v2157_v22 = vld [vmem:[#allocation2 + $0x5c] sm:$0x1] }
  0xe0   : > { %v1835_v56 = vrot.slane %v1833_v37, 4  ;;  %v12960_v37 = vrot.slane %v2140_v31, 9  ;;  %v2227_v38 = vrot.slane %v2225_v30, 4  ;;  %v2249_v23 = vrot.slane %v2151_v11, 5  ;;  %v2162_v31 = vld [vmem:[#allocation2 + $0x70] sm:$0xf] }
  0xe1   : > { %v1807_v2 = vsel %vm15732_vm0, %v1802_v49, %v1806_v51  ;;  %v2145_v49 = vld [vmem:[#allocation2 + $0x2c] sm:$0x1]  ;;  %v2239_v51 = vrot.slane %v2147_v42, 5  ;;  %v12964_v9 = vrot.slane %v2152_v12, 9  ;;  %v2260_v27 = vrot.slane %v2156_v15, 5 }
  0xe2   : > { %v1839_v3 = vor.u32 %v1838_v57, %v1835_v56  ;;  %v12943_v13 = vcombine.low %v1797_v0, %v1807_v2  ;;  %v2226_v46 = vsel %vm15834_vm5, %v12960_v37, %v2225_v30  ;;  %v2229_v47 = vsel %vm15834_vm5, %v2227_v38, %v2228_v39  ;;  %v2150_v0 = vld [vmem:[#allocation2 + $0x40] sm:$0xf]  ;;  %v2153_v2 = vld [vmem:[#allocation2 + $0x4c] sm:$0xf]  ;;  %v2160_v30 = vld [vmem:[#allocation2 + $0x68] sm:$0x1] }
  0xe3   : > { %v12972_v56 = vcombine.low %v2219_v43, %v2222_v44  ;;  %v12973_v57 = vcombine.low %v2226_v46, %v2229_v47  ;;  %v2235_v50 = vrot.slane %v2145_v49, 5  ;;  %v2241_v62 = vrot.slane %v2239_v51, 4  ;;  %v2163_v44 = vld [vmem:[#allocation2 + $0x74] sm:$0x1]  ;;  %v2164_v47 = vld [vmem:[#allocation2 + $0x78] sm:$0xe] }
  0xe4   : > { %v1840_v6 = vrot.slane %v1839_v3, 4  ;;  %v15863_v3 = vld [vmem:[%s18186_s3 + $0x8] sm:$0x3]  ;;  %v2246_v5 = vrot.slane %v2150_v0, 5  ;;  %v12965_v34 = vrot.slane %v2155_v19, 9  ;;  %v2262_v37 = vrot.slane %v2260_v27, 4 }
  0xe5   : > { %14130 = vmatmul.mubr.msk.bf16.gmra.mrb[32].mxu0 %vm1334_vm13, %v12939_v18  ;;  %v1854_v18 = vrot.slane %v1852_v4, 5  ;;  %v2149_v4 = vld [vmem:[#allocation2 + $0x3c] sm:$0xe]  ;;  %v2243_v8 = vsel %vm15834_vm5, %v2241_v62, %v2242_v63  ;;  %v2263_v38 = vrot.slane %v2157_v22, 5  ;;  %v12966_v39 = vrot.slane %v2158_v28, 9 }
  0xe6   : > { %14133 = vmatprep.mubr.msk.bf16.mxu0 %vm1334_vm13, %v12940_v20  ;;  %v1845_v24 = vsel %vm15732_vm0, %v1840_v6, %v1844_v54  ;;  %v2234_v54 = vrot.slane %v2232_v40, 4  ;;  %v12963_v6 = vrot.slane %v2149_v4, 9  ;;  %v2248_v21 = vrot.slane %v2246_v5, 4  ;;  %v15887_v49 = vld [vmem:[#allocation2 + $0x88] sm:$0xf] }
  0xe7   : > { %v1855_v25 = vsel %vm15732_vm0, %v1850_v17, %v1854_v18  ;;  %v2159_v17 = vld [vmem:[#allocation2 + $0x64] sm:$0xf]  ;;  %v2270_v43 = vrot.slane %v2160_v30, 5  ;;  %v12968_v0 = vrot.slane %v2164_v47, 9  ;;  %v2284_v4 = vrot.slane %v2166_v55, 5 }
  0xe8   : > { %v12945_v32 = vcombine.low %v1845_v24, %v1855_v25  ;;  %v2236_v26 = vsel %vm15834_vm5, %v2234_v54, %v2235_v50  ;;  %v2256_v25 = vrot.slane %v2154_v14, 5  ;;  %v2267_v29 = vrot.slane %v2159_v17, 5  ;;  %v2905_v28 = vld [vmem:[#allocation2 + $0x28] sm:$0xf] }
  0xe9   : > { %v2247_v10 = vsel %vm15834_vm5, %v12963_v6, %v2246_v5  ;;  %v12967_v54 = vrot.slane %v2161_v41, 9  ;;  %v2277_v50 = vrot.slane %v2163_v44, 5  ;;  %v2902_v6 = vld [vmem:[#allocation2 + $0x1c] sm:$0xf]  ;;  %v15935_v55 = vld [vmem:[%s18186_s3 + $0xa] sm:$0x3] }
  0xea   : > { %v2269_v42 = vrot.slane %v2267_v29, 4 }
  0xec   : > { %v2271_v62 = vsel %vm15834_vm5, %v2269_v42, %v2270_v43 }
  0xed   : > { %14134 = vmatmul.mubr.msk.bf16.gmra.mrb[36].mxu0 %vm1334_vm13, %v12941_v53  ;;  %v2146_v53 = vld [vmem:[#allocation2 + $0x30] sm:$0xe] }
  0xee   : > { %14137 = vmatprep.mubr.msk.bf16.mxu0 %vm1334_vm13, %v12942_v58  ;;  %v12961_v58 = vrot.slane %v2143_v45, 9  ;;  %v12962_v52 = vrot.slane %v2146_v53, 9  ;;  %v2281_v45 = vrot.slane %v2165_v35, 5  ;;  %v2261_v53 = vsel %vm15834_vm5, %v12965_v34, %v2260_v27 }
  0xf0   : > { %v2233_v1 = vsel %vm15834_vm5, %v12961_v58, %v2232_v40  ;;  %v2240_v7 = vsel %vm15834_vm5, %v12962_v52, %v2239_v51  ;;  %v2274_v40 = vrot.slane %v2162_v31, 5  ;;  %v2268_v58 = vsel %vm15834_vm5, %v12966_v39, %v2267_v29  ;;  %v15897_v52 = vld [vmem:[#allocation2 + $0x8c] sm:$0x1]  ;;  %v2907_v29 = vld [vmem:[#allocation2 + $0x30] sm:$0xf] }
  0xf1   : > { %v12975_v18 = vcombine.low %v2240_v7, %v2243_v8  ;;  %v2291_v11 = vrot.slane %v15897_v52, 5  ;;  %v12979_v17 = vcombine.low %v2268_v58, %v2271_v62  ;;  %v2996_v39 = vshrl.u32 %v2905_v28, 16  ;;  %v2906_v58 = vld [vmem:[#allocation2 + $0x2c] sm:$0x1]  ;;  %v2909_v62 = vld [vmem:[#allocation2 + $0x38] sm:$0x1] }
  0xf2   : > { %v2276_v63 = vrot.slane %v2274_v40, 4  ;;  %v3007_v41 = vshrl.u32 %v2907_v29, 16  ;;  %v3010_v42 = vshll.u32 %v2907_v29, 16  ;;  %v2914_v29 = vld [vmem:[#allocation2 + $0x4c] sm:$0xf] }
  0xf3   : > { %v2998_v52 = vrot.slane %v2996_v39, 4 }
  0xf5   : > { %14138 = vmatmul.mubr.msk.bf16.gmra.mrb[40].mxu0 %vm1334_vm13, %v12943_v13  ;;  %v2253_v13 = vrot.slane %v2153_v2, 5  ;;  %v2288_v2 = vrot.slane %v15887_v49, 5 }
  0xf6   : > { %14141 = vmatprep.mubr.msk.bf16.mxu0 %vm1334_vm13, %v12944_v16  ;;  %v12974_v16 = vcombine.low %v2233_v1, %v2236_v26  ;;  %v2899_v1 = vld [vmem:[#allocation2 + $0x10] sm:$0xf]  ;;  %v2283_v26 = vrot.slane %v2281_v45, 4 }
  0xf7   : > { %v2255_v24 = vrot.slane %v2253_v13, 4  ;;  %v2944_v14 = vshll.u32 %v2899_v1, 16  ;;  %v2948_v15 = vshrl.u32 %v2899_v1, 16 }
  0xf8   : > { %v15924_v19 = vsel %vm15834_vm5, %v2283_v26, %v2284_v4 }
  0xf9   : > { %v2257_v36 = vsel %vm15834_vm5, %v2255_v24, %v2256_v25  ;;  %v2904_v24 = vld [vmem:[#allocation2 + $0x24] sm:$0xf]  ;;  %v2278_v25 = vsel %vm15834_vm5, %v2276_v63, %v2277_v50  ;;  %v2950_v34 = vrot.slane %v2948_v15, 4  ;;  %v3009_v63 = vrot.slane %v3007_v41, 4  ;;  %v2919_v41 = vld [vmem:[#allocation2 + $0x60] sm:$0xf] }
  0xfa   : > { %v2983_v35 = vshrl.u32 %v2904_v24, 16 }
  0xfd   : > { %14142 = vmatmul.mubr.msk.bf16.gmra.mrb[44].mxu0 %vm1334_vm13, %v12945_v32  ;;  %v2250_v32 = vsel %vm15834_vm5, %v2248_v21, %v2249_v23  ;;  %v2290_v21 = vrot.slane %v2288_v2, 4  ;;  %v15918_v23 = vsel %vm1371_vm12, %v15863_v3, 0 }
  0xfe   : > { %14147 = vmatprep.mubr.msk.bf16.mxu0 %vm1334_vm13, %v12971_v33  ;;  %v2254_v33 = vsel %vm15834_vm5, %v12964_v9, %v2253_v13  ;;  %v12976_v46 = vcombine.low %v2247_v10, %v2250_v32  ;;  %v15908_v13 = vsel %vm15834_vm5, %v12967_v54, %v2274_v40  ;;  %v2900_v9 = vld [vmem:[#allocation2 + $0x14] sm:$0x1]  ;;  %v2968_v10 = vshll.u32 %v2902_v6, 16 }
  0xff   : > { %v12977_v51 = vcombine.low %v2254_v33, %v2257_v36  ;;  %v2972_v32 = vshrl.u32 %v2902_v6, 16  ;;  %v2908_v33 = vld [vmem:[#allocation2 + $0x34] sm:$0xf]  ;;  %v2986_v36 = vshll.u32 %v2904_v24, 16  ;;  %v2954_v44 = vshll.u32 %v2900_v9, 16 }
 0x100   : > { %v3016_v40 = vshll.u32 %v2908_v33, 16  ;;  %v2985_v54 = vrot.slane %v2983_v35, 4  ;;  %v12980_v1 = vcombine.low %v15908_v13, %v2278_v25  ;;  %v15956_v13 = vsel %vm1371_vm12, %v15935_v55, 0  ;;  %v2911_v25 = vld [vmem:[#allocation2 + $0x40] sm:$0xf] }
 0x101   : > { %v2988_v50 = vrot.slane %v2986_v36, 5  ;;  %v15952_v6 = vrot.slane %v2954_v44, 5  ;;  %v3040_v39 = vshll.u32 %v2911_v25, 16 }
 0x102   : > { %v15943_v4 = vrot.slane %v3016_v40, 5  ;;  %v3044_v40 = vshrl.u32 %v2911_v25, 16 }
 0x105   : > { %14148 = vmatmul.mubr.msk.bf16.vlgmr.msra.gmra.mrb[48].mxu0 %vm1334_vm13, %v12972_v56  ;;  %v2898_v56 = vld [vmem:[#allocation2 + $0xc] sm:$0xf] }
 0x106   : > { %14172 = vmatpush3.bf16.msra.mxu0 %v2695_v61  ;;  %14151 = vmatprep.mubr.msk.bf16.mxu0 %vm1334_vm13, %v12973_v57  ;;  %v2264_v57 = vsel %vm15834_vm5, %v2262_v37, %v2263_v38  ;;  %v15895_v61 = vld [vmem:[#allocation2 + $0x84] sm:$0xe]  ;;  %v2935_v5 = vshrl.u32 %v2898_v56, 16  ;;  %v2938_v7 = vshll.u32 %v2898_v56, 16  ;;  %v2903_v37 = vld [vmem:[#allocation2 + $0x20] sm:$0x1] }
 0x107   : > { %14855 = vmatprep.subr.msk.bf16.mxu0 %vm1371_vm12, %v15863_v3  ;;  %v12969_v8 = vrot.slane %v15895_v61, 9  ;;  %v12978_v12 = vcombine.low %v2261_v53, %v2264_v57  ;;  %v15926_v3 = vrot.slane %v2944_v14, 5  ;;  %v2992_v38 = vshll.u32 %v2905_v28, 16  ;;  %v2913_v28 = vld [vmem:[#allocation2 + $0x48] sm:$0xf] }
 0x108   : > { %v2937_v27 = vrot.slane %v2935_v5, 4  ;;  %v2940_v22 = vrot.slane %v2938_v7, 5  ;;  %v2974_v53 = vrot.slane %v2972_v32, 4  ;;  %v2978_v57 = vshll.u32 %v2903_v37, 16  ;;  %v2916_v32 = vld [vmem:[#allocation2 + $0x54] sm:$0xf] }
 0x109   : > { %v2951_v56 = vor.u32 %v2950_v34, %v15926_v3  ;;  %v15938_v61 = vrot.slane %v2992_v38, 5  ;;  %v2289_v7 = vsel %vm15834_vm5, %v12969_v8, %v2288_v2  ;;  %v3026_v8 = vshll.u32 %v2909_v62, 16  ;;  %v14951_v34 = vld [vmem:[#allocation2 + $0xc] sm:$0xff]   ;;  %v15980_v37 = vld [vmem:[#allocation2 + $0x44] sm:$0x1] }
 0x10a   : > { %v2941_v43 = vor.u32 %v2940_v22, %v2937_v27  ;;  %v2920_v62 = vld [vmem:[#allocation2 + $0x64] sm:$0xf] }
 0x10b   : > { %v15960_v49 = vrot.slane %v2951_v56, 4  ;;  %v2999_v2 = vor.u32 %v2998_v52, %v15938_v61  ;;  %v15978_v36 = vrot.slane %v3026_v8, 5  ;;  %v3079_v56 = vshrl.u32 %v2916_v32, 16 }
 0x10c   : > { %v15958_v9 = vrot.slane %v2941_v43, 4  ;;  %v3112_v8 = vshll.u32 %v2920_v62, 16 }
 0x10d   : > { %14152 = vmatmul.mubr.msk.bf16.gmra.mrb[52].mxu0 %vm1334_vm13, %v12974_v16  ;;  %v2901_v16 = vld [vmem:[#allocation2 + $0x18] sm:$0xf]  ;;  %v15976_v35 = vrot.slane %v2999_v2, 4 }
 0x10e   : > { %14155 = vmatprep.mubr.msk.bf16.mxu0 %vm1334_vm13, %v12975_v18  ;;  %v15912_v18 = vsel %vm15834_vm5, %v12968_v0, %v2281_v45  ;;  %v2959_v30 = vshrl.u32 %v2901_v16, 16  ;;  %v2962_v31 = vshll.u32 %v2901_v16, 16  ;;  %v3012_v0 = vrot.slane %v3010_v42, 5  ;;  %v2910_v16 = vld [vmem:[#allocation2 + $0x3c] sm:$0xf] }
 0x10f   : > { %v12981_v26 = vcombine.low %v15912_v18, %v15924_v19  ;;  %v3002_v18 = vshll.u32 %v2906_v58, 16  ;;  %v3031_v19 = vshrl.u32 %v2910_v16, 16  ;;  %v3034_v38 = vshll.u32 %v2910_v16, 16  ;;  %v14952_v16 = vld [vmem:[#allocation2 + $0x18] sm:$0xff]  }
 0x110   : > { %v2961_v47 = vrot.slane %v2959_v30, 4  ;;  %v2964_v45 = vrot.slane %v2962_v31, 5  ;;  %v2947_v25 = vsel %vm15732_vm0, %v15958_v9, %v15926_v3  ;;  %v14956_v3 = vld [vmem:[#allocation2 + $0x48] sm:$0xff]   ;;  %v14957_v9 = vld [vmem:[#allocation2 + $0x54] sm:$0xff]  }
 0x111   : > { %v3033_v44 = vrot.slane %v3031_v19, 4  ;;  %v3036_v58 = vrot.slane %v3034_v38, 5 }
 0x112   : > { %v2965_v14 = vor.u32 %v2964_v45, %v2961_v47  ;;  %v3058_v47 = vshll.u32 %v2913_v28, 16  ;;  %v3064_v45 = vshll.u32 %v2914_v29, 16 }
 0x113   : > { %v3037_v19 = vor.u32 %v3036_v58, %v3033_v44  ;;  %v2923_v58 = vld [vmem:[#allocation2 + $0x70] sm:$0xf] }
 0x114   : > { %v15968_v27 = vrot.slane %v2965_v14, 4  ;;  %v15991_v14 = vrot.slane %v3064_v45, 5  ;;  %v16012_v45 = vrot.slane %v3112_v8, 5 }
 0x115   : > { %14156 = vmatmul.mubr.msk.bf16.gmra.mrb[56].mxu0 %vm1334_vm13, %v12976_v46  ;;  %v3020_v46 = vshrl.u32 %v2908_v33, 16  ;;  %v2917_v33 = vld [vmem:[#allocation2 + $0x58] sm:$0xf] }
 0x116   : > { %14159 = vmatprep.mubr.msk.bf16.mxu0 %vm1334_vm13, %v12977_v51  ;;  %v15930_v51 = vrot.slane %v2968_v10, 5  ;;  %v15974_v10 = vrot.slane %v3002_v18, 5  ;;  %v3092_v52 = vshrl.u32 %v2917_v33, 16  ;;  %v3081_v18 = vrot.slane %v3079_v56, 4 }
 0x117   : > { %v3022_v5 = vrot.slane %v3020_v46, 4  ;;  %v3055_v46 = vshrl.u32 %v2913_v28, 16 }
 0x118   : > { %v2975_v15 = vor.u32 %v2974_v53, %v15930_v51  ;;  %v3068_v53 = vshrl.u32 %v2914_v29, 16  ;;  %v3094_v29 = vrot.slane %v3092_v52, 4  ;;  %v2971_v44 = vsel %vm15732_vm0, %v15968_v27, %v15930_v51 }
 0x119   : > { %v3023_v24 = vor.u32 %v3022_v5, %v15943_v4  ;;  %v2915_v5 = vld [vmem:[#allocation2 + $0x50] sm:$0x1] }
 0x11a   : > { %v15970_v22 = vrot.slane %v2975_v15, 4  ;;  %v3070_v15 = vrot.slane %v3068_v53, 4 }
 0x11b   : > { %v15984_v43 = vrot.slane %v3023_v24, 4  ;;  %v2922_v24 = vld [vmem:[#allocation2 + $0x6c] sm:$0xf] }
 0x11c   : > { %v3071_v56 = vor.u32 %v3070_v15, %v15991_v14 }
 0x11d   : > { %14160 = vmatmul.mubr.msk.bf16.gmra.mrb[60].mxu0 %vm1334_vm13, %v12978_v12  ;;  %v2292_v12 = vsel %vm15834_vm5, %v2290_v21, %v2291_v11  ;;  %v15964_v11 = vrot.slane %v2978_v57, 5  ;;  %v3013_v21 = vor.u32 %v3012_v0, %v3009_v63  ;;  %v3082_v57 = vshll.u32 %v2916_v32, 16 }
 0x11e   : > { %14163 = vmatprep.mubr.msk.bf16.mxu0 %vm1334_vm13, %v12979_v17  ;;  %v2989_v17 = vor.u32 %v2988_v50, %v2985_v54  ;;  %v12982_v30 = vcombine.low %v2289_v7, %v2292_v12  ;;  %v15986_v54 = vrot.slane %v3040_v39, 5  ;;  %v3088_v50 = vshll.u32 %v2917_v33, 16 }
 0x11f   : > { %v15982_v42 = vrot.slane %v3013_v21, 4  ;;  %v3046_v63 = vrot.slane %v3044_v40, 4  ;;  %v3050_v0 = vshll.u32 %v15980_v37, 16  ;;  %v3057_v7 = vrot.slane %v3055_v46, 4 }
 0x120   : > { %v15972_v31 = vrot.slane %v2989_v17, 4  ;;  %v3060_v12 = vrot.slane %v3058_v47, 5  ;;  %v2918_v17 = vld [vmem:[#allocation2 + $0x5c] sm:$0x1]  ;;  %v3084_v2 = vrot.slane %v3082_v57, 5  ;;  %v3116_v21 = vshrl.u32 %v2920_v62, 16 }
 0x121   : > { %v15997_v28 = vrot.slane %v3088_v50, 5  ;;  %v3047_v32 = vor.u32 %v3046_v63, %v15986_v54  ;;  %v3074_v33 = vshll.u32 %v2915_v5, 16  ;;  %v2957_v39 = vsel %vm15732_vm0, %v15960_v49, %v15952_v6 }
 0x122   : > { %v3127_v40 = vshrl.u32 %v2922_v24, 16  ;;  %v3130_v46 = vshll.u32 %v2922_v24, 16  ;;  %v2981_v47 = vsel %vm15732_vm0, %v15970_v22, %v15964_v11  ;;  %v3118_v53 = vrot.slane %v3116_v21, 4  ;;  %v2925_v21 = vld [vmem:[#allocation2 + $0x78] sm:$0xf]  ;;  %v14955_v24 = vld [vmem:[#allocation2 + $0x3c] sm:$0xff]  }
 0x123   : > { %v3085_v57 = vor.u32 %v3084_v2, %v3081_v18  ;;  %v3095_v6 = vor.u32 %v3094_v29, %v15997_v28  ;;  %v3098_v49 = vshll.u32 %v2918_v17, 16  ;;  %v3038_v50 = vrot.slane %v3037_v19, 4  ;;  %v2926_v19 = vld [vmem:[#allocation2 + $0x7c] sm:$0xf] }
 0x124   : > { %v3048_v52 = vrot.slane %v3047_v32, 4  ;;  %v3052_v51 = vrot.slane %v3050_v0, 5  ;;  %v3076_v27 = vrot.slane %v3074_v33, 5  ;;  %v3129_v62 = vrot.slane %v3127_v40, 4 }
 0x125   : > { %14164 = vmatmul.mubr.msk.bf16.gmra.mrb[64].mxu0 %vm1334_vm13, %v12980_v1  ;;  %v3103_v1 = vshrl.u32 %v2919_v41, 16  ;;  %v3132_v63 = vrot.slane %v3130_v46, 5  ;;  %v3119_v5 = vor.u32 %v3118_v53, %v16012_v45  ;;  %v3072_v15 = vrot.slane %v3071_v56, 4 }
 0x126   : > { %14167 = vmatprep.mubr.msk.bf16.mxu0 %vm1334_vm13, %v12981_v26  ;;  %v3106_v26 = vshll.u32 %v2919_v41, 16  ;;  %v3061_v41 = vor.u32 %v3060_v12, %v3057_v7  ;;  %v3136_v7 = vshll.u32 %v2923_v58, 16  ;;  %v3140_v12 = vshrl.u32 %v2923_v58, 16 }
 0x127   : > { %v3105_v37 = vrot.slane %v3103_v1, 4  ;;  %v14954_v1 = vld [vmem:[#allocation2 + $0x30] sm:$0xff]   ;;  %v3086_v0 = vrot.slane %v3085_v57, 4  ;;  %v3100_v17 = vrot.slane %v3098_v49, 5  ;;  %v2995_v18 = vsel %vm15732_vm0, %v15972_v31, %v15938_v61 }
 0x128   : > { %v3108_v38 = vrot.slane %v3106_v26, 5  ;;  %v3062_v11 = vrot.slane %v3061_v41, 4  ;;  %v3019_v2 = vsel %vm15732_vm0, %v15982_v42, %v15943_v4  ;;  %v3029_v8 = vsel %vm15732_vm0, %v15984_v43, %v15978_v36 }
 0x129   : > { %v3043_v61 = vsel %vm15732_vm0, %v3038_v50, %v15986_v54  ;;  %v3053_v31 = vsel %vm15732_vm0, %v3048_v52, %v3052_v51  ;;  %v16043_v4 = vrot.slane %v3136_v7, 5  ;;  %v3142_v42 = vrot.slane %v3140_v12, 4  ;;  %v2928_v52 = vld [vmem:[#allocation2 + $0x84] sm:$0xf] }
 0x12a   : > { %v3109_v26 = vor.u32 %v3108_v38, %v3105_v37  ;;  %v3067_v36 = vsel %vm15732_vm0, %v3062_v11, %v15991_v14  ;;  %v3077_v43 = vsel %vm15732_vm0, %v3072_v15, %v3076_v27  ;;  %v3091_v54 = vsel %vm15732_vm0, %v3086_v0, %v15997_v28  ;;  %v4264_v12 = vld [vmem:[#allocation2 + $0x24] sm:$0xf] }
 0x12b   : > { %v3154_v37 = vshll.u32 %v2925_v21, 16  ;;  %v3160_v38 = vshll.u32 %v2926_v19, 16  ;;  %v16062_v14 = vcombine.low %v2947_v25, %v2957_v39  ;;  %v16064_v41 = vcombine.low %v2971_v44, %v2981_v47 }
 0x12c   : > { %v3110_v29 = vrot.slane %v3109_v26, 4  ;;  %v3164_v40 = vshrl.u32 %v2926_v19, 16  ;;  %v3143_v57 = vor.u32 %v3142_v42, %v16043_v4  ;;  %v16076_v25 = vcombine.low %v3019_v2, %v3029_v8  ;;  %v4266_v42 = vld [vmem:[#allocation2 + $0x2c] sm:$0x1] }
 0x12d   : > { %14168 = vmatmul.mubr.msk.bf16.gmra.mrb[68].mxu0 %vm1334_vm13, %v12982_v30  ;;  %v14953_v30 = vld [vmem:[#allocation2 + $0x24] sm:$0xff]   ;;  %v16078_v39 = vcombine.low %v3043_v61, %v3053_v31  ;;  %v16080_v44 = vcombine.low %v3067_v36, %v3077_v43  ;;  %v16090_v50 = vrot.slane %v3160_v38, 5  ;;  %v3175_v15 = vshrl.u32 %v2928_v52, 16  ;;  %v4263_v31 = vld [vmem:[#allocation2 + $0x20] sm:$0x1] }
 0x12e   : > { %14173 = vmatprep.mubr.msk.bf16.mxu0 %vm1334_vm13, %v14951_v34  ;;  %v2921_v34 = vld [vmem:[#allocation2 + $0x68] sm:$0x1]  ;;  %v3115_v53 = vsel %vm15732_vm0, %v3110_v29, %v16012_v45  ;;  %v16088_v45 = vrot.slane %v3154_v37, 5  ;;  %v16098_v11 = vrot.slane %v3164_v40, 4  ;;  %v3178_v61 = vshll.u32 %v2928_v52, 16  ;;  %v14959_v37 = vld [vmem:[#allocation2 + $0x6c] sm:$0xff]  }
 0x12f   : > { %v3122_v22 = vshll.u32 %v2921_v34, 16  ;;  %v3151_v34 = vshrl.u32 %v2925_v21, 16 }
 0x131   : > { %v16086_v58 = vrot.slane %v3151_v34, 4  ;;  %v14958_v34 = vld [vmem:[#allocation2 + $0x60] sm:$0xff]  }
 0x135   : > { %14174 = vmatmul.mubr.msk.bf16.vlgmr.msra.gmra.mrb[72].mxu0 %vm1334_vm13, %v14952_v16  ;;  %v3096_v16 = vrot.slane %v3095_v6, 4  ;;  %v2927_v6 = vld [vmem:[#allocation2 + $0x80] sm:$0x1] }
 0x136   : > { %14198 = vmatpush3.bf16.msra.mxu0 %v15918_v23  ;;  %14177 = vmatprep.mubr.msk.bf16.mxu0 %vm1334_vm13, %v14953_v30  ;;  %v2924_v23 = vld [vmem:[#allocation2 + $0x74] sm:$0x1]  ;;  %v3120_v30 = vrot.slane %v3119_v5, 4 }
 0x137   : > { %14856 = vmatprep.subr.msk.bf16.mxu0 %vm1371_vm12, %v15935_v55  ;;  %v3005_v55 = vsel %vm15732_vm0, %v15976_v35, %v15974_v10  ;;  %v3124_v10 = vrot.slane %v3122_v22, 5  ;;  %v3133_v35 = vor.u32 %v3132_v63, %v3129_v62  ;;  %v3101_v32 = vsel %vm15732_vm0, %v3096_v16, %v3100_v17  ;;  %v4261_v62 = vld [vmem:[#allocation2 + $0x18] sm:$0xf]  ;;  %v4262_v63 = vld [vmem:[#allocation2 + $0x1c] sm:$0xf] }
 0x138   : > { %v3146_v33 = vshll.u32 %v2924_v23, 16  ;;  %v16068_v46 = vcombine.low %v2995_v18, %v3005_v55  ;;  %v16082_v47 = vcombine.low %v3091_v54, %v3101_v32  ;;  %v3170_v22 = vshll.u32 %v2927_v6, 16  ;;  %v4265_v16 = vld [vmem:[#allocation2 + $0x28] sm:$0xf] }
 0x139   : > { %v16066_v28 = vrot.slane %v3133_v35, 4  ;;  %v3125_v56 = vsel %vm15732_vm0, %v3120_v30, %v3124_v10  ;;  %v4298_v26 = vshrl.u32 %v4261_v62, 16  ;;  %v4301_v5 = vshll.u32 %v4261_v62, 16  ;;  %v16103_v18 = vld [vmem:[#allocation2 + $0x88] sm:$0xf] }
 0x13a   : > { %v16084_v49 = vrot.slane %v3146_v33, 5  ;;  %v16092_v51 = vcombine.low %v3115_v53, %v3125_v56  ;;  %v4307_v7 = vshll.u32 %v4262_v63, 16  ;;  %v4311_v0 = vshrl.u32 %v4262_v63, 16 }
 0x13b   : > { %v3139_v27 = vsel %vm15732_vm0, %v16066_v28, %v16043_v4  ;;  %v4322_v17 = vshrl.u32 %v4264_v12, 16  ;;  %v4325_v23 = vshll.u32 %v4264_v12, 16  ;;  %v4300_v55 = vrot.slane %v4298_v26, 4 }
 0x13c   : > { %v4303_v2 = vrot.slane %v4301_v5, 5  ;;  %v4309_v8 = vrot.slane %v4307_v7, 5  ;;  %v4331_v21 = vshll.u32 %v4265_v16, 16  ;;  %v4313_v10 = vrot.slane %v4311_v0, 4  ;;  %v4267_v5 = vld [vmem:[#allocation2 + $0x30] sm:$0xf] }
 0x13d   : > { %14178 = vmatmul.mubr.msk.bf16.gmra.mrb[76].mxu0 %vm1334_vm13, %v14954_v1  ;;  %v16100_v1 = vrot.slane %v3143_v57, 4  ;;  %v4324_v35 = vrot.slane %v4322_v17, 4  ;;  %v16108_v19 = vrot.slane %v3170_v22, 5  ;;  %v4317_v30 = vshll.u32 %v4263_v31, 16  ;;  %v4270_v17 = vld [vmem:[#allocation2 + $0x3c] sm:$0xf] }
 0x13e   : > { %14181 = vmatprep.mubr.msk.bf16.mxu0 %vm1334_vm13, %v14955_v24  ;;  %v3157_v24 = vor.u32 %v16088_v45, %v16086_v58  ;;  %v4304_v29 = vor.u32 %v4303_v2, %v4300_v55  ;;  %v4327_v36 = vrot.slane %v4325_v23, 5  ;;  %v4314_v43 = vor.u32 %v4313_v10, %v4309_v8  ;;  %v4269_v31 = vld [vmem:[#allocation2 + $0x38] sm:$0x1] }
 0x13f   : > { %v4333_v54 = vrot.slane %v4331_v21, 5  ;;  %v4335_v32 = vshrl.u32 %v4265_v16, 16  ;;  %v4341_v33 = vshll.u32 %v4266_v42, 16  ;;  %v3184_v38 = vshll.u32 %v16103_v18, 16  ;;  %v4271_v21 = vld [vmem:[#allocation2 + $0x40] sm:$0xf] }
 0x140   : > { %v4305_v40 = vrot.slane %v4304_v29, 4  ;;  %v4319_v53 = vrot.slane %v4317_v30, 5  ;;  %v4328_v56 = vor.u32 %v4327_v36, %v4324_v35  ;;  %v16111_v57 = vrot.slane %v3175_v15, 4  ;;  %v4268_v15 = vld [vmem:[#allocation2 + $0x34] sm:$0xf] }
 0x141   : > { %v16113_v6 = vrot.slane %v3178_v61, 5  ;;  %v4337_v52 = vrot.slane %v4335_v32, 4  ;;  %v4343_v26 = vrot.slane %v4341_v33, 5  ;;  %v4346_v0 = vshrl.u32 %v4267_v5, 16 }
 0x142   : > { %v4310_v62 = vsel %vm15732_vm0, %v4305_v40, %v4309_v8  ;;  %v4329_v63 = vrot.slane %v4328_v56, 4  ;;  %v4349_v16 = vshll.u32 %v4267_v5, 16  ;;  %v4355_v2 = vshll.u32 %v4268_v15, 16 }
 0x143   : > { %v4338_v12 = vor.u32 %v4337_v52, %v4333_v54  ;;  %v4359_v8 = vshrl.u32 %v4268_v15, 16  ;;  %v4348_v10 = vrot.slane %v4346_v0, 4  ;;  %v4370_v29 = vshrl.u32 %v4270_v17, 16  ;;  %v14961_v52 = vld [vmem:[#allocation2 + $0x84] sm:$0xff]  }
 0x144   : > { %v4334_v55 = vsel %vm15732_vm0, %v4329_v63, %v4333_v54  ;;  %v4351_v35 = vrot.slane %v4349_v16, 5  ;;  %v4357_v30 = vrot.slane %v4355_v2, 5  ;;  %v4365_v36 = vshll.u32 %v4269_v31, 16  ;;  %v4273_v0 = vld [vmem:[#allocation2 + $0x48] sm:$0xf] }
 0x145   : > { %14182 = vmatmul.mubr.msk.bf16.gmra.mrb[80].mxu0 %vm1334_vm13, %v14956_v3  ;;  %v13107_v3 = vld [vmem:[%s18186_s3 + $0xe] sm:$0x3]  ;;  %v4339_v61 = vrot.slane %v4338_v12, 4  ;;  %v4361_v42 = vrot.slane %v4359_v8, 4  ;;  %v4373_v32 = vshll.u32 %v4270_v17, 16  ;;  %v4379_v40 = vshll.u32 %v4271_v21, 16 }
 0x146   : > { %14185 = vmatprep.mubr.msk.bf16.mxu0 %vm1334_vm13, %v14957_v9  ;;  %v4315_v9 = vrot.slane %v4314_v43, 4  ;;  %14858 = vmatprep.subr.msk.bf16.mxu1 %vm1371_vm12, %v13107_v3  ;;  %v4660_v22 = vsel %vm1371_vm12, %v13107_v3, 0  ;;  %v4272_v43 = vld [vmem:[#allocation2 + $0x44] sm:$0x1]  ;;  %v4352_v33 = vor.u32 %v4351_v35, %v4348_v10  ;;  %v4367_v3 = vrot.slane %v4365_v36, 5 }
 0x147   : > { %14276 = vmatpush3.bf16.msra.mxu1 %v4660_v22  ;;  %v4344_v54 = vsel %vm15732_vm0, %v4339_v61, %v4343_v26  ;;  %v4362_v56 = vor.u32 %v4361_v42, %v4357_v30  ;;  %v4383_v63 = vshrl.u32 %v4271_v21, 16  ;;  %v4389_v5 = vshll.u32 %v4272_v43, 16  ;;  %v4274_v16 = vld [vmem:[#allocation2 + $0x4c] sm:$0xf]  ;;  %v4276_v10 = vld [vmem:[#allocation2 + $0x54] sm:$0xf] }
 0x148   : > { %v4320_v7 = vsel %vm15732_vm0, %v4315_v9, %v4319_v53  ;;  %v14960_v53 = vld [vmem:[#allocation2 + $0x78] sm:$0xff]   ;;  %v4375_v9 = vrot.slane %v4373_v32, 5  ;;  %v4353_v22 = vrot.slane %v4352_v33, 4  ;;  %v3188_v12 = vshrl.u32 %v16103_v18, 16  ;;  %v4275_v42 = vld [vmem:[#allocation2 + $0x50] sm:$0x1] }
 0x149   : > { %v13108_v23 = vcombine.low %v4310_v62, %v4320_v7  ;;  %v4381_v62 = vrot.slane %v4379_v40, 5  ;;  %v3167_v7 = vor.u32 %v16098_v11, %v16090_v50  ;;  %v4363_v26 = vrot.slane %v4362_v56, 4 }
 0x14a   : > { %v4358_v17 = vsel %vm15732_vm0, %v4353_v22, %v4357_v30  ;;  %v4394_v2 = vshrl.u32 %v4273_v0, 16  ;;  %v4397_v61 = vshll.u32 %v4273_v0, 16  ;;  %v4403_v31 = vshll.u32 %v4274_v16, 16  ;;  %v4277_v30 = vld [vmem:[#allocation2 + $0x58] sm:$0xf] }
 0x14b   : > { %14277 = vmatprep.mubr.msk.bf16.mxu1 %vm1334_vm13, %v13108_v23  ;;  %v4385_v23 = vrot.slane %v4383_v63, 4  ;;  %v4368_v8 = vsel %vm15732_vm0, %v4363_v26, %v4367_v3  ;;  %v4407_v43 = vshrl.u32 %v4274_v16, 16  ;;  %v4421_v56 = vshll.u32 %v4276_v10, 16  ;;  %v14962_v3 = vld [vmem:[#allocation2 + $0x90] sm:$0xff]   ;;  %v4278_v22 = vld [vmem:[#allocation2 + $0x5c] sm:$0x1] }
 0x14c   : > { %v13110_v35 = vcombine.low %v4358_v17, %v4368_v8  ;;  %v4396_v36 = vrot.slane %v4394_v2, 4  ;;  %v4405_v33 = vrot.slane %v4403_v31, 5  ;;  %v4427_v63 = vshll.u32 %v4277_v30, 16  ;;  %v4279_v16 = vld [vmem:[#allocation2 + $0x60] sm:$0xf] }
 0x14d   : > { %14186 = vmatmul.mubr.msk.bf16.gmra.mrb[84].mxu0 %vm1334_vm13, %v14958_v34  ;;  %v4372_v34 = vrot.slane %v4370_v29, 4  ;;  %v4386_v29 = vor.u32 %v4385_v23, %v4381_v62  ;;  %v4423_v0 = vrot.slane %v4421_v56, 5  ;;  %v16216_v18 = vrot.slane %v3167_v7, 4 }
 0x14e   : > { %14189 = vmatprep.mubr.msk.bf16.mxu0 %vm1334_vm13, %v14959_v37  ;;  %v13109_v37 = vcombine.low %v4334_v55, %v4344_v54  ;;  %v4391_v55 = vrot.slane %v4389_v5, 5  ;;  %v4399_v54 = vrot.slane %v4397_v61, 5  ;;  %v4431_v5 = vshrl.u32 %v4277_v30, 16  ;;  %v4283_v30 = vld [vmem:[#allocation2 + $0x70] sm:$0xf] }
 0x14f   : > { %v4376_v15 = vor.u32 %v4375_v9, %v4372_v34  ;;  %v4413_v34 = vshll.u32 %v4275_v42, 16  ;;  %v4387_v40 = vrot.slane %v4386_v29, 4  ;;  %v4429_v2 = vrot.slane %v4427_v63, 5 }
 0x150   : > { %14278 = vmatmul.mubr.msk.bf16.vlgmr.msra.gmra.mrb[0].mxu1 %vm1334_vm13, %v13109_v37  ;;  %v4418_v37 = vshrl.u32 %v4276_v10, 16  ;;  %v4400_v9 = vor.u32 %v4399_v54, %v4396_v36  ;;  %v4433_v8 = vrot.slane %v4431_v5, 4  ;;  %v4437_v10 = vshll.u32 %v4278_v22, 16 }
 0x151   : > { %v4377_v21 = vrot.slane %v4376_v15, 4  ;;  %14281 = vmatprep.mubr.msk.bf16.mxu1 %vm1334_vm13, %v13110_v35  ;;  %v4392_v26 = vsel %vm15732_vm0, %v4387_v40, %v4391_v55  ;;  %v4442_v35 = vshrl.u32 %v4279_v16, 16  ;;  %v4445_v42 = vshll.u32 %v4279_v16, 16  ;;  %v4281_v40 = vld [vmem:[#allocation2 + $0x68] sm:$0x1] }
 0x152   : > { %v4401_v23 = vrot.slane %v4400_v9, 4  ;;  %v4434_v29 = vor.u32 %v4433_v8, %v4429_v2  ;;  %v4461_v63 = vshll.u32 %v4281_v40, 16  ;;  %v4285_v8 = vld [vmem:[#allocation2 + $0x78] sm:$0xf]  ;;  %v4288_v40 = vld [vmem:[#allocation2 + $0x84] sm:$0xf] }
 0x153   : > { %v4382_v32 = vsel %vm15732_vm0, %v4377_v21, %v4381_v62  ;;  %v4420_v62 = vrot.slane %v4418_v37, 4  ;;  %v4280_v21 = vld [vmem:[#allocation2 + $0x64] sm:$0xf] }
 0x154   : > { %v13111_v17 = vcombine.low %v4382_v32, %v4392_v26  ;;  %v4406_v55 = vsel %vm15732_vm0, %v4401_v23, %v4405_v33  ;;  %v4451_v36 = vshll.u32 %v4280_v21, 16  ;;  %v4435_v56 = vrot.slane %v4434_v29, 4  ;;  %v4284_v26 = vld [vmem:[#allocation2 + $0x74] sm:$0x1]  ;;  %v4286_v29 = vld [vmem:[#allocation2 + $0x7c] sm:$0xf] }
 0x155   : > { %14190 = vmatmul.mubr.msk.bf16.gmra.mrb[88].mxu0 %vm1334_vm13, %v14960_v53  ;;  %v4409_v53 = vrot.slane %v4407_v43, 4  ;;  %v4424_v31 = vor.u32 %v4423_v0, %v4420_v62  ;;  %v4282_v43 = vld [vmem:[#allocation2 + $0x6c] sm:$0xf]  ;;  %v4455_v22 = vshrl.u32 %v4280_v21, 16  ;;  %v4475_v62 = vshll.u32 %v4283_v30, 16 }
 0x156   : > { %14193 = vmatprep.mubr.msk.bf16.mxu0 %vm1334_vm13, %v14961_v52  ;;  %v4415_v52 = vrot.slane %v4413_v34, 5  ;;  %v4439_v34 = vrot.slane %v4437_v10, 5  ;;  %v4453_v9 = vrot.slane %v4451_v36, 5  ;;  %v4466_v5 = vshrl.u32 %v4282_v43, 16 }
 0x157   : > { %v4410_v15 = vor.u32 %v4409_v53, %v4405_v33  ;;  %v4425_v54 = vrot.slane %v4424_v31, 4  ;;  %v4444_v53 = vrot.slane %v4442_v35, 4  ;;  %v4457_v16 = vrot.slane %v4455_v22, 4 }
 0x158   : > { %14282 = vmatmul.mubr.msk.bf16.gmra.mrb[4].mxu1 %vm1334_vm13, %v13111_v17  ;;  %v4463_v17 = vrot.slane %v4461_v63, 5  ;;  %v4468_v23 = vrot.slane %v4466_v5, 4  ;;  %v4477_v31 = vrot.slane %v4475_v62, 5  ;;  %v4479_v10 = vshrl.u32 %v4283_v30, 16 }
 0x159   : > { %v4411_v61 = vrot.slane %v4410_v15, 4  ;;  %v4430_v33 = vsel %vm15732_vm0, %v4425_v54, %v4429_v2  ;;  %v4469_v15 = vshll.u32 %v4282_v43, 16  ;;  %v16162_v2 = vld [vmem:[%s18186_s3 + $0xc] sm:$0x3]  ;;  %v4458_v35 = vor.u32 %v4457_v16, %v4453_v9 }
 0x15a   : > { %v4493_v36 = vshll.u32 %v4285_v8, 16  ;;  %v4481_v54 = vrot.slane %v4479_v10, 4  ;;  %v4503_v22 = vshrl.u32 %v4286_v29, 16 }
 0x15b   : > { %v4416_v32 = vsel %vm15732_vm0, %v4411_v61, %v4415_v52  ;;  %v4471_v61 = vrot.slane %v4469_v15, 5  ;;  %v4459_v30 = vrot.slane %v4458_v35, 4 }
 0x15c   : > { %v13112_v37 = vcombine.low %v4406_v55, %v4416_v32  ;;  %v4485_v55 = vshll.u32 %v4284_v26, 16  ;;  %v4505_v62 = vrot.slane %v4503_v22, 4 }
 0x15d   : > { %14194 = vmatmul.mubr.msk.bf16.gmra.mrb[92].mxu0 %vm1334_vm13, %v14962_v3  ;;  %v4447_v3 = vrot.slane %v4445_v42, 5  ;;  %v4490_v42 = vshrl.u32 %v4285_v8, 16  ;;  %v4472_v32 = vor.u32 %v4471_v61, %v4468_v23  ;;  %v4464_v63 = vsel %vm15732_vm0, %v4459_v30, %v4463_v17  ;;  %v16203_v30 = vld [vmem:[#allocation2 + $0x94] sm:$0xf] }
 0x15e   : > { %14199 = vmatprep.mubr.msk.bf16.mxu0 %vm1334_vm13, %v16062_v14  ;;  %14285 = vmatprep.mubr.msk.bf16.mxu1 %vm1334_vm13, %v13112_v37  ;;  %v4440_v14 = vsel %vm15732_vm0, %v4435_v56, %v4439_v34  ;;  %v4499_v34 = vshll.u32 %v4286_v29, 16  ;;  %v4287_v37 = vld [vmem:[#allocation2 + $0x80] sm:$0x1] }
 0x15f   : > { %v4448_v52 = vor.u32 %v4447_v3, %v4444_v53  ;;  %v13113_v0 = vcombine.low %v4430_v33, %v4440_v14  ;;  %v4487_v53 = vrot.slane %v4485_v55, 5  ;;  %v4492_v56 = vrot.slane %v4490_v42, 4  ;;  %v4289_v14 = vld [vmem:[#allocation2 + $0x88] sm:$0xf]  ;;  %v2931_v55 = vld [vmem:[#allocation2 + $0x90] sm:$0xf] }
 0x160   : > { %v4495_v3 = vrot.slane %v4493_v36, 5  ;;  %v4482_v33 = vor.u32 %v4481_v54, %v4477_v31  ;;  %v4523_v10 = vshll.u32 %v4289_v14, 16  ;;  %v4527_v35 = vshrl.u32 %v4289_v14, 16 }
 0x161   : > { %v4449_v21 = vrot.slane %v4448_v52, 4  ;;  %14286 = vmatmul.mubr.msk.bf16.gmra.mrb[8].mxu1 %vm1334_vm13, %v13113_v0  ;;  %v4514_v52 = vshrl.u32 %v4288_v40, 16  ;;  %v4290_v0 = vld [vmem:[#allocation2 + $0x8c] sm:$0x1] }
 0x162   : > { %v4496_v5 = vor.u32 %v4495_v3, %v4492_v56  ;;  %v4483_v15 = vrot.slane %v4482_v33, 4  ;;  %v4533_v36 = vshll.u32 %v4290_v0, 16  ;;  %v4525_v54 = vrot.slane %v4523_v10, 5 }
 0x163   : > { %v4454_v43 = vsel %vm15732_vm0, %v4449_v21, %v4453_v9  ;;  %v4501_v9 = vrot.slane %v4499_v34, 5  ;;  %v4516_v8 = vrot.slane %v4514_v52, 4  ;;  %v4517_v21 = vshll.u32 %v4288_v40, 16  ;;  %v16191_v40 = vld [vmem:[#allocation2 + $0x8c] sm:$0x1] }
 0x164   : > { %v4497_v16 = vrot.slane %v4496_v5, 4  ;;  %v4488_v17 = vsel %vm15732_vm0, %v4483_v15, %v4487_v53  ;;  %v4529_v34 = vrot.slane %v4527_v35, 4  ;;  %v4535_v3 = vrot.slane %v4533_v36, 5  ;;  %v4294_v5 = vld [vmem:[#allocation2 + $0x9c] sm:$0xf] }
 0x165   : > { %14200 = vmatmul.mubr.msk.bf16.vlgmr.msra.gmra.mrb[96].mxu0 %vm1334_vm13, %v16064_v41  ;;  %v4473_v41 = vrot.slane %v4472_v32, 4  ;;  %v4506_v61 = vor.u32 %v4505_v62, %v4501_v9  ;;  %v4519_v42 = vrot.slane %v4517_v21, 5  ;;  %v3202_v33 = vshll.u32 %v2931_v55, 16 }
 0x166   : > { %14224 = vmatpush3.bf16.msra.mxu0 %v15956_v13  ;;  %14203 = vmatprep.mubr.msk.bf16.mxu0 %vm1334_vm13, %v16068_v46  ;;  %v4509_v13 = vshll.u32 %v4287_v37, 16  ;;  %v13114_v46 = vcombine.low %v4454_v43, %v4464_v63  ;;  %v4502_v43 = vsel %vm15732_vm0, %v4497_v16, %v4501_v9  ;;  %v4530_v56 = vor.u32 %v4529_v34, %v4525_v54  ;;  %v4292_v63 = vld [vmem:[#allocation2 + $0x94] sm:$0xf] }
 0x167   : > { %14857 = vmatprep.subr.msk.bf16.mxu0 %vm1371_vm12, %v16162_v2  ;;  %v4478_v26 = vsel %vm15732_vm0, %v4473_v41, %v4477_v31  ;;  %v3149_v31 = vsel %vm15732_vm0, %v16100_v1, %v16084_v49  ;;  %v4507_v32 = vrot.slane %v4506_v61, 4  ;;  %v3181_v49 = vor.u32 %v16113_v6, %v16111_v57  ;;  %v4291_v57 = vld [vmem:[#allocation2 + $0x90] sm:$0xf] }
 0x168   : > { %v4511_v23 = vrot.slane %v4509_v13, 5  ;;  %14289 = vmatprep.mubr.msk.bf16.mxu1 %vm1334_vm13, %v13114_v46  ;;  %v13115_v29 = vcombine.low %v4478_v26, %v4488_v17  ;;  %v16197_v1 = vrot.slane %v3184_v38, 5  ;;  %v4520_v53 = vor.u32 %v4519_v42, %v4516_v8 }
 0x169   : > { %v16211_v38 = vrot.slane %v3157_v24, 4  ;;  %v3194_v41 = vshll.u32 %v16191_v40, 16  ;;  %v3208_v9 = vshll.u32 %v16203_v30, 16  ;;  %v4531_v22 = vrot.slane %v4530_v56, 4  ;;  %v4293_v24 = vld [vmem:[#allocation2 + $0x98] sm:$0x1] }
 0x16a   : > { %14290 = vmatmul.mubr.msk.bf16.gmra.mrb[12].mxu1 %vm1334_vm13, %v13115_v29  ;;  %v4512_v37 = vsel %vm15732_vm0, %v4507_v32, %v4511_v23  ;;  %v16225_v58 = vcombine.low %v3139_v27, %v3149_v31  ;;  %v16227_v45 = vrot.slane %v3181_v49, 4  ;;  %v4538_v7 = vshrl.u32 %v4291_v57, 16  ;;  %v4295_v27 = vld [vmem:[#allocation2 + $0xa0] sm:$0xf]  ;;  %v4296_v23 = vld [vmem:[#allocation2 + $0xa4] sm:$0x1] }
 0x16b   : > { %v13116_v6 = vcombine.low %v4502_v43, %v4512_v37  ;;  %v4536_v4 = vsel %vm15732_vm0, %v4531_v22, %v4535_v3  ;;  %v4541_v28 = vshll.u32 %v4291_v57, 16  ;;  %v3212_v52 = vshrl.u32 %v16203_v30, 16  ;;  %v2933_v30 = vld [vmem:[#allocation2 + $0x98] sm:$0x1]  ;;  %v3501_v22 = vld [vmem:[#allocation2 + $0x10] sm:$0xf] }
 0x16c   : > { %v4540_v26 = vrot.slane %v4538_v7, 4  ;;  %v4547_v15 = vshll.u32 %v4292_v63, 16  ;;  %v4551_v0 = vshrl.u32 %v4292_v63, 16  ;;  %v4557_v16 = vshll.u32 %v4293_v24, 16 }
 0x16d   : > { %14204 = vmatmul.mubr.msk.bf16.gmra.mrb[100].mxu0 %vm1334_vm13, %v16076_v25  ;;  %v16201_v25 = vrot.slane %v3188_v12, 4  ;;  %v4521_v12 = vrot.slane %v4520_v53, 4  ;;  %14293 = vmatprep.mubr.msk.bf16.mxu1 %vm1334_vm13, %v13116_v6  ;;  %v4543_v62 = vrot.slane %v4541_v28, 5  ;;  %v4562_v8 = vshrl.u32 %v4294_v5, 16  ;;  %v3500_v28 = vld [vmem:[#allocation2 + $0xc] sm:$0xe] }
 0x16e   : > { %14207 = vmatprep.mubr.msk.bf16.mxu0 %vm1334_vm13, %v16078_v39  ;;  %v3199_v39 = vshrl.u32 %v2931_v55, 16  ;;  %v4549_v21 = vrot.slane %v4547_v15, 5  ;;  %v4565_v17 = vshll.u32 %v4294_v5, 16  ;;  %v4571_v61 = vshll.u32 %v4295_v27, 16 }
 0x16f   : > { %v4526_v11 = vsel %vm15732_vm0, %v4521_v12, %v4525_v54  ;;  %v3191_v13 = vor.u32 %v16201_v25, %v16197_v1  ;;  %v4575_v10 = vshrl.u32 %v4295_v27, 16  ;;  %v3204_v35 = vrot.slane %v3202_v33, 5  ;;  %v3502_v27 = vld [vmem:[#allocation2 + $0x14] sm:$0x1] }
 0x170   : > { %v16234_v14 = vrot.slane %v3199_v39, 4  ;;  %v13117_v46 = vcombine.low %v4526_v11, %v4536_v4  ;;  %v4544_v31 = vor.u32 %v4543_v62, %v4540_v26  ;;  %v4553_v55 = vrot.slane %v4551_v0, 4 }
 0x171   : > { %v4564_v29 = vrot.slane %v4562_v8, 4  ;;  %v4573_v36 = vrot.slane %v4571_v61, 5  ;;  %v4577_v43 = vrot.slane %v4575_v10, 4  ;;  %v4581_v32 = vshll.u32 %v4296_v23, 16 }
 0x172   : > { %14294 = vmatmul.mubr.msk.bf16.gmra.mrb[16].mxu1 %vm1334_vm13, %v13117_v46  ;;  %v16245_v34 = vrot.slane %v3208_v9, 5  ;;  %v4554_v40 = vor.u32 %v4553_v55, %v4549_v21  ;;  %v4559_v49 = vrot.slane %v4557_v16, 5  ;;  %v3214_v53 = vrot.slane %v3212_v52, 4 }
 0x173   : > { %v4578_v37 = vor.u32 %v4577_v43, %v4573_v36  ;;  %v4583_v56 = vrot.slane %v4581_v32, 5  ;;  %v3192_v57 = vrot.slane %v3191_v13, 4  ;;  %v3196_v6 = vrot.slane %v3194_v41, 5  ;;  %v3506_v43 = vld [vmem:[#allocation2 + $0x24] sm:$0xe] }
 0x174   : > { %v4555_v33 = vrot.slane %v4554_v40, 4  ;;  %v3163_v9 = vsel %vm15732_vm0, %v16211_v38, %v16090_v50  ;;  %v3173_v41 = vsel %vm15732_vm0, %v16216_v18, %v16108_v19  ;;  %v3205_v24 = vor.u32 %v3204_v35, %v16234_v14  ;;  %v3508_v32 = vld [vmem:[#allocation2 + $0x2c] sm:$0x1] }
 0x175   : > { %14208 = vmatmul.mubr.msk.bf16.gmra.mrb[104].mxu0 %vm1334_vm13, %v16080_v44  ;;  %v4567_v44 = vrot.slane %v4565_v17, 5  ;;  %v4579_v11 = vrot.slane %v4578_v37, 4  ;;  %v3218_v7 = vshll.u32 %v2933_v30, 16  ;;  %v3215_v50 = vor.u32 %v3214_v53, %v16245_v34  ;;  %v3507_v17 = vld [vmem:[#allocation2 + $0x28] sm:$0xf] }
 0x176   : > { %14211 = vmatprep.mubr.msk.bf16.mxu0 %vm1334_vm13, %v16082_v47  ;;  %v4545_v47 = vrot.slane %v4544_v31, 4  ;;  %v4560_v5 = vsel %vm15732_vm0, %v4555_v33, %v4559_v49  ;;  %v3187_v19 = vsel %vm15732_vm0, %v16227_v45, %v16197_v1  ;;  %v3197_v18 = vsel %vm15732_vm0, %v3192_v57, %v3196_v6  ;;  %v3513_v57 = vld [vmem:[#allocation2 + $0x40] sm:$0xf] }
 0x177   : > { %v4568_v39 = vor.u32 %v4567_v44, %v4564_v29  ;;  %v4584_v13 = vsel %vm15732_vm0, %v4579_v11, %v4583_v56  ;;  %v3574_v14 = vrot.slane %v3501_v22, 5  ;;  %v13030_v46 = vcombine.low %v3163_v9, %v3173_v41  ;;  %v3503_v29 = vld [vmem:[#allocation2 + $0x18] sm:$0xe]  ;;  %v3511_v11 = vld [vmem:[#allocation2 + $0x38] sm:$0x1] }
 0x178   : > { %v14097_v42 = vpop.f32.mrb[0].mxu0  ;;  %v4550_v12 = vsel %vm15732_vm0, %v4545_v47, %v4549_v21  ;;  %v13031_v1 = vcombine.low %v3187_v19, %v3197_v18  ;;  %v3206_v45 = vrot.slane %v3205_v24, 4  ;;  %v3216_v15 = vrot.slane %v3215_v50, 4  ;;  %v3504_v21 = vld [vmem:[#allocation2 + $0x1c] sm:$0xf] }
 0x179   : > { %1507 = vst.msk [vmem:[#allocation5 + $0x10] sm:$0xff] %vm1504_vm7, %v14097_v42  ;;  %v1409_v54 = vpop.f32.mrb[1].mxu0  ;;  %v4569_v63 = vrot.slane %v4568_v39, 4  ;;  %v13118_v38 = vcombine.low %v4550_v12, %v4560_v5  ;;  %v3220_v62 = vrot.slane %v3218_v7, 5  ;;  %v13045_v16 = vrot.slane %v3500_v28, 9 }
 0x17a   : > { %1505 = vst.msk [vmem:[#allocation5] sm:$0xff] %vm1504_vm7, %v1409_v54  ;;  %v14098_v25 = vpop.f32.mrb[2].mxu0  ;;  %v3576_v23 = vrot.slane %v3574_v14, 4  ;;  %v3577_v8 = vrot.slane %v3502_v27, 5  ;;  %v3211_v61 = vsel %vm15732_vm0, %v3206_v45, %v16245_v34  ;;  %v3581_v35 = vrot.slane %v3504_v21, 5 }
 0x17b   : > { %1508 = vst.msk [vmem:[#allocation5 + $0x18] sm:$0xff] %vm1504_vm7, %v14098_v25  ;;  %v1412_v3 = vpop.f32.mrb[3].mxu0  ;;  %14297 = vmatprep.mubr.msk.bf16.mxu1 %vm1334_vm13, %v13118_v38  ;;  %v3221_v10 = vsel %vm15732_vm0, %v3216_v15, %v3220_v62  ;;  %v3575_v31 = vsel %vm15834_vm5, %v13045_v16, %v3574_v14  ;;  %v3505_v42 = vld [vmem:[#allocation2 + $0x20] sm:$0x1]  ;;  %v3588_v44 = vrot.slane %v3507_v17, 5  ;;  %v13046_v49 = vrot.slane %v3503_v29, 9 }
 0x17c   : > { %1506 = vst.msk [vmem:[#allocation5 + $0x8] sm:$0xff] %vm1504_vm7, %v1412_v3  ;;  %v3578_v55 = vsel %vm15834_vm5, %v3576_v23, %v3577_v8  ;;  %v13032_v34 = vcombine.low %v3211_v61, %v3221_v10  ;;  %v3583_v25 = vrot.slane %v3581_v35, 4  ;;  %v3584_v30 = vrot.slane %v3505_v42, 5  ;;  %v3510_v3 = vld [vmem:[#allocation2 + $0x34] sm:$0xf] }
 0x17d   : > { %14212 = vmatmul.mubr.msk.bf16.gmra.mrb[108].mxu0 %vm1334_vm13, %v16092_v51  ;;  %v4574_v51 = vsel %vm15732_vm0, %v4569_v63, %v4573_v36  ;;  %v13058_v40 = vcombine.low %v3575_v31, %v3578_v55  ;;  %v13047_v39 = vrot.slane %v3506_v43, 9  ;;  %v3590_v37 = vrot.slane %v3588_v44, 4  ;;  %v3509_v63 = vld [vmem:[#allocation2 + $0x30] sm:$0xe]  ;;  %v3512_v7 = vld [vmem:[#allocation2 + $0x3c] sm:$0xe] }
 0x17e   : > { %14215 = vmatprep.mubr.msk.bf16.mxu0 %vm1334_vm13, %v16225_v58  ;;  %v13119_v4 = vcombine.low %v4574_v51, %v4584_v13  ;;  %v3591_v56 = vrot.slane %v3508_v32, 5  ;;  %v3582_v6 = vsel %vm15834_vm5, %v13046_v49, %v3581_v35  ;;  %v3585_v12 = vsel %vm15834_vm5, %v3583_v25, %v3584_v30  ;;  %v3514_v5 = vld [vmem:[#allocation2 + $0x44] sm:$0x1]  ;;  %v3515_v16 = vld [vmem:[#allocation2 + $0x48] sm:$0xe] }
 0x17f   : > { %v3595_v33 = vrot.slane %v3510_v3, 5  ;;  %v3589_v9 = vsel %vm15834_vm5, %v13047_v39, %v3588_v44  ;;  %v3602_v41 = vrot.slane %v3513_v57, 5  ;;  %v13059_v38 = vcombine.low %v3582_v6, %v3585_v12  ;;  %v3517_v23 = vld [vmem:[#allocation2 + $0x50] sm:$0x1]  ;;  %v3518_v17 = vld [vmem:[#allocation2 + $0x54] sm:$0xe] }
 0x180   : > { %v14101_v58 = vpop.f32.mrb[4].mxu0  ;;  %14298 = vmatmul.mubr.msk.bf16.gmra.mrb[20].mxu1 %vm1334_vm13, %v13119_v4  ;;  %v3592_v22 = vsel %vm15834_vm5, %v3590_v37, %v3591_v56  ;;  %v13048_v19 = vrot.slane %v3509_v63, 9  ;;  %v3598_v14 = vrot.slane %v3511_v11, 5  ;;  %v3516_v4 = vld [vmem:[#allocation2 + $0x4c] sm:$0xf]  ;;  %v4058_v28 = vsel %vm1371_vm12, %v16162_v2, 0 }
 0x181   : > { %1511 = vst.msk [vmem:[#allocation5 + $0x30] sm:$0xff] %vm1504_vm7, %v14101_v58  ;;  %v1425_v52 = vpop.f32.mrb[5].mxu0  ;;  %v13060_v13 = vcombine.low %v3589_v9, %v3592_v22  ;;  %v3597_v18 = vrot.slane %v3595_v33, 4  ;;  %v13049_v27 = vrot.slane %v3512_v7, 9  ;;  %v3609_v15 = vrot.slane %v3516_v4, 5 }
 0x182   : > { %1509 = vst.msk [vmem:[#allocation5 + $0x20] sm:$0xff] %vm1504_vm7, %v1425_v52  ;;  %v14102_v26 = vpop.f32.mrb[6].mxu0  ;;  %v3604_v52 = vrot.slane %v3602_v41, 4  ;;  %v3596_v45 = vsel %vm15834_vm5, %v13048_v19, %v3595_v33  ;;  %v3520_v61 = vld [vmem:[#allocation2 + $0x5c] sm:$0x1]  ;;  %v13050_v29 = vrot.slane %v3515_v16, 9 }
 0x183   : > { %1512 = vst.msk [vmem:[#allocation5 + $0x38] sm:$0xff] %vm1504_vm7, %v14102_v26  ;;  %v1428_v0 = vpop.f32.mrb[7].mxu0  ;;  %v3519_v26 = vld [vmem:[#allocation2 + $0x58] sm:$0xf]  ;;  %v3599_v2 = vsel %vm15834_vm5, %v3597_v18, %v3598_v14  ;;  %v3603_v62 = vsel %vm15834_vm5, %v13049_v27, %v3602_v41  ;;  %v3611_v42 = vrot.slane %v3609_v15, 4  ;;  %v3612_v44 = vrot.slane %v3517_v23, 5 }
 0x184   : > { %1510 = vst.msk [vmem:[#allocation5 + $0x28] sm:$0xff] %vm1504_vm7, %v1428_v0  ;;  %v3616_v8 = vrot.slane %v3519_v26, 5  ;;  %v13061_v35 = vcombine.low %v3596_v45, %v3599_v2  ;;  %v13051_v43 = vrot.slane %v3518_v17, 9  ;;  %v3521_v39 = vld [vmem:[#allocation2 + $0x60] sm:$0xe] }
 0x185   : > { %14216 = vmatmul.mubr.msk.bf16.gmra.mrb[112].mxu0 %vm1334_vm13, %v13030_v46  ;;  %v3605_v46 = vrot.slane %v3514_v5, 5  ;;  %v3613_v49 = vsel %vm15834_vm5, %v3611_v42, %v3612_v44  ;;  %v3523_v37 = vld [vmem:[#allocation2 + $0x68] sm:$0x1]  ;;  %v3524_v57 = vld [vmem:[#allocation2 + $0x6c] sm:$0xe]  ;;  %v13052_v63 = vrot.slane %v3521_v39, 9 }
 0x186   : > { %14219 = vmatprep.mubr.msk.bf16.mxu0 %vm1334_vm13, %v13031_v1  ;;  %v16318_v1 = vld [vmem:[%s18186_s3 + $0x10] sm:$0x3]  ;;  %v3618_v32 = vrot.slane %v3616_v8, 4  ;;  %v3617_v30 = vsel %vm15834_vm5, %v13051_v43, %v3616_v8  ;;  %v3526_v6 = vld [vmem:[#allocation2 + $0x74] sm:$0x1]  ;;  %v3626_v41 = vrot.slane %v3523_v37, 5 }
 0x187   : > { %v3606_v0 = vsel %vm15834_vm5, %v3604_v52, %v3605_v46  ;;  %v13053_v7 = vrot.slane %v3524_v57, 9  ;;  %v3527_v18 = vld [vmem:[#allocation2 + $0x78] sm:$0xe]  ;;  %v3530_v26 = vld [vmem:[#allocation2 + $0x84] sm:$0xe] }
 0x188   : > { %v14105_v36 = vpop.f32.mrb[8].mxu0  ;;  %v13062_v55 = vcombine.low %v3603_v62, %v3606_v0  ;;  %v2064_v46 = vld [vmem:[#allocation5 + $0x10] sm:$0xff]  ;;  %v3532_v45 = vld [vmem:[#allocation2 + $0x8c] sm:$0x1]  ;;  %v13054_v16 = vrot.slane %v3527_v18, 9  ;;  %v13055_v42 = vrot.slane %v3530_v26, 9 }
 0x189   : > { %1515 = vst.msk [vmem:[#allocation5 + $0x50] sm:$0xff] %vm1504_vm7, %v14105_v36  ;;  %v1441_v54 = vpop.f32.mrb[9].mxu0  ;;  %v2062_v62 = vld [vmem:[#allocation5] sm:$0xff] }
 0x18a   : > { %1513 = vst.msk [vmem:[#allocation5 + $0x40] sm:$0xff] %vm1504_vm7, %v1441_v54  ;;  %v14106_v47 = vpop.f32.mrb[10].mxu0  ;;  %v3619_v54 = vrot.slane %v3520_v61, 5 }
 0x18b   : > { %1516 = vst.msk [vmem:[#allocation5 + $0x58] sm:$0xff] %vm1504_vm7, %v14106_v47  ;;  %v1444_v53 = vpop.f32.mrb[11].mxu0  ;;  %v3525_v47 = vld [vmem:[#allocation2 + $0x70] sm:$0xf] }
 0x18c   : > { %1514 = vst.msk [vmem:[#allocation5 + $0x48] sm:$0xff] %vm1504_vm7, %v1444_v53  ;;  %v3620_v53 = vsel %vm15834_vm5, %v3618_v32, %v3619_v54  ;;  %v3630_v56 = vrot.slane %v3525_v47, 5 }
 0x18d   : > { %14220 = vmatmul.mubr.msk.bf16.gmra.mrb[116].mxu0 %vm1334_vm13, %v13032_v34  ;;  %v3522_v34 = vld [vmem:[#allocation2 + $0x64] sm:$0xf]  ;;  %v13064_v22 = vcombine.low %v3617_v30, %v3620_v53  ;;  %v2068_v53 = vld [vmem:[#allocation5 + $0x30] sm:$0xff] }
 0x18e   : > { %14225 = vmatprep.mubr.msk.bf16.mxu0 %vm1334_vm13, %v13058_v40  ;;  %v3610_v40 = vsel %vm15834_vm5, %v13050_v29, %v3609_v15  ;;  %v3623_v25 = vrot.slane %v3522_v34, 5  ;;  %v3632_v5 = vrot.slane %v3630_v56, 4  ;;  %v3631_v4 = vsel %vm15834_vm5, %v13053_v7, %v3630_v56  ;;  %v2063_v29 = vld [vmem:[#allocation5 + $0x8] sm:$0xff]  ;;  %v2066_v56 = vld [vmem:[#allocation5 + $0x20] sm:$0xff] }
 0x18f   : > { %v13063_v33 = vcombine.low %v3610_v40, %v3613_v49  ;;  %v3533_v34 = vld [vmem:[#allocation2 + $0x90] sm:$0xe] }
 0x190   : > { %v14109_v24 = vpop.f32.mrb[12].mxu0  ;;  %v3625_v11 = vrot.slane %v3623_v25, 4  ;;  %v13056_v57 = vrot.slane %v3533_v34, 9 }
 0x191   : > { %1519 = vst.msk [vmem:[#allocation5 + $0x70] sm:$0xff] %vm1504_vm7, %v14109_v24  ;;  %v1457_v50 = vpop.f32.mrb[13].mxu0  ;;  %v2070_v18 = vld [vmem:[#allocation5 + $0x40] sm:$0xff] }
 0x192   : > { %1517 = vst.msk [vmem:[#allocation5 + $0x60] sm:$0xff] %vm1504_vm7, %v1457_v50  ;;  %v14110_v51 = vpop.f32.mrb[14].mxu0  ;;  %v3633_v50 = vrot.slane %v3526_v6, 5  ;;  %v3627_v19 = vsel %vm15834_vm5, %v3625_v11, %v3626_v41 }
 0x193   : > { %1520 = vst.msk [vmem:[#allocation5 + $0x78] sm:$0xff] %vm1504_vm7, %v14110_v51  ;;  %v1460_v58 = vpop.f32.mrb[15].mxu0  ;;  %v3531_v51 = vld [vmem:[#allocation2 + $0x88] sm:$0xf]  ;;  %v2071_v26 = vld [vmem:[#allocation5 + $0x48] sm:$0xff] }
 0x194   : > { %1518 = vst.msk [vmem:[#allocation5 + $0x68] sm:$0xff] %vm1504_vm7, %v1460_v58  ;;  %v3634_v58 = vsel %vm15834_vm5, %v3632_v5, %v3633_v50  ;;  %v3644_v27 = vrot.slane %v3531_v51, 5  ;;  %v2072_v51 = vld [vmem:[#allocation5 + $0x50] sm:$0xff] }
 0x195   : > { %14226 = vmatmul.mubr.msk.bf16.vlgmr.msra.gmra.mrb[120].mxu0 %vm1334_vm13, %v13059_v38  ;;  %v3528_v38 = vld [vmem:[#allocation2 + $0x7c] sm:$0xf]  ;;  %v13066_v17 = vcombine.low %v3631_v4, %v3634_v58 }
 0x196   : > { %14250 = vmatpush3.bf16.msra.mxu0 %v4058_v28  ;;  %14229 = vmatprep.mubr.msk.bf16.mxu0 %vm1334_vm13, %v13060_v13  ;;  %v3624_v13 = vsel %vm15834_vm5, %v13052_v63, %v3623_v25  ;;  %v3637_v14 = vrot.slane %v3528_v38, 5  ;;  %v3529_v28 = vld [vmem:[#allocation2 + $0x80] sm:$0x1]  ;;  %v3646_v44 = vrot.slane %v3644_v27, 4  ;;  %v3645_v40 = vsel %vm15834_vm5, %v13055_v42, %v3644_v27  ;;  %v3535_v25 = vld [vmem:[#allocation2 + $0x98] sm:$0x1] }
 0x197   : > { %14859 = vmatprep.subr.msk.bf16.mxu0 %vm1371_vm12, %v16318_v1  ;;  %v13065_v0 = vcombine.low %v3624_v13, %v3627_v19  ;;  %v3654_v63 = vrot.slane %v3535_v25, 5  ;;  %v14963_v27 = vld [vmem:[#allocation2 + $0x18] sm:$0xff]  }
 0x198   : > { %v14113_v21 = vpop.f32.mrb[16].mxu0  ;;  %v3639_v61 = vrot.slane %v3637_v14, 4  ;;  %v3638_v32 = vsel %vm15834_vm5, %v13054_v16, %v3637_v14 }
 0x199   : > { %1523 = vst.msk [vmem:[#allocation5 + $0x90] sm:$0xff] %vm1504_vm7, %v14113_v21  ;;  %v1473_v10 = vpop.f32.mrb[17].mxu0  ;;  %v2065_v21 = vld [vmem:[#allocation5 + $0x18] sm:$0xff]  ;;  %v2074_v16 = vld [vmem:[#allocation5 + $0x60] sm:$0xff] }
 0x19a   : > { %1521 = vst.msk [vmem:[#allocation5 + $0x80] sm:$0xff] %vm1504_vm7, %v1473_v10  ;;  %v14114_v31 = vpop.f32.mrb[18].mxu0  ;;  %v3640_v10 = vrot.slane %v3529_v28, 5  ;;  %v2073_v28 = vld [vmem:[#allocation5 + $0x58] sm:$0xff] }
 0x19b   : > { %1524 = vst.msk [vmem:[#allocation5 + $0x98] sm:$0xff] %vm1504_vm7, %v14114_v31  ;;  %v1476_v36 = vpop.f32.mrb[19].mxu0 }
 0x19c   : > { %1522 = vst.msk [vmem:[#allocation5 + $0x88] sm:$0xff] %vm1504_vm7, %v1476_v36  ;;  %v3647_v36 = vrot.slane %v3532_v45, 5  ;;  %v3641_v54 = vsel %vm15834_vm5, %v3639_v61, %v3640_v10  ;;  %v14965_v61 = vld [vmem:[#allocation2 + $0x30] sm:$0xff]  }
 0x19d   : > { %14230 = vmatmul.mubr.msk.bf16.gmra.mrb[124].mxu0 %vm1334_vm13, %v13061_v35  ;;  %v3534_v35 = vld [vmem:[#allocation2 + $0x94] sm:$0xf] }
 0x19e   : > { %14233 = vmatprep.mubr.msk.bf16.mxu0 %vm1334_vm13, %v13062_v55  ;;  %v3651_v47 = vrot.slane %v3534_v35, 5  ;;  %v3648_v49 = vsel %vm15834_vm5, %v3646_v44, %v3647_v36 }
 0x1a0   : > { %v14117_v3 = vpop.f32.mrb[20].mxu0  ;;  %v3652_v5 = vsel %vm15834_vm5, %v13056_v57, %v3651_v47  ;;  %v2080_v44 = vld [vmem:[#allocation5 + $0x90] sm:$0xff] }
 0x1a1   : > { %1527 = vst.msk [vmem:[#allocation5 + $0xb0] sm:$0xff] %vm1504_vm7, %v14117_v3  ;;  %v1489_v12 = vpop.f32.mrb[21].mxu0  ;;  %v13067_v3 = vcombine.low %v3638_v32, %v3641_v54  ;;  %v2078_v32 = vld [vmem:[#allocation5 + $0x80] sm:$0xff]  ;;  %v14966_v54 = vld [vmem:[#allocation2 + $0x3c] sm:$0xff]  }
 0x1a2   : > { %1525 = vst.msk [vmem:[#allocation5 + $0xa0] sm:$0xff] %vm1504_vm7, %v1489_v12  ;;  %v14118_v9 = vpop.f32.mrb[22].mxu0 }
 0x1a3   : > { %1528 = vst.msk [vmem:[#allocation5 + $0xb8] sm:$0xff] %vm1504_vm7, %v14118_v9  ;;  %v1492_v24 = vpop.f32.mrb[23].mxu0  ;;  %v13068_v9 = vcombine.low %v3645_v40, %v3648_v49  ;;  %v14967_v40 = vld [vmem:[#allocation2 + $0x48] sm:$0xff]  }
 0x1a4   : > { %1526 = vst.msk [vmem:[#allocation5 + $0xa8] sm:$0xff] %vm1504_vm7, %v1492_v24  ;;  %v2067_v24 = vld [vmem:[#allocation5 + $0x28] sm:$0xff] }
 0x1a5   : > { %14234 = vmatmul.mubr.msk.bf16.gmra.mrb[128].mxu0 %vm1334_vm13, %v13063_v33  ;;  %v2069_v33 = vld [vmem:[#allocation5 + $0x38] sm:$0xff] }
 0x1a6   : > { %14237 = vmatprep.mubr.msk.bf16.mxu0 %vm1334_vm13, %v13064_v22  ;;  %v3653_v22 = vrot.slane %v3651_v47, 4  ;;  %v2081_v47 = vld [vmem:[#allocation5 + $0x98] sm:$0xff] }
 0x1a8   : > { %v14123_v52 = vpop.f32.mrb[24].mxu0  ;;  %v3655_v50 = vsel %vm15834_vm5, %v3653_v22, %v3654_v63  ;;  %v14969_v22 = vld [vmem:[#allocation2 + $0x60] sm:$0xff]  }
 0x1a9   : > { %v2088_v2 = vadd.f32 %v14123_v52, %v2064_v46  ;;  %v1967_v15 = vpop.f32.mrb[25].mxu0  ;;  %v13069_v14 = vcombine.low %v3652_v5, %v3655_v50  ;;  %v2082_v57 = vld [vmem:[#allocation5 + $0xa0] sm:$0xff] }
 0x1aa   : > { %v2086_v23 = vadd.f32 %v2062_v62, %v1967_v15  ;;  %v14124_v8 = vpop.f32.mrb[26].mxu0  ;;  %v2076_v15 = vld [vmem:[#allocation5 + $0x70] sm:$0xff] }
 0x1ab   : > { %2112 = vst.msk [vmem:[#allocation5 + $0x10] sm:$0xff] %vm1504_vm7, %v2088_v2  ;;  %v2089_v31 = vadd.f32 %v14124_v8, %v2065_v21  ;;  %v1970_v55 = vpop.f32.mrb[27].mxu0 }
 0x1ac   : > { %2110 = vst.msk [vmem:[#allocation5] sm:$0xff] %vm1504_vm7, %v2086_v23  ;;  %v2087_v43 = vadd.f32 %v2063_v29, %v1970_v55  ;;  %v14964_v23 = vld [vmem:[#allocation2 + $0x24] sm:$0xff]   ;;  %v5094_v55 = vsel %vm1371_vm12, %v16318_v1, 0 }
 0x1ad   : > { %2113 = vst.msk [vmem:[#allocation5 + $0x18] sm:$0xff] %vm1504_vm7, %v2089_v31  ;;  %14238 = vmatmul.mubr.msk.bf16.gmra.mrb[132].mxu0 %vm1334_vm13, %v13065_v0  ;;  %v2075_v31 = vld [vmem:[#allocation5 + $0x68] sm:$0xff] }
 0x1ae   : > { %2111 = vst.msk [vmem:[#allocation5 + $0x8] sm:$0xff] %vm1504_vm7, %v2087_v43  ;;  %14241 = vmatprep.mubr.msk.bf16.mxu0 %vm1334_vm13, %v13066_v17  ;;  %v2077_v17 = vld [vmem:[#allocation5 + $0x78] sm:$0xff] }
 0x1b0   : > { %v14127_v30 = vpop.f32.mrb[28].mxu0 }
 0x1b1   : > { %v2092_v39 = vadd.f32 %v14127_v30, %v2068_v53  ;;  %v1983_v37 = vpop.f32.mrb[29].mxu0  ;;  %v2079_v30 = vld [vmem:[#allocation5 + $0x88] sm:$0xff] }
 0x1b2   : > { %v2090_v6 = vadd.f32 %v2066_v56, %v1983_v37  ;;  %v14128_v12 = vpop.f32.mrb[30].mxu0  ;;  %v2084_v37 = vld [vmem:[#allocation5 + $0xb0] sm:$0xff] }
 0x1b3   : > { %2116 = vst.msk [vmem:[#allocation5 + $0x30] sm:$0xff] %vm1504_vm7, %v2092_v39  ;;  %v2093_v11 = vadd.f32 %v14128_v12, %v2069_v33  ;;  %v1986_v41 = vpop.f32.mrb[31].mxu0  ;;  %v2501_v5 = vld [vmem:[#allocation5 + $0x10] sm:$0xff] }
 0x1b4   : > { %2114 = vst.msk [vmem:[#allocation5 + $0x20] sm:$0xff] %vm1504_vm7, %v2090_v6  ;;  %v2091_v7 = vadd.f32 %v2067_v24, %v1986_v41  ;;  %v14968_v6 = vld [vmem:[#allocation2 + $0x54] sm:$0xff]  }
 0x1b5   : > { %2117 = vst.msk [vmem:[#allocation5 + $0x38] sm:$0xff] %vm1504_vm7, %v2093_v11  ;;  %14242 = vmatmul.mubr.msk.bf16.gmra.mrb[136].mxu0 %vm1334_vm13, %v13067_v3  ;;  %v2083_v41 = vld [vmem:[#allocation5 + $0xa8] sm:$0xff] }
 0x1b6   : > { %2115 = vst.msk [vmem:[#allocation5 + $0x28] sm:$0xff] %vm1504_vm7, %v2091_v7  ;;  %14245 = vmatprep.mubr.msk.bf16.mxu0 %vm1334_vm13, %v13068_v9  ;;  %v2085_v9 = vld [vmem:[#allocation5 + $0xb8] sm:$0xff] }
 0x1b8   : > { %v14131_v38 = vpop.f32.mrb[32].mxu0 }
 0x1b9   : > { %v2096_v13 = vadd.f32 %v14131_v38, %v2072_v51  ;;  %v1999_v19 = vpop.f32.mrb[33].mxu0  ;;  %v2499_v51 = vld [vmem:[#allocation5] sm:$0xff] }
 0x1ba   : > { %v2094_v4 = vadd.f32 %v2070_v18, %v1999_v19  ;;  %v14132_v58 = vpop.f32.mrb[34].mxu0 }
 0x1bb   : > { %2120 = vst.msk [vmem:[#allocation5 + $0x50] sm:$0xff] %vm1504_vm7, %v2096_v13  ;;  %v2097_v52 = vadd.f32 %v14132_v58, %v2073_v28  ;;  %v2002_v46 = vpop.f32.mrb[35].mxu0  ;;  %v14970_v13 = vld [vmem:[#allocation2 + $0x6c] sm:$0xff]  }
 0x1bc   : > { %2118 = vst.msk [vmem:[#allocation5 + $0x40] sm:$0xff] %vm1504_vm7, %v2094_v4  ;;  %v2095_v45 = vadd.f32 %v2071_v26, %v2002_v46  ;;  %v14971_v4 = vld [vmem:[#allocation2 + $0x78] sm:$0xff]  }
 0x1bd   : > { %2121 = vst.msk [vmem:[#allocation5 + $0x58] sm:$0xff] %vm1504_vm7, %v2097_v52  ;;  %14246 = vmatmul.mubr.msk.bf16.gmra.mrb[140].mxu0 %vm1334_vm13, %v13069_v14  ;;  %v2502_v14 = vld [vmem:[#allocation5 + $0x18] sm:$0xff]  ;;  %v4864_v46 = vld [vmem:[#allocation2 + $0x1c] sm:$0xf] }
 0x1be   : > { %2119 = vst.msk [vmem:[#allocation5 + $0x48] sm:$0xff] %vm1504_vm7, %v2095_v45  ;;  %14251 = vmatprep.mubr.msk.bf16.mxu0 %vm1334_vm13, %v14963_v27  ;;  %v2500_v27 = vld [vmem:[#allocation5 + $0x8] sm:$0xff]  ;;  %v4937_v26 = vrot.slane %v4864_v46, 5 }
 0x1c0   : > { %v14135_v2 = vpop.f32.mrb[36].mxu0 }
 0x1c1   : > { %v2100_v62 = vadd.f32 %v14135_v2, %v2076_v15  ;;  %v2015_v0 = vpop.f32.mrb[37].mxu0  ;;  %v2505_v2 = vld [vmem:[#allocation5 + $0x30] sm:$0xff] }
 0x1c2   : > { %v2098_v8 = vadd.f32 %v2074_v16, %v2015_v0  ;;  %v14136_v21 = vpop.f32.mrb[38].mxu0  ;;  %v4863_v15 = vld [vmem:[#allocation2 + $0x18] sm:$0xe] }
 0x1c3   : > { %2124 = vst.msk [vmem:[#allocation5 + $0x70] sm:$0xff] %vm1504_vm7, %v2100_v62  ;;  %v2101_v10 = vadd.f32 %v14136_v21, %v2077_v17  ;;  %v2018_v35 = vpop.f32.mrb[39].mxu0  ;;  %v4865_v62 = vld [vmem:[#allocation2 + $0x20] sm:$0x1] }
 0x1c4   : > { %2122 = vst.msk [vmem:[#allocation5 + $0x60] sm:$0xff] %vm1504_vm7, %v2098_v8  ;;  %v2099_v29 = vadd.f32 %v2075_v31, %v2018_v35  ;;  %v14972_v8 = vld [vmem:[#allocation2 + $0x84] sm:$0xff]  }
 0x1c5   : > { %2125 = vst.msk [vmem:[#allocation5 + $0x78] sm:$0xff] %vm1504_vm7, %v2101_v10  ;;  %14252 = vmatmul.mubr.msk.bf16.vlgmr.msra.gmra.mrb[144].mxu0 %vm1334_vm13, %v14964_v23  ;;  %v2503_v23 = vld [vmem:[#allocation5 + $0x20] sm:$0xff]  ;;  %v14973_v10 = vld [vmem:[#allocation2 + $0x90] sm:$0xff]  }
 0x1c6   : > { %2123 = vst.msk [vmem:[#allocation5 + $0x68] sm:$0xff] %vm1504_vm7, %v2099_v29  ;;  %14302 = vmatpush3.bf16.msra.mxu0 %v5094_v55  ;;  %14255 = vmatprep.mubr.msk.bf16.mxu0 %vm1334_vm13, %v14965_v61  ;;  %v2506_v61 = vld [vmem:[#allocation5 + $0x38] sm:$0xff]  ;;  %v4867_v35 = vld [vmem:[#allocation2 + $0x28] sm:$0xf]  ;;  %v2504_v29 = vld [vmem:[#allocation5 + $0x28] sm:$0xff] }
 0x1c8   : > { %v14139_v42 = vpop.f32.mrb[40].mxu0 }
 0x1c9   : > { %v2104_v36 = vadd.f32 %v14139_v42, %v2080_v44  ;;  %v2031_v43 = vpop.f32.mrb[41].mxu0  ;;  %v13132_v42 = vrot.slane %v4863_v15, 9  ;;  %v4939_v44 = vrot.slane %v4937_v26, 4  ;;  %v4877_v15 = vld [vmem:[#allocation2 + $0x50] sm:$0x1] }
 0x1ca   : > { %v2102_v34 = vadd.f32 %v2078_v32, %v2031_v43  ;;  %v14140_v1 = vpop.f32.mrb[42].mxu0  ;;  %v4870_v32 = vld [vmem:[#allocation2 + $0x34] sm:$0xf] }
 0x1cb   : > { %2128 = vst.msk [vmem:[#allocation5 + $0x90] sm:$0xff] %vm1504_vm7, %v2104_v36  ;;  %v2105_v49 = vadd.f32 %v14140_v1, %v2081_v47  ;;  %v2034_v25 = vpop.f32.mrb[43].mxu0  ;;  %v4940_v36 = vrot.slane %v4865_v62, 5  ;;  %v4938_v1 = vsel %vm15834_vm5, %v13132_v42, %v4937_v26 }
 0x1cc   : > { %2126 = vst.msk [vmem:[#allocation5 + $0x80] sm:$0xff] %vm1504_vm7, %v2102_v34  ;;  %v2103_v53 = vadd.f32 %v2079_v30, %v2034_v25  ;;  %v4944_v34 = vrot.slane %v4867_v35, 5  ;;  %v2509_v30 = vld [vmem:[#allocation5 + $0x50] sm:$0xff] }
 0x1cd   : > { %2129 = vst.msk [vmem:[#allocation5 + $0x98] sm:$0xff] %vm1504_vm7, %v2105_v49  ;;  %14256 = vmatmul.mubr.msk.bf16.gmra.mrb[148].mxu0 %vm1334_vm13, %v14966_v54  ;;  %v4866_v54 = vld [vmem:[#allocation2 + $0x24] sm:$0xe]  ;;  %v4941_v47 = vsel %vm15834_vm5, %v4939_v44, %v4940_v36  ;;  %v4951_v49 = vrot.slane %v4870_v32, 5  ;;  %v2512_v44 = vld [vmem:[#allocation5 + $0x68] sm:$0xff]  ;;  %v4968_v32 = vrot.slane %v4877_v15, 5 }
 0x1ce   : > { %2127 = vst.msk [vmem:[#allocation5 + $0x88] sm:$0xff] %vm1504_vm7, %v2103_v53  ;;  %14259 = vmatprep.mubr.msk.bf16.mxu0 %vm1334_vm13, %v14967_v40  ;;  %v4868_v40 = vld [vmem:[#allocation2 + $0x2c] sm:$0x1]  ;;  %v4869_v53 = vld [vmem:[#allocation2 + $0x30] sm:$0xe] }
 0x1d0   : > { %v14143_v39 = vpop.f32.mrb[44].mxu0 }
 0x1d1   : > { %v2108_v56 = vadd.f32 %v14143_v39, %v2084_v37  ;;  %v2047_v3 = vpop.f32.mrb[45].mxu0  ;;  %v4871_v39 = vld [vmem:[#allocation2 + $0x38] sm:$0x1] }
 0x1d2   : > { %v2106_v12 = vadd.f32 %v2082_v57, %v2047_v3  ;;  %v14144_v33 = vpop.f32.mrb[46].mxu0  ;;  %v2507_v3 = vld [vmem:[#allocation5 + $0x40] sm:$0xff]  ;;  %v14974_v57 = vld [vmem:[#allocation2 + $0x9c] sm:$0xff]  }
 0x1d3   : > { %2132 = vst.msk [vmem:[#allocation5 + $0xb0] sm:$0xff] %vm1504_vm7, %v2108_v56  ;;  %v2109_v63 = vadd.f32 %v14144_v33, %v2085_v9  ;;  %v2050_v11 = vpop.f32.mrb[47].mxu0  ;;  %v2510_v9 = vld [vmem:[#allocation5 + $0x58] sm:$0xff] }
 0x1d4   : > { %2130 = vst.msk [vmem:[#allocation5 + $0xa0] sm:$0xff] %vm1504_vm7, %v2106_v12  ;;  %v2107_v24 = vadd.f32 %v2083_v41, %v2050_v11  ;;  %v4947_v11 = vrot.slane %v4868_v40, 5  ;;  %v4873_v41 = vld [vmem:[#allocation2 + $0x40] sm:$0xf]  ;;  %v4878_v40 = vld [vmem:[#allocation2 + $0x54] sm:$0xe] }
 0x1d5   : > { %2133 = vst.msk [vmem:[#allocation5 + $0xb8] sm:$0xff] %vm1504_vm7, %v2109_v63  ;;  %14260 = vmatmul.mubr.msk.bf16.gmra.mrb[152].mxu0 %vm1334_vm13, %v14968_v6  ;;  %v13133_v6 = vrot.slane %v4866_v54, 9  ;;  %v4946_v63 = vrot.slane %v4944_v34, 4 }
 0x1d6   : > { %2131 = vst.msk [vmem:[#allocation5 + $0xa8] sm:$0xff] %vm1504_vm7, %v2107_v24  ;;  %14263 = vmatprep.mubr.msk.bf16.mxu0 %vm1334_vm13, %v14969_v22  ;;  %v13145_v22 = vcombine.low %v4938_v1, %v4941_v47 }
 0x1d8   : > { %v14149_v7 = vpop.f32.mrb[48].mxu0 }
 0x1d9   : > { %v2525_v50 = vadd.f32 %v14149_v7, %v2501_v5  ;;  %v2404_v38 = vpop.f32.mrb[49].mxu0  ;;  %v2508_v5 = vld [vmem:[#allocation5 + $0x48] sm:$0xff] }
 0x1da   : > { %v2523_v19 = vadd.f32 %v2499_v51, %v2404_v38  ;;  %v14150_v18 = vpop.f32.mrb[50].mxu0  ;;  %v4953_v38 = vrot.slane %v4951_v49, 4  ;;  %v4954_v51 = vrot.slane %v4871_v39, 5 }
 0x1db   : > { %2549 = vst.msk [vmem:[#allocation5 + $0x10] sm:$0xff] %vm1504_vm7, %v2525_v50  ;;  %v2526_v58 = vadd.f32 %v14150_v18, %v2502_v14  ;;  %v2407_v28 = vpop.f32.mrb[51].mxu0  ;;  %v13134_v50 = vrot.slane %v4869_v53, 9  ;;  %v4945_v18 = vsel %vm15834_vm5, %v13133_v6, %v4944_v34  ;;  %v4948_v14 = vsel %vm15834_vm5, %v4946_v63, %v4947_v11  ;;  %v4882_v34 = vld [vmem:[#allocation2 + $0x64] sm:$0xf] }
 0x1dc   : > { %2547 = vst.msk [vmem:[#allocation5] sm:$0xff] %vm1504_vm7, %v2523_v19  ;;  %v2524_v52 = vadd.f32 %v2500_v27, %v2407_v28  ;;  %v4876_v19 = vld [vmem:[#allocation2 + $0x4c] sm:$0xf]  ;;  %v4955_v27 = vsel %vm15834_vm5, %v4953_v38, %v4954_v51  ;;  %v4880_v53 = vld [vmem:[#allocation2 + $0x5c] sm:$0x1]  ;;  %v4979_v39 = vrot.slane %v4882_v34, 5 }
 0x1dd   : > { %2550 = vst.msk [vmem:[#allocation5 + $0x18] sm:$0xff] %vm1504_vm7, %v2526_v58  ;;  %14264 = vmatmul.mubr.msk.bf16.gmra.mrb[156].mxu0 %vm1334_vm13, %v14970_v13  ;;  %v4958_v58 = vrot.slane %v4873_v41, 5  ;;  %v4952_v28 = vsel %vm15834_vm5, %v13134_v50, %v4951_v49  ;;  %v4965_v46 = vrot.slane %v4876_v19, 5  ;;  %v2518_v41 = vld [vmem:[#allocation5 + $0x98] sm:$0xff]  ;;  %v4885_v50 = vld [vmem:[#allocation2 + $0x70] sm:$0xf] }
 0x1de   : > { %2548 = vst.msk [vmem:[#allocation5 + $0x8] sm:$0xff] %vm1504_vm7, %v2524_v52  ;;  %14267 = vmatprep.mubr.msk.bf16.mxu0 %vm1334_vm13, %v14971_v4  ;;  %v4872_v4 = vld [vmem:[#allocation2 + $0x3c] sm:$0xe]  ;;  %v4874_v52 = vld [vmem:[#allocation2 + $0x44] sm:$0x1] }
 0x1df   : > { %v4960_v35 = vrot.slane %v4958_v58, 4 }
 0x1e0   : > { %v14153_v45 = vpop.f32.mrb[52].mxu0 }
 0x1e1   : > { %v2529_v0 = vadd.f32 %v14153_v45, %v2505_v2  ;;  %v2420_v16 = vpop.f32.mrb[53].mxu0  ;;  %v2513_v45 = vld [vmem:[#allocation5 + $0x70] sm:$0xff]  ;;  %v4875_v2 = vld [vmem:[#allocation2 + $0x48] sm:$0xe] }
 0x1e2   : > { %v2527_v21 = vadd.f32 %v2503_v23, %v2420_v16  ;;  %v14154_v17 = vpop.f32.mrb[54].mxu0  ;;  %v2511_v16 = vld [vmem:[#allocation5 + $0x60] sm:$0xff]  ;;  %v13146_v23 = vcombine.low %v4945_v18, %v4948_v14  ;;  %v13136_v36 = vrot.slane %v4875_v2, 9  ;;  %v4981_v18 = vrot.slane %v4979_v39, 4  ;;  %v4886_v2 = vld [vmem:[#allocation2 + $0x74] sm:$0x1] }
 0x1e3   : > { %2553 = vst.msk [vmem:[#allocation5 + $0x30] sm:$0xff] %vm1504_vm7, %v2529_v0  ;;  %v2530_v31 = vadd.f32 %v14154_v17, %v2506_v61  ;;  %v2423_v55 = vpop.f32.mrb[55].mxu0  ;;  %v2514_v61 = vld [vmem:[#allocation5 + $0x78] sm:$0xff] }
 0x1e4   : > { %2551 = vst.msk [vmem:[#allocation5 + $0x20] sm:$0xff] %vm1504_vm7, %v2527_v21  ;;  %v2528_v43 = vadd.f32 %v2504_v29, %v2423_v55  ;;  %v4879_v55 = vld [vmem:[#allocation2 + $0x58] sm:$0xf] }
 0x1e5   : > { %2554 = vst.msk [vmem:[#allocation5 + $0x38] sm:$0xff] %vm1504_vm7, %v2530_v31  ;;  %14268 = vmatmul.mubr.msk.bf16.gmra.mrb[160].mxu0 %vm1334_vm13, %v14972_v8  ;;  %v13135_v8 = vrot.slane %v4872_v4, 9  ;;  %v4961_v31 = vrot.slane %v4874_v52, 5  ;;  %v4972_v49 = vrot.slane %v4879_v55, 5  ;;  %v4884_v52 = vld [vmem:[#allocation2 + $0x6c] sm:$0xe] }
 0x1e6   : > { %2552 = vst.msk [vmem:[#allocation5 + $0x28] sm:$0xff] %vm1504_vm7, %v2528_v43  ;;  %14271 = vmatprep.mubr.msk.bf16.mxu0 %vm1334_vm13, %v14973_v10  ;;  %v13147_v10 = vcombine.low %v4952_v28, %v4955_v27  ;;  %v4967_v43 = vrot.slane %v4965_v46, 4  ;;  %v2522_v55 = vld [vmem:[#allocation5 + $0xb8] sm:$0xff] }
 0x1e7   : > { %v4959_v1 = vsel %vm15834_vm5, %v13135_v8, %v4958_v58  ;;  %v4962_v47 = vsel %vm15834_vm5, %v4960_v35, %v4961_v31  ;;  %v4888_v58 = vld [vmem:[#allocation2 + $0x7c] sm:$0xf] }
 0x1e8   : > { %v14157_v25 = vpop.f32.mrb[56].mxu0  ;;  %v4993_v15 = vrot.slane %v4888_v58, 5 }
 0x1e9   : > { %v2533_v37 = vadd.f32 %v14157_v25, %v2509_v30  ;;  %v2436_v56 = vpop.f32.mrb[57].mxu0  ;;  %v4966_v25 = vsel %vm15834_vm5, %v13136_v36, %v4965_v46  ;;  %v4969_v30 = vsel %vm15834_vm5, %v4967_v43, %v4968_v32  ;;  %v4986_v46 = vrot.slane %v4885_v50, 5  ;;  %v4891_v36 = vld [vmem:[#allocation2 + $0x88] sm:$0xf]  ;;  %v2829_v50 = vld [vmem:[#allocation5 + $0x18] sm:$0xff] }
 0x1ea   : > { %v2531_v12 = vadd.f32 %v2507_v3, %v2436_v56  ;;  %v14158_v33 = vpop.f32.mrb[58].mxu0  ;;  %v2517_v56 = vld [vmem:[#allocation5 + $0x90] sm:$0xff]  ;;  %v4881_v3 = vld [vmem:[#allocation2 + $0x60] sm:$0xe] }
 0x1eb   : > { %2557 = vst.msk [vmem:[#allocation5 + $0x50] sm:$0xff] %vm1504_vm7, %v2533_v37  ;;  %v2534_v24 = vadd.f32 %v14158_v33, %v2510_v9  ;;  %v2439_v7 = vpop.f32.mrb[59].mxu0  ;;  %v2515_v33 = vld [vmem:[#allocation5 + $0x80] sm:$0xff]  ;;  %v13148_v9 = vcombine.low %v4959_v1, %v4962_v47  ;;  %v13138_v19 = vrot.slane %v4881_v3, 9  ;;  %v4995_v1 = vrot.slane %v4993_v15, 4 }
 0x1ec   : > { %2555 = vst.msk [vmem:[#allocation5 + $0x40] sm:$0xff] %vm1504_vm7, %v2531_v12  ;;  %v2532_v13 = vadd.f32 %v2508_v5, %v2439_v7  ;;  %v4974_v7 = vrot.slane %v4972_v49, 4  ;;  %v4975_v5 = vrot.slane %v4880_v53, 5  ;;  %v4890_v53 = vld [vmem:[#allocation2 + $0x84] sm:$0xe] }
 0x1ed   : > { %2558 = vst.msk [vmem:[#allocation5 + $0x58] sm:$0xff] %vm1504_vm7, %v2534_v24  ;;  %14272 = vmatmul.mubr.msk.bf16.gmra.mrb[164].mxu0 %vm1334_vm13, %v14974_v57  ;;  %v4883_v57 = vld [vmem:[#allocation2 + $0x68] sm:$0x1]  ;;  %v13149_v24 = vcombine.low %v4966_v25, %v4969_v30  ;;  %v4892_v3 = vld [vmem:[#allocation2 + $0x8c] sm:$0x1] }
 0x1ee   : > { %2556 = vst.msk [vmem:[#allocation5 + $0x48] sm:$0xff] %vm1504_vm7, %v2532_v13  ;;  %14303 = vmatprep.mubr.msk.bf16.mxu0 %vm1334_vm13, %v13145_v22  ;;  %v13137_v22 = vrot.slane %v4878_v40, 9  ;;  %v2516_v13 = vld [vmem:[#allocation5 + $0x88] sm:$0xff]  ;;  %v4982_v14 = vrot.slane %v4883_v57, 5  ;;  %v4976_v27 = vsel %vm15834_vm5, %v4974_v7, %v4975_v5 }
 0x1f0   : > { %v14161_v26 = vpop.f32.mrb[60].mxu0  ;;  %v4973_v28 = vsel %vm15834_vm5, %v13137_v22, %v4972_v49  ;;  %v4894_v49 = vld [vmem:[#allocation2 + $0x94] sm:$0xf] }
 0x1f1   : > { %v2537_v62 = vadd.f32 %v14161_v26, %v2513_v45  ;;  %v2452_v0 = vpop.f32.mrb[61].mxu0  ;;  %v4980_v26 = vsel %vm15834_vm5, %v13138_v19, %v4979_v39  ;;  %v4983_v45 = vsel %vm15834_vm5, %v4981_v18, %v4982_v14  ;;  %v5000_v39 = vrot.slane %v4891_v36, 5  ;;  %v4897_v19 = vld [vmem:[#allocation2 + $0xa0] sm:$0xf] }
 0x1f2   : > { %v2535_v21 = vadd.f32 %v2511_v16, %v2452_v0  ;;  %v14162_v17 = vpop.f32.mrb[62].mxu0  ;;  %v2521_v0 = vld [vmem:[#allocation5 + $0xb0] sm:$0xff]  ;;  %v5007_v57 = vrot.slane %v4894_v49, 5 }
 0x1f3   : > { %2561 = vst.msk [vmem:[#allocation5 + $0x70] sm:$0xff] %vm1504_vm7, %v2537_v62  ;;  %v2538_v29 = vadd.f32 %v14162_v17, %v2514_v61  ;;  %v2455_v42 = vpop.f32.mrb[63].mxu0  ;;  %v4887_v16 = vld [vmem:[#allocation2 + $0x78] sm:$0xe]  ;;  %v2519_v17 = vld [vmem:[#allocation5 + $0xa0] sm:$0xff]  ;;  %v13150_v61 = vcombine.low %v4973_v28, %v4976_v27 }
 0x1f4   : > { %2559 = vst.msk [vmem:[#allocation5 + $0x60] sm:$0xff] %vm1504_vm7, %v2535_v21  ;;  %v2536_v54 = vadd.f32 %v2512_v44, %v2455_v42  ;;  %v4988_v42 = vrot.slane %v4986_v46, 4  ;;  %v4989_v44 = vrot.slane %v4886_v2, 5  ;;  %v13140_v34 = vrot.slane %v4887_v16, 9 }
 0x1f5   : > { %2562 = vst.msk [vmem:[#allocation5 + $0x78] sm:$0xff] %vm1504_vm7, %v2538_v29  ;;  %14304 = vmatmul.mubr.msk.bf16.vlgmr.msra.gmra.mrb[168].mxu0 %vm1334_vm13, %v13146_v23  ;;  %v4889_v23 = vld [vmem:[#allocation2 + $0x80] sm:$0x1]  ;;  %v13151_v29 = vcombine.low %v4980_v26, %v4983_v45  ;;  %v5009_v28 = vrot.slane %v5007_v57, 4  ;;  %v4896_v45 = vld [vmem:[#allocation2 + $0x9c] sm:$0xe] }
 0x1f6   : > { %2560 = vst.msk [vmem:[#allocation5 + $0x68] sm:$0xff] %vm1504_vm7, %v2536_v54  ;;  %14307 = vmatprep.mubr.msk.bf16.mxu0 %vm1334_vm13, %v13147_v10  ;;  %v13139_v10 = vrot.slane %v4884_v52, 9  ;;  %v2520_v54 = vld [vmem:[#allocation5 + $0xa8] sm:$0xff]  ;;  %v4996_v47 = vrot.slane %v4889_v23, 5  ;;  %v4990_v30 = vsel %vm15834_vm5, %v4988_v42, %v4989_v44  ;;  %v5014_v2 = vrot.slane %v4897_v19, 5  ;;  %v2832_v23 = vld [vmem:[#allocation5 + $0x30] sm:$0xff] }
 0x1f8   : > { %v14165_v37 = vpop.f32.mrb[64].mxu0  ;;  %v4987_v25 = vsel %vm15834_vm5, %v13139_v10, %v4986_v46  ;;  %v13143_v10 = vrot.slane %v4896_v45, 9  ;;  %v5016_v42 = vrot.slane %v5014_v2, 4 }
 0x1f9   : > { %v2541_v6 = vadd.f32 %v14165_v37, %v2517_v56  ;;  %v2468_v12 = vpop.f32.mrb[65].mxu0  ;;  %v4994_v37 = vsel %vm15834_vm5, %v13140_v34, %v4993_v15  ;;  %v4997_v56 = vsel %vm15834_vm5, %v4995_v1, %v4996_v47 }
 0x1fa   : > { %v2539_v63 = vadd.f32 %v2515_v33, %v2468_v12  ;;  %v14166_v11 = vpop.f32.mrb[66].mxu0  ;;  %v2828_v12 = vld [vmem:[#allocation5 + $0x10] sm:$0xff]  ;;  %v4893_v33 = vld [vmem:[#allocation2 + $0x90] sm:$0xe]  ;;  %v5015_v34 = vsel %vm15834_vm5, %v13143_v10, %v5014_v2 }
 0x1fb   : > { %2565 = vst.msk [vmem:[#allocation5 + $0x90] sm:$0xff] %vm1504_vm7, %v2541_v6  ;;  %v2542_v38 = vadd.f32 %v14166_v11, %v2518_v41  ;;  %v2471_v51 = vpop.f32.mrb[67].mxu0  ;;  %v2826_v11 = vld [vmem:[#allocation5] sm:$0xff]  ;;  %v13152_v41 = vcombine.low %v4987_v25, %v4990_v30  ;;  %v13142_v58 = vrot.slane %v4893_v33, 9 }
 0x1fc   : > { %2563 = vst.msk [vmem:[#allocation5 + $0x80] sm:$0xff] %vm1504_vm7, %v2539_v63  ;;  %v2540_v4 = vadd.f32 %v2516_v13, %v2471_v51  ;;  %v5002_v51 = vrot.slane %v5000_v39, 4  ;;  %v5003_v13 = vrot.slane %v4892_v3, 5  ;;  %v2834_v30 = vld [vmem:[#allocation5 + $0x40] sm:$0xff] }
 0x1fd   : > { %2566 = vst.msk [vmem:[#allocation5 + $0x98] sm:$0xff] %vm1504_vm7, %v2542_v38  ;;  %14308 = vmatmul.mubr.msk.bf16.gmra.mrb[172].mxu0 %vm1334_vm13, %v13148_v9  ;;  %v4895_v9 = vld [vmem:[#allocation2 + $0x98] sm:$0x1]  ;;  %v13153_v38 = vcombine.low %v4994_v37, %v4997_v56  ;;  %v5008_v15 = vsel %vm15834_vm5, %v13142_v58, %v5007_v57  ;;  %v2837_v56 = vld [vmem:[#allocation5 + $0x58] sm:$0xff] }
 0x1fe   : > { %2564 = vst.msk [vmem:[#allocation5 + $0x88] sm:$0xff] %vm1504_vm7, %v2540_v4  ;;  %14311 = vmatprep.mubr.msk.bf16.mxu0 %vm1334_vm13, %v13149_v24  ;;  %v13141_v24 = vrot.slane %v4890_v53, 9  ;;  %v2827_v4 = vld [vmem:[#allocation5 + $0x8] sm:$0xff]  ;;  %v5010_v27 = vrot.slane %v4895_v9, 5  ;;  %v5004_v26 = vsel %vm15834_vm5, %v5002_v51, %v5003_v13  ;;  %v2840_v9 = vld [vmem:[#allocation5 + $0x70] sm:$0xff] }
 0x200   : > { %v14169_v62 = vpop.f32.mrb[68].mxu0  ;;  %v5001_v46 = vsel %vm15834_vm5, %v13141_v24, %v5000_v39 }
 0x201   : > { %v2545_v8 = vadd.f32 %v14169_v62, %v2521_v0  ;;  %v2484_v21 = vpop.f32.mrb[69].mxu0  ;;  %v5011_v62 = vsel %vm15834_vm5, %v5009_v28, %v5010_v27  ;;  %v4898_v0 = vld [vmem:[#allocation2 + $0xa4] sm:$0x1] }
 0x202   : > { %v2543_v35 = vadd.f32 %v2519_v17, %v2484_v21  ;;  %v14170_v31 = vpop.f32.mrb[70].mxu0  ;;  %v2830_v17 = vld [vmem:[#allocation5 + $0x20] sm:$0xff]  ;;  %v5017_v44 = vrot.slane %v4898_v0, 5 }
 0x203   : > { %2569 = vst.msk [vmem:[#allocation5 + $0xb0] sm:$0xff] %vm1504_vm7, %v2545_v8  ;;  %v2546_v43 = vadd.f32 %v14170_v31, %v2522_v55  ;;  %v2487_v32 = vpop.f32.mrb[71].mxu0  ;;  %v2833_v55 = vld [vmem:[#allocation5 + $0x38] sm:$0xff]  ;;  %v2842_v27 = vld [vmem:[#allocation5 + $0x80] sm:$0xff] }
 0x204   : > { %2567 = vst.msk [vmem:[#allocation5 + $0xa0] sm:$0xff] %vm1504_vm7, %v2543_v35  ;;  %v2544_v40 = vadd.f32 %v2520_v54, %v2487_v32  ;;  %v2831_v32 = vld [vmem:[#allocation5 + $0x28] sm:$0xff]  ;;  %v5018_v1 = vsel %vm15834_vm5, %v5016_v42, %v5017_v44  ;;  %v2845_v45 = vld [vmem:[#allocation5 + $0x98] sm:$0xff] }
 0x205   : > { %2570 = vst.msk [vmem:[#allocation5 + $0xb8] sm:$0xff] %vm1504_vm7, %v2546_v43  ;;  %14312 = vmatmul.mubr.msk.bf16.gmra.mrb[176].mxu0 %vm1334_vm13, %v13150_v61  ;;  %v13154_v61 = vcombine.low %v5001_v46, %v5004_v26  ;;  %v13156_v53 = vcombine.low %v5015_v34, %v5018_v1 }
 0x206   : > { %2568 = vst.msk [vmem:[#allocation5 + $0xa8] sm:$0xff] %vm1504_vm7, %v2544_v40  ;;  %14315 = vmatprep.mubr.msk.bf16.mxu0 %vm1334_vm13, %v13151_v29  ;;  %v13155_v29 = vcombine.low %v5008_v15, %v5011_v62  ;;  %v2836_v40 = vld [vmem:[#allocation5 + $0x50] sm:$0xff]  ;;  %v2843_v62 = vld [vmem:[#allocation5 + $0x88] sm:$0xff] }
 0x208   : > { %v14175_v6 = vpop.f32.mrb[72].mxu0 }
 0x209   : > { %v2852_v22 = vadd.f32 %v14175_v6, %v2828_v12  ;;  %v2731_v63 = vpop.f32.mrb[73].mxu0  ;;  %v2835_v6 = vld [vmem:[#allocation5 + $0x48] sm:$0xff] }
 0x20a   : > { %v2850_v7 = vadd.f32 %v2826_v11, %v2731_v63  ;;  %v14176_v5 = vpop.f32.mrb[74].mxu0  ;;  %v2838_v11 = vld [vmem:[#allocation5 + $0x60] sm:$0xff] }
 0x20b   : > { %2876 = vst.msk [vmem:[#allocation5 + $0x10] sm:$0xff] %vm1504_vm7, %v2852_v22  ;;  %v2853_v18 = vadd.f32 %v14176_v5, %v2829_v50  ;;  %v2734_v14 = vpop.f32.mrb[75].mxu0 }
 0x20c   : > { %2874 = vst.msk [vmem:[#allocation5] sm:$0xff] %vm1504_vm7, %v2850_v7  ;;  %v2851_v52 = vadd.f32 %v2827_v4, %v2734_v14  ;;  %v2841_v7 = vld [vmem:[#allocation5 + $0x78] sm:$0xff]  ;;  %v2844_v14 = vld [vmem:[#allocation5 + $0x90] sm:$0xff] }
 0x20d   : > { %2877 = vst.msk [vmem:[#allocation5 + $0x18] sm:$0xff] %vm1504_vm7, %v2853_v18  ;;  %14316 = vmatmul.mubr.msk.bf16.gmra.mrb[180].mxu0 %vm1334_vm13, %v13152_v41 }
 0x20e   : > { %2875 = vst.msk [vmem:[#allocation5 + $0x8] sm:$0xff] %vm1504_vm7, %v2851_v52  ;;  %14319 = vmatprep.mubr.msk.bf16.mxu0 %vm1334_vm13, %v13153_v38  ;;  %v2839_v38 = vld [vmem:[#allocation5 + $0x68] sm:$0xff] }
 0x210   : > { %v14179_v16 = vpop.f32.mrb[76].mxu0 }
 0x211   : > { %v2856_v8 = vadd.f32 %v14179_v16, %v2832_v23  ;;  %v2747_v21 = vpop.f32.mrb[77].mxu0  ;;  %v2848_v23 = vld [vmem:[#allocation5 + $0xb0] sm:$0xff] }
 0x212   : > { %v2854_v35 = vadd.f32 %v2830_v17, %v2747_v21  ;;  %v14180_v31 = vpop.f32.mrb[78].mxu0  ;;  %v3430_v34 = vld [vmem:[#allocation5 + $0x10] sm:$0xff] }
 0x213   : > { %2880 = vst.msk [vmem:[#allocation5 + $0x30] sm:$0xff] %vm1504_vm7, %v2856_v8  ;;  %v2857_v36 = vadd.f32 %v14180_v31, %v2833_v55  ;;  %v2750_v43 = vpop.f32.mrb[79].mxu0  ;;  %v2849_v55 = vld [vmem:[#allocation5 + $0xb8] sm:$0xff] }
 0x214   : > { %2878 = vst.msk [vmem:[#allocation5 + $0x20] sm:$0xff] %vm1504_vm7, %v2854_v35  ;;  %v2855_v54 = vadd.f32 %v2831_v32, %v2750_v43 }
 0x215   : > { %2881 = vst.msk [vmem:[#allocation5 + $0x38] sm:$0xff] %vm1504_vm7, %v2857_v36  ;;  %14320 = vmatmul.mubr.msk.bf16.gmra.mrb[184].mxu0 %vm1334_vm13, %v13154_v61  ;;  %v2846_v61 = vld [vmem:[#allocation5 + $0xa0] sm:$0xff]  ;;  %v2847_v36 = vld [vmem:[#allocation5 + $0xa8] sm:$0xff] }
 0x216   : > { %2879 = vst.msk [vmem:[#allocation5 + $0x28] sm:$0xff] %vm1504_vm7, %v2855_v54  ;;  %14323 = vmatprep.mubr.msk.bf16.mxu0 %vm1334_vm13, %v13155_v29 }
 0x218   : > { %v14183_v47 = vpop.f32.mrb[80].mxu0 }
 0x219   : > { %v2860_v49 = vadd.f32 %v14183_v47, %v2836_v40  ;;  %v2763_v25 = vpop.f32.mrb[81].mxu0 }
 0x21a   : > { %v2858_v39 = vadd.f32 %v2834_v30, %v2763_v25  ;;  %v14184_v37 = vpop.f32.mrb[82].mxu0 }
 0x21b   : > { %2884 = vst.msk [vmem:[#allocation5 + $0x50] sm:$0xff] %vm1504_vm7, %v2860_v49  ;;  %v2861_v3 = vadd.f32 %v14184_v37, %v2837_v56  ;;  %v2766_v57 = vpop.f32.mrb[83].mxu0  ;;  %v3428_v49 = vld [vmem:[#allocation5] sm:$0xff] }
 0x21c   : > { %2882 = vst.msk [vmem:[#allocation5 + $0x40] sm:$0xff] %vm1504_vm7, %v2858_v39  ;;  %v2859_v12 = vadd.f32 %v2835_v6, %v2766_v57  ;;  %v3431_v39 = vld [vmem:[#allocation5 + $0x18] sm:$0xff]  ;;  %v3429_v57 = vld [vmem:[#allocation5 + $0x8] sm:$0xff] }
 0x21d   : > { %2885 = vst.msk [vmem:[#allocation5 + $0x58] sm:$0xff] %vm1504_vm7, %v2861_v3  ;;  %14324 = vmatmul.mubr.msk.bf16.gmra.mrb[188].mxu0 %vm1334_vm13, %v13156_v53 }
 0x21e   : > { %2883 = vst.msk [vmem:[#allocation5 + $0x48] sm:$0xff] %vm1504_vm7, %v2859_v12 }
 0x220   : > { %v14187_v33 = vpop.f32.mrb[84].mxu0 }
 0x221   : > { %v2864_v22 = vadd.f32 %v14187_v33, %v2840_v9  ;;  %v2779_v63 = vpop.f32.mrb[85].mxu0  ;;  %v3434_v9 = vld [vmem:[#allocation5 + $0x30] sm:$0xff] }
 0x222   : > { %v2862_v41 = vadd.f32 %v2838_v11, %v2779_v63  ;;  %v14188_v24 = vpop.f32.mrb[86].mxu0  ;;  %v3432_v11 = vld [vmem:[#allocation5 + $0x20] sm:$0xff] }
 0x223   : > { %2888 = vst.msk [vmem:[#allocation5 + $0x70] sm:$0xff] %vm1504_vm7, %v2864_v22  ;;  %v2865_v5 = vadd.f32 %v14188_v24, %v2841_v7  ;;  %v2782_v50 = vpop.f32.mrb[87].mxu0  ;;  %v16515_v13 = vpop.f32.mrb[0].mxu1 }
 0x224   : > { %2886 = vst.msk [vmem:[#allocation5 + $0x60] sm:$0xff] %vm1504_vm7, %v2862_v41  ;;  %v2863_v51 = vadd.f32 %v2839_v38, %v2782_v50  ;;  %v16517_v19 = vpop.f32.mrb[1].mxu1 }
 0x225   : > { %2889 = vst.msk [vmem:[#allocation5 + $0x78] sm:$0xff] %vm1504_vm7, %v2865_v5  ;;  %v16519_v4 = vpop.f32.mrb[2].mxu1  ;;  %v3435_v5 = vld [vmem:[#allocation5 + $0x38] sm:$0xff] }
 0x226   : > { %2887 = vst.msk [vmem:[#allocation5 + $0x68] sm:$0xff] %vm1504_vm7, %v2863_v51  ;;  %v16521_v52 = vpop.f32.mrb[3].mxu1 }
 0x228   : > { %v14191_v18 = vpop.f32.mrb[88].mxu0 }
 0x229   : > { %v2868_v58 = vadd.f32 %v14191_v18, %v2844_v14  ;;  %v2795_v28 = vpop.f32.mrb[89].mxu0  ;;  %v3433_v18 = vld [vmem:[#allocation5 + $0x28] sm:$0xff] }
 0x22a   : > { %v2866_v46 = vadd.f32 %v2842_v27, %v2795_v28  ;;  %v14192_v26 = vpop.f32.mrb[90].mxu0 }
 0x22b   : > { %2892 = vst.msk [vmem:[#allocation5 + $0x90] sm:$0xff] %vm1504_vm7, %v2868_v58  ;;  %v2869_v2 = vadd.f32 %v14192_v26, %v2845_v45  ;;  %v2798_v15 = vpop.f32.mrb[91].mxu0  ;;  %v16527_v8 = vpop.f32.mrb[4].mxu1 }
 0x22c   : > { %2890 = vst.msk [vmem:[#allocation5 + $0x80] sm:$0xff] %vm1504_vm7, %v2866_v46  ;;  %v2867_v0 = vadd.f32 %v2843_v62, %v2798_v15  ;;  %v16529_v10 = vpop.f32.mrb[5].mxu1  ;;  %v3438_v46 = vld [vmem:[#allocation5 + $0x50] sm:$0xff] }
 0x22d   : > { %2893 = vst.msk [vmem:[#allocation5 + $0x98] sm:$0xff] %vm1504_vm7, %v2869_v2  ;;  %v16531_v29 = vpop.f32.mrb[6].mxu1  ;;  %v3436_v2 = vld [vmem:[#allocation5 + $0x40] sm:$0xff] }
 0x22e   : > { %2891 = vst.msk [vmem:[#allocation5 + $0x88] sm:$0xff] %vm1504_vm7, %v2867_v0  ;;  %v16534_v43 = vpop.f32.mrb[7].mxu1 }
 0x230   : > { %v14195_v16 = vpop.f32.mrb[92].mxu0 }
 0x231   : > { %v2872_v21 = vadd.f32 %v14195_v16, %v2848_v23  ;;  %v2811_v17 = vpop.f32.mrb[93].mxu0  ;;  %v3439_v16 = vld [vmem:[#allocation5 + $0x58] sm:$0xff] }
 0x232   : > { %v2870_v35 = vadd.f32 %v2846_v61, %v2811_v17  ;;  %v14196_v31 = vpop.f32.mrb[94].mxu0  ;;  %v3437_v61 = vld [vmem:[#allocation5 + $0x48] sm:$0xff] }
 0x233   : > { %2896 = vst.msk [vmem:[#allocation5 + $0xb0] sm:$0xff] %vm1504_vm7, %v2872_v21  ;;  %v2873_v42 = vadd.f32 %v14196_v31, %v2849_v55  ;;  %v2814_v44 = vpop.f32.mrb[95].mxu0 }
 0x234   : > { %2894 = vst.msk [vmem:[#allocation5 + $0xa0] sm:$0xff] %vm1504_vm7, %v2870_v35  ;;  %v2871_v32 = vadd.f32 %v2847_v36, %v2814_v44  ;;  %v16539_v1 = vpop.f32.mrb[8].mxu1  ;;  %v3442_v44 = vld [vmem:[#allocation5 + $0x70] sm:$0xff] }
 0x235   : > { %2897 = vst.msk [vmem:[#allocation5 + $0xb8] sm:$0xff] %vm1504_vm7, %v2873_v42  ;;  %v16541_v25 = vpop.f32.mrb[9].mxu1 }
 0x236   : > { %2895 = vst.msk [vmem:[#allocation5 + $0xa8] sm:$0xff] %vm1504_vm7, %v2871_v32  ;;  %v16543_v37 = vpop.f32.mrb[10].mxu1 }
 0x237   : > { %v16546_v6 = vpop.f32.mrb[11].mxu1 }
 0x238   : > { %v14201_v54 = vpop.f32.mrb[96].mxu0 }
 0x239   : > { %v3454_v47 = vadd.f32 %v14201_v54, %v3430_v34  ;;  %v3333_v40 = vpop.f32.mrb[97].mxu0  ;;  %v3440_v54 = vld [vmem:[#allocation5 + $0x60] sm:$0xff] }
 0x23a   : > { %v3452_v30 = vadd.f32 %v3428_v49, %v3333_v40  ;;  %v14202_v53 = vpop.f32.mrb[98].mxu0  ;;  %v3443_v40 = vld [vmem:[#allocation5 + $0x78] sm:$0xff] }
 0x23b   : > { %3478 = vst.msk [vmem:[#allocation5 + $0x10] sm:$0xff] %vm1504_vm7, %v3454_v47  ;;  %v3455_v56 = vadd.f32 %v14202_v53, %v3431_v39  ;;  %v3336_v3 = vpop.f32.mrb[99].mxu0  ;;  %v3441_v53 = vld [vmem:[#allocation5 + $0x68] sm:$0xff] }
 0x23c   : > { %3476 = vst.msk [vmem:[#allocation5] sm:$0xff] %vm1504_vm7, %v3452_v30  ;;  %v3453_v12 = vadd.f32 %v3429_v57, %v3336_v3 }
 0x23d   : > { %3479 = vst.msk [vmem:[#allocation5 + $0x18] sm:$0xff] %vm1504_vm7, %v3455_v56  ;;  %v16551_v41 = vpop.f32.mrb[12].mxu1 }
 0x23e   : > { %3477 = vst.msk [vmem:[#allocation5 + $0x8] sm:$0xff] %vm1504_vm7, %v3453_v12  ;;  %v16553_v50 = vpop.f32.mrb[13].mxu1 }
 0x23f   : > { %v16556_v14 = vpop.f32.mrb[14].mxu1 }
 0x240   : > { %v14205_v33 = vpop.f32.mrb[100].mxu0  ;;  %v16559_v28 = vpop.f32.mrb[15].mxu1 }
 0x241   : > { %v3458_v22 = vadd.f32 %v14205_v33, %v3434_v9  ;;  %v3349_v63 = vpop.f32.mrb[101].mxu0  ;;  %v3446_v9 = vld [vmem:[#allocation5 + $0x90] sm:$0xff] }
 0x242   : > { %v3456_v24 = vadd.f32 %v3432_v11, %v3349_v63  ;;  %v14206_v7 = vpop.f32.mrb[102].mxu0  ;;  %v3444_v11 = vld [vmem:[#allocation5 + $0x80] sm:$0xff] }
 0x243   : > { %3482 = vst.msk [vmem:[#allocation5 + $0x30] sm:$0xff] %vm1504_vm7, %v3458_v22  ;;  %v3459_v38 = vadd.f32 %v14206_v7, %v3435_v5  ;;  %v3352_v51 = vpop.f32.mrb[103].mxu0  ;;  %v3447_v5 = vld [vmem:[#allocation5 + $0x98] sm:$0xff] }
 0x244   : > { %3480 = vst.msk [vmem:[#allocation5 + $0x20] sm:$0xff] %vm1504_vm7, %v3456_v24  ;;  %v3457_v58 = vadd.f32 %v3433_v18, %v3352_v51  ;;  %v3445_v18 = vld [vmem:[#allocation5 + $0x88] sm:$0xff] }
 0x245   : > { %3483 = vst.msk [vmem:[#allocation5 + $0x38] sm:$0xff] %vm1504_vm7, %v3459_v38  ;;  %v16563_v15 = vpop.f32.mrb[16].mxu1 }
 0x246   : > { %3481 = vst.msk [vmem:[#allocation5 + $0x28] sm:$0xff] %vm1504_vm7, %v3457_v58  ;;  %v16565_v23 = vpop.f32.mrb[17].mxu1 }
 0x247   : > { %v16568_v35 = vpop.f32.mrb[18].mxu1 }
 0x248   : > { %v14209_v27 = vpop.f32.mrb[104].mxu0  ;;  %v16571_v55 = vpop.f32.mrb[19].mxu1 }
 0x249   : > { %v3462_v26 = vadd.f32 %v14209_v27, %v3438_v46  ;;  %v3365_v45 = vpop.f32.mrb[105].mxu0  ;;  %v3450_v46 = vld [vmem:[#allocation5 + $0xb0] sm:$0xff] }
 0x24a   : > { %v3460_v62 = vadd.f32 %v3436_v2, %v3365_v45  ;;  %v14210_v0 = vpop.f32.mrb[106].mxu0  ;;  %v3448_v2 = vld [vmem:[#allocation5 + $0xa0] sm:$0xff] }
 0x24b   : > { %3486 = vst.msk [vmem:[#allocation5 + $0x50] sm:$0xff] %vm1504_vm7, %v3462_v26  ;;  %v3463_v21 = vadd.f32 %v14210_v0, %v3439_v16  ;;  %v3368_v17 = vpop.f32.mrb[107].mxu0  ;;  %v3451_v16 = vld [vmem:[#allocation5 + $0xb8] sm:$0xff] }
 0x24c   : > { %3484 = vst.msk [vmem:[#allocation5 + $0x40] sm:$0xff] %vm1504_vm7, %v3460_v62  ;;  %v3461_v31 = vadd.f32 %v3437_v61, %v3368_v17  ;;  %v3449_v61 = vld [vmem:[#allocation5 + $0xa8] sm:$0xff] }
 0x24d   : > { %3487 = vst.msk [vmem:[#allocation5 + $0x58] sm:$0xff] %vm1504_vm7, %v3463_v21 }
 0x24e   : > { %3485 = vst.msk [vmem:[#allocation5 + $0x48] sm:$0xff] %vm1504_vm7, %v3461_v31 }
 0x250   : > { %v14213_v42 = vpop.f32.mrb[108].mxu0 }
 0x251   : > { %v3466_v36 = vadd.f32 %v14213_v42, %v3442_v44  ;;  %v3381_v32 = vpop.f32.mrb[109].mxu0  ;;  %v3864_v44 = vld [vmem:[#allocation5 + $0x10] sm:$0xff] }
 0x252   : > { %v3464_v34 = vadd.f32 %v3440_v54, %v3381_v32  ;;  %v14214_v47 = vpop.f32.mrb[110].mxu0  ;;  %v3862_v54 = vld [vmem:[#allocation5] sm:$0xff] }
 0x253   : > { %3490 = vst.msk [vmem:[#allocation5 + $0x70] sm:$0xff] %vm1504_vm7, %v3466_v36  ;;  %v3467_v49 = vadd.f32 %v14214_v47, %v3443_v40  ;;  %v3384_v30 = vpop.f32.mrb[111].mxu0  ;;  %v16577_v56 = vpop.f32.mrb[20].mxu1  ;;  %v3865_v40 = vld [vmem:[#allocation5 + $0x18] sm:$0xff] }
 0x254   : > { %3488 = vst.msk [vmem:[#allocation5 + $0x60] sm:$0xff] %vm1504_vm7, %v3464_v34  ;;  %v3465_v39 = vadd.f32 %v3441_v53, %v3384_v30  ;;  %v16580_v3 = vpop.f32.mrb[21].mxu1  ;;  %v3863_v53 = vld [vmem:[#allocation5 + $0x8] sm:$0xff] }
 0x255   : > { %3491 = vst.msk [vmem:[#allocation5 + $0x78] sm:$0xff] %vm1504_vm7, %v3467_v49  ;;  %v16583_v57 = vpop.f32.mrb[22].mxu1 }
 0x256   : > { %3489 = vst.msk [vmem:[#allocation5 + $0x68] sm:$0xff] %vm1504_vm7, %v3465_v39  ;;  %v16585_v12 = vpop.f32.mrb[23].mxu1 }
 0x258   : > { %v14217_v33 = vpop.f32.mrb[112].mxu0 }
 0x259   : > { %v3470_v22 = vadd.f32 %v14217_v33, %v3446_v9  ;;  %v3397_v63 = vpop.f32.mrb[113].mxu0  ;;  %v3868_v9 = vld [vmem:[#allocation5 + $0x30] sm:$0xff] }
 0x25a   : > { %v3468_v24 = vadd.f32 %v3444_v11, %v3397_v63  ;;  %v14218_v7 = vpop.f32.mrb[114].mxu0  ;;  %v3866_v11 = vld [vmem:[#allocation5 + $0x20] sm:$0xff] }
 0x25b   : > { %3494 = vst.msk [vmem:[#allocation5 + $0x90] sm:$0xff] %vm1504_vm7, %v3470_v22  ;;  %v3471_v38 = vadd.f32 %v14218_v7, %v3447_v5  ;;  %v3400_v51 = vpop.f32.mrb[115].mxu0  ;;  %v3869_v5 = vld [vmem:[#allocation5 + $0x38] sm:$0xff] }
 0x25c   : > { %3492 = vst.msk [vmem:[#allocation5 + $0x80] sm:$0xff] %vm1504_vm7, %v3468_v24  ;;  %v3469_v58 = vadd.f32 %v3445_v18, %v3400_v51  ;;  %v3867_v18 = vld [vmem:[#allocation5 + $0x28] sm:$0xff] }
 0x25d   : > { %3495 = vst.msk [vmem:[#allocation5 + $0x98] sm:$0xff] %vm1504_vm7, %v3471_v38 }
 0x25e   : > { %3493 = vst.msk [vmem:[#allocation5 + $0x88] sm:$0xff] %vm1504_vm7, %v3469_v58 }
 0x260   : > { %v14221_v27 = vpop.f32.mrb[116].mxu0 }
 0x261   : > { %v3474_v26 = vadd.f32 %v14221_v27, %v3450_v46  ;;  %v3413_v45 = vpop.f32.mrb[117].mxu0  ;;  %v3872_v46 = vld [vmem:[#allocation5 + $0x50] sm:$0xff] }
 0x262   : > { %v3472_v62 = vadd.f32 %v3448_v2, %v3413_v45  ;;  %v14222_v0 = vpop.f32.mrb[118].mxu0  ;;  %v3870_v2 = vld [vmem:[#allocation5 + $0x40] sm:$0xff] }
 0x263   : > { %3498 = vst.msk [vmem:[#allocation5 + $0xb0] sm:$0xff] %vm1504_vm7, %v3474_v26  ;;  %v3475_v21 = vadd.f32 %v14222_v0, %v3451_v16  ;;  %v3416_v17 = vpop.f32.mrb[119].mxu0  ;;  %v3873_v16 = vld [vmem:[#allocation5 + $0x58] sm:$0xff] }
 0x264   : > { %3496 = vst.msk [vmem:[#allocation5 + $0xa0] sm:$0xff] %vm1504_vm7, %v3472_v62  ;;  %v3473_v31 = vadd.f32 %v3449_v61, %v3416_v17  ;;  %v3871_v61 = vld [vmem:[#allocation5 + $0x48] sm:$0xff] }
 0x265   : > { %3499 = vst.msk [vmem:[#allocation5 + $0xb8] sm:$0xff] %vm1504_vm7, %v3475_v21 }
 0x266   : > { %3497 = vst.msk [vmem:[#allocation5 + $0xa8] sm:$0xff] %vm1504_vm7, %v3473_v31 }
 0x268   : > { %v14227_v42 = vpop.f32.mrb[120].mxu0 }
 0x269   : > { %v3888_v36 = vadd.f32 %v14227_v42, %v3864_v44  ;;  %v3767_v32 = vpop.f32.mrb[121].mxu0  ;;  %v3876_v44 = vld [vmem:[#allocation5 + $0x70] sm:$0xff] }
 0x26a   : > { %v3886_v34 = vadd.f32 %v3862_v54, %v3767_v32  ;;  %v14228_v47 = vpop.f32.mrb[122].mxu0  ;;  %v3874_v54 = vld [vmem:[#allocation5 + $0x60] sm:$0xff] }
 0x26b   : > { %3912 = vst.msk [vmem:[#allocation5 + $0x10] sm:$0xff] %vm1504_vm7, %v3888_v36  ;;  %v3889_v49 = vadd.f32 %v14228_v47, %v3865_v40  ;;  %v3770_v30 = vpop.f32.mrb[123].mxu0  ;;  %v3877_v40 = vld [vmem:[#allocation5 + $0x78] sm:$0xff] }
 0x26c   : > { %3910 = vst.msk [vmem:[#allocation5] sm:$0xff] %vm1504_vm7, %v3886_v34  ;;  %v3887_v39 = vadd.f32 %v3863_v53, %v3770_v30  ;;  %v3875_v53 = vld [vmem:[#allocation5 + $0x68] sm:$0xff] }
 0x26d   : > { %3913 = vst.msk [vmem:[#allocation5 + $0x18] sm:$0xff] %vm1504_vm7, %v3889_v49 }
 0x26e   : > { %3911 = vst.msk [vmem:[#allocation5 + $0x8] sm:$0xff] %vm1504_vm7, %v3887_v39 }
 0x270   : > { %v14231_v33 = vpop.f32.mrb[124].mxu0 }
 0x271   : > { %v3892_v22 = vadd.f32 %v14231_v33, %v3868_v9  ;;  %v3783_v63 = vpop.f32.mrb[125].mxu0  ;;  %v3880_v9 = vld [vmem:[#allocation5 + $0x90] sm:$0xff] }
 0x272   : > { %v3890_v24 = vadd.f32 %v3866_v11, %v3783_v63  ;;  %v14232_v7 = vpop.f32.mrb[126].mxu0  ;;  %v3878_v11 = vld [vmem:[#allocation5 + $0x80] sm:$0xff] }
 0x273   : > { %3916 = vst.msk [vmem:[#allocation5 + $0x30] sm:$0xff] %vm1504_vm7, %v3892_v22  ;;  %v3893_v38 = vadd.f32 %v14232_v7, %v3869_v5  ;;  %v3786_v51 = vpop.f32.mrb[127].mxu0  ;;  %v3881_v5 = vld [vmem:[#allocation5 + $0x98] sm:$0xff] }
 0x274   : > { %3914 = vst.msk [vmem:[#allocation5 + $0x20] sm:$0xff] %vm1504_vm7, %v3890_v24  ;;  %v3891_v58 = vadd.f32 %v3867_v18, %v3786_v51  ;;  %v3879_v18 = vld [vmem:[#allocation5 + $0x88] sm:$0xff] }
 0x275   : > { %3917 = vst.msk [vmem:[#allocation5 + $0x38] sm:$0xff] %vm1504_vm7, %v3893_v38 }
 0x276   : > { %3915 = vst.msk [vmem:[#allocation5 + $0x28] sm:$0xff] %vm1504_vm7, %v3891_v58 }
 0x278   : > { %v14235_v27 = vpop.f32.mrb[128].mxu0 }
 0x279   : > { %v3896_v26 = vadd.f32 %v14235_v27, %v3872_v46  ;;  %v3799_v45 = vpop.f32.mrb[129].mxu0  ;;  %v3884_v46 = vld [vmem:[#allocation5 + $0xb0] sm:$0xff] }
 0x27a   : > { %v3894_v62 = vadd.f32 %v3870_v2, %v3799_v45  ;;  %v14236_v0 = vpop.f32.mrb[130].mxu0  ;;  %v3882_v2 = vld [vmem:[#allocation5 + $0xa0] sm:$0xff] }
 0x27b   : > { %3920 = vst.msk [vmem:[#allocation5 + $0x50] sm:$0xff] %vm1504_vm7, %v3896_v26  ;;  %v3897_v21 = vadd.f32 %v14236_v0, %v3873_v16  ;;  %v3802_v17 = vpop.f32.mrb[131].mxu0  ;;  %v3885_v16 = vld [vmem:[#allocation5 + $0xb8] sm:$0xff] }
 0x27c   : > { %3918 = vst.msk [vmem:[#allocation5 + $0x40] sm:$0xff] %vm1504_vm7, %v3894_v62  ;;  %v3895_v31 = vadd.f32 %v3871_v61, %v3802_v17  ;;  %v3883_v61 = vld [vmem:[#allocation5 + $0xa8] sm:$0xff] }
 0x27d   : > { %3921 = vst.msk [vmem:[#allocation5 + $0x58] sm:$0xff] %vm1504_vm7, %v3897_v21 }
 0x27e   : > { %3919 = vst.msk [vmem:[#allocation5 + $0x48] sm:$0xff] %vm1504_vm7, %v3895_v31 }
 0x280   : > { %v14239_v42 = vpop.f32.mrb[132].mxu0 }
 0x281   : > { %v3900_v36 = vadd.f32 %v14239_v42, %v3876_v44  ;;  %v3815_v32 = vpop.f32.mrb[133].mxu0  ;;  %v4191_v44 = vld [vmem:[#allocation5 + $0x10] sm:$0xff] }
 0x282   : > { %v3898_v34 = vadd.f32 %v3874_v54, %v3815_v32  ;;  %v14240_v47 = vpop.f32.mrb[134].mxu0  ;;  %v4189_v54 = vld [vmem:[#allocation5] sm:$0xff] }
 0x283   : > { %3924 = vst.msk [vmem:[#allocation5 + $0x70] sm:$0xff] %vm1504_vm7, %v3900_v36  ;;  %v3901_v49 = vadd.f32 %v14240_v47, %v3877_v40  ;;  %v3818_v30 = vpop.f32.mrb[135].mxu0  ;;  %v4192_v40 = vld [vmem:[#allocation5 + $0x18] sm:$0xff] }
 0x284   : > { %3922 = vst.msk [vmem:[#allocation5 + $0x60] sm:$0xff] %vm1504_vm7, %v3898_v34  ;;  %v3899_v39 = vadd.f32 %v3875_v53, %v3818_v30  ;;  %v4190_v53 = vld [vmem:[#allocation5 + $0x8] sm:$0xff] }
 0x285   : > { %3925 = vst.msk [vmem:[#allocation5 + $0x78] sm:$0xff] %vm1504_vm7, %v3901_v49 }
 0x286   : > { %3923 = vst.msk [vmem:[#allocation5 + $0x68] sm:$0xff] %vm1504_vm7, %v3899_v39 }
 0x288   : > { %v14243_v33 = vpop.f32.mrb[136].mxu0 }
 0x289   : > { %v3904_v22 = vadd.f32 %v14243_v33, %v3880_v9  ;;  %v3831_v63 = vpop.f32.mrb[137].mxu0  ;;  %v4195_v9 = vld [vmem:[#allocation5 + $0x30] sm:$0xff] }
 0x28a   : > { %v3902_v24 = vadd.f32 %v3878_v11, %v3831_v63  ;;  %v14244_v7 = vpop.f32.mrb[138].mxu0  ;;  %v4193_v11 = vld [vmem:[#allocation5 + $0x20] sm:$0xff] }
 0x28b   : > { %3928 = vst.msk [vmem:[#allocation5 + $0x90] sm:$0xff] %vm1504_vm7, %v3904_v22  ;;  %v3905_v38 = vadd.f32 %v14244_v7, %v3881_v5  ;;  %v3834_v51 = vpop.f32.mrb[139].mxu0  ;;  %v4196_v5 = vld [vmem:[#allocation5 + $0x38] sm:$0xff] }
 0x28c   : > { %3926 = vst.msk [vmem:[#allocation5 + $0x80] sm:$0xff] %vm1504_vm7, %v3902_v24  ;;  %v3903_v58 = vadd.f32 %v3879_v18, %v3834_v51 }
 0x28d   : > { %3929 = vst.msk [vmem:[#allocation5 + $0x98] sm:$0xff] %vm1504_vm7, %v3905_v38 }
 0x28e   : > { %3927 = vst.msk [vmem:[#allocation5 + $0x88] sm:$0xff] %vm1504_vm7, %v3903_v58 }
 0x290   : > { %v14247_v27 = vpop.f32.mrb[140].mxu0 }
 0x291   : > { %v3908_v26 = vadd.f32 %v14247_v27, %v3884_v46  ;;  %v3847_v45 = vpop.f32.mrb[141].mxu0  ;;  %v4194_v27 = vld [vmem:[#allocation5 + $0x28] sm:$0xff] }
 0x292   : > { %v3906_v62 = vadd.f32 %v3882_v2, %v3847_v45  ;;  %v14248_v0 = vpop.f32.mrb[142].mxu0 }
 0x293   : > { %3932 = vst.msk [vmem:[#allocation5 + $0xb0] sm:$0xff] %vm1504_vm7, %v3908_v26  ;;  %v3909_v21 = vadd.f32 %v14248_v0, %v3885_v16  ;;  %v3850_v17 = vpop.f32.mrb[143].mxu0 }
 0x294   : > { %3930 = vst.msk [vmem:[#allocation5 + $0xa0] sm:$0xff] %vm1504_vm7, %v3906_v62  ;;  %v3907_v31 = vadd.f32 %v3883_v61, %v3850_v17  ;;  %v4197_v61 = vld [vmem:[#allocation5 + $0x40] sm:$0xff] }
 0x295   : > { %3933 = vst.msk [vmem:[#allocation5 + $0xb8] sm:$0xff] %vm1504_vm7, %v3909_v21 }
 0x296   : > { %3931 = vst.msk [vmem:[#allocation5 + $0xa8] sm:$0xff] %vm1504_vm7, %v3907_v31 }
 0x298   : > { %v14253_v42 = vpop.f32.mrb[144].mxu0 }
 0x299   : > { %v4215_v36 = vadd.f32 %v14253_v42, %v4191_v44  ;;  %v4094_v32 = vpop.f32.mrb[145].mxu0  ;;  %v4200_v44 = vld [vmem:[#allocation5 + $0x58] sm:$0xff] }
 0x29a   : > { %v4213_v34 = vadd.f32 %v4189_v54, %v4094_v32  ;;  %v14254_v47 = vpop.f32.mrb[146].mxu0 }
 0x29b   : > { %4239 = vst.msk [vmem:[#allocation5 + $0x10] sm:$0xff] %vm1504_vm7, %v4215_v36  ;;  %v4216_v49 = vadd.f32 %v14254_v47, %v4192_v40  ;;  %v4097_v30 = vpop.f32.mrb[147].mxu0 }
 0x29c   : > { %4237 = vst.msk [vmem:[#allocation5] sm:$0xff] %vm1504_vm7, %v4213_v34  ;;  %v4214_v39 = vadd.f32 %v4190_v53, %v4097_v30 }
 0x29d   : > { %4240 = vst.msk [vmem:[#allocation5 + $0x18] sm:$0xff] %vm1504_vm7, %v4216_v49 }
 0x29e   : > { %4238 = vst.msk [vmem:[#allocation5 + $0x8] sm:$0xff] %vm1504_vm7, %v4214_v39 }
 0x2a0   : > { %v14257_v33 = vpop.f32.mrb[148].mxu0 }
 0x2a1   : > { %v4219_v22 = vadd.f32 %v14257_v33, %v4195_v9  ;;  %v4110_v63 = vpop.f32.mrb[149].mxu0 }
 0x2a2   : > { %v4217_v24 = vadd.f32 %v4193_v11, %v4110_v63  ;;  %v14258_v7 = vpop.f32.mrb[150].mxu0  ;;  %v4793_v38 = vld [vmem:[#allocation5 + $0x10] sm:$0xff] }
 0x2a3   : > { %4243 = vst.msk [vmem:[#allocation5 + $0x30] sm:$0xff] %vm1504_vm7, %v4219_v22  ;;  %v4220_v51 = vadd.f32 %v14258_v7, %v4196_v5  ;;  %v4817_v18 = vadd.f32 %v16515_v13, %v4793_v38  ;;  %v4113_v58 = vpop.f32.mrb[151].mxu0  ;;  %v4791_v46 = vld [vmem:[#allocation5] sm:$0xff] }
 0x2a4   : > { %4241 = vst.msk [vmem:[#allocation5 + $0x20] sm:$0xff] %vm1504_vm7, %v4217_v24  ;;  %v4218_v26 = vadd.f32 %v4194_v27, %v4113_v58  ;;  %v4815_v45 = vadd.f32 %v4791_v46, %v16517_v19  ;;  %v4794_v2 = vld [vmem:[#allocation5 + $0x18] sm:$0xff]  ;;  %v4199_v19 = vld [vmem:[#allocation5 + $0x50] sm:$0xff]  ;;  %v4201_v22 = vld [vmem:[#allocation5 + $0x60] sm:$0xff] }
 0x2a5   : > { %4244 = vst.msk [vmem:[#allocation5 + $0x38] sm:$0xff] %vm1504_vm7, %v4220_v51  ;;  %4841 = vst.msk [vmem:[#allocation5 + $0x10] sm:$0xff] %vm1504_vm7, %v4817_v18  ;;  %v4818_v62 = vadd.f32 %v16519_v4, %v4794_v2  ;;  %v4792_v0 = vld [vmem:[#allocation5 + $0x8] sm:$0xff]  ;;  %v4204_v24 = vld [vmem:[#allocation5 + $0x78] sm:$0xff] }
 0x2a6   : > { %4242 = vst.msk [vmem:[#allocation5 + $0x28] sm:$0xff] %vm1504_vm7, %v4218_v26  ;;  %4839 = vst.msk [vmem:[#allocation5] sm:$0xff] %vm1504_vm7, %v4815_v45  ;;  %v4816_v13 = vadd.f32 %v4792_v0, %v16521_v52  ;;  %v4198_v52 = vld [vmem:[#allocation5 + $0x48] sm:$0xff]  ;;  %v4205_v0 = vld [vmem:[#allocation5 + $0x80] sm:$0xff] }
 0x2a7   : > { %4842 = vst.msk [vmem:[#allocation5 + $0x18] sm:$0xff] %vm1504_vm7, %v4818_v62 }
 0x2a8   : > { %4840 = vst.msk [vmem:[#allocation5 + $0x8] sm:$0xff] %vm1504_vm7, %v4816_v13  ;;  %v14261_v16 = vpop.f32.mrb[152].mxu0 }
 0x2a9   : > { %v4223_v21 = vadd.f32 %v14261_v16, %v4199_v19  ;;  %v4126_v17 = vpop.f32.mrb[153].mxu0  ;;  %v4208_v19 = vld [vmem:[#allocation5 + $0x98] sm:$0xff] }
 0x2aa   : > { %v4221_v31 = vadd.f32 %v4197_v61, %v4126_v17  ;;  %v14262_v42 = vpop.f32.mrb[154].mxu0  ;;  %v4797_v4 = vld [vmem:[#allocation5 + $0x30] sm:$0xff] }
 0x2ab   : > { %4247 = vst.msk [vmem:[#allocation5 + $0x50] sm:$0xff] %vm1504_vm7, %v4223_v21  ;;  %v4224_v36 = vadd.f32 %v14262_v42, %v4200_v44  ;;  %v4821_v32 = vadd.f32 %v16527_v8, %v4797_v4  ;;  %v4129_v54 = vpop.f32.mrb[155].mxu0  ;;  %v4795_v34 = vld [vmem:[#allocation5 + $0x20] sm:$0xff] }
 0x2ac   : > { %4245 = vst.msk [vmem:[#allocation5 + $0x40] sm:$0xff] %vm1504_vm7, %v4221_v31  ;;  %v4222_v47 = vadd.f32 %v4198_v52, %v4129_v54  ;;  %v4819_v40 = vadd.f32 %v4795_v34, %v16529_v10  ;;  %v4798_v49 = vld [vmem:[#allocation5 + $0x38] sm:$0xff]  ;;  %v4203_v10 = vld [vmem:[#allocation5 + $0x70] sm:$0xff] }
 0x2ad   : > { %4248 = vst.msk [vmem:[#allocation5 + $0x58] sm:$0xff] %vm1504_vm7, %v4224_v36  ;;  %4845 = vst.msk [vmem:[#allocation5 + $0x30] sm:$0xff] %vm1504_vm7, %v4821_v32  ;;  %v4822_v30 = vadd.f32 %v16531_v29, %v4798_v49  ;;  %v4796_v53 = vld [vmem:[#allocation5 + $0x28] sm:$0xff] }
 0x2ae   : > { %4246 = vst.msk [vmem:[#allocation5 + $0x48] sm:$0xff] %vm1504_vm7, %v4222_v47  ;;  %4843 = vst.msk [vmem:[#allocation5 + $0x20] sm:$0xff] %vm1504_vm7, %v4819_v40  ;;  %v4820_v8 = vadd.f32 %v4796_v53, %v16534_v43  ;;  %v4202_v43 = vld [vmem:[#allocation5 + $0x68] sm:$0xff]  ;;  %v4209_v47 = vld [vmem:[#allocation5 + $0xa0] sm:$0xff] }
 0x2af   : > { %4846 = vst.msk [vmem:[#allocation5 + $0x38] sm:$0xff] %vm1504_vm7, %v4822_v30  ;;  %v4212_v30 = vld [vmem:[#allocation5 + $0xb8] sm:$0xff] }
 0x2b0   : > { %4844 = vst.msk [vmem:[#allocation5 + $0x28] sm:$0xff] %vm1504_vm7, %v4820_v8  ;;  %v14265_v39 = vpop.f32.mrb[156].mxu0 }
 0x2b1   : > { %v4227_v33 = vadd.f32 %v14265_v39, %v4203_v10  ;;  %v4142_v9 = vpop.f32.mrb[157].mxu0 }
 0x2b2   : > { %v4225_v63 = vadd.f32 %v4201_v22, %v4142_v9  ;;  %v14266_v11 = vpop.f32.mrb[158].mxu0  ;;  %v4801_v29 = vld [vmem:[#allocation5 + $0x50] sm:$0xff] }
 0x2b3   : > { %4251 = vst.msk [vmem:[#allocation5 + $0x70] sm:$0xff] %vm1504_vm7, %v4227_v33  ;;  %v4228_v7 = vadd.f32 %v14266_v11, %v4204_v24  ;;  %v4825_v5 = vadd.f32 %v16539_v1, %v4801_v29  ;;  %v4145_v38 = vpop.f32.mrb[159].mxu0  ;;  %v4799_v51 = vld [vmem:[#allocation5 + $0x40] sm:$0xff] }
 0x2b4   : > { %4249 = vst.msk [vmem:[#allocation5 + $0x60] sm:$0xff] %vm1504_vm7, %v4225_v63  ;;  %v4226_v18 = vadd.f32 %v4202_v43, %v4145_v38  ;;  %v4823_v58 = vadd.f32 %v4799_v51, %v16541_v25  ;;  %v4802_v27 = vld [vmem:[#allocation5 + $0x58] sm:$0xff]  ;;  %v4207_v25 = vld [vmem:[#allocation5 + $0x90] sm:$0xff] }
 0x2b5   : > { %4252 = vst.msk [vmem:[#allocation5 + $0x78] sm:$0xff] %vm1504_vm7, %v4228_v7  ;;  %4849 = vst.msk [vmem:[#allocation5 + $0x50] sm:$0xff] %vm1504_vm7, %v4825_v5  ;;  %v4826_v46 = vadd.f32 %v16543_v37, %v4802_v27  ;;  %v4800_v26 = vld [vmem:[#allocation5 + $0x48] sm:$0xff]  ;;  %v5225_v5 = vld [vmem:[#allocation5] sm:$0xff] }
 0x2b6   : > { %4250 = vst.msk [vmem:[#allocation5 + $0x68] sm:$0xff] %vm1504_vm7, %v4226_v18  ;;  %4847 = vst.msk [vmem:[#allocation5 + $0x40] sm:$0xff] %vm1504_vm7, %v4823_v58  ;;  %v4824_v1 = vadd.f32 %v4800_v26, %v16546_v6  ;;  %v4206_v6 = vld [vmem:[#allocation5 + $0x88] sm:$0xff] }
 0x2b7   : > { %4850 = vst.msk [vmem:[#allocation5 + $0x58] sm:$0xff] %vm1504_vm7, %v4826_v46  ;;  %v5226_v46 = vld [vmem:[#allocation5 + $0x8] sm:$0xff] }
 0x2b8   : > { %4848 = vst.msk [vmem:[#allocation5 + $0x48] sm:$0xff] %vm1504_vm7, %v4824_v1  ;;  %v14269_v45 = vpop.f32.mrb[160].mxu0 }
 0x2b9   : > { %v4231_v2 = vadd.f32 %v14269_v45, %v4207_v25  ;;  %v4158_v62 = vpop.f32.mrb[161].mxu0 }
 0x2ba   : > { %v4229_v13 = vadd.f32 %v4205_v0, %v4158_v62  ;;  %v14270_v16 = vpop.f32.mrb[162].mxu0  ;;  %v4805_v37 = vld [vmem:[#allocation5 + $0x70] sm:$0xff] }
 0x2bb   : > { %4255 = vst.msk [vmem:[#allocation5 + $0x90] sm:$0xff] %vm1504_vm7, %v4231_v2  ;;  %v4232_v21 = vadd.f32 %v14270_v16, %v4208_v19  ;;  %v4829_v17 = vadd.f32 %v16551_v41, %v4805_v37  ;;  %v4161_v61 = vpop.f32.mrb[163].mxu0  ;;  %v4803_v31 = vld [vmem:[#allocation5 + $0x60] sm:$0xff]  ;;  %v5231_v0 = vld [vmem:[#allocation5 + $0x30] sm:$0xff] }
 0x2bc   : > { %4253 = vst.msk [vmem:[#allocation5 + $0x80] sm:$0xff] %vm1504_vm7, %v4229_v13  ;;  %v4230_v42 = vadd.f32 %v4206_v6, %v4161_v61  ;;  %v4827_v44 = vadd.f32 %v4803_v31, %v16553_v50  ;;  %v4806_v4 = vld [vmem:[#allocation5 + $0x78] sm:$0xff]  ;;  %v4211_v50 = vld [vmem:[#allocation5 + $0xb0] sm:$0xff]  ;;  %v5229_v16 = vld [vmem:[#allocation5 + $0x20] sm:$0xff] }
 0x2bd   : > { %4256 = vst.msk [vmem:[#allocation5 + $0x98] sm:$0xff] %vm1504_vm7, %v4232_v21  ;;  %4853 = vst.msk [vmem:[#allocation5 + $0x70] sm:$0xff] %vm1504_vm7, %v4829_v17  ;;  %v4830_v36 = vadd.f32 %v16556_v14, %v4806_v4  ;;  %v4804_v32 = vld [vmem:[#allocation5 + $0x68] sm:$0xff]  ;;  %v5232_v17 = vld [vmem:[#allocation5 + $0x38] sm:$0xff] }
 0x2be   : > { %4254 = vst.msk [vmem:[#allocation5 + $0x88] sm:$0xff] %vm1504_vm7, %v4230_v42  ;;  %4851 = vst.msk [vmem:[#allocation5 + $0x60] sm:$0xff] %vm1504_vm7, %v4827_v44  ;;  %v4828_v41 = vadd.f32 %v4804_v32, %v16559_v28  ;;  %v4210_v28 = vld [vmem:[#allocation5 + $0xa8] sm:$0xff] }
 0x2bf   : > { %4854 = vst.msk [vmem:[#allocation5 + $0x78] sm:$0xff] %vm1504_vm7, %v4830_v36  ;;  %v5230_v42 = vld [vmem:[#allocation5 + $0x28] sm:$0xff] }
 0x2c0   : > { %4852 = vst.msk [vmem:[#allocation5 + $0x68] sm:$0xff] %vm1504_vm7, %v4828_v41  ;;  %v14273_v54 = vpop.f32.mrb[164].mxu0 }
 0x2c1   : > { %v4235_v52 = vadd.f32 %v14273_v54, %v4211_v50  ;;  %v4174_v34 = vpop.f32.mrb[165].mxu0 }
 0x2c2   : > { %v4233_v40 = vadd.f32 %v4209_v47, %v4174_v34  ;;  %v14274_v49 = vpop.f32.mrb[166].mxu0  ;;  %v4809_v14 = vld [vmem:[#allocation5 + $0x90] sm:$0xff] }
 0x2c3   : > { %4259 = vst.msk [vmem:[#allocation5 + $0xb0] sm:$0xff] %vm1504_vm7, %v4235_v52  ;;  %v4236_v53 = vadd.f32 %v14274_v49, %v4212_v30  ;;  %v4833_v8 = vadd.f32 %v16563_v15, %v4809_v14  ;;  %v4177_v39 = vpop.f32.mrb[167].mxu0  ;;  %v4807_v10 = vld [vmem:[#allocation5 + $0x80] sm:$0xff]  ;;  %v5235_v14 = vld [vmem:[#allocation5 + $0x50] sm:$0xff] }
 0x2c4   : > { %4257 = vst.msk [vmem:[#allocation5 + $0xa0] sm:$0xff] %vm1504_vm7, %v4233_v40  ;;  %v4234_v33 = vadd.f32 %v4210_v28, %v4177_v39  ;;  %v4831_v9 = vadd.f32 %v4807_v10, %v16565_v23  ;;  %v4810_v22 = vld [vmem:[#allocation5 + $0x98] sm:$0xff]  ;;  %v5227_v23 = vld [vmem:[#allocation5 + $0x10] sm:$0xff] }
 0x2c5   : > { %4260 = vst.msk [vmem:[#allocation5 + $0xb8] sm:$0xff] %vm1504_vm7, %v4236_v53  ;;  %4857 = vst.msk [vmem:[#allocation5 + $0x90] sm:$0xff] %vm1504_vm7, %v4833_v8  ;;  %v4834_v63 = vadd.f32 %v16568_v35, %v4810_v22  ;;  %v4808_v11 = vld [vmem:[#allocation5 + $0x88] sm:$0xff]  ;;  %v5228_v35 = vld [vmem:[#allocation5 + $0x18] sm:$0xff] }
 0x2c6   : > { %4258 = vst.msk [vmem:[#allocation5 + $0xa8] sm:$0xff] %vm1504_vm7, %v4234_v33  ;;  %4855 = vst.msk [vmem:[#allocation5 + $0x80] sm:$0xff] %vm1504_vm7, %v4831_v9  ;;  %v4832_v15 = vadd.f32 %v4808_v11, %v16571_v55  ;;  %v5233_v33 = vld [vmem:[#allocation5 + $0x40] sm:$0xff] }
 0x2c7   : > { %4858 = vst.msk [vmem:[#allocation5 + $0x98] sm:$0xff] %vm1504_vm7, %v4834_v63 }
 0x2c8   : > { %4856 = vst.msk [vmem:[#allocation5 + $0x88] sm:$0xff] %vm1504_vm7, %v4832_v15  ;;  %v14305_v24 = vpop.f32.mrb[168].mxu0 }
 0x2c9   : > { %v5251_v29 = vadd.f32 %v14305_v24, %v5227_v23  ;;  %v5130_v7 = vpop.f32.mrb[169].mxu0 }
 0x2ca   : > { %v5249_v38 = vadd.f32 %v5225_v5, %v5130_v7  ;;  %v4813_v43 = vld [vmem:[#allocation5 + $0xb0] sm:$0xff]  ;;  %v14306_v51 = vpop.f32.mrb[170].mxu0 }
 0x2cb   : > { %5275 = vst.msk [vmem:[#allocation5 + $0x10] sm:$0xff] %vm1504_vm7, %v5251_v29  ;;  %v4837_v18 = vadd.f32 %v16577_v56, %v4813_v43  ;;  %v5252_v58 = vadd.f32 %v14306_v51, %v5228_v35  ;;  %v4811_v27 = vld [vmem:[#allocation5 + $0xa0] sm:$0xff]  ;;  %v5133_v55 = vpop.f32.mrb[171].mxu0  ;;  %v5697_v35 = vld [vmem:[#allocation3 + $0xc] sm:$0xf] }
 0x2cc   : > { %5273 = vst.msk [vmem:[#allocation5] sm:$0xff] %vm1504_vm7, %v5249_v38  ;;  %v4835_v26 = vadd.f32 %v4811_v27, %v16580_v3  ;;  %v5250_v1 = vadd.f32 %v5226_v46, %v5133_v55  ;;  %v4814_v45 = vld [vmem:[#allocation5 + $0xb8] sm:$0xff] }
 0x2cd   : > { %4861 = vst.msk [vmem:[#allocation5 + $0xb0] sm:$0xff] %vm1504_vm7, %v4837_v18  ;;  %5276 = vst.msk [vmem:[#allocation5 + $0x18] sm:$0xff] %vm1504_vm7, %v5252_v58  ;;  %v4838_v25 = vadd.f32 %v16583_v57, %v4814_v45  ;;  %v4812_v2 = vld [vmem:[#allocation5 + $0xa8] sm:$0xff]  ;;  %v16697_v3 = vld [vmem:[%s18187_s4] ss:$0 sm:$0xff] }
 0x2ce   : > { %4859 = vst.msk [vmem:[#allocation5 + $0xa0] sm:$0xff] %vm1504_vm7, %v4835_v26  ;;  %5274 = vst.msk [vmem:[#allocation5 + $0x8] sm:$0xff] %vm1504_vm7, %v5250_v1  ;;  %v4836_v56 = vadd.f32 %v4812_v2, %v16585_v12  ;;  %v5689_v1 = vld [vmem:[#allocation3] sm:$0xf] }
 0x2cf   : > { %4862 = vst.msk [vmem:[#allocation5 + $0xb8] sm:$0xff] %vm1504_vm7, %v4838_v25 }
 0x2d0   : > { %4860 = vst.msk [vmem:[#allocation5 + $0xa8] sm:$0xff] %vm1504_vm7, %v4836_v56  ;;  %v14309_v62 = vpop.f32.mrb[172].mxu0 }
 0x2d1   : > { %v5255_v13 = vadd.f32 %v14309_v62, %v5231_v0  ;;  %v5146_v57 = vpop.f32.mrb[173].mxu0  ;;  %v5701_v62 = vld [vmem:[#allocation3 + $0x14] sm:$0x1] }
 0x2d2   : > { %v5299_v19 = vld [vmem:[#allocation5 + $0x10] sm:$0xff]  ;;  %v5253_v37 = vadd.f32 %v5229_v16, %v5146_v57  ;;  %v14310_v21 = vpop.f32.mrb[174].mxu0 }
 0x2d3   : > { %v5329_v12 = vadd.f32 %v16697_v3, %v5299_v19  ;;  %v5297_v61 = vld [vmem:[#allocation5] sm:$0xff]  ;;  %5279 = vst.msk [vmem:[#allocation5 + $0x30] sm:$0xff] %vm1504_vm7, %v5255_v13  ;;  %v5256_v6 = vadd.f32 %v14310_v21, %v5232_v17  ;;  %v5149_v31 = vpop.f32.mrb[175].mxu0 }
 0x2d4   : > { %v5327_v44 = vadd.f32 %v16697_v3, %v5297_v61  ;;  %v5300_v4 = vld [vmem:[#allocation5 + $0x18] sm:$0xff]  ;;  %5277 = vst.msk [vmem:[#allocation5 + $0x20] sm:$0xff] %vm1504_vm7, %v5253_v37  ;;  %v5254_v36 = vadd.f32 %v5230_v42, %v5149_v31  ;;  %v5694_v37 = vld [vmem:[#allocation3 + $0x8] sm:$0x1] }
 0x2d5   : > { %v5353_v32 = vmax.f32 %v5329_v12, 0.0  ;;  %v5330_v41 = vadd.f32 %v16697_v3, %v5300_v4  ;;  %v5298_v54 = vld [vmem:[#allocation5 + $0x8] sm:$0xff]  ;;  %5280 = vst.msk [vmem:[#allocation5 + $0x38] sm:$0xff] %vm1504_vm7, %v5256_v6 }
 0x2d6   : > { %v5351_v50 = vmax.f32 %v5327_v44, 0.0  ;;  %v5328_v52 = vadd.f32 %v16697_v3, %v5298_v54  ;;  %5278 = vst.msk [vmem:[#allocation5 + $0x28] sm:$0xff] %vm1504_vm7, %v5254_v36 }
 0x2d7   : > { %v13735_v34 = vpack.c.bf16 %v5353_v32, %v5353_v32  ;;  %v5354_v47 = vmax.f32 %v5330_v41, 0.0 }
 0x2d8   : > { %v13733_v40 = vpack.c.bf16 %v5351_v50, %v5351_v50  ;;  %v5352_v49 = vmax.f32 %v5328_v52, 0.0  ;;  %v14313_v30 = vpop.f32.mrb[176].mxu0 }
 0x2d9   : > { %v5465_v53 = vshrl.u32 %v13735_v34, 16  ;;  %v5468_v8 = vshll.u32 %v13735_v34, 16  ;;  %v13736_v39 = vpack.c.bf16 %v5354_v47, %v5354_v47  ;;  %v5259_v28 = vadd.f32 %v14313_v30, %v5235_v14  ;;  %v5162_v10 = vpop.f32.mrb[177].mxu0 }
 0x2da   : > { %v5448_v9 = vshrl.u32 %v13733_v40, 16  ;;  %v5451_v22 = vshll.u32 %v13733_v40, 16  ;;  %v13734_v63 = vpack.c.bf16 %v5352_v49, %v5352_v49  ;;  %v5303_v11 = vld [vmem:[#allocation5 + $0x30] sm:$0xff]  ;;  %v5257_v15 = vadd.f32 %v5233_v33, %v5162_v10  ;;  %v16708_v24 = vpop.f32.mrb[178].mxu0  ;;  %v5234_v10 = vld [vmem:[#allocation5 + $0x48] sm:$0xff] }
 0x2db   : > { %v5467_v23 = vrot.slane %v5465_v53, 7  ;;  %v5473_v29 = vshrl.u32 %v13736_v39, 16  ;;  %v5476_v7 = vshll.u32 %v13736_v39, 16  ;;  %v5333_v5 = vadd.f32 %v16697_v3, %v5303_v11  ;;  %v5301_v38 = vld [vmem:[#allocation5 + $0x20] sm:$0xff]  ;;  %5283 = vst.msk [vmem:[#allocation5 + $0x50] sm:$0xff] %vm1504_vm7, %v5259_v28  ;;  %v5165_v43 = vpop.f32.mrb[179].mxu0 }
 0x2dc   : > { %v5450_v18 = vrot.slane %v5448_v9, 7  ;;  %v5456_v58 = vshrl.u32 %v13734_v63, 16  ;;  %v5459_v27 = vshll.u32 %v13734_v63, 16  ;;  %v5331_v55 = vadd.f32 %v16697_v3, %v5301_v38  ;;  %5281 = vst.msk [vmem:[#allocation5 + $0x40] sm:$0xff] %vm1504_vm7, %v5257_v15  ;;  %v5304_v31 = vld [vmem:[#allocation5 + $0x38] sm:$0xff] }
 0x2dd   : > { %v5470_v46 = vor.u32 %v5468_v8, %v5467_v23  ;;  %v5471_v26 = vrot.slane %v5467_v23, 4  ;;  %v5475_v45 = vrot.slane %v5473_v29, 7  ;;  %v5357_v25 = vmax.f32 %v5333_v5, 0.0  ;;  %v5302_v42 = vld [vmem:[#allocation5 + $0x28] sm:$0xff]  ;;  %v5236_v28 = vld [vmem:[#allocation5 + $0x58] sm:$0xff] }
 0x2de   : > { %v5453_v2 = vor.u32 %v5451_v22, %v5450_v18  ;;  %v5454_v56 = vrot.slane %v5450_v18, 4  ;;  %v5458_v0 = vrot.slane %v5456_v58, 7  ;;  %v5355_v13 = vmax.f32 %v5331_v55, 0.0  ;;  %v5711_v9 = vld [vmem:[#allocation3 + $0x24] sm:$0xf]  ;;  %v5239_v55 = vld [vmem:[#allocation5 + $0x70] sm:$0xff] }
 0x2df   : > { %v5698_v57 = vsel %vm16714_vm9, %v5470_v46, %v5697_v35  ;;  %v5478_v16 = vor.u32 %v5476_v7, %v5475_v45  ;;  %v5480_v19 = vrot.slane %v5475_v45, 4  ;;  %v13739_v21 = vpack.c.bf16 %v5357_v25, %v5357_v25  ;;  %v5704_v7 = vld [vmem:[#allocation3 + $0x18] sm:$0xf] }
 0x2e0   : > { %5699 = vst [vmem:[#allocation3 + $0xc] sm:$0xf] %v5698_v57  ;;  %v5690_v17 = vsel %vm16714_vm9, %v5453_v2, %v5689_v1  ;;  %v5461_v12 = vor.u32 %v5459_v27, %v5458_v0  ;;  %v5463_v61 = vrot.slane %v5458_v0, 4  ;;  %v13737_v6 = vpack.c.bf16 %v5355_v13, %v5355_v13  ;;  %v14317_v44 = vpop.f32.mrb[180].mxu0  ;;  %v5237_v1 = vld [vmem:[#allocation5 + $0x60] sm:$0xff] }
 0x2e1   : > { %5691 = vst [vmem:[#allocation3] sm:$0xf] %v5690_v17  ;;  %v5479_v4 = vsel %vm15516_vm11, %v5471_v26, %v5478_v16  ;;  %v5702_v36 = vsel %vm15363_vm6, %v5480_v19, %v5701_v62  ;;  %v5499_v32 = vshrl.u32 %v13739_v21, 16  ;;  %v5502_v41 = vshll.u32 %v13739_v21, 16  ;;  %v5178_v54 = vpop.f32.mrb[181].mxu0  ;;  %v5240_v19 = vld [vmem:[#allocation5 + $0x78] sm:$0xff] }
 0x2e2   : > { %5700 = vst.msk [vmem:[#allocation3 + $0x10] sm:$0xf] %vm5687_vm8, %v5479_v4  ;;  %5703 = vst [vmem:[#allocation3 + $0x14] sm:$0x1] %v5702_v36  ;;  %v5462_v50 = vsel %vm15516_vm11, %v5454_v56, %v5461_v12  ;;  %v5695_v52 = vsel %vm15363_vm6, %v5463_v61, %v5694_v37  ;;  %v5482_v34 = vshrl.u32 %v13737_v6, 16  ;;  %v5485_v47 = vshll.u32 %v13737_v6, 16 }
 0x2e3   : > { %v5307_v40 = vld [vmem:[#allocation5 + $0x50] sm:$0xff]  ;;  %v14318_v49 = vpop.f32.mrb[182].mxu0  ;;  %5693 = vst.msk [vmem:[#allocation3 + $0x4] sm:$0xf] %vm5687_vm8, %v5462_v50  ;;  %5696 = vst [vmem:[#allocation3 + $0x8] sm:$0x1] %v5695_v52  ;;  %v5334_v14 = vadd.f32 %v16697_v3, %v5304_v31  ;;  %v5332_v53 = vadd.f32 %v16697_v3, %v5302_v42  ;;  %v5260_v11 = vadd.f32 %v16708_v24, %v5236_v28 }
 0x2e4   : > { %v16734_v30 = vrot.slane %v5499_v32, 7  ;;  %v5337_v8 = vadd.f32 %v16697_v3, %v5307_v40  ;;  %v5305_v39 = vld [vmem:[#allocation5 + $0x40] sm:$0xff]  ;;  %v5181_v33 = vpop.f32.mrb[183].mxu0  ;;  %v16739_v22 = vrot.slane %v5482_v34, 7  ;;  %v5258_v15 = vadd.f32 %v5234_v10, %v5165_v43  ;;  %v5715_v21 = vld [vmem:[#allocation3 + $0x2c] sm:$0x1] }
 0x2e5   : > { %v5335_v63 = vadd.f32 %v16697_v3, %v5305_v39  ;;  %v5358_v5 = vmax.f32 %v5334_v14, 0.0  ;;  %v5356_v38 = vmax.f32 %v5332_v53, 0.0  ;;  %5284 = vst.msk [vmem:[#allocation5 + $0x58] sm:$0xff] %vm1504_vm7, %v5260_v11  ;;  %v5263_v26 = vadd.f32 %v14317_v44, %v5239_v55  ;;  %v5238_v31 = vld [vmem:[#allocation5 + $0x68] sm:$0xff]  ;;  %v5708_v52 = vld [vmem:[#allocation3 + $0x20] sm:$0x1] }
 0x2e6   : > { %v5504_v23 = vor.u32 %v5502_v41, %v16734_v30  ;;  %v5505_v29 = vrot.slane %v16734_v30, 4  ;;  %v5487_v35 = vor.u32 %v5485_v47, %v16739_v22  ;;  %v5488_v18 = vrot.slane %v16739_v22, 4  ;;  %5282 = vst.msk [vmem:[#allocation5 + $0x48] sm:$0xff] %vm1504_vm7, %v5258_v15  ;;  %v5243_v41 = vld [vmem:[#allocation5 + $0x90] sm:$0xff]  ;;  %v5725_v47 = vld [vmem:[#allocation3 + $0x3c] sm:$0xf] }
 0x2e7   : > { %v5361_v58 = vmax.f32 %v5337_v8, 0.0  ;;  %v5359_v27 = vmax.f32 %v5335_v63, 0.0  ;;  %v13740_v43 = vpack.c.bf16 %v5358_v5, %v5358_v5  ;;  %v13738_v46 = vpack.c.bf16 %v5356_v38, %v5356_v38  ;;  %5287 = vst.msk [vmem:[#allocation5 + $0x70] sm:$0xff] %vm1504_vm7, %v5263_v26  ;;  %v5244_v5 = vld [vmem:[#allocation5 + $0x98] sm:$0xff]  ;;  %v5247_v55 = vld [vmem:[#allocation5 + $0xb0] sm:$0xff] }
 0x2e8   : > { %v5712_v24 = vsel %vm16714_vm9, %v5504_v23, %v5711_v9  ;;  %v5705_v45 = vsel %vm16714_vm9, %v5487_v35, %v5704_v7  ;;  %v5261_v56 = vadd.f32 %v5237_v1, %v5178_v54  ;;  %v14321_v62 = vpop.f32.mrb[184].mxu0  ;;  %v5264_v36 = vadd.f32 %v14318_v49, %v5240_v19  ;;  %v5241_v54 = vld [vmem:[#allocation5 + $0x80] sm:$0xff]  ;;  %v5718_v9 = vld [vmem:[#allocation3 + $0x30] sm:$0xf] }
 0x2e9   : > { %5713 = vst [vmem:[#allocation3 + $0x24] sm:$0xf] %v5712_v24  ;;  %v13743_v25 = vpack.c.bf16 %v5361_v58, %v5361_v58  ;;  %v13741_v2 = vpack.c.bf16 %v5359_v27, %v5359_v27  ;;  %5706 = vst [vmem:[#allocation3 + $0x18] sm:$0xf] %v5705_v45  ;;  %v5507_v0 = vshrl.u32 %v13740_v43, 16  ;;  %v5510_v13 = vshll.u32 %v13740_v43, 16 }
 0x2ea   : > { %v5490_v57 = vshrl.u32 %v13738_v46, 16  ;;  %v5493_v16 = vshll.u32 %v13738_v46, 16  ;;  %v5194_v37 = vpop.f32.mrb[185].mxu0  ;;  %5285 = vst.msk [vmem:[#allocation5 + $0x60] sm:$0xff] %vm1504_vm7, %v5261_v56  ;;  %v5262_v32 = vadd.f32 %v5238_v31, %v5181_v33  ;;  %v5267_v14 = vadd.f32 %v14321_v62, %v5243_v41  ;;  %5288 = vst.msk [vmem:[#allocation5 + $0x78] sm:$0xff] %vm1504_vm7, %v5264_v36  ;;  %v5242_v58 = vld [vmem:[#allocation5 + $0x88] sm:$0xff] }
 0x2eb   : > { %v5533_v17 = vshrl.u32 %v13743_v25, 16  ;;  %v5536_v12 = vshll.u32 %v13743_v25, 16  ;;  %v5516_v61 = vshrl.u32 %v13741_v2, 16  ;;  %v5519_v6 = vshll.u32 %v13741_v2, 16  ;;  %v14322_v42 = vpop.f32.mrb[186].mxu0  ;;  %v5245_v25 = vld [vmem:[#allocation5 + $0xa0] sm:$0xff] }
 0x2ec   : > { %v5509_v44 = vrot.slane %v5507_v0, 7  ;;  %v5492_v4 = vrot.slane %v5490_v57, 7  ;;  %v5197_v50 = vpop.f32.mrb[187].mxu0  ;;  %v5265_v53 = vadd.f32 %v5241_v54, %v5194_v37  ;;  %v5308_v22 = vld [vmem:[#allocation5 + $0x58] sm:$0xff]  ;;  %5286 = vst.msk [vmem:[#allocation5 + $0x68] sm:$0xff] %vm1504_vm7, %v5262_v32  ;;  %5291 = vst.msk [vmem:[#allocation5 + $0x90] sm:$0xff] %vm1504_vm7, %v5267_v14  ;;  %v5268_v46 = vadd.f32 %v14322_v42, %v5244_v5 }
 0x2ed   : > { %v16755_v34 = vrot.slane %v5533_v17, 7  ;;  %v16757_v40 = vrot.slane %v5516_v61, 7  ;;  %v5306_v63 = vld [vmem:[#allocation5 + $0x48] sm:$0xff]  ;;  %v5338_v38 = vadd.f32 %v16697_v3, %v5308_v22  ;;  %v5266_v26 = vadd.f32 %v5242_v58, %v5197_v50  ;;  %v5248_v57 = vld [vmem:[#allocation5 + $0xb8] sm:$0xff] }
 0x2ee   : > { %v5512_v8 = vor.u32 %v5510_v13, %v5509_v44  ;;  %v5514_v39 = vrot.slane %v5509_v44, 4  ;;  %v5495_v28 = vor.u32 %v5493_v16, %v5492_v4  ;;  %v5497_v10 = vrot.slane %v5492_v4, 4  ;;  %5289 = vst.msk [vmem:[#allocation5 + $0x80] sm:$0xff] %vm1504_vm7, %v5265_v53  ;;  %5292 = vst.msk [vmem:[#allocation5 + $0x98] sm:$0xff] %vm1504_vm7, %v5268_v46  ;;  %v5246_v17 = vld [vmem:[#allocation5 + $0xa8] sm:$0xff] }
 0x2ef   : > { %v5538_v49 = vor.u32 %v5536_v12, %v16755_v34  ;;  %v5521_v33 = vor.u32 %v5519_v6, %v16757_v40  ;;  %v5336_v35 = vadd.f32 %v16697_v3, %v5306_v63  ;;  %v5362_v2 = vmax.f32 %v5338_v38, 0.0  ;;  %5290 = vst.msk [vmem:[#allocation5 + $0x88] sm:$0xff] %vm1504_vm7, %v5266_v26  ;;  %v5722_v63 = vld [vmem:[#allocation3 + $0x38] sm:$0x1]  ;;  %v5732_v26 = vld [vmem:[#allocation3 + $0x48] sm:$0xf] }
 0x2f0   : > { %v5513_v11 = vsel %vm15516_vm11, %v5505_v29, %v5512_v8  ;;  %v5716_v15 = vsel %vm15363_vm6, %v5514_v39, %v5715_v21  ;;  %v5496_v23 = vsel %vm15516_vm11, %v5488_v18, %v5495_v28  ;;  %v5709_v7 = vsel %vm15363_vm6, %v5497_v10, %v5708_v52  ;;  %v5311_v18 = vld [vmem:[#allocation5 + $0x70] sm:$0xff]  ;;  %v14325_v27 = vpop.f32.mrb[188].mxu0 }
 0x2f1   : > { %5714 = vst.msk [vmem:[#allocation3 + $0x28] sm:$0xf] %vm5687_vm8, %v5513_v11  ;;  %5717 = vst [vmem:[#allocation3 + $0x2c] sm:$0x1] %v5716_v15  ;;  %v5726_v30 = vsel %vm16714_vm9, %v5538_v49, %v5725_v47  ;;  %v5719_v29 = vsel %vm16714_vm9, %v5521_v33, %v5718_v9  ;;  %v5341_v24 = vadd.f32 %v16697_v3, %v5311_v18  ;;  %v5309_v43 = vld [vmem:[#allocation5 + $0x60] sm:$0xff]  ;;  %v5210_v45 = vpop.f32.mrb[189].mxu0 }
 0x2f2   : > { %5707 = vst.msk [vmem:[#allocation3 + $0x1c] sm:$0xf] %vm5687_vm8, %v5496_v23  ;;  %5710 = vst [vmem:[#allocation3 + $0x20] sm:$0x1] %v5709_v7  ;;  %v5271_v1 = vadd.f32 %v14325_v27, %v5247_v55  ;;  %v5360_v56 = vmax.f32 %v5336_v35, 0.0  ;;  %v5339_v62 = vadd.f32 %v16697_v3, %v5309_v43  ;;  %v5269_v0 = vadd.f32 %v5245_v25, %v5210_v45  ;;  %v14326_v13 = vpop.f32.mrb[190].mxu0 }
 0x2f3   : > { %5727 = vst [vmem:[#allocation3 + $0x3c] sm:$0xf] %v5726_v30  ;;  %5720 = vst [vmem:[#allocation3 + $0x30] sm:$0xf] %v5719_v29  ;;  %v5539_v16 = vrot.slane %v16755_v34, 4  ;;  %v5365_v19 = vmax.f32 %v5341_v24, 0.0  ;;  %v5272_v37 = vadd.f32 %v14326_v13, %v5248_v57  ;;  %v13744_v12 = vpack.c.bf16 %v5362_v2, %v5362_v2 }
 0x2f4   : > { %5295 = vst.msk [vmem:[#allocation5 + $0xb0] sm:$0xff] %vm1504_vm7, %v5271_v1  ;;  %v5213_v21 = vpop.f32.mrb[191].mxu0  ;;  %v13742_v61 = vpack.c.bf16 %v5360_v56, %v5360_v56  ;;  %v5363_v6 = vmax.f32 %v5339_v62, 0.0  ;;  %v5312_v31 = vld [vmem:[#allocation5 + $0x78] sm:$0xff]  ;;  %v5310_v42 = vld [vmem:[#allocation5 + $0x68] sm:$0xff]  ;;  %5293 = vst.msk [vmem:[#allocation5 + $0xa0] sm:$0xff] %vm1504_vm7, %v5269_v0 }
 0x2f5   : > { %v5270_v44 = vadd.f32 %v5246_v17, %v5213_v21  ;;  %v5522_v4 = vrot.slane %v16757_v40, 4  ;;  %v13747_v36 = vpack.c.bf16 %v5365_v19, %v5365_v19  ;;  %v5342_v32 = vadd.f32 %v16697_v3, %v5312_v31  ;;  %v5315_v54 = vld [vmem:[#allocation5 + $0x90] sm:$0xff]  ;;  %5296 = vst.msk [vmem:[#allocation5 + $0xb8] sm:$0xff] %vm1504_vm7, %v5272_v37  ;;  %v5729_v40 = vld [vmem:[#allocation3 + $0x44] sm:$0x1]  ;;  %v5316_v1 = vld [vmem:[#allocation5 + $0x98] sm:$0xff] }
 0x2f6   : > { %v5340_v41 = vadd.f32 %v16697_v3, %v5310_v42  ;;  %v5541_v50 = vshrl.u32 %v13744_v12, 16  ;;  %v5544_v52 = vshll.u32 %v13744_v12, 16  ;;  %v5524_v34 = vshrl.u32 %v13742_v61, 16  ;;  %v5739_v29 = vld [vmem:[#allocation3 + $0x54] sm:$0xf]  ;;  %v5313_v27 = vld [vmem:[#allocation5 + $0x80] sm:$0xff] }
 0x2f7   : > { %v5527_v47 = vshll.u32 %v13742_v61, 16  ;;  %5294 = vst.msk [vmem:[#allocation5 + $0xa8] sm:$0xff] %vm1504_vm7, %v5270_v44  ;;  %v5567_v14 = vshrl.u32 %v13747_v36, 16  ;;  %v5570_v53 = vshll.u32 %v13747_v36, 16  ;;  %v13745_v8 = vpack.c.bf16 %v5363_v6, %v5363_v6  ;;  %v5314_v45 = vld [vmem:[#allocation5 + $0x88] sm:$0xff] }
 0x2f8   : > { %v5366_v39 = vmax.f32 %v5342_v32, 0.0  ;;  %v5543_v28 = vrot.slane %v5541_v50, 7  ;;  %v5526_v10 = vrot.slane %v5524_v34, 7  ;;  %v5364_v9 = vmax.f32 %v5340_v41, 0.0  ;;  %v5743_v13 = vld [vmem:[#allocation3 + $0x5c] sm:$0x1] }
 0x2f9   : > { %v5345_v22 = vadd.f32 %v16697_v3, %v5315_v54  ;;  %v5569_v49 = vrot.slane %v5567_v14, 7  ;;  %v5550_v33 = vshrl.u32 %v13745_v8, 16  ;;  %v5553_v11 = vshll.u32 %v13745_v8, 16  ;;  %v5736_v14 = vld [vmem:[#allocation3 + $0x50] sm:$0x1] }
 0x2fa   : > { %v13748_v15 = vpack.c.bf16 %v5366_v39, %v5366_v39  ;;  %v5546_v23 = vor.u32 %v5544_v52, %v5543_v28  ;;  %v5548_v7 = vrot.slane %v5543_v28, 4  ;;  %v5529_v5 = vor.u32 %v5527_v47, %v5526_v10 }
 0x2fb   : > { %v5531_v30 = vrot.slane %v5526_v10, 4  ;;  %v5572_v38 = vor.u32 %v5570_v53, %v5569_v49  ;;  %v5573_v35 = vrot.slane %v5569_v49, 4  ;;  %v5552_v18 = vrot.slane %v5550_v33, 7  ;;  %v5319_v44 = vld [vmem:[#allocation5 + $0xb0] sm:$0xff]  ;;  %v5317_v54 = vld [vmem:[#allocation5 + $0xa0] sm:$0xff] }
 0x2fc   : > { %v5575_v58 = vshrl.u32 %v13748_v15, 16  ;;  %v5547_v55 = vsel %vm15516_vm11, %v5539_v16, %v5546_v23  ;;  %v5730_v24 = vsel %vm15363_vm6, %v5548_v7, %v5729_v40  ;;  %v5530_v43 = vsel %vm15516_vm11, %v5522_v4, %v5529_v5 }
 0x2fd   : > { %v5723_v46 = vsel %vm15363_vm6, %v5531_v30, %v5722_v63  ;;  %5728 = vst.msk [vmem:[#allocation3 + $0x40] sm:$0xf] %vm5687_vm8, %v5547_v55  ;;  %5731 = vst [vmem:[#allocation3 + $0x44] sm:$0x1] %v5730_v24  ;;  %v5740_v25 = vsel %vm16714_vm9, %v5572_v38, %v5739_v29  ;;  %v5555_v2 = vor.u32 %v5553_v11, %v5552_v18  ;;  %v5556_v56 = vrot.slane %v5552_v18, 4 }
 0x2fe   : > { %5721 = vst.msk [vmem:[#allocation3 + $0x34] sm:$0xf] %vm5687_vm8, %v5530_v43  ;;  %5724 = vst [vmem:[#allocation3 + $0x38] sm:$0x1] %v5723_v46  ;;  %v5577_v62 = vrot.slane %v5575_v58, 7  ;;  %v5578_v0 = vshll.u32 %v13748_v15, 16  ;;  %v13746_v57 = vpack.c.bf16 %v5364_v9, %v5364_v9  ;;  %v5343_v19 = vadd.f32 %v16697_v3, %v5313_v27 }
 0x2ff   : > { %5741 = vst [vmem:[#allocation3 + $0x54] sm:$0xf] %v5740_v25  ;;  %v5369_v16 = vmax.f32 %v5345_v22, 0.0  ;;  %v5733_v37 = vsel %vm16714_vm9, %v5555_v2, %v5732_v26  ;;  %v5346_v17 = vadd.f32 %v16697_v3, %v5316_v1  ;;  %v5344_v12 = vadd.f32 %v16697_v3, %v5314_v45  ;;  %v5753_v63 = vld [vmem:[#allocation3 + $0x6c] sm:$0xf]  ;;  %v5320_v15 = vld [vmem:[#allocation5 + $0xb8] sm:$0xff] }
 0x300   : > { %v5582_v21 = vrot.slane %v5577_v62, 4  ;;  %5734 = vst [vmem:[#allocation3 + $0x48] sm:$0xf] %v5733_v37  ;;  %v5580_v61 = vor.u32 %v5578_v0, %v5577_v62  ;;  %v5558_v6 = vshrl.u32 %v13746_v57, 16  ;;  %v5561_v31 = vshll.u32 %v13746_v57, 16  ;;  %v5318_v26 = vld [vmem:[#allocation5 + $0xa8] sm:$0xff] }
 0x301   : > { %v13751_v42 = vpack.c.bf16 %v5369_v16, %v5369_v16  ;;  %v5367_v36 = vmax.f32 %v5343_v19, 0.0  ;;  %v5370_v32 = vmax.f32 %v5346_v17, 0.0  ;;  %v5368_v41 = vmax.f32 %v5344_v12, 0.0  ;;  %v5757_v55 = vld [vmem:[#allocation3 + $0x74] sm:$0x1] }
 0x302   : > { %v5744_v4 = vsel %vm15363_vm6, %v5582_v21, %v5743_v13  ;;  %v5581_v50 = vsel %vm15516_vm11, %v5573_v35, %v5580_v61  ;;  %v5560_v52 = vrot.slane %v5558_v6, 7  ;;  %v5349_v28 = vadd.f32 %v16697_v3, %v5319_v44  ;;  %v5746_v35 = vld [vmem:[#allocation3 + $0x60] sm:$0xf]  ;;  %v5750_v37 = vld [vmem:[#allocation3 + $0x68] sm:$0x1] }
 0x303   : > { %5745 = vst [vmem:[#allocation3 + $0x5c] sm:$0x1] %v5744_v4  ;;  %v5601_v34 = vshrl.u32 %v13751_v42, 16  ;;  %v5604_v47 = vshll.u32 %v13751_v42, 16  ;;  %5742 = vst.msk [vmem:[#allocation3 + $0x58] sm:$0xf] %vm5687_vm8, %v5581_v50  ;;  %v13749_v53 = vpack.c.bf16 %v5367_v36, %v5367_v36  ;;  %v13752_v8 = vpack.c.bf16 %v5370_v32, %v5370_v32 }
 0x304   : > { %v13750_v39 = vpack.c.bf16 %v5368_v41, %v5368_v41  ;;  %v5563_v40 = vor.u32 %v5561_v31, %v5560_v52  ;;  %v5565_v10 = vrot.slane %v5560_v52, 4  ;;  %v5347_v22 = vadd.f32 %v16697_v3, %v5317_v54 }
 0x305   : > { %v5603_v9 = vrot.slane %v5601_v34, 7  ;;  %v5584_v49 = vshrl.u32 %v13749_v53, 16  ;;  %v5587_v33 = vshll.u32 %v13749_v53, 16  ;;  %v5609_v11 = vshrl.u32 %v13752_v8, 16 }
 0x306   : > { %v5564_v23 = vsel %vm15516_vm11, %v5556_v56, %v5563_v40  ;;  %v5737_v7 = vsel %vm15363_vm6, %v5565_v10, %v5736_v14  ;;  %v5612_v30 = vshll.u32 %v13752_v8, 16  ;;  %v5592_v58 = vshrl.u32 %v13750_v39, 16  ;;  %v5760_v14 = vld [vmem:[#allocation3 + $0x78] sm:$0xf] }
 0x307   : > { %v5606_v5 = vor.u32 %v5604_v47, %v5603_v9  ;;  %5735 = vst.msk [vmem:[#allocation3 + $0x4c] sm:$0xf] %vm5687_vm8, %v5564_v23  ;;  %5738 = vst [vmem:[#allocation3 + $0x50] sm:$0x1] %v5737_v7  ;;  %v5607_v29 = vrot.slane %v5603_v9, 4  ;;  %v5586_v38 = vrot.slane %v5584_v49, 7  ;;  %v5350_v46 = vadd.f32 %v16697_v3, %v5320_v15 }
 0x308   : > { %v5611_v18 = vrot.slane %v5609_v11, 7  ;;  %v5373_v24 = vmax.f32 %v5349_v28, 0.0  ;;  %v5371_v43 = vmax.f32 %v5347_v22, 0.0  ;;  %v5595_v2 = vshll.u32 %v13750_v39, 16  ;;  %v5771_v9 = vld [vmem:[#allocation3 + $0x8c] sm:$0x1] }
 0x309   : > { %v5754_v27 = vsel %vm16714_vm9, %v5606_v5, %v5753_v63  ;;  %v5589_v1 = vor.u32 %v5587_v33, %v5586_v38  ;;  %v5594_v56 = vrot.slane %v5592_v58, 7  ;;  %v5374_v13 = vmax.f32 %v5350_v46, 0.0  ;;  %v5764_v23 = vld [vmem:[#allocation3 + $0x80] sm:$0x1] }
 0x30a   : > { %5755 = vst [vmem:[#allocation3 + $0x6c] sm:$0xf] %v5754_v27  ;;  %v5614_v45 = vor.u32 %v5612_v30, %v5611_v18  ;;  %v5616_v25 = vrot.slane %v5611_v18, 4  ;;  %v13755_v62 = vpack.c.bf16 %v5373_v24, %v5373_v24  ;;  %v13753_v0 = vpack.c.bf16 %v5371_v43, %v5371_v43 }
 0x30b   : > { %v5747_v57 = vsel %vm16714_vm9, %v5589_v1, %v5746_v35  ;;  %v5348_v21 = vadd.f32 %v16697_v3, %v5318_v26  ;;  %v5590_v17 = vrot.slane %v5586_v38, 4  ;;  %v5597_v12 = vor.u32 %v5595_v2, %v5594_v56  ;;  %v5767_v3 = vld [vmem:[#allocation3 + $0x84] sm:$0xf] }
 0x30c   : > { %v5615_v16 = vsel %vm15516_vm11, %v5607_v29, %v5614_v45  ;;  %v5758_v19 = vsel %vm15363_vm6, %v5616_v25, %v5757_v55  ;;  %5748 = vst [vmem:[#allocation3 + $0x60] sm:$0xf] %v5747_v57  ;;  %v5599_v61 = vrot.slane %v5594_v56, 4  ;;  %v5635_v6 = vshrl.u32 %v13755_v62, 16 }
 0x30d   : > { %5756 = vst.msk [vmem:[#allocation3 + $0x70] sm:$0xf] %vm5687_vm8, %v5615_v16  ;;  %5759 = vst [vmem:[#allocation3 + $0x74] sm:$0x1] %v5758_v19  ;;  %v5618_v31 = vshrl.u32 %v13753_v0, 16  ;;  %v13756_v42 = vpack.c.bf16 %v5374_v13, %v5374_v13  ;;  %v5372_v44 = vmax.f32 %v5348_v21, 0.0  ;;  %v5598_v4 = vsel %vm15516_vm11, %v5590_v17, %v5597_v12 }
 0x30e   : > { %v5751_v36 = vsel %vm15363_vm6, %v5599_v61, %v5750_v37  ;;  %v5637_v32 = vrot.slane %v5635_v6, 7  ;;  %v5638_v41 = vshll.u32 %v13755_v62, 16  ;;  %5749 = vst.msk [vmem:[#allocation3 + $0x64] sm:$0xf] %vm5687_vm8, %v5598_v4  ;;  %v5621_v50 = vshll.u32 %v13753_v0, 16 }
 0x30f   : > { %5752 = vst [vmem:[#allocation3 + $0x68] sm:$0x1] %v5751_v36  ;;  %v5620_v54 = vrot.slane %v5618_v31, 7  ;;  %v5643_v52 = vshrl.u32 %v13756_v42, 16  ;;  %v13754_v34 = vpack.c.bf16 %v5372_v44, %v5372_v44  ;;  %v5646_v39 = vshll.u32 %v13756_v42, 16 }
 0x310   : > { %v5640_v47 = vor.u32 %v5638_v41, %v5637_v32  ;;  %v5641_v40 = vrot.slane %v5637_v32, 4  ;;  %v15163_v18 = vmov (!%p12907_p5), 0  }
 0x311   : > { %v5623_v53 = vor.u32 %v5621_v50, %v5620_v54  ;;  %v5645_v8 = vrot.slane %v5643_v52, 7  ;;  %v5626_v28 = vshrl.u32 %v13754_v34, 16  ;;  %v5629_v22 = vshll.u32 %v13754_v34, 16  ;;  %5777 = vst.msk [vmem:[#allocation3] sm:$0xf] (!%p12907_p5), %vm5687_vm8, %v15163_v18 }
 0x312   : > { %v5768_v10 = vsel %vm16714_vm9, %v5640_v47, %v5767_v3  ;;  %v5624_v15 = vrot.slane %v5620_v54, 4  ;;  %5776 = sbr.rel (%p12907_p5) target bundleno = 793 (0x319), region = 68  ;;  %5778 = vst.msk [vmem:[#allocation3 + $0x4] sm:$0xf] (!%p12907_p5), %vm5687_vm8, %v15163_v18  ;;  %5781 = vst.msk [vmem:[#allocation3 + $0xc] sm:$0xf] (!%p12907_p5), %vm5687_vm8, %v15163_v18 }
 0x313   : > { %5769 = vst [vmem:[#allocation3 + $0x84] sm:$0xf] %v5768_v10  ;;  %v5761_v63 = vsel %vm16714_vm9, %v5623_v53, %v5760_v14  ;;  %v5648_v49 = vor.u32 %v5646_v39, %v5645_v8  ;;  %v5650_v33 = vrot.slane %v5645_v8, 4  ;;  %v5628_v11 = vrot.slane %v5626_v28, 7  ;;  %5780 = vst.msk [vmem:[#allocation3 + $0x8] sm:$0x1] (!%p12907_p5), %vm575_vm3, %v15163_v18 }
 0x314   : > { %5762 = vst [vmem:[#allocation3 + $0x78] sm:$0xf] %v5761_v63  ;;  %5782 = vst.msk [vmem:[#allocation3 + $0x10] sm:$0xf] (!%p12907_p5), %vm5687_vm8, %v15163_v18 }
 0x315   : > { %v5649_v7 = vsel %vm15516_vm11, %v5641_v40, %v5648_v49  ;;  %v5772_v5 = vsel %vm15363_vm6, %v5650_v33, %v5771_v9  ;;  %v5631_v30 = vor.u32 %v5629_v22, %v5628_v11  ;;  %v5633_v29 = vrot.slane %v5628_v11, 4  ;;  %5783 = vst.msk [vmem:[#allocation3 + $0x14] sm:$0x1] (!%p12907_p5), %vm575_vm3, %v15163_v18 }
 0x316   : > { %5770 = vst.msk [vmem:[#allocation3 + $0x88] sm:$0xf] %vm5687_vm8, %v5649_v7  ;;  %5773 = vst [vmem:[#allocation3 + $0x8c] sm:$0x1] %v5772_v5 }
 0x317   : > { %v5632_v38 = vsel %vm15516_vm11, %v5624_v15, %v5631_v30  ;;  %v5765_v35 = vsel %vm15363_vm6, %v5633_v29, %v5764_v23 }
 0x318   : > { %5763 = vst.msk [vmem:[#allocation3 + $0x7c] sm:$0xf] %vm5687_vm8, %v5632_v38  ;;  %5766 = vst [vmem:[#allocation3 + $0x80] sm:$0x1] %v5765_v35 }
 0x319 PF: > { %5786 = sbr.rel (%p12908_p6) target bundleno = 800 (0x320), region = 72  ;;  %v15164_v58 = vmov (!%p12908_p6), 0  }
 0x31a   : > { %5788 = vst.msk [vmem:[#allocation3 + $0x78] sm:$0xf] (!%p12908_p6), %vm5687_vm8, %v15164_v58  ;;  %5789 = vst.msk [vmem:[#allocation3 + $0x7c] sm:$0xf] (!%p12908_p6), %vm5687_vm8, %v15164_v58 }
 0x31b   : > { %5791 = vst.msk [vmem:[#allocation3 + $0x80] sm:$0x1] (!%p12908_p6), %vm575_vm3, %v15164_v58  ;;  %5794 = vst.msk [vmem:[#allocation3 + $0x8c] sm:$0x1] (!%p12908_p6), %vm575_vm3, %v15164_v58 }
 0x31c   : > { %5792 = vst.msk [vmem:[#allocation3 + $0x84] sm:$0xf] (!%p12908_p6), %vm5687_vm8, %v15164_v58  ;;  %5793 = vst.msk [vmem:[#allocation3 + $0x88] sm:$0xf] (!%p12908_p6), %vm5687_vm8, %v15164_v58 }
 0x320 PF: > { %v14975_v27 = vld [vmem:[%s18188_s5] sm:$0xff]   ;;  %v14976_v55 = vld [vmem:[%s18188_s5 + $0x8] sm:$0xff]   ;;  %v14979_v43 = vld [vmem:[%s18188_s5 + $0x10] sm:$0xff]  }
 0x321   : > { %14327 = vmatprep.subr.bf16.mxu1 %v14975_v27  ;;  %v14977_v24 = vld [vmem:[#allocation3] sm:$0xff]   ;;  %v14978_v46 = vld [vmem:[#allocation3 + $0xc] sm:$0xff]   ;;  %v14980_v26 = vld [vmem:[#allocation3 + $0x18] sm:$0xff]  }
 0x322   : > { %14328 = vmatpush3.bf16.msra.mxu1 %v14975_v27  ;;  %14331 = vmatprep.mubr.msk.bf16.mxu1 %vm1504_vm7, %v14977_v24  ;;  %v14984_v1 = vld [vmem:[%s18188_s5 + $0x18] sm:$0xff]   ;;  %v14981_v45 = vld [vmem:[#allocation3 + $0x24] sm:$0xff]   ;;  %v6045_v2 = vld [vmem:[#allocation3] sm:$0xf] }
 0x323   : > { %14329 = vmatprep.subr.bf16.mxu1 %v14976_v55  ;;  %v14982_v25 = vld [vmem:[#allocation3 + $0x30] sm:$0xff]   ;;  %v6046_v56 = vld [vmem:[#allocation3 + $0x4] sm:$0xf]  ;;  %v6047_v62 = vld [vmem:[#allocation3 + $0x8] sm:$0x1]  ;;  %v6076_v0 = vshrl.u32 %v6045_v2, 16 }
 0x324   : > { %v6079_v13 = vshll.u32 %v6045_v2, 16  ;;  %v6085_v57 = vshll.u32 %v6046_v56, 16  ;;  %v6089_v16 = vshrl.u32 %v6046_v56, 16  ;;  %v6048_v19 = vld [vmem:[#allocation3 + $0xc] sm:$0xf]  ;;  %v6095_v37 = vshll.u32 %v6047_v62, 16 }
 0x325   : > { %v6049_v21 = vld [vmem:[#allocation3 + $0x10] sm:$0xf]  ;;  %v6050_v17 = vld [vmem:[#allocation3 + $0x14] sm:$0x1]  ;;  %v6100_v12 = vshrl.u32 %v6048_v19, 16  ;;  %v6078_v61 = vrot.slane %v6076_v0, 4 }
 0x326   : > { %14330 = vmatpush3.bf16.msra.mxu1 %v14976_v55  ;;  %v6081_v6 = vrot.slane %v6079_v13, 5  ;;  %v6087_v31 = vrot.slane %v6085_v57, 5  ;;  %v6091_v42 = vrot.slane %v6089_v16, 4  ;;  %v6097_v44 = vrot.slane %v6095_v37, 5  ;;  %v14989_v52 = vld [vmem:[%s18188_s5 + $0x20] sm:$0xff]   ;;  %v16894_v34 = vld [vmem:[%s18188_s5 + $0x30] sm:$0xff]  }
 0x327   : > { %14351 = vmatprep.subr.bf16.mxu1 %v14979_v43  ;;  %v6102_v4 = vrot.slane %v6100_v12, 4  ;;  %v6103_v36 = vshll.u32 %v6048_v19, 16  ;;  %v6109_v32 = vshll.u32 %v6049_v21, 16  ;;  %v6113_v54 = vshrl.u32 %v6049_v21, 16  ;;  %v14983_v47 = vld [vmem:[#allocation3 + $0x3c] sm:$0xff]   ;;  %v14985_v8 = vld [vmem:[#allocation3 + $0x48] sm:$0xff]   ;;  %14375 = vmatprep.subr.bf16.mxu0 %v14989_v52 }
 0x328   : > { %v6082_v41 = vor.u32 %v6081_v6, %v6078_v61  ;;  %v6092_v3 = vor.u32 %v6091_v42, %v6087_v31  ;;  %v6119_v50 = vshll.u32 %v6050_v17, 16  ;;  %14376 = vmatpush3.bf16.msra.mxu0 %v14989_v52  ;;  %v14991_v22 = vld [vmem:[%s18188_s5 + $0x28] sm:$0xff]   ;;  %v6051_v63 = vld [vmem:[#allocation3 + $0x18] sm:$0xf]  ;;  %v6052_v49 = vld [vmem:[#allocation3 + $0x1c] sm:$0xf] }
 0x329   : > { %14332 = vmatmul.mubr.msk.bf16.vlgmr.msra.gmra.mrb[24].mxu1 %vm1504_vm7, %v14978_v46  ;;  %v6105_v14 = vrot.slane %v6103_v36, 5  ;;  %v6111_v53 = vrot.slane %v6109_v32, 5  ;;  %v6115_v40 = vrot.slane %v6113_v54, 4  ;;  %v6053_v23 = vld [vmem:[#allocation3 + $0x20] sm:$0x1]  ;;  %v6124_v7 = vshrl.u32 %v6051_v63, 16  ;;  %14377 = vmatprep.subr.bf16.mxu0 %v14991_v22 }
 0x32a   : > { %14352 = vmatpush3.bf16.msra.mxu1 %v14979_v43  ;;  %14335 = vmatprep.mubr.msk.bf16.mxu1 %vm1504_vm7, %v14980_v26  ;;  %v6083_v39 = vrot.slane %v6082_v41, 4  ;;  %v6093_v28 = vrot.slane %v6092_v3, 4  ;;  %v6121_v9 = vrot.slane %v6119_v50, 5  ;;  %v6565_v5 = vld [vmem:[#allocation3] sm:$0xe]  ;;  %v16907_v30 = vld [vmem:[%s18188_s5 + $0x40] sm:$0xff]  }
 0x32b   : > { %14353 = vmatprep.subr.bf16.mxu1 %v14984_v1  ;;  %v6106_v10 = vor.u32 %v6105_v14, %v6102_v4  ;;  %v6116_v15 = vor.u32 %v6115_v40, %v6111_v53  ;;  %v6127_v35 = vshll.u32 %v6051_v63, 16  ;;  %v6133_v18 = vshll.u32 %v6052_v49, 16  ;;  %v6566_v58 = vld [vmem:[#allocation3 + $0x4] sm:$0xf]  ;;  %v6567_v46 = vld [vmem:[#allocation3 + $0x8] sm:$0x1] }
 0x32c   : > { %v6088_v33 = vsel %vm15732_vm0, %v6083_v39, %v6087_v31  ;;  %v6098_v11 = vsel %vm15732_vm0, %v6093_v28, %v6097_v44  ;;  %v6126_v55 = vrot.slane %v6124_v7, 4  ;;  %v6137_v24 = vshrl.u32 %v6052_v49, 16  ;;  %14378 = vmatpush3.bf16.msra.mxu0 %v14991_v22  ;;  %v6054_v2 = vld [vmem:[#allocation3 + $0x24] sm:$0xf]  ;;  %v6055_v57 = vld [vmem:[#allocation3 + $0x28] sm:$0xf] }
 0x32d   : > { %v16909_v29 = vcombine.low %v6088_v33, %v6098_v11  ;;  %v6107_v38 = vrot.slane %v6106_v10, 4  ;;  %v6117_v27 = vrot.slane %v6116_v15, 4  ;;  %v6143_v43 = vshll.u32 %v6053_v23, 16  ;;  %14423 = vmatprep.subr.bf16.mxu0 %v16907_v30  ;;  %v14986_v16 = vld [vmem:[#allocation3 + $0x54] sm:$0xff]   ;;  %v6056_v17 = vld [vmem:[#allocation3 + $0x2c] sm:$0x1] }
 0x32e   : > { %14354 = vmatpush3.bf16.msra.mxu1 %v14984_v1  ;;  %v6129_v1 = vrot.slane %v6127_v35, 5  ;;  %v6139_v62 = vrot.slane %v6137_v24, 4  ;;  %v6627_v13 = vrot.slane %v6566_v58, 5  ;;  %v6630_v21 = vrot.slane %v6567_v46, 5  ;;  %v6568_v61 = vld [vmem:[#allocation3 + $0xc] sm:$0xe] }
 0x32f   : > { %14399 = vmatprep.subr.bf16.mxu1 %v16894_v34  ;;  %v6112_v26 = vsel %vm15732_vm0, %v6107_v38, %v6111_v53  ;;  %v6122_v56 = vsel %vm15732_vm0, %v6117_v27, %v6121_v9  ;;  %v6145_v0 = vrot.slane %v6143_v43, 5  ;;  %v6148_v12 = vshrl.u32 %v6054_v2, 16  ;;  %v6569_v4 = vld [vmem:[#allocation3 + $0x10] sm:$0xf]  ;;  %v6570_v36 = vld [vmem:[#allocation3 + $0x14] sm:$0x1] }
 0x330   : > { %v16918_v19 = vcombine.low %v6112_v26, %v6122_v56  ;;  %v6130_v37 = vor.u32 %v6129_v1, %v6126_v55  ;;  %v6629_v42 = vrot.slane %v6627_v13, 4  ;;  %v6151_v44 = vshll.u32 %v6054_v2, 16  ;;  %v14987_v50 = vld [vmem:[#allocation3 + $0x60] sm:$0xff]   ;;  %v6057_v10 = vld [vmem:[#allocation3 + $0x30] sm:$0xf] }
 0x331   : > { %14336 = vmatmul.mubr.msk.bf16.gmra.mrb[28].mxu1 %vm1504_vm7, %v14981_v45  ;;  %v6135_v45 = vrot.slane %v6133_v18, 5  ;;  %v6150_v41 = vrot.slane %v6148_v12, 4  ;;  %v6157_v3 = vshll.u32 %v6055_v57, 16  ;;  %v6161_v54 = vshrl.u32 %v6055_v57, 16  ;;  %v6058_v9 = vld [vmem:[#allocation3 + $0x34] sm:$0xf] }
 0x332   : > { %14339 = vmatprep.mubr.msk.bf16.mxu1 %vm1504_vm7, %v14982_v25  ;;  %v13244_v25 = vrot.slane %v6565_v5, 9  ;;  %v6131_v32 = vrot.slane %v6130_v37, 4  ;;  %v6153_v14 = vrot.slane %v6151_v44, 5  ;;  %v6167_v53 = vshll.u32 %v6056_v17, 16  ;;  %v6059_v5 = vld [vmem:[#allocation3 + $0x38] sm:$0x1] }
 0x333   : > { %v6140_v6 = vor.u32 %v6139_v62, %v6135_v45  ;;  %v6159_v28 = vrot.slane %v6157_v3, 5  ;;  %v6163_v40 = vrot.slane %v6161_v54, 4  ;;  %v13245_v33 = vrot.slane %v6568_v61, 9  ;;  %v6571_v27 = vld [vmem:[#allocation3 + $0x18] sm:$0xe]  ;;  %v14988_v1 = vld [vmem:[#allocation3 + $0x6c] sm:$0xff]  }
 0x334   : > { %v6628_v31 = vsel %vm15834_vm5, %v13244_v25, %v6627_v13  ;;  %v6154_v63 = vor.u32 %v6153_v14, %v6150_v41  ;;  %v6169_v49 = vrot.slane %v6167_v53, 5  ;;  %v6634_v23 = vrot.slane %v6569_v4, 5  ;;  %v6572_v26 = vld [vmem:[#allocation3 + $0x1c] sm:$0xf]  ;;  %v6573_v62 = vld [vmem:[#allocation3 + $0x20] sm:$0x1] }
 0x335   : > { %v6141_v52 = vrot.slane %v6140_v6, 4  ;;  %v6164_v15 = vor.u32 %v6163_v40, %v6159_v28  ;;  %v6637_v7 = vrot.slane %v6570_v36, 5  ;;  %v6172_v35 = vshrl.u32 %v6057_v10, 16  ;;  %v6060_v37 = vld [vmem:[#allocation3 + $0x3c] sm:$0xf] }
 0x336   : > { %v6155_v38 = vrot.slane %v6154_v63, 4  ;;  %v6175_v18 = vshll.u32 %v6057_v10, 16  ;;  %v6181_v58 = vshll.u32 %v6058_v9, 16  ;;  %v6635_v24 = vsel %vm15834_vm5, %v13245_v33, %v6634_v23 }
 0x337   : > { %v6146_v22 = vsel %vm15732_vm0, %v6141_v52, %v6145_v0  ;;  %v6165_v55 = vrot.slane %v6164_v15, 4  ;;  %v6636_v43 = vrot.slane %v6634_v23, 4  ;;  %v6185_v46 = vshrl.u32 %v6058_v9, 16  ;;  %v6574_v52 = vld [vmem:[#allocation3 + $0x24] sm:$0xe] }
 0x338   : > { %v6174_v25 = vrot.slane %v6172_v35, 4  ;;  %v6177_v2 = vrot.slane %v6175_v18, 5  ;;  %v6183_v56 = vrot.slane %v6181_v58, 5  ;;  %v13246_v6 = vrot.slane %v6571_v27, 9  ;;  %v6063_v15 = vld [vmem:[#allocation3 + $0x48] sm:$0xf] }
 0x339   : > { %14340 = vmatmul.mubr.msk.bf16.gmra.mrb[32].mxu1 %vm1504_vm7, %v14983_v47  ;;  %v6631_v47 = vsel %vm15834_vm5, %v6629_v42, %v6630_v21  ;;  %v6170_v0 = vsel %vm15732_vm0, %v6165_v55, %v6169_v49  ;;  %v6638_v13 = vsel %vm15834_vm5, %v6636_v43, %v6637_v7  ;;  %v6187_v57 = vrot.slane %v6185_v46, 4  ;;  %v6061_v21 = vld [vmem:[#allocation3 + $0x40] sm:$0xf]  ;;  %v6064_v23 = vld [vmem:[#allocation3 + $0x4c] sm:$0xf] }
 0x33a   : > { %14343 = vmatprep.mubr.msk.bf16.mxu1 %vm1504_vm7, %v14985_v8  ;;  %v6136_v8 = vsel %vm15732_vm0, %v6131_v32, %v6135_v45  ;;  %v13258_v39 = vcombine.low %v6628_v31, %v6631_v47  ;;  %v6160_v45 = vsel %vm15732_vm0, %v6155_v38, %v6159_v28  ;;  %v13259_v12 = vcombine.low %v6635_v24, %v6638_v13  ;;  %v6062_v31 = vld [vmem:[#allocation3 + $0x44] sm:$0x1]  ;;  %v6065_v18 = vld [vmem:[#allocation3 + $0x50] sm:$0x1]  ;;  %v6577_v43 = vld [vmem:[#allocation3 + $0x30] sm:$0xe] }
 0x33b   : > { %v16929_v11 = vcombine.low %v6136_v8, %v6146_v22  ;;  %v16941_v17 = vcombine.low %v6160_v45, %v6170_v0  ;;  %v6178_v61 = vor.u32 %v6177_v2, %v6174_v25  ;;  %v14994_v42 = vld [vmem:[%s18188_s5 + $0x48] sm:$0xff]   ;;  %v6188_v44 = vor.u32 %v6187_v57, %v6183_v56  ;;  %v6576_v22 = vld [vmem:[#allocation3 + $0x2c] sm:$0x1]  ;;  %v6578_v25 = vld [vmem:[#allocation3 + $0x34] sm:$0xf] }
 0x33c   : > { %14379 = vmatprep.mubr.msk.bf16.mxu0 %vm1504_vm7, %v13258_v39  ;;  %v6641_v36 = vrot.slane %v6572_v26, 5  ;;  %v6644_v32 = vrot.slane %v6573_v62, 5  ;;  %v6196_v3 = vshrl.u32 %v6060_v37, 16  ;;  %v6199_v54 = vshll.u32 %v6060_v37, 16  ;;  %v6575_v39 = vld [vmem:[#allocation3 + $0x28] sm:$0xf] }
 0x33d   : > { %14380 = vmatmul.mubr.msk.bf16.vlgmr.msra.gmra.mrb[192].mxu0 %vm1504_vm7, %v13259_v12  ;;  %v6179_v41 = vrot.slane %v6178_v61, 4  ;;  %v6189_v47 = vrot.slane %v6188_v44, 4  ;;  %v6209_v8 = vshrl.u32 %v6061_v21, 16  ;;  %v6215_v33 = vshll.u32 %v6062_v31, 16  ;;  %v14993_v0 = vld [vmem:[%s18188_s5 + $0x38] sm:$0xff]  }
 0x33e   : > { %14424 = vmatpush3.bf16.msra.mxu0 %v16907_v30  ;;  %v6642_v14 = vsel %vm15834_vm5, %v13246_v6, %v6641_v36  ;;  %v6643_v53 = vrot.slane %v6641_v36, 4  ;;  %v6198_v40 = vrot.slane %v6196_v3, 4  ;;  %v6201_v10 = vrot.slane %v6199_v54, 5  ;;  %v16958_v30 = vld [vmem:[%s18188_s5 + $0x60] sm:$0xff]   ;;  %v6066_v61 = vld [vmem:[#allocation3 + $0x54] sm:$0xf] }
 0x33f   : > { %v6184_v28 = vsel %vm15732_vm0, %v6179_v41, %v6183_v56  ;;  %14425 = vmatprep.subr.bf16.mxu0 %v14994_v42  ;;  %v13247_v35 = vrot.slane %v6574_v52, 9  ;;  %v6217_v27 = vrot.slane %v6215_v33, 5  ;;  %v6648_v55 = vrot.slane %v6575_v39, 5  ;;  %v6579_v57 = vld [vmem:[#allocation3 + $0x38] sm:$0x1] }
 0x340   : > { %v6645_v49 = vsel %vm15834_vm5, %v6643_v53, %v6644_v32  ;;  %v6202_v38 = vor.u32 %v6201_v10, %v6198_v40  ;;  %v6651_v24 = vrot.slane %v6576_v22, 5  ;;  %v6220_v26 = vshrl.u32 %v6063_v15, 16  ;;  %v6580_v39 = vld [vmem:[#allocation3 + $0x3c] sm:$0xe]  ;;  %v6581_v22 = vld [vmem:[#allocation3 + $0x40] sm:$0xf] }
 0x341   : > { %14344 = vmatmul.mubr.msk.bf16.gmra.mrb[36].mxu1 %vm1504_vm7, %v14986_v16  ;;  %v6191_v16 = vshll.u32 %v6059_v5, 16  ;;  %v13260_v5 = vcombine.low %v6642_v14, %v6645_v49  ;;  %v6229_v45 = vshll.u32 %v6064_v23, 16  ;;  %v6649_v56 = vsel %vm15834_vm5, %v13247_v35, %v6648_v55  ;;  %v16989_v14 = vld [vmem:[%s18188_s5 + $0x50] sm:$0xff]  }
 0x342   : > { %14347 = vmatprep.mubr.msk.bf16.mxu1 %vm1504_vm7, %v14987_v50  ;;  %v6205_v50 = vshll.u32 %v6061_v21, 16  ;;  %14426 = vmatpush3.bf16.msra.mxu0 %v14994_v42  ;;  %v6203_v46 = vrot.slane %v6202_v38, 4  ;;  %v6650_v62 = vrot.slane %v6648_v55, 4  ;;  %v6233_v13 = vshrl.u32 %v6064_v23, 16 }
 0x343   : > { %v6193_v4 = vrot.slane %v6191_v16, 5  ;;  %14383 = vmatprep.mubr.msk.bf16.mxu0 %vm1504_vm7, %v13260_v5  ;;  %14471 = vmatprep.subr.bf16.mxu0 %v16958_v30  ;;  %v6222_v37 = vrot.slane %v6220_v26, 4  ;;  %v6231_v12 = vrot.slane %v6229_v45, 5  ;;  %v6239_v44 = vshll.u32 %v6065_v18, 16  ;;  %v6069_v18 = vld [vmem:[#allocation3 + $0x60] sm:$0xf] }
 0x344   : > { %v6207_v9 = vrot.slane %v6205_v50, 5  ;;  %v6652_v31 = vsel %vm15834_vm5, %v6650_v62, %v6651_v24  ;;  %v6235_v42 = vrot.slane %v6233_v13, 4  ;;  %v13248_v3 = vrot.slane %v6577_v43, 9  ;;  %v6583_v13 = vld [vmem:[#allocation3 + $0x48] sm:$0xe] }
 0x345   : > { %v6194_v63 = vsel %vm15732_vm0, %v6189_v47, %v6193_v4  ;;  %v6067_v4 = vld [vmem:[#allocation3 + $0x58] sm:$0xf]  ;;  %v13261_v32 = vcombine.low %v6649_v56, %v6652_v31  ;;  %v6241_v54 = vrot.slane %v6239_v44, 5  ;;  %v6655_v50 = vrot.slane %v6578_v25, 5  ;;  %v6068_v47 = vld [vmem:[#allocation3 + $0x5c] sm:$0x1] }
 0x346   : > { %v16964_v7 = vcombine.low %v6184_v28, %v6194_v63  ;;  %v6208_v16 = vsel %vm15732_vm0, %v6203_v46, %v6207_v9  ;;  %v6658_v52 = vrot.slane %v6579_v57, 5  ;;  %v6247_v53 = vshll.u32 %v6066_v61, 16  ;;  %v6071_v25 = vld [vmem:[#allocation3 + $0x68] sm:$0x1]  ;;  %v6585_v31 = vld [vmem:[#allocation3 + $0x50] sm:$0x1] }
 0x347   : > { %14384 = vmatmul.mubr.msk.bf16.gmra.mrb[196].mxu0 %vm1504_vm7, %v13261_v32  ;;  %v6656_v40 = vsel %vm15834_vm5, %v13248_v3, %v6655_v50  ;;  %v6657_v10 = vrot.slane %v6655_v50, 4  ;;  %v6263_v35 = vshll.u32 %v6068_v47, 16  ;;  %v13249_v43 = vrot.slane %v6580_v39, 9  ;;  %v6073_v3 = vld [vmem:[#allocation3 + $0x70] sm:$0xf] }
 0x348   : > { %v6268_v56 = vshrl.u32 %v6069_v18, 16  ;;  %v6271_v62 = vshll.u32 %v6069_v18, 16  ;;  %v6287_v32 = vshll.u32 %v6071_v25, 16  ;;  %v6074_v47 = vld [vmem:[#allocation3 + $0x74] sm:$0x1] }
 0x349   : > { %14348 = vmatmul.mubr.msk.bf16.gmra.mrb[40].mxu1 %vm1504_vm7, %v14988_v1  ;;  %v6223_v1 = vshll.u32 %v6063_v15, 16  ;;  %v6582_v15 = vld [vmem:[#allocation3 + $0x44] sm:$0x1]  ;;  %v6659_v5 = vsel %vm15834_vm5, %v6657_v10, %v6658_v52  ;;  %v6265_v26 = vrot.slane %v6263_v35, 5  ;;  %v13250_v52 = vrot.slane %v6583_v13, 9 }
 0x34a   : > { %14355 = vmatprep.mubr.msk.bf16.mxu1 %vm1504_vm7, %v16909_v29  ;;  %v6211_v29 = vrot.slane %v6209_v8, 4  ;;  %v6253_v8 = vshll.u32 %v6067_v4, 16  ;;  %v13262_v55 = vcombine.low %v6656_v40, %v6659_v5  ;;  %v6665_v45 = vrot.slane %v6582_v15, 5  ;;  %v6586_v39 = vld [vmem:[#allocation3 + $0x54] sm:$0xe] }
 0x34b   : > { %v6225_v21 = vrot.slane %v6223_v1, 5  ;;  %v6662_v1 = vrot.slane %v6581_v22, 5  ;;  %v6587_v22 = vld [vmem:[#allocation3 + $0x58] sm:$0xf]  ;;  %v6305_v15 = vshrl.u32 %v6073_v3, 16 }
 0x34c   : > { %v6212_v58 = vor.u32 %v6211_v29, %v6207_v9  ;;  %v6257_v9 = vshrl.u32 %v6067_v4, 16  ;;  %v6249_v29 = vrot.slane %v6247_v53, 5  ;;  %v6255_v33 = vrot.slane %v6253_v8, 5  ;;  %14387 = vmatprep.mubr.msk.bf16.mxu0 %vm1504_vm7, %v13262_v55  ;;  %v6590_v5 = vld [vmem:[#allocation3 + $0x64] sm:$0xf] }
 0x34d   : > { %v6226_v41 = vor.u32 %v6225_v21, %v6222_v37  ;;  %v6584_v21 = vld [vmem:[#allocation3 + $0x4c] sm:$0xf]  ;;  %v6672_v8 = vrot.slane %v6585_v31, 5  ;;  %v6676_v13 = vrot.slane %v6587_v22, 5  ;;  %v7241_v22 = vld [vmem:[#allocation3 + $0x20] sm:$0x1] }
 0x34e   : > { %v6213_v2 = vrot.slane %v6212_v58, 4  ;;  %v6259_v38 = vrot.slane %v6257_v9, 4  ;;  %v6070_v58 = vld [vmem:[#allocation3 + $0x64] sm:$0xf]  ;;  %v6669_v53 = vrot.slane %v6584_v21, 5  ;;  %v6301_v9 = vshll.u32 %v6073_v3, 16 }
 0x34f   : > { %v6281_v37 = vshrl.u32 %v6070_v58, 16  ;;  %v7238_v3 = vld [vmem:[#allocation3 + $0x14] sm:$0x1] }
 0x350   : > { %v6218_v6 = vsel %vm15732_vm0, %v6213_v2, %v6217_v27  ;;  %v6260_v46 = vor.u32 %v6259_v38, %v6255_v33  ;;  %v6591_v38 = vld [vmem:[#allocation3 + $0x68] sm:$0x1]  ;;  %v6303_v55 = vrot.slane %v6301_v9, 5 }
 0x351   : > { %14356 = vmatmul.mubr.msk.bf16.vlgmr.msra.gmra.mrb[44].mxu1 %vm1504_vm7, %v16918_v19  ;;  %v16984_v36 = vcombine.low %v6208_v16, %v6218_v6  ;;  %v6236_v19 = vor.u32 %v6235_v42, %v6231_v12  ;;  %v6663_v16 = vsel %vm15834_vm5, %v13249_v43, %v6662_v1  ;;  %v6273_v6 = vrot.slane %v6271_v62, 5 }
 0x352   : > { %14400 = vmatpush3.bf16.msra.mxu1 %v16894_v34  ;;  %14359 = vmatprep.mubr.msk.bf16.mxu1 %vm1504_vm7, %v16929_v11  ;;  %v6227_v34 = vrot.slane %v6226_v41, 4  ;;  %v6244_v11 = vshrl.u32 %v6066_v61, 16  ;;  %v6261_v57 = vrot.slane %v6260_v46, 4  ;;  %v6270_v61 = vrot.slane %v6268_v56, 4  ;;  %v6072_v41 = vld [vmem:[#allocation3 + $0x6c] sm:$0xf] }
 0x353   : > { %14401 = vmatprep.subr.bf16.mxu1 %v14993_v0  ;;  %v6237_v28 = vrot.slane %v6236_v19, 4  ;;  %v6283_v4 = vrot.slane %v6281_v37, 4  ;;  %v6292_v40 = vshrl.u32 %v6072_v41, 16  ;;  %v6295_v10 = vshll.u32 %v6072_v41, 16  ;;  %v6594_v56 = vld [vmem:[#allocation3 + $0x74] sm:$0x1] }
 0x354   : > { %v6232_v63 = vsel %vm15732_vm0, %v6227_v34, %v6231_v12  ;;  %v6246_v49 = vrot.slane %v6244_v11, 4  ;;  %v6266_v42 = vsel %vm15732_vm0, %v6261_v57, %v6265_v26  ;;  %v6274_v50 = vor.u32 %v6273_v6, %v6270_v61 }
 0x355   : > { %v6242_v23 = vsel %vm15732_vm0, %v6237_v28, %v6241_v54  ;;  %v6289_v11 = vrot.slane %v6287_v32, 5  ;;  %v6294_v18 = vrot.slane %v6292_v40, 4  ;;  %v6307_v46 = vrot.slane %v6305_v15, 4 }
 0x356   : > { %14402 = vmatpush3.bf16.msra.mxu1 %v14993_v0  ;;  %v13228_v27 = vcombine.low %v6232_v63, %v6242_v23  ;;  %v6250_v24 = vor.u32 %v6249_v29, %v6246_v49  ;;  %v6277_v0 = vshll.u32 %v6070_v58, 16  ;;  %v6275_v28 = vrot.slane %v6274_v50, 4  ;;  %v6588_v63 = vld [vmem:[#allocation3 + $0x5c] sm:$0x1]  ;;  %v6589_v23 = vld [vmem:[#allocation3 + $0x60] sm:$0xe] }
 0x357   : > { %14447 = vmatprep.subr.bf16.mxu1 %v16989_v14  ;;  %v6670_v29 = vsel %vm15834_vm5, %v13250_v52, %v6669_v53  ;;  %v6297_v58 = vrot.slane %v6295_v10, 5  ;;  %v6311_v26 = vshll.u32 %v6074_v47, 16  ;;  %v6308_v62 = vor.u32 %v6307_v46, %v6303_v55 }
 0x358   : > { %v6251_v2 = vrot.slane %v6250_v24, 4  ;;  %v6592_v24 = vld [vmem:[#allocation3 + $0x6c] sm:$0xe]  ;;  %v6679_v57 = vrot.slane %v6588_v63, 5  ;;  %v6683_v37 = vrot.slane %v6590_v5, 5  ;;  %v6686_v21 = vrot.slane %v6591_v38, 5 }
 0x359   : > { %14360 = vmatmul.mubr.msk.bf16.gmra.mrb[48].mxu1 %vm1504_vm7, %v16941_v17  ;;  %v6664_v17 = vrot.slane %v6662_v1, 4  ;;  %v6593_v1 = vld [vmem:[#allocation3 + $0x70] sm:$0xf]  ;;  %v6309_v61 = vrot.slane %v6308_v62, 4  ;;  %v13253_v31 = vrot.slane %v6592_v24, 9  ;;  %v6693_v52 = vrot.slane %v6594_v56, 5 }
 0x35a   : > { %14363 = vmatprep.mubr.msk.bf16.mxu1 %vm1504_vm7, %v16964_v7  ;;  %v6256_v12 = vsel %vm15732_vm0, %v6251_v2, %v6255_v33  ;;  %v6279_v7 = vrot.slane %v6277_v0, 5  ;;  %v6671_v33 = vrot.slane %v6669_v53, 4  ;;  %v6298_v2 = vor.u32 %v6297_v58, %v6294_v18  ;;  %v7244_v56 = vld [vmem:[#allocation3 + $0x2c] sm:$0x1] }
 0x35b   : > { %v6666_v44 = vsel %vm15834_vm5, %v6664_v17, %v6665_v45  ;;  %v13229_v19 = vcombine.low %v6256_v12, %v6266_v42  ;;  %v6313_v0 = vrot.slane %v6311_v26, 5  ;;  %v13252_v17 = vrot.slane %v6589_v23, 9  ;;  %v7236_v12 = vld [vmem:[#allocation3 + $0xc] sm:$0xf]  ;;  %v7237_v42 = vld [vmem:[#allocation3 + $0x10] sm:$0xf] }
 0x35c   : > { %v13263_v54 = vcombine.low %v6663_v16, %v6666_v44  ;;  %v6284_v34 = vor.u32 %v6283_v4, %v6279_v7  ;;  %v6280_v35 = vsel %vm15732_vm0, %v6275_v28, %v6279_v7  ;;  %v6673_v43 = vsel %vm15834_vm5, %v6671_v33, %v6672_v8 }
 0x35d   : > { %v13264_v25 = vcombine.low %v6670_v29, %v6673_v43  ;;  %v6299_v16 = vrot.slane %v6298_v2, 4  ;;  %v6678_v7 = vrot.slane %v6676_v13, 4  ;;  %v6684_v4 = vsel %vm15834_vm5, %v13252_v17, %v6683_v37 }
 0x35e   : > { %14388 = vmatmul.mubr.msk.bf16.gmra.mrb[200].mxu0 %vm1504_vm7, %v13263_v54  ;;  %v6285_v49 = vrot.slane %v6284_v34, 4  ;;  %v6685_v32 = vrot.slane %v6683_v37, 4  ;;  %v6690_v41 = vrot.slane %v6593_v1, 5  ;;  %v6314_v54 = vsel %vm15732_vm0, %v6309_v61, %v6313_v0  ;;  %v7239_v34 = vld [vmem:[#allocation3 + $0x18] sm:$0xf] }
 0x35f   : > { %14391 = vmatprep.mubr.msk.bf16.mxu0 %vm1504_vm7, %v13264_v25  ;;  %v6304_v44 = vsel %vm15732_vm0, %v6299_v16, %v6303_v55  ;;  %v6680_v50 = vsel %vm15834_vm5, %v6678_v7, %v6679_v57  ;;  %v7267_v47 = vshrl.u32 %v7236_v12, 16  ;;  %v7270_v9 = vshll.u32 %v7236_v12, 16  ;;  %v14996_v61 = vld [vmem:[#allocation3 + $0x18] sm:$0xff]  }
 0x360   : > { %v6687_v8 = vsel %vm15834_vm5, %v6685_v32, %v6686_v21  ;;  %v6692_v40 = vrot.slane %v6690_v41, 4  ;;  %v7276_v63 = vshll.u32 %v7237_v42, 16  ;;  %v7286_v29 = vshll.u32 %v7238_v3, 16 }
 0x361   : > { %14364 = vmatmul.mubr.msk.bf16.gmra.mrb[52].mxu1 %vm1504_vm7, %v16984_v36  ;;  %v6290_v36 = vsel %vm15732_vm0, %v6285_v49, %v6289_v11  ;;  %v13231_v11 = vcombine.low %v6304_v44, %v6314_v54  ;;  %v13266_v28 = vcombine.low %v6684_v4, %v6687_v8  ;;  %v7269_v10 = vrot.slane %v7267_v47, 4  ;;  %v7245_v44 = vld [vmem:[#allocation3 + $0x30] sm:$0xf]  ;;  %v14998_v4 = vld [vmem:[#allocation3 + $0x24] sm:$0xff]  }
 0x362   : > { %14367 = vmatprep.mubr.msk.bf16.mxu1 %vm1504_vm7, %v13228_v27  ;;  %v13230_v45 = vcombine.low %v6280_v35, %v6290_v36  ;;  %v13251_v27 = vrot.slane %v6586_v39, 9  ;;  %v6691_v39 = vsel %vm15834_vm5, %v13253_v31, %v6690_v41  ;;  %v7280_v49 = vshrl.u32 %v7237_v42, 16  ;;  %v14995_v35 = vld [vmem:[#allocation3 + $0xc] sm:$0xff]   ;;  %v7242_v36 = vld [vmem:[#allocation3 + $0x24] sm:$0xf] }
 0x363   : > { %v7291_v33 = vshrl.u32 %v7239_v34, 16  ;;  %v6694_v15 = vsel %vm15834_vm5, %v6692_v40, %v6693_v52  ;;  %v7272_v23 = vrot.slane %v7270_v9, 5  ;;  %v7294_v5 = vshll.u32 %v7239_v34, 16  ;;  %v7247_v52 = vld [vmem:[#allocation3 + $0x38] sm:$0x1]  ;;  %v15003_v8 = vld [vmem:[%s18188_s5 + $0x58] sm:$0xff]  }
 0x364   : > { %v6677_v6 = vsel %vm15834_vm5, %v13251_v27, %v6676_v13  ;;  %v13267_v18 = vcombine.low %v6691_v39, %v6694_v15  ;;  %v7278_v58 = vrot.slane %v7276_v63, 5  ;;  %v7282_v55 = vrot.slane %v7280_v49, 4 }
 0x365   : > { %v13265_v53 = vcombine.low %v6677_v6, %v6680_v50  ;;  %v7288_v24 = vrot.slane %v7286_v29, 5  ;;  %v7273_v43 = vor.u32 %v7272_v23, %v7269_v10  ;;  %v7293_v46 = vrot.slane %v7291_v33, 4  ;;  %v7246_v50 = vld [vmem:[#allocation3 + $0x34] sm:$0xf]  ;;  %v7248_v23 = vld [vmem:[#allocation3 + $0x3c] sm:$0xf] }
 0x366   : > { %v7296_v26 = vrot.slane %v7294_v5, 5  ;;  %v7283_v25 = vor.u32 %v7282_v55, %v7278_v58  ;;  %v7310_v27 = vshll.u32 %v7241_v22, 16  ;;  %v7315_v62 = vshrl.u32 %v7242_v36, 16  ;;  %v7249_v5 = vld [vmem:[#allocation3 + $0x40] sm:$0xf] }
 0x367   : > { %14392 = vmatmul.mubr.msk.bf16.gmra.mrb[204].mxu0 %vm1504_vm7, %v13265_v53  ;;  %v7274_v0 = vrot.slane %v7273_v43, 4  ;;  %v7318_v57 = vshll.u32 %v7242_v36, 16  ;;  %v7334_v54 = vshll.u32 %v7244_v56, 16  ;;  %v7339_v53 = vshrl.u32 %v7245_v44, 16  ;;  %v7250_v55 = vld [vmem:[#allocation3 + $0x44] sm:$0x1] }
 0x368   : > { %14395 = vmatprep.mubr.msk.bf16.mxu0 %vm1504_vm7, %v13266_v28  ;;  %v7297_v13 = vor.u32 %v7296_v26, %v7293_v46  ;;  %v7284_v17 = vrot.slane %v7283_v25, 4  ;;  %v7312_v21 = vrot.slane %v7310_v27, 5  ;;  %v7317_v12 = vrot.slane %v7315_v62, 4  ;;  %v15006_v26 = vld [vmem:[%s18188_s5 + $0x68] sm:$0xff]   ;;  %v7251_v27 = vld [vmem:[#allocation3 + $0x48] sm:$0xf] }
 0x369   : > { %14368 = vmatmul.mubr.msk.bf16.gmra.mrb[56].mxu1 %vm1504_vm7, %v13229_v19  ;;  %v7240_v19 = vld [vmem:[#allocation3 + $0x1c] sm:$0xf]  ;;  %v7279_v6 = vsel %vm15732_vm0, %v7274_v0, %v7278_v58  ;;  %v7320_v31 = vrot.slane %v7318_v57, 5  ;;  %v7336_v28 = vrot.slane %v7334_v54, 5  ;;  %v7342_v40 = vshll.u32 %v7245_v44, 16  ;;  %v14999_v56 = vld [vmem:[#allocation3 + $0x30] sm:$0xff]  }
 0x36a   : > { %14371 = vmatprep.mubr.msk.bf16.mxu1 %vm1504_vm7, %v13230_v45  ;;  %v7300_v38 = vshll.u32 %v7240_v19, 16  ;;  %v7243_v45 = vld [vmem:[#allocation3 + $0x28] sm:$0xf]  ;;  %v7304_v2 = vshrl.u32 %v7240_v19, 16  ;;  %v7298_v7 = vrot.slane %v7297_v13, 4  ;;  %v7289_v32 = vsel %vm15732_vm0, %v7284_v17, %v7288_v24  ;;  %v15001_v17 = vld [vmem:[#allocation3 + $0x3c] sm:$0xff]  }
 0x36b   : > { %v7324_v16 = vshll.u32 %v7243_v45, 16  ;;  %v7328_v3 = vshrl.u32 %v7243_v45, 16  ;;  %v13310_v47 = vcombine.low %v7279_v6, %v7289_v32  ;;  %v7341_v9 = vrot.slane %v7339_v53, 4  ;;  %v7253_v6 = vld [vmem:[#allocation3 + $0x50] sm:$0x1] }
 0x36c   : > { %v7302_v1 = vrot.slane %v7300_v38, 5  ;;  %v7306_v37 = vrot.slane %v7304_v2, 4  ;;  %v7348_v22 = vshll.u32 %v7246_v50, 16  ;;  %v7352_v63 = vshrl.u32 %v7246_v50, 16 }
 0x36d   : > { %v7326_v42 = vrot.slane %v7324_v16, 5  ;;  %v7330_v19 = vrot.slane %v7328_v3, 4  ;;  %v7344_v33 = vrot.slane %v7342_v40, 5  ;;  %v7358_v15 = vshll.u32 %v7247_v52, 16  ;;  %v7252_v16 = vld [vmem:[#allocation3 + $0x4c] sm:$0xf] }
 0x36e   : > { %v7307_v41 = vor.u32 %v7306_v37, %v7302_v1  ;;  %v7303_v34 = vsel %vm15732_vm0, %v7298_v7, %v7302_v1  ;;  %v7354_v58 = vrot.slane %v7352_v63, 4  ;;  %v7363_v46 = vshrl.u32 %v7248_v23, 16 }
 0x36f   : > { %14396 = vmatmul.mubr.msk.bf16.gmra.mrb[208].mxu0 %vm1504_vm7, %v13267_v18  ;;  %v7331_v29 = vor.u32 %v7330_v19, %v7326_v42  ;;  %v7350_v18 = vrot.slane %v7348_v22, 5  ;;  %v7345_v36 = vor.u32 %v7344_v33, %v7341_v9  ;;  %v7360_v43 = vrot.slane %v7358_v15, 5  ;;  %v7255_v19 = vld [vmem:[#allocation3 + $0x58] sm:$0xf] }
 0x370   : > { %v7308_v39 = vrot.slane %v7307_v41, 4  ;;  %14427 = vmatprep.mubr.msk.bf16.mxu0 %vm1504_vm7, %v13310_v47  ;;  %v7366_v45 = vshll.u32 %v7248_v23, 16  ;;  %v7372_v25 = vshll.u32 %v7249_v5, 16  ;;  %v7376_v2 = vshrl.u32 %v7249_v5, 16 }
 0x371   : > { %14372 = vmatmul.mubr.msk.bf16.gmra.mrb[60].mxu1 %vm1504_vm7, %v13231_v11  ;;  %v7321_v11 = vor.u32 %v7320_v31, %v7317_v12  ;;  %v7332_v24 = vrot.slane %v7331_v29, 4  ;;  %v7355_v1 = vor.u32 %v7354_v58, %v7350_v18  ;;  %v7346_v0 = vrot.slane %v7345_v36, 4  ;;  %v15002_v58 = vld [vmem:[#allocation3 + $0x48] sm:$0xff]  }
 0x372   : > { %14403 = vmatprep.mubr.msk.bf16.mxu1 %vm1504_vm7, %v14995_v35  ;;  %v7313_v49 = vsel %vm15732_vm0, %v7308_v39, %v7312_v21  ;;  %v7365_v13 = vrot.slane %v7363_v46, 4  ;;  %v7382_v57 = vshll.u32 %v7250_v55, 16  ;;  %v7368_v12 = vrot.slane %v7366_v45, 5  ;;  %v15004_v46 = vld [vmem:[#allocation3 + $0x54] sm:$0xff]  }
 0x373   : > { %v7322_v10 = vrot.slane %v7321_v11, 4  ;;  %v13311_v38 = vcombine.low %v7303_v34, %v7313_v49  ;;  %v7337_v62 = vsel %vm15732_vm0, %v7332_v24, %v7336_v28  ;;  %v7356_v21 = vrot.slane %v7355_v1, 4  ;;  %v7254_v34 = vld [vmem:[#allocation3 + $0x54] sm:$0xf] }
 0x374   : > { %v7351_v7 = vsel %vm15732_vm0, %v7346_v0, %v7350_v18  ;;  %v7378_v31 = vrot.slane %v7376_v2, 4  ;;  %v7387_v44 = vshrl.u32 %v7251_v27, 16  ;;  %v7369_v32 = vor.u32 %v7368_v12, %v7365_v13  ;;  %v7258_v18 = vld [vmem:[#allocation3 + $0x64] sm:$0xf]  ;;  %v7260_v13 = vld [vmem:[#allocation3 + $0x6c] sm:$0xf] }
 0x375   : > { %v7327_v35 = vsel %vm15732_vm0, %v7322_v10, %v7326_v42  ;;  %v7384_v42 = vrot.slane %v7382_v57, 5  ;;  %v7390_v41 = vshll.u32 %v7251_v27, 16  ;;  %v7396_v3 = vshll.u32 %v7252_v16, 16  ;;  %v7256_v10 = vld [vmem:[#allocation3 + $0x5c] sm:$0x1] }
 0x376   : > { %v13312_v37 = vcombine.low %v7327_v35, %v7337_v62  ;;  %v7389_v52 = vrot.slane %v7387_v44, 4  ;;  %v7400_v47 = vshrl.u32 %v7252_v16, 16  ;;  %v7370_v11 = vrot.slane %v7369_v32, 4  ;;  %v7257_v35 = vld [vmem:[#allocation3 + $0x60] sm:$0xf] }
 0x377   : > { %14428 = vmatmul.mubr.msk.bf16.vlgmr.msra.gmra.mrb[212].mxu0 %vm1504_vm7, %v13311_v38  ;;  %v7392_v53 = vrot.slane %v7390_v41, 5  ;;  %v7406_v39 = vshll.u32 %v7253_v6, 16  ;;  %v7411_v9 = vshrl.u32 %v7254_v34, 16  ;;  %v7414_v22 = vshll.u32 %v7254_v34, 16 }
 0x378   : > { %14472 = vmatpush3.bf16.msra.mxu0 %v16958_v30  ;;  %14431 = vmatprep.mubr.msk.bf16.mxu0 %vm1504_vm7, %v13312_v37  ;;  %v7361_v30 = vsel %vm15732_vm0, %v7356_v21, %v7360_v43  ;;  %v7402_v40 = vrot.slane %v7400_v47, 4  ;;  %v7420_v33 = vshll.u32 %v7255_v19, 16  ;;  %v7424_v43 = vshrl.u32 %v7255_v19, 16  ;;  %v7261_v21 = vld [vmem:[#allocation3 + $0x70] sm:$0xf] }
 0x379   : > { %14404 = vmatmul.mubr.msk.bf16.vlgmr.msra.gmra.mrb[64].mxu1 %vm1504_vm7, %v14996_v61  ;;  %v7374_v61 = vrot.slane %v7372_v25, 5  ;;  %14473 = vmatprep.subr.bf16.mxu0 %v15006_v26  ;;  %v13313_v54 = vcombine.low %v7351_v7, %v7361_v30  ;;  %v7393_v49 = vor.u32 %v7392_v53, %v7389_v52  ;;  %v7408_v29 = vrot.slane %v7406_v39, 5  ;;  %v7259_v25 = vld [vmem:[#allocation3 + $0x68] sm:$0x1]  ;;  %v7262_v30 = vld [vmem:[#allocation3 + $0x74] sm:$0x1] }
 0x37a   : > { %14448 = vmatpush3.bf16.msra.mxu1 %v16989_v14  ;;  %14407 = vmatprep.mubr.msk.bf16.mxu1 %vm1504_vm7, %v14998_v4  ;;  %v17073_v14 = vld [vmem:[%s18188_s5 + $0x70] sm:$0xff]   ;;  %v17084_v4 = vld [vmem:[%s18188_s5 + $0x80] sm:$0xff]   ;;  %v7413_v5 = vrot.slane %v7411_v9, 4  ;;  %v7416_v38 = vrot.slane %v7414_v22, 5  ;;  %v7422_v36 = vrot.slane %v7420_v33, 5  ;;  %v7430_v45 = vshll.u32 %v7256_v10, 16 }
 0x37b   : > { %14449 = vmatprep.subr.bf16.mxu1 %v15003_v8  ;;  %v7379_v50 = vor.u32 %v7378_v31, %v7374_v61  ;;  %v7375_v63 = vsel %vm15732_vm0, %v7370_v11, %v7374_v61  ;;  %v7394_v24 = vrot.slane %v7393_v49, 4  ;;  %v7435_v2 = vshrl.u32 %v7257_v35, 16  ;;  %v7756_v52 = vld [vmem:[#allocation3 + $0xc] sm:$0xe]  ;;  %v15005_v39 = vld [vmem:[#allocation3 + $0x60] sm:$0xff]  }
 0x37c   : > { %14474 = vmatpush3.bf16.msra.mxu0 %v15006_v26  ;;  %v7417_v1 = vor.u32 %v7416_v38, %v7413_v5  ;;  %v7438_v62 = vshll.u32 %v7257_v35, 16  ;;  %v7444_v0 = vshll.u32 %v7258_v18, 16  ;;  %v7454_v44 = vshll.u32 %v7259_v25, 16  ;;  %v7758_v9 = vld [vmem:[#allocation3 + $0x14] sm:$0x1]  ;;  %v15007_v22 = vld [vmem:[#allocation3 + $0x6c] sm:$0xff]  }
 0x37d   : > { %v7380_v28 = vrot.slane %v7379_v50, 4  ;;  %14519 = vmatprep.subr.bf16.mxu0 %v17084_v4  ;;  %v7437_v37 = vrot.slane %v7435_v2, 4  ;;  %v7459_v32 = vshrl.u32 %v7260_v13, 16  ;;  %v7468_v50 = vshll.u32 %v7261_v21, 16  ;;  %v7759_v25 = vld [vmem:[#allocation3 + $0x18] sm:$0xe] }
 0x37e   : > { %14450 = vmatpush3.bf16.msra.mxu1 %v15003_v8  ;;  %v7398_v8 = vrot.slane %v7396_v3, 5  ;;  %v7418_v16 = vrot.slane %v7417_v1, 4  ;;  %v7440_v6 = vrot.slane %v7438_v62, 5  ;;  %v7446_v7 = vrot.slane %v7444_v0, 5  ;;  %v7760_v2 = vld [vmem:[#allocation3 + $0x1c] sm:$0xf] }
 0x37f   : > { %14495 = vmatprep.subr.bf16.mxu1 %v17073_v14  ;;  %14432 = vmatmul.mubr.msk.bf16.gmra.mrb[216].mxu0 %vm1504_vm7, %v13313_v54  ;;  %v7385_v15 = vsel %vm15732_vm0, %v7380_v28, %v7384_v42  ;;  %v7448_v42 = vshrl.u32 %v7258_v18, 16  ;;  %v7462_v54 = vshll.u32 %v7260_v13, 16  ;;  %v7456_v34 = vrot.slane %v7454_v44, 5  ;;  %v7264_v18 = vld [vmem:[#allocation3 + $0x7c] sm:$0xf] }
 0x380   : > { %v7403_v23 = vor.u32 %v7402_v40, %v7398_v8  ;;  %v13314_v55 = vcombine.low %v7375_v63, %v7385_v15  ;;  %v7399_v27 = vsel %vm15732_vm0, %v7394_v24, %v7398_v8  ;;  %v7423_v31 = vsel %vm15732_vm0, %v7418_v16, %v7422_v36  ;;  %v7757_v8 = vld [vmem:[#allocation3 + $0x10] sm:$0xf]  ;;  %v7263_v15 = vld [vmem:[#allocation3 + $0x78] sm:$0xf] }
 0x381   : > { %14408 = vmatmul.mubr.msk.bf16.gmra.mrb[68].mxu1 %vm1504_vm7, %v14999_v56  ;;  %v7426_v56 = vrot.slane %v7424_v43, 4  ;;  %v7441_v3 = vor.u32 %v7440_v6, %v7437_v37  ;;  %v7450_v47 = vrot.slane %v7448_v42, 4  ;;  %v7461_v11 = vrot.slane %v7459_v32, 4  ;;  %v7265_v43 = vld [vmem:[#allocation3 + $0x80] sm:$0x1]  ;;  %v15008_v42 = vld [vmem:[#allocation3 + $0x78] sm:$0xff]  }
 0x382   : > { %14411 = vmatprep.mubr.msk.bf16.mxu1 %vm1504_vm7, %v15001_v17  ;;  %v7404_v26 = vrot.slane %v7403_v23, 4  ;;  %14435 = vmatprep.mubr.msk.bf16.mxu0 %vm1504_vm7, %v13314_v55  ;;  %v7432_v17 = vrot.slane %v7430_v45, 5  ;;  %v7472_v53 = vshrl.u32 %v7261_v21, 16  ;;  %v7464_v40 = vrot.slane %v7462_v54, 5 }
 0x383   : > { %v7427_v61 = vor.u32 %v7426_v56, %v7422_v36  ;;  %v7442_v28 = vrot.slane %v7441_v3, 4  ;;  %v7470_v10 = vrot.slane %v7468_v50, 5  ;;  %v7451_v49 = vor.u32 %v7450_v47, %v7446_v7  ;;  %v7766_v47 = vld [vmem:[#allocation3 + $0x34] sm:$0xf] }
 0x384   : > { %v7409_v57 = vsel %vm15732_vm0, %v7404_v26, %v7408_v29  ;;  %v7474_v29 = vrot.slane %v7472_v53, 4  ;;  %v7478_v33 = vshll.u32 %v7262_v30, 16  ;;  %v7465_v5 = vor.u32 %v7464_v40, %v7461_v11 }
 0x385   : > { %v13315_v12 = vcombine.low %v7399_v27, %v7409_v57  ;;  %v7428_v41 = vrot.slane %v7427_v61, 4  ;;  %v7447_v23 = vsel %vm15732_vm0, %v7442_v28, %v7446_v7  ;;  %v13332_v38 = vrot.slane %v7756_v52, 9  ;;  %v7761_v27 = vld [vmem:[#allocation3 + $0x20] sm:$0x1]  ;;  %v7762_v57 = vld [vmem:[#allocation3 + $0x24] sm:$0xe] }
 0x386   : > { %v7818_v35 = vrot.slane %v7757_v8, 5  ;;  %v7475_v55 = vor.u32 %v7474_v29, %v7470_v10  ;;  %v7480_v24 = vrot.slane %v7478_v33, 5  ;;  %v7821_v36 = vrot.slane %v7758_v9, 5  ;;  %v7767_v29 = vld [vmem:[#allocation3 + $0x38] sm:$0x1] }
 0x387   : > { %14436 = vmatmul.mubr.msk.bf16.gmra.mrb[220].mxu0 %vm1504_vm7, %v13315_v12  ;;  %v7433_v19 = vsel %vm15732_vm0, %v7428_v41, %v7432_v17  ;;  %v7483_v45 = vshrl.u32 %v7263_v15, 16  ;;  %v7486_v0 = vshll.u32 %v7263_v15, 16  ;;  %v7492_v13 = vshll.u32 %v7264_v18, 16  ;;  %v7763_v12 = vld [vmem:[#allocation3 + $0x28] sm:$0xf] }
 0x388   : > { %v13316_v63 = vcombine.low %v7423_v31, %v7433_v19  ;;  %v7819_v26 = vsel %vm15834_vm5, %v13332_v38, %v7818_v35  ;;  %v7820_v1 = vrot.slane %v7818_v35, 4  ;;  %v7476_v62 = vrot.slane %v7475_v55, 4  ;;  %v7764_v31 = vld [vmem:[#allocation3 + $0x2c] sm:$0x1]  ;;  %v7768_v33 = vld [vmem:[#allocation3 + $0x3c] sm:$0xe] }
 0x389   : > { %14412 = vmatmul.mubr.msk.bf16.gmra.mrb[72].mxu1 %vm1504_vm7, %v15002_v58  ;;  %v7452_v58 = vrot.slane %v7451_v49, 4  ;;  %v7485_v21 = vrot.slane %v7483_v45, 4  ;;  %v7488_v7 = vrot.slane %v7486_v0, 5  ;;  %v7494_v30 = vrot.slane %v7492_v13, 5  ;;  %v7769_v15 = vld [vmem:[#allocation3 + $0x40] sm:$0xf] }
 0x38a   : > { %14415 = vmatprep.mubr.msk.bf16.mxu1 %vm1504_vm7, %v15004_v46  ;;  %14439 = vmatprep.mubr.msk.bf16.mxu0 %vm1504_vm7, %v13316_v63  ;;  %v7466_v46 = vrot.slane %v7465_v5, 4  ;;  %v7822_v37 = vsel %vm15834_vm5, %v7820_v1, %v7821_v36  ;;  %v7481_v61 = vsel %vm15732_vm0, %v7476_v62, %v7480_v24  ;;  %v7496_v32 = vshrl.u32 %v7264_v18, 16  ;;  %v7770_v18 = vld [vmem:[#allocation3 + $0x44] sm:$0x1]  ;;  %v7771_v1 = vld [vmem:[#allocation3 + $0x48] sm:$0xe] }
 0x38b   : > { %v7457_v56 = vsel %vm15732_vm0, %v7452_v58, %v7456_v34  ;;  %v13346_v6 = vcombine.low %v7819_v26, %v7822_v37  ;;  %v7502_v41 = vshll.u32 %v7265_v43, 16  ;;  %v7489_v3 = vor.u32 %v7488_v7, %v7485_v21  ;;  %v15010_v58 = vld [vmem:[#allocation3 + $0x18] sm:$0xff]   ;;  %v7772_v45 = vld [vmem:[#allocation3 + $0x4c] sm:$0xf]  ;;  %v7773_v0 = vld [vmem:[#allocation3 + $0x50] sm:$0x1] }
 0x38c   : > { %v13317_v16 = vcombine.low %v7447_v23, %v7457_v56  ;;  %v7471_v17 = vsel %vm15732_vm0, %v7466_v46, %v7470_v10  ;;  %v13333_v54 = vrot.slane %v7759_v25, 9  ;;  %v7825_v50 = vrot.slane %v7760_v2, 5  ;;  %v15015_v25 = vld [vmem:[%s18188_s5 + $0x78] sm:$0xff]  }
 0x38d   : > { %v13318_v44 = vcombine.low %v7471_v17, %v7481_v61  ;;  %v7828_v52 = vrot.slane %v7761_v27, 5  ;;  %v7498_v34 = vrot.slane %v7496_v32, 4  ;;  %v13334_v11 = vrot.slane %v7762_v57, 9  ;;  %v7774_v37 = vld [vmem:[#allocation3 + $0x54] sm:$0xe] }
 0x38e   : > { %v7832_v53 = vrot.slane %v7763_v12, 5  ;;  %v7835_v8 = vrot.slane %v7764_v31, 5  ;;  %v7490_v19 = vrot.slane %v7489_v3, 4  ;;  %v7504_v28 = vrot.slane %v7502_v41, 5  ;;  %v7775_v12 = vld [vmem:[#allocation3 + $0x58] sm:$0xf] }
 0x38f   : > { %14440 = vmatmul.mubr.msk.bf16.gmra.mrb[224].mxu0 %vm1504_vm7, %v13317_v16  ;;  %v7827_v40 = vrot.slane %v7825_v50, 4  ;;  %v7499_v10 = vor.u32 %v7498_v34, %v7494_v30  ;;  %v7826_v63 = vsel %vm15834_vm5, %v13333_v54, %v7825_v50  ;;  %v7846_v24 = vrot.slane %v7769_v15, 5  ;;  %v7776_v61 = vld [vmem:[#allocation3 + $0x5c] sm:$0x1]  ;;  %v7777_v3 = vld [vmem:[#allocation3 + $0x60] sm:$0xe] }
 0x390   : > { %14443 = vmatprep.mubr.msk.bf16.mxu0 %vm1504_vm7, %v13318_v44  ;;  %v7834_v9 = vrot.slane %v7832_v53, 4  ;;  %v7495_v23 = vsel %vm15732_vm0, %v7490_v19, %v7494_v30  ;;  %v7833_v38 = vsel %vm15834_vm5, %v13334_v11, %v7832_v53  ;;  %v7842_v26 = vrot.slane %v7767_v29, 5  ;;  %v7779_v54 = vld [vmem:[#allocation3 + $0x68] sm:$0x1]  ;;  %v15013_v50 = vld [vmem:[#allocation3 + $0x30] sm:$0xff]  }
 0x391   : > { %14416 = vmatmul.mubr.msk.bf16.gmra.mrb[76].mxu1 %vm1504_vm7, %v15005_v39  ;;  %v7765_v39 = vld [vmem:[#allocation3 + $0x30] sm:$0xe]  ;;  %v7829_v49 = vsel %vm15834_vm5, %v7827_v40, %v7828_v52  ;;  %v7500_v5 = vrot.slane %v7499_v10, 4  ;;  %v13336_v56 = vrot.slane %v7768_v33, 9  ;;  %v7849_v62 = vrot.slane %v7770_v18, 5  ;;  %v15014_v18 = vld [vmem:[#allocation3 + $0x3c] sm:$0xff]  }
 0x392   : > { %14419 = vmatprep.mubr.msk.bf16.mxu1 %vm1504_vm7, %v15007_v22  ;;  %v7839_v22 = vrot.slane %v7766_v47, 5  ;;  %v7836_v35 = vsel %vm15834_vm5, %v7834_v9, %v7835_v8  ;;  %v13335_v55 = vrot.slane %v7765_v39, 9  ;;  %v13347_v43 = vcombine.low %v7826_v63, %v7829_v49  ;;  %v15018_v8 = vld [vmem:[%s18188_s5 + $0x88] sm:$0xff]   ;;  %v7780_v40 = vld [vmem:[#allocation3 + $0x6c] sm:$0xe] }
 0x393   : > { %v7505_v36 = vsel %vm15732_vm0, %v7500_v5, %v7504_v28  ;;  %v13348_v27 = vcombine.low %v7833_v38, %v7836_v35  ;;  %v7848_v13 = vrot.slane %v7846_v24, 4  ;;  %v13337_v57 = vrot.slane %v7771_v1, 9  ;;  %v7781_v10 = vld [vmem:[#allocation3 + $0x70] sm:$0xf]  ;;  %v7782_v9 = vld [vmem:[#allocation3 + $0x74] sm:$0x1] }
 0x394   : > { %v7841_v46 = vrot.slane %v7839_v22, 4  ;;  %v13319_v2 = vcombine.low %v7495_v23, %v7505_v36  ;;  %v7853_v16 = vrot.slane %v7772_v45, 5  ;;  %v7856_v17 = vrot.slane %v7773_v0, 5  ;;  %v7783_v33 = vld [vmem:[#allocation3 + $0x78] sm:$0xe] }
 0x395   : > { %v7840_v7 = vsel %vm15834_vm5, %v13335_v55, %v7839_v22  ;;  %v7860_v44 = vrot.slane %v7775_v12, 5  ;;  %v7863_v30 = vrot.slane %v7776_v61, 5  ;;  %v7847_v32 = vsel %vm15834_vm5, %v13336_v56, %v7846_v24  ;;  %v7784_v15 = vld [vmem:[#allocation3 + $0x7c] sm:$0xf]  ;;  %v7785_v5 = vld [vmem:[#allocation3 + $0x80] sm:$0x1] }
 0x396   : > { %v7855_v21 = vrot.slane %v7853_v16, 4  ;;  %v7843_v31 = vsel %vm15834_vm5, %v7841_v46, %v7842_v26  ;;  %v7850_v41 = vsel %vm15834_vm5, %v7848_v13, %v7849_v62  ;;  %v13339_v47 = vrot.slane %v7777_v3, 9  ;;  %v8427_v45 = vld [vmem:[#allocation3 + $0x18] sm:$0xf]  ;;  %v8429_v56 = vld [vmem:[#allocation3 + $0x20] sm:$0x1] }
 0x397   : > { %14444 = vmatmul.mubr.msk.bf16.gmra.mrb[228].mxu0 %vm1504_vm7, %v13319_v2  ;;  %v7862_v52 = vrot.slane %v7860_v44, 4  ;;  %v13349_v34 = vcombine.low %v7840_v7, %v7843_v31  ;;  %v7870_v53 = vrot.slane %v7779_v54, 5  ;;  %v13350_v39 = vcombine.low %v7847_v32, %v7850_v41  ;;  %v8432_v32 = vld [vmem:[#allocation3 + $0x2c] sm:$0x1] }
 0x398   : > { %14475 = vmatprep.mubr.msk.bf16.mxu0 %vm1504_vm7, %v15010_v58  ;;  %v7854_v19 = vsel %vm15834_vm5, %v13337_v57, %v7853_v16  ;;  %v7857_v28 = vsel %vm15834_vm5, %v7855_v21, %v7856_v17  ;;  %v13340_v63 = vrot.slane %v7780_v40, 9  ;;  %v7874_v49 = vrot.slane %v7781_v10, 5 }
 0x399   : > { %14420 = vmatmul.mubr.msk.bf16.gmra.mrb[80].mxu1 %vm1504_vm7, %v15008_v42  ;;  %v15011_v42 = vld [vmem:[#allocation3 + $0x24] sm:$0xff]   ;;  %v7877_v29 = vrot.slane %v7782_v9, 5  ;;  %v13351_v23 = vcombine.low %v7854_v19, %v7857_v28  ;;  %v13341_v38 = vrot.slane %v7783_v33, 9  ;;  %v7881_v35 = vrot.slane %v7784_v15, 5  ;;  %v8434_v19 = vld [vmem:[#allocation3 + $0x34] sm:$0xf] }
 0x39a   : > { %14451 = vmatprep.mubr.msk.bf16.mxu1 %vm1504_vm7, %v13346_v6  ;;  %v13338_v6 = vrot.slane %v7774_v37, 9  ;;  %v7864_v55 = vsel %vm15834_vm5, %v7862_v52, %v7863_v30  ;;  %v7876_v24 = vrot.slane %v7874_v49, 4  ;;  %v7884_v36 = vrot.slane %v7785_v5, 5  ;;  %v8431_v30 = vld [vmem:[#allocation3 + $0x28] sm:$0xf] }
 0x39b   : > { %v17183_v26 = vsel %vm15834_vm5, %v13340_v63, %v7874_v49  ;;  %v7883_v1 = vrot.slane %v7881_v35, 4  ;;  %v17191_v2 = vsel %vm15834_vm5, %v13341_v38, %v7881_v35  ;;  %v8458_v62 = vshrl.u32 %v8427_v45, 16  ;;  %v8435_v63 = vld [vmem:[#allocation3 + $0x38] sm:$0x1]  ;;  %v8947_v38 = vld [vmem:[#allocation3 + $0x18] sm:$0xe] }
 0x39c   : > { %v7861_v58 = vsel %vm15834_vm5, %v13338_v6, %v7860_v44  ;;  %v8461_v0 = vshll.u32 %v8427_v45, 16  ;;  %v8477_v61 = vshll.u32 %v8429_v56, 16  ;;  %v8430_v6 = vld [vmem:[#allocation3 + $0x24] sm:$0xf]  ;;  %v15017_v49 = vld [vmem:[#allocation3 + $0x54] sm:$0xff]  }
 0x39d   : > { %v13352_v13 = vcombine.low %v7861_v58, %v7864_v55  ;;  %v17195_v57 = vsel %vm15834_vm5, %v7883_v1, %v7884_v36  ;;  %v8460_v21 = vrot.slane %v8458_v62, 4  ;;  %v8485_v54 = vshll.u32 %v8430_v6, 16  ;;  %v8949_v36 = vld [vmem:[#allocation3 + $0x20] sm:$0x1]  ;;  %v8436_v45 = vld [vmem:[#allocation3 + $0x3c] sm:$0xf] }
 0x39e   : > { %v8463_v12 = vrot.slane %v8461_v0, 5  ;;  %v13355_v31 = vcombine.low %v17191_v2, %v17195_v57  ;;  %v8479_v3 = vrot.slane %v8477_v61, 5  ;;  %v8515_v58 = vshll.u32 %v8434_v19, 16  ;;  %v8955_v2 = vld [vmem:[#allocation3 + $0x38] sm:$0x1] }
 0x39f   : > { %14476 = vmatmul.mubr.msk.bf16.vlgmr.msra.gmra.mrb[232].mxu0 %vm1504_vm7, %v15011_v42  ;;  %v8519_v55 = vshrl.u32 %v8434_v19, 16  ;;  %v8525_v1 = vshll.u32 %v8435_v63, 16  ;;  %v13420_v0 = vrot.slane %v8947_v38, 9  ;;  %v15021_v19 = vld [vmem:[#allocation3 + $0x78] sm:$0xff]   ;;  %v8441_v38 = vld [vmem:[#allocation3 + $0x50] sm:$0x1] }
 0x3a0   : > { %14520 = vmatpush3.bf16.msra.mxu0 %v17084_v4  ;;  %14479 = vmatprep.mubr.msk.bf16.mxu0 %vm1504_vm7, %v15013_v50  ;;  %v8464_v41 = vor.u32 %v8463_v12, %v8460_v21  ;;  %v8433_v50 = vld [vmem:[#allocation3 + $0x30] sm:$0xf]  ;;  %v8517_v56 = vrot.slane %v8515_v58, 5  ;;  %v8437_v12 = vld [vmem:[#allocation3 + $0x40] sm:$0xf] }
 0x3a1   : > { %14452 = vmatmul.mubr.msk.bf16.vlgmr.msra.gmra.mrb[84].mxu1 %vm1504_vm7, %v13347_v43  ;;  %v15016_v43 = vld [vmem:[#allocation3 + $0x48] sm:$0xff]   ;;  %14521 = vmatprep.subr.bf16.mxu0 %v15018_v8  ;;  %v8506_v28 = vshrl.u32 %v8433_v50, 16  ;;  %v8509_v5 = vshll.u32 %v8433_v50, 16  ;;  %v8521_v62 = vrot.slane %v8519_v55, 4 }
 0x3a2   : > { %14496 = vmatpush3.bf16.msra.mxu1 %v17073_v14  ;;  %14455 = vmatprep.mubr.msk.bf16.mxu1 %vm1504_vm7, %v13348_v27  ;;  %v7778_v14 = vld [vmem:[#allocation3 + $0x64] sm:$0xf]  ;;  %v8428_v27 = vld [vmem:[#allocation3 + $0x1c] sm:$0xf] }
 0x3a3   : > { %14497 = vmatprep.subr.bf16.mxu1 %v15015_v25  ;;  %v7867_v11 = vrot.slane %v7778_v14, 5  ;;  %v8467_v16 = vshll.u32 %v8428_v27, 16  ;;  %v8471_v17 = vshrl.u32 %v8428_v27, 16  ;;  %v8482_v14 = vshrl.u32 %v8430_v6, 16 }
 0x3a4   : > { %14522 = vmatpush3.bf16.msra.mxu0 %v15018_v8  ;;  %v8522_v6 = vor.u32 %v8521_v62, %v8517_v56 }
 0x3a5   : > { %v7869_v22 = vrot.slane %v7867_v11, 4  ;;  %v17175_v4 = vsel %vm15834_vm5, %v13339_v47, %v7867_v11  ;;  %v8469_v42 = vrot.slane %v8467_v16, 5  ;;  %v8473_v44 = vrot.slane %v8471_v17, 4 }
 0x3a6   : > { %14498 = vmatpush3.bf16.msra.mxu1 %v15015_v25  ;;  %v17187_v25 = vsel %vm15834_vm5, %v7876_v24, %v7877_v29  ;;  %v8491_v47 = vshll.u32 %v8431_v30, 16  ;;  %v8501_v11 = vshll.u32 %v8432_v32, 16  ;;  %v8484_v8 = vrot.slane %v8482_v14, 4  ;;  %v15019_v29 = vld [vmem:[#allocation3 + $0x60] sm:$0xff]   ;;  %v8948_v24 = vld [vmem:[#allocation3 + $0x1c] sm:$0xf] }
 0x3a7   : > { %v17179_v46 = vsel %vm15834_vm5, %v7869_v22, %v7870_v53  ;;  %v13354_v7 = vcombine.low %v17183_v26, %v17187_v25  ;;  %14480 = vmatmul.mubr.msk.bf16.gmra.mrb[236].mxu0 %vm1504_vm7, %v15014_v18  ;;  %v8474_v52 = vor.u32 %v8473_v44, %v8469_v42  ;;  %v8465_v53 = vrot.slane %v8464_v41, 4  ;;  %v8438_v44 = vld [vmem:[#allocation3 + $0x44] sm:$0x1]  ;;  %v15020_v32 = vld [vmem:[#allocation3 + $0x6c] sm:$0xff]  }
 0x3a8   : > { %v13353_v37 = vcombine.low %v17175_v4, %v17179_v46  ;;  %14483 = vmatprep.mubr.msk.bf16.mxu0 %vm1504_vm7, %v15016_v43  ;;  %v8493_v10 = vrot.slane %v8491_v47, 5  ;;  %v8503_v22 = vrot.slane %v8501_v11, 5  ;;  %v8511_v46 = vrot.slane %v8509_v5, 5  ;;  %v8951_v11 = vld [vmem:[#allocation3 + $0x28] sm:$0xf] }
 0x3a9   : > { %14456 = vmatmul.mubr.msk.bf16.gmra.mrb[88].mxu1 %vm1504_vm7, %v13349_v34  ;;  %v8495_v34 = vshrl.u32 %v8431_v30, 16  ;;  %v8475_v40 = vrot.slane %v8474_v52, 4  ;;  %v8470_v33 = vsel %vm15732_vm0, %v8465_v53, %v8469_v42  ;;  %v8527_v17 = vrot.slane %v8525_v1, 5 }
 0x3aa   : > { %14459 = vmatprep.mubr.msk.bf16.mxu1 %vm1504_vm7, %v13350_v39  ;;  %v8487_v39 = vrot.slane %v8485_v54, 5  ;;  %v9009_v21 = vrot.slane %v8948_v24, 5  ;;  %v9012_v42 = vrot.slane %v8949_v36, 5  ;;  %v8530_v30 = vshrl.u32 %v8436_v45, 16  ;;  %v8950_v54 = vld [vmem:[#allocation3 + $0x24] sm:$0xe] }
 0x3ab   : > { %v8497_v9 = vrot.slane %v8495_v34, 4  ;;  %v8480_v35 = vsel %vm15732_vm0, %v8475_v40, %v8479_v3  ;;  %v8523_v50 = vrot.slane %v8522_v6, 4  ;;  %v8533_v47 = vshll.u32 %v8436_v45, 16  ;;  %v8953_v36 = vld [vmem:[#allocation3 + $0x30] sm:$0xe] }
 0x3ac   : > { %v8488_v15 = vor.u32 %v8487_v39, %v8484_v8  ;;  %v17211_v43 = vcombine.low %v8470_v33, %v8480_v35  ;;  %v9011_v14 = vrot.slane %v9009_v21, 4  ;;  %v8532_v52 = vrot.slane %v8530_v30, 4  ;;  %v8952_v8 = vld [vmem:[#allocation3 + $0x2c] sm:$0x1]  ;;  %v8439_v39 = vld [vmem:[#allocation3 + $0x48] sm:$0xf] }
 0x3ad   : > { %v8498_v18 = vor.u32 %v8497_v9, %v8493_v10  ;;  %v8539_v34 = vshll.u32 %v8437_v12, 16  ;;  %v8549_v53 = vshll.u32 %v8438_v44, 16  ;;  %v13421_v33 = vrot.slane %v8950_v54, 9  ;;  %v8443_v44 = vld [vmem:[#allocation3 + $0x58] sm:$0xf] }
 0x3ae   : > { %v8489_v4 = vrot.slane %v8488_v15, 4  ;;  %v17234_v25 = vsel %vm15834_vm5, %v9011_v14, %v9012_v42  ;;  %v9019_v5 = vrot.slane %v8952_v8, 5  ;;  %v8554_v35 = vshrl.u32 %v8439_v39, 16  ;;  %v8444_v54 = vld [vmem:[#allocation3 + $0x5c] sm:$0x1] }
 0x3af   : > { %v8499_v27 = vrot.slane %v8498_v18, 4  ;;  %14484 = vmatmul.mubr.msk.bf16.gmra.mrb[240].mxu0 %vm1504_vm7, %v15017_v49  ;;  %v8541_v9 = vrot.slane %v8539_v34, 5  ;;  %v8557_v58 = vshll.u32 %v8439_v39, 16  ;;  %v9026_v14 = vrot.slane %v8955_v2, 5  ;;  %v8957_v39 = vld [vmem:[#allocation3 + $0x40] sm:$0xf] }
 0x3b0   : > { %14487 = vmatprep.mubr.msk.bf16.mxu0 %vm1504_vm7, %v15019_v29  ;;  %v8551_v29 = vrot.slane %v8549_v53, 5  ;;  %v8556_v45 = vrot.slane %v8554_v35, 4  ;;  %v8587_v53 = vshll.u32 %v8443_v44, 16  ;;  %v8591_v8 = vshrl.u32 %v8443_v44, 16  ;;  %v8449_v44 = vld [vmem:[#allocation3 + $0x70] sm:$0xf] }
 0x3b1   : > { %14460 = vmatmul.mubr.msk.bf16.gmra.mrb[92].mxu1 %vm1504_vm7, %v13351_v23  ;;  %v8508_v23 = vrot.slane %v8506_v28, 4  ;;  %v8504_v61 = vsel %vm15732_vm0, %v8499_v27, %v8503_v22  ;;  %v8528_v28 = vsel %vm15732_vm0, %v8523_v50, %v8527_v17  ;;  %v8440_v22 = vld [vmem:[#allocation3 + $0x4c] sm:$0xf]  ;;  %v8954_v27 = vld [vmem:[#allocation3 + $0x34] sm:$0xf]  ;;  %v8559_v62 = vrot.slane %v8557_v58, 5 }
 0x3b2   : > { %14463 = vmatprep.mubr.msk.bf16.mxu1 %vm1504_vm7, %v13352_v13  ;;  %v8494_v13 = vsel %vm15732_vm0, %v8489_v4, %v8493_v10  ;;  %v8535_v10 = vrot.slane %v8533_v47, 5  ;;  %v8563_v55 = vshll.u32 %v8440_v22, 16  ;;  %v8567_v24 = vshrl.u32 %v8440_v22, 16  ;;  %v8958_v22 = vld [vmem:[#allocation3 + $0x44] sm:$0x1] }
 0x3b3   : > { %v8512_v16 = vor.u32 %v8511_v46, %v8508_v23  ;;  %v17224_v41 = vcombine.low %v8494_v13, %v8504_v61  ;;  %v9016_v23 = vrot.slane %v8951_v11, 5  ;;  %v13422_v17 = vrot.slane %v8953_v36, 9  ;;  %v8956_v11 = vld [vmem:[#allocation3 + $0x3c] sm:$0xe] }
 0x3b4   : > { %v8536_v15 = vor.u32 %v8535_v10, %v8532_v52  ;;  %v8569_v13 = vrot.slane %v8567_v24, 4  ;;  %v8560_v6 = vor.u32 %v8559_v62, %v8556_v45  ;;  %v13423_v58 = vrot.slane %v8956_v11, 9 }
 0x3b5   : > { %v8513_v3 = vrot.slane %v8512_v16, 4  ;;  %v17250_v46 = vsel %vm15834_vm5, %v13421_v33, %v9016_v23  ;;  %v9018_v1 = vrot.slane %v9016_v23, 4  ;;  %v8573_v16 = vshll.u32 %v8441_v38, 16 }
 0x3b6   : > { %v8537_v4 = vrot.slane %v8536_v15, 4  ;;  %v8561_v50 = vrot.slane %v8560_v6, 4  ;;  %v8589_v15 = vrot.slane %v8587_v53, 5  ;;  %v8593_v23 = vrot.slane %v8591_v8, 4 }
 0x3b7   : > { %v8518_v26 = vsel %vm15732_vm0, %v8513_v3, %v8517_v56  ;;  %14488 = vmatmul.mubr.msk.bf16.gmra.mrb[244].mxu0 %vm1504_vm7, %v15020_v32  ;;  %v8575_v32 = vrot.slane %v8573_v16, 5  ;;  %v9023_v3 = vrot.slane %v8954_v27, 5  ;;  %v9030_v24 = vrot.slane %v8957_v39, 5  ;;  %v8960_v27 = vld [vmem:[#allocation3 + $0x4c] sm:$0xf] }
 0x3b8   : > { %v17240_v63 = vcombine.low %v8518_v26, %v8528_v28  ;;  %14491 = vmatprep.mubr.msk.bf16.mxu0 %vm1504_vm7, %v15021_v19  ;;  %v8542_v57 = vsel %vm15732_vm0, %v8537_v4, %v8541_v9 }
 0x3b9   : > { %14464 = vmatmul.mubr.msk.bf16.gmra.mrb[96].mxu1 %vm1504_vm7, %v13353_v37  ;;  %v17228_v37 = vsel %vm15834_vm5, %v13420_v0, %v9009_v21  ;;  %v8565_v0 = vrot.slane %v8563_v55, 5  ;;  %v8442_v21 = vld [vmem:[#allocation3 + $0x54] sm:$0xf]  ;;  %v9024_v26 = vsel %vm15834_vm5, %v13422_v17, %v9023_v3  ;;  %v8594_v55 = vor.u32 %v8593_v23, %v8589_v15 }
 0x3ba   : > { %14467 = vmatprep.mubr.msk.bf16.mxu1 %vm1504_vm7, %v13354_v7  ;;  %v8543_v7 = vshrl.u32 %v8437_v12, 16  ;;  %v13434_v40 = vcombine.low %v17228_v37, %v17234_v25  ;;  %v15022_v12 = vld [vmem:[#allocation3 + $0x84] sm:$0xff]   ;;  %v8578_v47 = vshrl.u32 %v8442_v21, 16  ;;  %v8581_v34 = vshll.u32 %v8442_v21, 16  ;;  %v8448_v21 = vld [vmem:[#allocation3 + $0x6c] sm:$0xf] }
 0x3bb   : > { %v8570_v42 = vor.u32 %v8569_v13, %v8565_v0  ;;  %v8566_v19 = vsel %vm15732_vm0, %v8561_v50, %v8565_v0  ;;  %v9033_v37 = vrot.slane %v8958_v22, 5  ;;  %v9031_v62 = vsel %vm15834_vm5, %v13423_v58, %v9030_v24  ;;  %v8961_v13 = vld [vmem:[#allocation3 + $0x50] sm:$0x1] }
 0x3bc   : > { %v8545_v49 = vrot.slane %v8543_v7, 4  ;;  %v9025_v7 = vrot.slane %v9023_v3, 4  ;;  %v8580_v10 = vrot.slane %v8578_v47, 4  ;;  %v9040_v47 = vrot.slane %v8961_v13, 5  ;;  %v8966_v13 = vld [vmem:[#allocation3 + $0x64] sm:$0xf] }
 0x3bd   : > { %v8571_v52 = vrot.slane %v8570_v42, 4  ;;  %v8626_v11 = vshrl.u32 %v8448_v21, 16 }
 0x3be   : > { %v8546_v18 = vor.u32 %v8545_v49, %v8541_v9  ;;  %v8583_v9 = vrot.slane %v8581_v34, 5  ;;  %v8445_v49 = vld [vmem:[#allocation3 + $0x60] sm:$0xf]  ;;  %v9027_v33 = vsel %vm15834_vm5, %v9025_v7, %v9026_v14  ;;  %v8450_v34 = vld [vmem:[#allocation3 + $0x74] sm:$0x1] }
 0x3bf   : > { %14492 = vmatmul.mubr.msk.bf16.gmra.mrb[248].mxu0 %vm1504_vm7, %v15022_v12  ;;  %v8576_v28 = vsel %vm15732_vm0, %v8571_v52, %v8575_v32  ;;  %v13436_v38 = vcombine.low %v9024_v26, %v9027_v33  ;;  %v8602_v25 = vshrl.u32 %v8445_v49, 16  ;;  %v9037_v52 = vrot.slane %v8960_v27, 5  ;;  %v8962_v7 = vld [vmem:[#allocation3 + $0x54] sm:$0xe]  ;;  %v8965_v27 = vld [vmem:[#allocation3 + $0x60] sm:$0xe] }
 0x3c0   : > { %v8547_v56 = vrot.slane %v8546_v18, 4  ;;  %14523 = vmatprep.mubr.msk.bf16.mxu0 %vm1504_vm7, %v13434_v40  ;;  %v8584_v35 = vor.u32 %v8583_v9, %v8580_v10  ;;  %v8597_v18 = vshll.u32 %v8444_v54, 16  ;;  %v8959_v40 = vld [vmem:[#allocation3 + $0x48] sm:$0xe]  ;;  %v8628_v39 = vrot.slane %v8626_v11, 4 }
 0x3c1   : > { %14468 = vmatmul.mubr.msk.bf16.gmra.mrb[100].mxu1 %vm1504_vm7, %v13355_v31  ;;  %v17258_v31 = vsel %vm15834_vm5, %v9018_v1, %v9019_v5  ;;  %v8446_v5 = vld [vmem:[#allocation3 + $0x64] sm:$0xf]  ;;  %v8605_v1 = vshll.u32 %v8445_v49, 16  ;;  %v8604_v0 = vrot.slane %v8602_v25, 4  ;;  %v13424_v42 = vrot.slane %v8959_v40, 9 }
 0x3c2   : > { %14499 = vmatprep.mubr.msk.bf16.mxu1 %vm1504_vm7, %v17211_v43  ;;  %v8552_v61 = vsel %vm15732_vm0, %v8547_v56, %v8551_v29  ;;  %v13435_v43 = vcombine.low %v17250_v46, %v17258_v31  ;;  %v13402_v29 = vcombine.low %v8566_v19, %v8576_v28  ;;  %v8585_v36 = vrot.slane %v8584_v35, 4  ;;  %v8963_v19 = vld [vmem:[#allocation3 + $0x58] sm:$0xf]  ;;  %v8964_v49 = vld [vmem:[#allocation3 + $0x5c] sm:$0x1] }
 0x3c3   : > { %v17264_v30 = vcombine.low %v8542_v57, %v8552_v61  ;;  %v8599_v4 = vrot.slane %v8597_v18, 5  ;;  %v8611_v45 = vshll.u32 %v8446_v5, 16  ;;  %v8595_v56 = vrot.slane %v8594_v55, 4  ;;  %v8453_v40 = vld [vmem:[#allocation3 + $0x80] sm:$0x1] }
 0x3c4   : > { %v8590_v2 = vsel %vm15732_vm0, %v8585_v36, %v8589_v15  ;;  %v8607_v57 = vrot.slane %v8605_v1, 5  ;;  %v8615_v17 = vshrl.u32 %v8446_v5, 16  ;;  %v8629_v31 = vshll.u32 %v8448_v21, 16  ;;  %v8451_v5 = vld [vmem:[#allocation3 + $0x78] sm:$0xf] }
 0x3c5   : > { %v8613_v16 = vrot.slane %v8611_v45, 5  ;;  %v8600_v12 = vsel %vm15732_vm0, %v8595_v56, %v8599_v4  ;;  %v9038_v53 = vsel %vm15834_vm5, %v13424_v42, %v9037_v52  ;;  %v9039_v8 = vrot.slane %v9037_v52, 4  ;;  %v8967_v21 = vld [vmem:[#allocation3 + $0x68] sm:$0x1]  ;;  %v8456_v11 = vld [vmem:[#allocation3 + $0x8c] sm:$0x1] }
 0x3c6   : > { %v13403_v32 = vcombine.low %v8590_v2, %v8600_v12  ;;  %v8608_v14 = vor.u32 %v8607_v57, %v8604_v0  ;;  %v8617_v54 = vrot.slane %v8615_v17, 4  ;;  %v8631_v9 = vrot.slane %v8629_v31, 5  ;;  %v8454_v12 = vld [vmem:[#allocation3 + $0x84] sm:$0xf] }
 0x3c7   : > { %14524 = vmatmul.mubr.msk.bf16.vlgmr.msra.gmra.mrb[252].mxu0 %vm1504_vm7, %v13435_v43  ;;  %v8635_v43 = vshll.u32 %v8449_v44, 16  ;;  %v8645_v15 = vshll.u32 %v8450_v34, 16  ;;  %v13425_v23 = vrot.slane %v8962_v7, 9  ;;  %v9044_v58 = vrot.slane %v8963_v19, 5 }
 0x3c8   : > { %14527 = vmatprep.mubr.msk.bf16.mxu0 %vm1504_vm7, %v13436_v38  ;;  %v8609_v26 = vrot.slane %v8608_v14, 4  ;;  %v8618_v46 = vor.u32 %v8617_v54, %v8613_v16  ;;  %v8632_v18 = vor.u32 %v8631_v9, %v8628_v39  ;;  %v9047_v25 = vrot.slane %v8964_v49, 5 }
 0x3c9   : > { %14500 = vmatmul.mubr.msk.bf16.vlgmr.msra.gmra.mrb[104].mxu1 %vm1504_vm7, %v17224_v41  ;;  %v8447_v41 = vld [vmem:[#allocation3 + $0x68] sm:$0x1]  ;;  %v8637_v22 = vrot.slane %v8635_v43, 5  ;;  %v9045_v4 = vsel %vm15834_vm5, %v13425_v23, %v9044_v58  ;;  %v9046_v1 = vrot.slane %v9044_v58, 4  ;;  %v8650_v45 = vshrl.u32 %v8451_v5, 16 }
 0x3ca   : > { %14503 = vmatprep.mubr.msk.bf16.mxu1 %vm1504_vm7, %v17240_v63  ;;  %v9032_v63 = vrot.slane %v9030_v24, 4  ;;  %v8621_v6 = vshll.u32 %v8447_v41, 16  ;;  %v8614_v28 = vsel %vm15732_vm0, %v8609_v26, %v8613_v16  ;;  %v8619_v10 = vrot.slane %v8618_v46, 4  ;;  %v8452_v41 = vld [vmem:[#allocation3 + $0x7c] sm:$0xf] }
 0x3cb   : > { %v8633_v36 = vrot.slane %v8632_v18, 4  ;;  %v8663_v0 = vshrl.u32 %v8452_v41, 16  ;;  %v9048_v57 = vsel %vm15834_vm5, %v9046_v1, %v9047_v25  ;;  %v8652_v16 = vrot.slane %v8650_v45, 4  ;;  %v8975_v1 = vld [vmem:[#allocation3 + $0x88] sm:$0xf] }
 0x3cc   : > { %v9034_v61 = vsel %vm15834_vm5, %v9032_v63, %v9033_v37  ;;  %v8623_v50 = vrot.slane %v8621_v6, 5  ;;  %v8647_v37 = vrot.slane %v8645_v15, 5  ;;  %v8659_v63 = vshll.u32 %v8452_v41, 16 }
 0x3cd   : > { %v13437_v3 = vcombine.low %v9031_v62, %v9034_v61  ;;  %v8653_v62 = vshll.u32 %v8451_v5, 16  ;;  %v8638_v2 = vsel %vm15732_vm0, %v8633_v36, %v8637_v22  ;;  %v8669_v17 = vshll.u32 %v8453_v40, 16 }
 0x3ce   : > { %v8624_v38 = vsel %vm15732_vm0, %v8619_v10, %v8623_v50  ;;  %v13439_v6 = vcombine.low %v9045_v4, %v9048_v57  ;;  %v8665_v14 = vrot.slane %v8663_v0, 4  ;;  %v13426_v50 = vrot.slane %v8965_v27, 9 }
 0x3cf   : > { %v13404_v55 = vcombine.low %v8614_v28, %v8624_v38  ;;  %14528 = vmatmul.mubr.msk.bf16.gmra.mrb[0].mxu0 %vm1504_vm7, %v13437_v3  ;;  %v8655_v42 = vrot.slane %v8653_v62, 5  ;;  %v8671_v54 = vrot.slane %v8669_v17, 5  ;;  %v9054_v34 = vrot.slane %v8967_v21, 5  ;;  %v8969_v28 = vld [vmem:[#allocation3 + $0x70] sm:$0xf] }
 0x3d0   : > { %v8674_v26 = vshrl.u32 %v8454_v12, 16  ;;  %v8677_v31 = vshll.u32 %v8454_v12, 16  ;;  %v8693_v23 = vshll.u32 %v8456_v11, 16  ;;  %v8971_v38 = vld [vmem:[#allocation3 + $0x78] sm:$0xe]  ;;  %v9058_v36 = vrot.slane %v8969_v28, 5 }
 0x3d1   : > { %14504 = vmatmul.mubr.msk.bf16.gmra.mrb[108].mxu1 %vm1504_vm7, %v17264_v30  ;;  %v8639_v30 = vshrl.u32 %v8449_v44, 16  ;;  %v8661_v44 = vrot.slane %v8659_v63, 5  ;;  %v8656_v52 = vor.u32 %v8655_v42, %v8652_v16  ;;  %v8976_v63 = vld [vmem:[#allocation3 + $0x8c] sm:$0x1]  ;;  %v9072_v42 = vrot.slane %v8975_v1, 5 }
 0x3d2   : > { %14507 = vmatprep.mubr.msk.bf16.mxu1 %vm1504_vm7, %v13402_v29  ;;  %v9041_v29 = vsel %vm15834_vm5, %v9039_v8, %v9040_v47  ;;  %v9051_v47 = vrot.slane %v8966_v13, 5  ;;  %v8676_v19 = vrot.slane %v8674_v26, 4  ;;  %v8679_v9 = vrot.slane %v8677_v31, 5 }
 0x3d3   : > { %v8641_v33 = vrot.slane %v8639_v30, 4  ;;  %v13438_v35 = vcombine.low %v9038_v53, %v9041_v29  ;;  %v8666_v46 = vor.u32 %v8665_v14, %v8661_v44  ;;  %v8968_v53 = vld [vmem:[#allocation3 + $0x6c] sm:$0xe]  ;;  %v8657_v8 = vrot.slane %v8656_v52, 4  ;;  %v8970_v29 = vld [vmem:[#allocation3 + $0x74] sm:$0x1] }
 0x3d4   : > { %v9052_v39 = vsel %vm15834_vm5, %v13426_v50, %v9051_v47  ;;  %v9053_v30 = vrot.slane %v9051_v47, 4  ;;  %v13427_v5 = vrot.slane %v8968_v53, 9  ;;  %v8680_v41 = vor.u32 %v8679_v9, %v8676_v19 }
 0x3d5   : > { %v8642_v24 = vor.u32 %v8641_v33, %v8637_v22  ;;  %14531 = vmatprep.mubr.msk.bf16.mxu0 %vm1504_vm7, %v13438_v35  ;;  %v8667_v10 = vrot.slane %v8666_v46, 4  ;;  %v8662_v33 = vsel %vm15732_vm0, %v8657_v8, %v8661_v44  ;;  %v8972_v35 = vld [vmem:[#allocation3 + $0x7c] sm:$0xf]  ;;  %v8695_v40 = vrot.slane %v8693_v23, 5 }
 0x3d6   : > { %v9055_v15 = vsel %vm15834_vm5, %v9053_v30, %v9054_v34  ;;  %v9061_v4 = vrot.slane %v8970_v29, 5  ;;  %v8681_v45 = vrot.slane %v8680_v41, 4  ;;  %v9065_v62 = vrot.slane %v8972_v35, 5 }
 0x3d7   : > { %v8643_v56 = vrot.slane %v8642_v24, 4  ;;  %14532 = vmatmul.mubr.msk.bf16.gmra.mrb[4].mxu0 %vm1504_vm7, %v13439_v6  ;;  %v8672_v18 = vsel %vm15732_vm0, %v8667_v10, %v8671_v54  ;;  %v13440_v58 = vcombine.low %v9052_v39, %v9055_v15  ;;  %v8973_v24 = vld [vmem:[#allocation3 + $0x80] sm:$0x1]  ;;  %v9059_v0 = vsel %vm15834_vm5, %v13427_v5, %v9058_v36 }
 0x3d8   : > { %v13406_v25 = vcombine.low %v8662_v33, %v8672_v18  ;;  %v9060_v13 = vrot.slane %v9058_v36, 4  ;;  %v9067_v12 = vrot.slane %v9065_v62, 4  ;;  %v9075_v44 = vrot.slane %v8976_v63, 5 }
 0x3d9   : > { %14508 = vmatmul.mubr.msk.bf16.gmra.mrb[112].mxu1 %vm1504_vm7, %v13403_v32  ;;  %v8648_v61 = vsel %vm15732_vm0, %v8643_v56, %v8647_v37  ;;  %v8455_v32 = vld [vmem:[#allocation3 + $0x88] sm:$0xf]  ;;  %v8974_v37 = vld [vmem:[#allocation3 + $0x84] sm:$0xe]  ;;  %14535 = vmatprep.mubr.msk.bf16.mxu0 %vm1504_vm7, %v13440_v58  ;;  %v13428_v56 = vrot.slane %v8971_v38, 9  ;;  %v9074_v54 = vrot.slane %v9072_v42, 4 }
 0x3da   : > { %14511 = vmatprep.mubr.msk.bf16.mxu1 %vm1504_vm7, %v13404_v55  ;;  %v13405_v3 = vcombine.low %v8638_v2, %v8648_v61  ;;  %v8683_v43 = vshll.u32 %v8455_v32, 16  ;;  %v8687_v7 = vshrl.u32 %v8455_v32, 16  ;;  %v9068_v2 = vrot.slane %v8973_v24, 5 }
 0x3db   : > { %v13429_v57 = vrot.slane %v8974_v37, 9  ;;  %v9066_v21 = vsel %vm15834_vm5, %v13428_v56, %v9065_v62  ;;  %v9062_v6 = vsel %vm15834_vm5, %v9060_v13, %v9061_v4  ;;  %v9076_v52 = vsel %vm15834_vm5, %v9074_v54, %v9075_v44 }
 0x3dc   : > { %v8685_v22 = vrot.slane %v8683_v43, 5  ;;  %v8689_v49 = vrot.slane %v8687_v7, 4  ;;  %v13441_v32 = vcombine.low %v9059_v0, %v9062_v6 }
 0x3dd   : > { %v9073_v50 = vsel %vm15834_vm5, %v13429_v57, %v9072_v42 }
 0x3de   : > { %v8690_v55 = vor.u32 %v8689_v49, %v8685_v22  ;;  %v8686_v16 = vsel %vm15732_vm0, %v8681_v45, %v8685_v22  ;;  %v13443_v47 = vcombine.low %v9073_v50, %v9076_v52 }
 0x3df   : > { %14536 = vmatmul.mubr.msk.bf16.gmra.mrb[8].mxu0 %vm1504_vm7, %v13441_v32 }
 0x3e0   : > { %v8691_v27 = vrot.slane %v8690_v55, 4 }
 0x3e1   : > { %14512 = vmatmul.mubr.msk.bf16.gmra.mrb[116].mxu1 %vm1504_vm7, %v13405_v3  ;;  %v9069_v3 = vsel %vm15834_vm5, %v9067_v12, %v9068_v2 }
 0x3e2   : > { %14515 = vmatprep.mubr.msk.bf16.mxu1 %vm1504_vm7, %v13406_v25  ;;  %v8696_v17 = vsel %vm15732_vm0, %v8691_v27, %v8695_v40  ;;  %v13442_v14 = vcombine.low %v9066_v21, %v9069_v3 }
 0x3e3   : > { %v13407_v61 = vcombine.low %v8686_v16, %v8696_v17 }
 0x3e4   : > { %14539 = vmatprep.mubr.msk.bf16.mxu0 %vm1504_vm7, %v13442_v14 }
 0x3e7   : > { %14540 = vmatmul.mubr.msk.bf16.gmra.mrb[12].mxu0 %vm1504_vm7, %v13443_v47 }
 0x3e9   : > { %14516 = vmatmul.mubr.msk.bf16.gmra.mrb[120].mxu1 %vm1504_vm7, %v13407_v61 }
 0x3fc   : > { %v14333_v34 = vpop.f32.mrb[24].mxu1 }
 0x3fd   : > { %6027 = vst.msk [vmem:[#allocation5 + $0x10] sm:$0xff] %vm1504_vm7, %v14333_v34  ;;  %v5946_v11 = vpop.f32.mrb[25].mxu1 }
 0x3fe   : > { %6025 = vst.msk [vmem:[#allocation5] sm:$0xff] %vm1504_vm7, %v5946_v11  ;;  %v14334_v26 = vpop.f32.mrb[26].mxu1 }
 0x3ff   : > { %6028 = vst.msk [vmem:[#allocation5 + $0x18] sm:$0xff] %vm1504_vm7, %v14334_v26  ;;  %v5949_v46 = vpop.f32.mrb[27].mxu1 }
 0x400   : > { %6026 = vst.msk [vmem:[#allocation5 + $0x8] sm:$0xff] %vm1504_vm7, %v5949_v46 }
 0x404   : > { %v14337_v31 = vpop.f32.mrb[28].mxu1  ;;  %v6507_v58 = vld [vmem:[#allocation5 + $0x10] sm:$0xff] }
 0x405   : > { %6031 = vst.msk [vmem:[#allocation5 + $0x30] sm:$0xff] %vm1504_vm7, %v14337_v31  ;;  %v5962_v43 = vpop.f32.mrb[29].mxu1  ;;  %v6505_v24 = vld [vmem:[#allocation5] sm:$0xff] }
 0x406   : > { %6029 = vst.msk [vmem:[#allocation5 + $0x20] sm:$0xff] %vm1504_vm7, %v5962_v43  ;;  %v14338_v7 = vpop.f32.mrb[30].mxu1  ;;  %v6508_v40 = vld [vmem:[#allocation5 + $0x18] sm:$0xff] }
 0x407   : > { %6032 = vst.msk [vmem:[#allocation5 + $0x38] sm:$0xff] %vm1504_vm7, %v14338_v7  ;;  %v5965_v53 = vpop.f32.mrb[31].mxu1  ;;  %v6506_v1 = vld [vmem:[#allocation5 + $0x8] sm:$0xff] }
 0x408   : > { %6030 = vst.msk [vmem:[#allocation5 + $0x28] sm:$0xff] %vm1504_vm7, %v5965_v53 }
 0x40c   : > { %v14341_v8 = vpop.f32.mrb[32].mxu1  ;;  %v6511_v13 = vld [vmem:[#allocation5 + $0x30] sm:$0xff] }
 0x40d   : > { %6035 = vst.msk [vmem:[#allocation5 + $0x50] sm:$0xff] %vm1504_vm7, %v14341_v8  ;;  %v5978_v39 = vpop.f32.mrb[33].mxu1  ;;  %v6509_v16 = vld [vmem:[#allocation5 + $0x20] sm:$0xff] }
 0x40e   : > { %6033 = vst.msk [vmem:[#allocation5 + $0x40] sm:$0xff] %vm1504_vm7, %v5978_v39  ;;  %v14342_v30 = vpop.f32.mrb[34].mxu1  ;;  %v6512_v61 = vld [vmem:[#allocation5 + $0x38] sm:$0xff] }
 0x40f   : > { %6036 = vst.msk [vmem:[#allocation5 + $0x58] sm:$0xff] %vm1504_vm7, %v14342_v30  ;;  %v5981_v19 = vpop.f32.mrb[35].mxu1  ;;  %v6510_v3 = vld [vmem:[#allocation5 + $0x28] sm:$0xff] }
 0x410   : > { %6034 = vst.msk [vmem:[#allocation5 + $0x48] sm:$0xff] %vm1504_vm7, %v5981_v19  ;;  %v14381_v49 = vpop.f32.mrb[192].mxu0 }
 0x411   : > { %v6806_v33 = vpop.f32.mrb[193].mxu0 }
 0x412   : > { %v14382_v23 = vpop.f32.mrb[194].mxu0 }
 0x413   : > { %v6809_v38 = vpop.f32.mrb[195].mxu0 }
 0x414   : > { %v14345_v28 = vpop.f32.mrb[36].mxu1  ;;  %v6515_v46 = vld [vmem:[#allocation5 + $0x50] sm:$0xff] }
 0x415   : > { %6039 = vst.msk [vmem:[#allocation5 + $0x70] sm:$0xff] %vm1504_vm7, %v14345_v28  ;;  %v5994_v10 = vpop.f32.mrb[37].mxu1  ;;  %v6513_v53 = vld [vmem:[#allocation5 + $0x40] sm:$0xff] }
 0x416   : > { %6037 = vst.msk [vmem:[#allocation5 + $0x60] sm:$0xff] %vm1504_vm7, %v5994_v10  ;;  %v14346_v9 = vpop.f32.mrb[38].mxu1  ;;  %v6516_v28 = vld [vmem:[#allocation5 + $0x58] sm:$0xff] }
 0x417   : > { %6040 = vst.msk [vmem:[#allocation5 + $0x78] sm:$0xff] %vm1504_vm7, %v14346_v9  ;;  %v5997_v22 = vpop.f32.mrb[39].mxu1 }
 0x418   : > { %6038 = vst.msk [vmem:[#allocation5 + $0x68] sm:$0xff] %vm1504_vm7, %v5997_v22 }
 0x41a   : > { %v14385_v45 = vpop.f32.mrb[196].mxu0 }
 0x41b   : > { %v6822_v56 = vpop.f32.mrb[197].mxu0 }
 0x41c   : > { %v14349_v29 = vpop.f32.mrb[40].mxu1  ;;  %v14386_v62 = vpop.f32.mrb[198].mxu0 }
 0x41d   : > { %6043 = vst.msk [vmem:[#allocation5 + $0x90] sm:$0xff] %vm1504_vm7, %v14349_v29  ;;  %v6010_v15 = vpop.f32.mrb[41].mxu1  ;;  %v6825_v63 = vpop.f32.mrb[199].mxu0 }
 0x41e   : > { %6041 = vst.msk [vmem:[#allocation5 + $0x80] sm:$0xff] %vm1504_vm7, %v6010_v15  ;;  %v14350_v5 = vpop.f32.mrb[42].mxu1 }
 0x41f   : > { %6044 = vst.msk [vmem:[#allocation5 + $0x98] sm:$0xff] %vm1504_vm7, %v14350_v5  ;;  %v6013_v35 = vpop.f32.mrb[43].mxu1 }
 0x420   : > { %6042 = vst.msk [vmem:[#allocation5 + $0x88] sm:$0xff] %vm1504_vm7, %v6013_v35 }
 0x424   : > { %v14357_v18 = vpop.f32.mrb[44].mxu1 }
 0x425   : > { %v6527_v41 = vadd.f32 %v14357_v18, %v6507_v58  ;;  %v6426_v55 = vpop.f32.mrb[45].mxu1 }
 0x426   : > { %v6525_v37 = vadd.f32 %v6505_v24, %v6426_v55  ;;  %v14358_v25 = vpop.f32.mrb[46].mxu1 }
 0x427   : > { %6547 = vst.msk [vmem:[#allocation5 + $0x10] sm:$0xff] %vm1504_vm7, %v6527_v41  ;;  %v6528_v36 = vadd.f32 %v14358_v25, %v6508_v40  ;;  %v6429_v4 = vpop.f32.mrb[47].mxu1  ;;  %v6519_v41 = vld [vmem:[#allocation5 + $0x70] sm:$0xff] }
 0x428   : > { %6545 = vst.msk [vmem:[#allocation5] sm:$0xff] %vm1504_vm7, %v6525_v37  ;;  %v6526_v27 = vadd.f32 %v6506_v1, %v6429_v4  ;;  %v6517_v37 = vld [vmem:[#allocation5 + $0x60] sm:$0xff]  ;;  %v6520_v4 = vld [vmem:[#allocation5 + $0x78] sm:$0xff] }
 0x429   : > { %6548 = vst.msk [vmem:[#allocation5 + $0x18] sm:$0xff] %vm1504_vm7, %v6528_v36 }
 0x42a   : > { %6546 = vst.msk [vmem:[#allocation5 + $0x8] sm:$0xff] %vm1504_vm7, %v6526_v27 }
 0x42c   : > { %v14361_v0 = vpop.f32.mrb[48].mxu1 }
 0x42d   : > { %v6531_v2 = vadd.f32 %v14361_v0, %v6511_v13  ;;  %v6442_v57 = vpop.f32.mrb[49].mxu1 }
 0x42e   : > { %v6887_v17 = vld [vmem:[#allocation5 + $0x10] sm:$0xff]  ;;  %v6529_v21 = vadd.f32 %v6509_v16, %v6442_v57  ;;  %v14362_v12 = vpop.f32.mrb[50].mxu1 }
 0x42f   : > { %6551 = vst.msk [vmem:[#allocation5 + $0x30] sm:$0xff] %vm1504_vm7, %v6531_v2  ;;  %v6907_v6 = vadd.f32 %v14381_v49, %v6887_v17  ;;  %v6885_v42 = vld [vmem:[#allocation5] sm:$0xff]  ;;  %v6532_v44 = vadd.f32 %v14362_v12, %v6512_v61  ;;  %v6445_v32 = vpop.f32.mrb[51].mxu1 }
 0x430   : > { %6549 = vst.msk [vmem:[#allocation5 + $0x20] sm:$0xff] %vm1504_vm7, %v6529_v21  ;;  %v6905_v14 = vadd.f32 %v6885_v42, %v6806_v33  ;;  %v6888_v54 = vld [vmem:[#allocation5 + $0x18] sm:$0xff]  ;;  %v6530_v50 = vadd.f32 %v6510_v3, %v6445_v32  ;;  %v6514_v33 = vld [vmem:[#allocation5 + $0x48] sm:$0xff]  ;;  %v6523_v42 = vld [vmem:[#allocation5 + $0x90] sm:$0xff] }
 0x431   : > { %6927 = vst.msk [vmem:[#allocation5 + $0x10] sm:$0xff] %vm1504_vm7, %v6907_v6  ;;  %6552 = vst.msk [vmem:[#allocation5 + $0x38] sm:$0xff] %vm1504_vm7, %v6532_v44  ;;  %v6908_v52 = vadd.f32 %v14382_v23, %v6888_v54  ;;  %v6886_v47 = vld [vmem:[#allocation5 + $0x8] sm:$0xff]  ;;  %v14389_v11 = vpop.f32.mrb[200].mxu0  ;;  %v6521_v3 = vld [vmem:[#allocation5 + $0x80] sm:$0xff] }
 0x432   : > { %6925 = vst.msk [vmem:[#allocation5] sm:$0xff] %vm1504_vm7, %v6905_v14  ;;  %6550 = vst.msk [vmem:[#allocation5 + $0x28] sm:$0xff] %vm1504_vm7, %v6530_v50  ;;  %v6906_v34 = vadd.f32 %v6886_v47, %v6809_v38  ;;  %v6838_v31 = vpop.f32.mrb[201].mxu0 }
 0x433   : > { %6928 = vst.msk [vmem:[#allocation5 + $0x18] sm:$0xff] %vm1504_vm7, %v6908_v52  ;;  %v14390_v8 = vpop.f32.mrb[202].mxu0  ;;  %v6524_v52 = vld [vmem:[#allocation5 + $0x98] sm:$0xff] }
 0x434   : > { %6926 = vst.msk [vmem:[#allocation5 + $0x8] sm:$0xff] %vm1504_vm7, %v6906_v34  ;;  %v14365_v26 = vpop.f32.mrb[52].mxu1  ;;  %v6841_v10 = vpop.f32.mrb[203].mxu0 }
 0x435   : > { %v6535_v43 = vadd.f32 %v14365_v26, %v6515_v46  ;;  %v6458_v7 = vpop.f32.mrb[53].mxu1  ;;  %v6522_v46 = vld [vmem:[#allocation5 + $0x88] sm:$0xff] }
 0x436   : > { %v6891_v39 = vld [vmem:[#allocation5 + $0x30] sm:$0xff]  ;;  %v6533_v30 = vadd.f32 %v6513_v53, %v6458_v7  ;;  %v14366_v19 = vpop.f32.mrb[54].mxu1 }
 0x437   : > { %6555 = vst.msk [vmem:[#allocation5 + $0x50] sm:$0xff] %vm1504_vm7, %v6535_v43  ;;  %v6911_v9 = vadd.f32 %v14385_v45, %v6891_v39  ;;  %v6889_v22 = vld [vmem:[#allocation5 + $0x20] sm:$0xff]  ;;  %v6536_v49 = vadd.f32 %v14366_v19, %v6516_v28  ;;  %v6461_v29 = vpop.f32.mrb[55].mxu1 }
 0x438   : > { %6553 = vst.msk [vmem:[#allocation5 + $0x40] sm:$0xff] %vm1504_vm7, %v6533_v30  ;;  %v6909_v15 = vadd.f32 %v6889_v22, %v6822_v56  ;;  %v6892_v23 = vld [vmem:[#allocation5 + $0x38] sm:$0xff]  ;;  %v6534_v5 = vadd.f32 %v6514_v33, %v6461_v29  ;;  %v7178_v22 = vld [vmem:[#allocation5 + $0x10] sm:$0xff] }
 0x439   : > { %6931 = vst.msk [vmem:[#allocation5 + $0x30] sm:$0xff] %vm1504_vm7, %v6911_v9  ;;  %6556 = vst.msk [vmem:[#allocation5 + $0x58] sm:$0xff] %vm1504_vm7, %v6536_v49  ;;  %v6912_v38 = vadd.f32 %v14386_v62, %v6892_v23  ;;  %v6890_v35 = vld [vmem:[#allocation5 + $0x28] sm:$0xff]  ;;  %v7176_v33 = vld [vmem:[#allocation5] sm:$0xff] }
 0x43a   : > { %6929 = vst.msk [vmem:[#allocation5 + $0x20] sm:$0xff] %vm1504_vm7, %v6909_v15  ;;  %6554 = vst.msk [vmem:[#allocation5 + $0x48] sm:$0xff] %vm1504_vm7, %v6534_v5  ;;  %v6910_v18 = vadd.f32 %v6890_v35, %v6825_v63  ;;  %v6518_v62 = vld [vmem:[#allocation5 + $0x68] sm:$0xff]  ;;  %v14393_v63 = vpop.f32.mrb[204].mxu0 }
 0x43b   : > { %6932 = vst.msk [vmem:[#allocation5 + $0x38] sm:$0xff] %vm1504_vm7, %v6912_v38  ;;  %v6854_v57 = vpop.f32.mrb[205].mxu0  ;;  %v7179_v38 = vld [vmem:[#allocation5 + $0x18] sm:$0xff] }
 0x43c   : > { %6930 = vst.msk [vmem:[#allocation5 + $0x28] sm:$0xff] %vm1504_vm7, %v6910_v18  ;;  %v14369_v58 = vpop.f32.mrb[56].mxu1  ;;  %v14394_v21 = vpop.f32.mrb[206].mxu0 }
 0x43d   : > { %v6539_v55 = vadd.f32 %v14369_v58, %v6519_v41  ;;  %v6474_v24 = vpop.f32.mrb[57].mxu1  ;;  %v6857_v61 = vpop.f32.mrb[207].mxu0 }
 0x43e   : > { %v6895_v25 = vld [vmem:[#allocation5 + $0x50] sm:$0xff]  ;;  %v6537_v40 = vadd.f32 %v6517_v37, %v6474_v24  ;;  %v14370_v36 = vpop.f32.mrb[58].mxu1 }
 0x43f   : > { %6559 = vst.msk [vmem:[#allocation5 + $0x70] sm:$0xff] %vm1504_vm7, %v6539_v55  ;;  %v6915_v1 = vadd.f32 %v14389_v11, %v6895_v25  ;;  %v6893_v45 = vld [vmem:[#allocation5 + $0x40] sm:$0xff]  ;;  %v6540_v27 = vadd.f32 %v14370_v36, %v6520_v4  ;;  %v6477_v56 = vpop.f32.mrb[59].mxu1  ;;  %v7177_v55 = vld [vmem:[#allocation5 + $0x8] sm:$0xff] }
 0x440   : > { %6557 = vst.msk [vmem:[#allocation5 + $0x60] sm:$0xff] %vm1504_vm7, %v6537_v40  ;;  %v6913_v0 = vadd.f32 %v6893_v45, %v6838_v31  ;;  %v6896_v13 = vld [vmem:[#allocation5 + $0x58] sm:$0xff]  ;;  %v6538_v2 = vadd.f32 %v6518_v62, %v6477_v56 }
 0x441   : > { %6935 = vst.msk [vmem:[#allocation5 + $0x50] sm:$0xff] %vm1504_vm7, %v6915_v1  ;;  %6560 = vst.msk [vmem:[#allocation5 + $0x78] sm:$0xff] %vm1504_vm7, %v6540_v27  ;;  %v6916_v16 = vadd.f32 %v14390_v8, %v6896_v13  ;;  %v6894_v17 = vld [vmem:[#allocation5 + $0x48] sm:$0xff] }
 0x442   : > { %6933 = vst.msk [vmem:[#allocation5 + $0x40] sm:$0xff] %vm1504_vm7, %v6913_v0  ;;  %6558 = vst.msk [vmem:[#allocation5 + $0x68] sm:$0xff] %vm1504_vm7, %v6538_v2  ;;  %v6914_v12 = vadd.f32 %v6894_v17, %v6841_v10  ;;  %v14397_v31 = vpop.f32.mrb[208].mxu0  ;;  %v7180_v2 = vld [vmem:[#allocation5 + $0x20] sm:$0xff] }
 0x443   : > { %6936 = vst.msk [vmem:[#allocation5 + $0x58] sm:$0xff] %vm1504_vm7, %v6916_v16  ;;  %v6870_v8 = vpop.f32.mrb[209].mxu0 }
 0x444   : > { %6934 = vst.msk [vmem:[#allocation5 + $0x48] sm:$0xff] %vm1504_vm7, %v6914_v12  ;;  %v14373_v6 = vpop.f32.mrb[60].mxu1  ;;  %v14398_v19 = vpop.f32.mrb[210].mxu0 }
 0x445   : > { %v6543_v44 = vadd.f32 %v14373_v6, %v6523_v42  ;;  %v6490_v32 = vpop.f32.mrb[61].mxu1  ;;  %v6873_v10 = vpop.f32.mrb[211].mxu0 }
 0x446   : > { %v6899_v14 = vld [vmem:[#allocation5 + $0x70] sm:$0xff]  ;;  %v6541_v54 = vadd.f32 %v6521_v3, %v6490_v32  ;;  %v14374_v50 = vpop.f32.mrb[62].mxu1 }
 0x447   : > { %6563 = vst.msk [vmem:[#allocation5 + $0x90] sm:$0xff] %vm1504_vm7, %v6543_v44  ;;  %v6919_v47 = vadd.f32 %v14393_v63, %v6899_v14  ;;  %v6897_v34 = vld [vmem:[#allocation5 + $0x60] sm:$0xff]  ;;  %v6544_v11 = vadd.f32 %v14374_v50, %v6524_v52  ;;  %v6493_v26 = vpop.f32.mrb[63].mxu1  ;;  %v7182_v63 = vld [vmem:[#allocation5 + $0x30] sm:$0xff]  ;;  %v7181_v44 = vld [vmem:[#allocation5 + $0x28] sm:$0xff] }
 0x448   : > { %6561 = vst.msk [vmem:[#allocation5 + $0x80] sm:$0xff] %vm1504_vm7, %v6541_v54  ;;  %v6917_v43 = vadd.f32 %v6897_v34, %v6854_v57  ;;  %v6900_v7 = vld [vmem:[#allocation5 + $0x78] sm:$0xff]  ;;  %v6542_v53 = vadd.f32 %v6522_v46, %v6493_v26 }
 0x449   : > { %6939 = vst.msk [vmem:[#allocation5 + $0x70] sm:$0xff] %vm1504_vm7, %v6919_v47  ;;  %6564 = vst.msk [vmem:[#allocation5 + $0x98] sm:$0xff] %vm1504_vm7, %v6544_v11  ;;  %v6920_v39 = vadd.f32 %v14394_v21, %v6900_v7  ;;  %v6898_v30 = vld [vmem:[#allocation5 + $0x68] sm:$0xff]  ;;  %v7183_v21 = vld [vmem:[#allocation5 + $0x38] sm:$0xff] }
 0x44a   : > { %6937 = vst.msk [vmem:[#allocation5 + $0x60] sm:$0xff] %vm1504_vm7, %v6917_v43  ;;  %6562 = vst.msk [vmem:[#allocation5 + $0x88] sm:$0xff] %vm1504_vm7, %v6542_v53  ;;  %v6918_v28 = vadd.f32 %v6898_v30, %v6857_v61  ;;  %v14429_v24 = vpop.f32.mrb[212].mxu0  ;;  %v7184_v53 = vld [vmem:[#allocation5 + $0x40] sm:$0xff] }
 0x44b   : > { %6940 = vst.msk [vmem:[#allocation5 + $0x78] sm:$0xff] %vm1504_vm7, %v6920_v39  ;;  %v7617_v36 = vpop.f32.mrb[213].mxu0 }
 0x44c   : > { %6938 = vst.msk [vmem:[#allocation5 + $0x68] sm:$0xff] %vm1504_vm7, %v6918_v28  ;;  %v14405_v9 = vpop.f32.mrb[64].mxu1  ;;  %v14430_v45 = vpop.f32.mrb[214].mxu0 }
 0x44d   : > { %v7198_v49 = vadd.f32 %v14405_v9, %v7178_v22  ;;  %v7097_v29 = vpop.f32.mrb[65].mxu1  ;;  %v7620_v56 = vpop.f32.mrb[215].mxu0 }
 0x44e   : > { %v6903_v15 = vld [vmem:[#allocation5 + $0x90] sm:$0xff]  ;;  %v7196_v23 = vadd.f32 %v7176_v33, %v7097_v29  ;;  %v14406_v5 = vpop.f32.mrb[66].mxu1 }
 0x44f   : > { %v6923_v35 = vadd.f32 %v14397_v31, %v6903_v15  ;;  %7218 = vst.msk [vmem:[#allocation5 + $0x10] sm:$0xff] %vm1504_vm7, %v7198_v49  ;;  %v6901_v18 = vld [vmem:[#allocation5 + $0x80] sm:$0xff]  ;;  %v7199_v58 = vadd.f32 %v14406_v5, %v7179_v38  ;;  %v7100_v41 = vpop.f32.mrb[67].mxu1  ;;  %v7186_v31 = vld [vmem:[#allocation5 + $0x50] sm:$0xff]  ;;  %v7185_v49 = vld [vmem:[#allocation5 + $0x48] sm:$0xff] }
 0x450   : > { %v6921_v37 = vadd.f32 %v6901_v18, %v6870_v8  ;;  %7216 = vst.msk [vmem:[#allocation5] sm:$0xff] %vm1504_vm7, %v7196_v23  ;;  %v6904_v25 = vld [vmem:[#allocation5 + $0x98] sm:$0xff]  ;;  %v7197_v40 = vadd.f32 %v7177_v55, %v7100_v41 }
 0x451   : > { %6943 = vst.msk [vmem:[#allocation5 + $0x90] sm:$0xff] %vm1504_vm7, %v6923_v35  ;;  %v6924_v4 = vadd.f32 %v14398_v19, %v6904_v25  ;;  %7219 = vst.msk [vmem:[#allocation5 + $0x18] sm:$0xff] %vm1504_vm7, %v7199_v58  ;;  %v6902_v1 = vld [vmem:[#allocation5 + $0x88] sm:$0xff]  ;;  %v7187_v19 = vld [vmem:[#allocation5 + $0x58] sm:$0xff] }
 0x452   : > { %6941 = vst.msk [vmem:[#allocation5 + $0x80] sm:$0xff] %vm1504_vm7, %v6921_v37  ;;  %v6922_v27 = vadd.f32 %v6902_v1, %v6873_v10  ;;  %7217 = vst.msk [vmem:[#allocation5 + $0x8] sm:$0xff] %vm1504_vm7, %v7197_v40  ;;  %v14433_v32 = vpop.f32.mrb[216].mxu0  ;;  %v7188_v40 = vld [vmem:[#allocation5 + $0x60] sm:$0xff] }
 0x453   : > { %6944 = vst.msk [vmem:[#allocation5 + $0x98] sm:$0xff] %vm1504_vm7, %v6924_v4  ;;  %v7633_v50 = vpop.f32.mrb[217].mxu0 }
 0x454   : > { %6942 = vst.msk [vmem:[#allocation5 + $0x88] sm:$0xff] %vm1504_vm7, %v6922_v27  ;;  %v14409_v62 = vpop.f32.mrb[68].mxu1  ;;  %v14434_v34 = vpop.f32.mrb[218].mxu0 }
 0x455   : > { %v7202_v0 = vadd.f32 %v14409_v62, %v7182_v63  ;;  %v7113_v13 = vpop.f32.mrb[69].mxu1  ;;  %v7636_v26 = vpop.f32.mrb[219].mxu0 }
 0x456   : > { %v7698_v57 = vld [vmem:[#allocation5 + $0x10] sm:$0xff]  ;;  %v7200_v16 = vadd.f32 %v7180_v2, %v7113_v13  ;;  %v14410_v17 = vpop.f32.mrb[70].mxu1 }
 0x457   : > { %7222 = vst.msk [vmem:[#allocation5 + $0x30] sm:$0xff] %vm1504_vm7, %v7202_v0  ;;  %v7718_v12 = vadd.f32 %v14429_v24, %v7698_v57  ;;  %v7696_v61 = vld [vmem:[#allocation5] sm:$0xff]  ;;  %v7203_v6 = vadd.f32 %v14410_v17, %v7183_v21  ;;  %v7116_v42 = vpop.f32.mrb[71].mxu1  ;;  %v7190_v24 = vld [vmem:[#allocation5 + $0x70] sm:$0xff]  ;;  %v7189_v0 = vld [vmem:[#allocation5 + $0x68] sm:$0xff] }
 0x458   : > { %7220 = vst.msk [vmem:[#allocation5 + $0x20] sm:$0xff] %vm1504_vm7, %v7200_v16  ;;  %v7716_v3 = vadd.f32 %v7696_v61, %v7617_v36  ;;  %v7699_v14 = vld [vmem:[#allocation5 + $0x18] sm:$0xff]  ;;  %v7201_v54 = vadd.f32 %v7181_v44, %v7116_v42 }
 0x459   : > { %7738 = vst.msk [vmem:[#allocation5 + $0x10] sm:$0xff] %vm1504_vm7, %v7718_v12  ;;  %7223 = vst.msk [vmem:[#allocation5 + $0x38] sm:$0xff] %vm1504_vm7, %v7203_v6  ;;  %v7719_v52 = vadd.f32 %v14430_v45, %v7699_v14  ;;  %v7697_v47 = vld [vmem:[#allocation5 + $0x8] sm:$0xff]  ;;  %v7191_v45 = vld [vmem:[#allocation5 + $0x78] sm:$0xff] }
 0x45a   : > { %7736 = vst.msk [vmem:[#allocation5] sm:$0xff] %vm1504_vm7, %v7716_v3  ;;  %7221 = vst.msk [vmem:[#allocation5 + $0x28] sm:$0xff] %vm1504_vm7, %v7201_v54  ;;  %v7717_v11 = vadd.f32 %v7697_v47, %v7620_v56  ;;  %v14437_v29 = vpop.f32.mrb[220].mxu0  ;;  %v7192_v54 = vld [vmem:[#allocation5 + $0x80] sm:$0xff] }
 0x45b   : > { %7739 = vst.msk [vmem:[#allocation5 + $0x18] sm:$0xff] %vm1504_vm7, %v7719_v52  ;;  %v7649_v5 = vpop.f32.mrb[221].mxu0 }
 0x45c   : > { %7737 = vst.msk [vmem:[#allocation5 + $0x8] sm:$0xff] %vm1504_vm7, %v7717_v11  ;;  %v14413_v46 = vpop.f32.mrb[72].mxu1  ;;  %v14438_v18 = vpop.f32.mrb[222].mxu0 }
 0x45d   : > { %v7206_v43 = vadd.f32 %v14413_v46, %v7186_v31  ;;  %v7129_v7 = vpop.f32.mrb[73].mxu1  ;;  %v7652_v41 = vpop.f32.mrb[223].mxu0 }
 0x45e   : > { %v7702_v8 = vld [vmem:[#allocation5 + $0x30] sm:$0xff]  ;;  %v7204_v39 = vadd.f32 %v7184_v53, %v7129_v7  ;;  %v14414_v30 = vpop.f32.mrb[74].mxu1 }
 0x45f   : > { %7226 = vst.msk [vmem:[#allocation5 + $0x50] sm:$0xff] %vm1504_vm7, %v7206_v43  ;;  %v7722_v28 = vadd.f32 %v14433_v32, %v7702_v8  ;;  %v7700_v10 = vld [vmem:[#allocation5 + $0x20] sm:$0xff]  ;;  %v7207_v9 = vadd.f32 %v14414_v30, %v7187_v19  ;;  %v7132_v22 = vpop.f32.mrb[75].mxu1  ;;  %v7194_v32 = vld [vmem:[#allocation5 + $0x90] sm:$0xff]  ;;  %v7193_v43 = vld [vmem:[#allocation5 + $0x88] sm:$0xff] }
 0x460   : > { %7224 = vst.msk [vmem:[#allocation5 + $0x40] sm:$0xff] %vm1504_vm7, %v7204_v39  ;;  %v7720_v33 = vadd.f32 %v7700_v10, %v7633_v50  ;;  %v7703_v15 = vld [vmem:[#allocation5 + $0x38] sm:$0xff]  ;;  %v7205_v23 = vadd.f32 %v7185_v49, %v7132_v22 }
 0x461   : > { %7742 = vst.msk [vmem:[#allocation5 + $0x30] sm:$0xff] %vm1504_vm7, %v7722_v28  ;;  %7227 = vst.msk [vmem:[#allocation5 + $0x58] sm:$0xff] %vm1504_vm7, %v7207_v9  ;;  %v7723_v38 = vadd.f32 %v14434_v34, %v7703_v15  ;;  %v7701_v35 = vld [vmem:[#allocation5 + $0x28] sm:$0xff]  ;;  %v7195_v34 = vld [vmem:[#allocation5 + $0x98] sm:$0xff] }
 0x462   : > { %7740 = vst.msk [vmem:[#allocation5 + $0x20] sm:$0xff] %vm1504_vm7, %v7720_v33  ;;  %7225 = vst.msk [vmem:[#allocation5 + $0x48] sm:$0xff] %vm1504_vm7, %v7205_v23  ;;  %v7721_v58 = vadd.f32 %v7701_v35, %v7636_v26  ;;  %v14441_v16 = vpop.f32.mrb[224].mxu0  ;;  %v8078_v9 = vld [vmem:[#allocation5 + $0x10] sm:$0xff]  ;;  %v8076_v33 = vld [vmem:[#allocation5] sm:$0xff] }
 0x463   : > { %7743 = vst.msk [vmem:[#allocation5 + $0x38] sm:$0xff] %vm1504_vm7, %v7723_v38  ;;  %v7665_v12 = vpop.f32.mrb[225].mxu0  ;;  %v8079_v35 = vld [vmem:[#allocation5 + $0x18] sm:$0xff] }
 0x464   : > { %7741 = vst.msk [vmem:[#allocation5 + $0x28] sm:$0xff] %vm1504_vm7, %v7721_v58  ;;  %v14417_v55 = vpop.f32.mrb[76].mxu1  ;;  %v14442_v6 = vpop.f32.mrb[226].mxu0 }
 0x465   : > { %v7210_v37 = vadd.f32 %v14417_v55, %v7190_v24  ;;  %v7145_v25 = vpop.f32.mrb[77].mxu1  ;;  %v7668_v42 = vpop.f32.mrb[227].mxu0 }
 0x466   : > { %v7706_v36 = vld [vmem:[#allocation5 + $0x50] sm:$0xff]  ;;  %v7208_v4 = vadd.f32 %v7188_v40, %v7145_v25  ;;  %v14418_v1 = vpop.f32.mrb[78].mxu1 }
 0x467   : > { %7230 = vst.msk [vmem:[#allocation5 + $0x70] sm:$0xff] %vm1504_vm7, %v7210_v37  ;;  %v7726_v27 = vadd.f32 %v14437_v29, %v7706_v36  ;;  %v7704_v56 = vld [vmem:[#allocation5 + $0x40] sm:$0xff]  ;;  %v7211_v62 = vadd.f32 %v14418_v1, %v7191_v45  ;;  %v7148_v63 = vpop.f32.mrb[79].mxu1  ;;  %v8077_v37 = vld [vmem:[#allocation5 + $0x8] sm:$0xff] }
 0x468   : > { %7228 = vst.msk [vmem:[#allocation5 + $0x60] sm:$0xff] %vm1504_vm7, %v7208_v4  ;;  %v7724_v13 = vadd.f32 %v7704_v56, %v7649_v5  ;;  %v7707_v2 = vld [vmem:[#allocation5 + $0x58] sm:$0xff]  ;;  %v7209_v57 = vadd.f32 %v7189_v0, %v7148_v63 }
 0x469   : > { %7746 = vst.msk [vmem:[#allocation5 + $0x50] sm:$0xff] %vm1504_vm7, %v7726_v27  ;;  %7231 = vst.msk [vmem:[#allocation5 + $0x78] sm:$0xff] %vm1504_vm7, %v7211_v62  ;;  %v7727_v17 = vadd.f32 %v14438_v18, %v7707_v2  ;;  %v7705_v21 = vld [vmem:[#allocation5 + $0x48] sm:$0xff]  ;;  %v8082_v62 = vld [vmem:[#allocation5 + $0x30] sm:$0xff] }
 0x46a   : > { %7744 = vst.msk [vmem:[#allocation5 + $0x40] sm:$0xff] %vm1504_vm7, %v7724_v13  ;;  %7229 = vst.msk [vmem:[#allocation5 + $0x68] sm:$0xff] %vm1504_vm7, %v7209_v57  ;;  %v7725_v61 = vadd.f32 %v7705_v21, %v7652_v41  ;;  %v14445_v28 = vpop.f32.mrb[228].mxu0  ;;  %v8080_v2 = vld [vmem:[#allocation5 + $0x20] sm:$0xff] }
 0x46b   : > { %7747 = vst.msk [vmem:[#allocation5 + $0x58] sm:$0xff] %vm1504_vm7, %v7727_v17  ;;  %v7681_v22 = vpop.f32.mrb[229].mxu0 }
 0x46c   : > { %7745 = vst.msk [vmem:[#allocation5 + $0x48] sm:$0xff] %vm1504_vm7, %v7725_v61  ;;  %v14421_v44 = vpop.f32.mrb[80].mxu1  ;;  %v14446_v15 = vpop.f32.mrb[230].mxu0 }
 0x46d   : > { %v7214_v3 = vadd.f32 %v14421_v44, %v7194_v32  ;;  %v7161_v14 = vpop.f32.mrb[81].mxu1  ;;  %v7684_v18 = vpop.f32.mrb[231].mxu0 }
 0x46e   : > { %v7710_v50 = vld [vmem:[#allocation5 + $0x70] sm:$0xff]  ;;  %v7212_v52 = vadd.f32 %v7192_v54, %v7161_v14  ;;  %v14422_v47 = vpop.f32.mrb[82].mxu1 }
 0x46f   : > { %7234 = vst.msk [vmem:[#allocation5 + $0x90] sm:$0xff] %vm1504_vm7, %v7214_v3  ;;  %v7730_v11 = vadd.f32 %v14441_v16, %v7710_v50  ;;  %v7708_v26 = vld [vmem:[#allocation5 + $0x60] sm:$0xff]  ;;  %v7215_v46 = vadd.f32 %v14422_v47, %v7195_v34  ;;  %v7164_v31 = vpop.f32.mrb[83].mxu1  ;;  %v8081_v3 = vld [vmem:[#allocation5 + $0x28] sm:$0xff] }
 0x470   : > { %7232 = vst.msk [vmem:[#allocation5 + $0x80] sm:$0xff] %vm1504_vm7, %v7212_v52  ;;  %v7728_v7 = vadd.f32 %v7708_v26, %v7665_v12  ;;  %v7711_v53 = vld [vmem:[#allocation5 + $0x78] sm:$0xff]  ;;  %v7213_v8 = vadd.f32 %v7193_v43, %v7164_v31 }
 0x471   : > { %7750 = vst.msk [vmem:[#allocation5 + $0x70] sm:$0xff] %vm1504_vm7, %v7730_v11  ;;  %7235 = vst.msk [vmem:[#allocation5 + $0x98] sm:$0xff] %vm1504_vm7, %v7215_v46  ;;  %v7731_v39 = vadd.f32 %v14442_v6, %v7711_v53  ;;  %v7709_v30 = vld [vmem:[#allocation5 + $0x68] sm:$0xff]  ;;  %v8083_v12 = vld [vmem:[#allocation5 + $0x38] sm:$0xff] }
 0x472   : > { %7748 = vst.msk [vmem:[#allocation5 + $0x60] sm:$0xff] %vm1504_vm7, %v7728_v7  ;;  %7233 = vst.msk [vmem:[#allocation5 + $0x88] sm:$0xff] %vm1504_vm7, %v7213_v8  ;;  %v7729_v19 = vadd.f32 %v7709_v30, %v7668_v42  ;;  %v14477_v27 = vpop.f32.mrb[232].mxu0  ;;  %v8086_v46 = vld [vmem:[#allocation5 + $0x50] sm:$0xff]  ;;  %v8084_v53 = vld [vmem:[#allocation5 + $0x40] sm:$0xff] }
 0x473   : > { %7751 = vst.msk [vmem:[#allocation5 + $0x78] sm:$0xff] %vm1504_vm7, %v7731_v39  ;;  %v8288_v63 = vpop.f32.mrb[233].mxu0 }
 0x474   : > { %7749 = vst.msk [vmem:[#allocation5 + $0x68] sm:$0xff] %vm1504_vm7, %v7729_v19  ;;  %v14453_v10 = vpop.f32.mrb[84].mxu1  ;;  %v14478_v57 = vpop.f32.mrb[234].mxu0 }
 0x475   : > { %v8098_v49 = vadd.f32 %v14453_v10, %v8078_v9  ;;  %v7997_v29 = vpop.f32.mrb[85].mxu1  ;;  %v8291_v61 = vpop.f32.mrb[235].mxu0 }
 0x476   : > { %v7714_v23 = vld [vmem:[#allocation5 + $0x90] sm:$0xff]  ;;  %v8096_v5 = vadd.f32 %v8076_v33, %v7997_v29  ;;  %v14454_v38 = vpop.f32.mrb[86].mxu1  ;;  %v8085_v33 = vld [vmem:[#allocation5 + $0x48] sm:$0xff] }
 0x477   : > { %v7734_v58 = vadd.f32 %v14445_v28, %v7714_v23  ;;  %8118 = vst.msk [vmem:[#allocation5 + $0x10] sm:$0xff] %vm1504_vm7, %v8098_v49  ;;  %v7712_v41 = vld [vmem:[#allocation5 + $0x80] sm:$0xff]  ;;  %v8099_v55 = vadd.f32 %v14454_v38, %v8079_v35  ;;  %v8000_v24 = vpop.f32.mrb[87].mxu1  ;;  %v8087_v28 = vld [vmem:[#allocation5 + $0x58] sm:$0xff] }
 0x478   : > { %v7732_v25 = vadd.f32 %v7712_v41, %v7681_v22  ;;  %8116 = vst.msk [vmem:[#allocation5] sm:$0xff] %vm1504_vm7, %v8096_v5  ;;  %v7715_v40 = vld [vmem:[#allocation5 + $0x98] sm:$0xff]  ;;  %v8097_v36 = vadd.f32 %v8077_v37, %v8000_v24 }
 0x479   : > { %7754 = vst.msk [vmem:[#allocation5 + $0x90] sm:$0xff] %vm1504_vm7, %v7734_v58  ;;  %v7735_v4 = vadd.f32 %v14446_v15, %v7715_v40  ;;  %8119 = vst.msk [vmem:[#allocation5 + $0x18] sm:$0xff] %vm1504_vm7, %v8099_v55  ;;  %v7713_v1 = vld [vmem:[#allocation5 + $0x88] sm:$0xff]  ;;  %v8090_v55 = vld [vmem:[#allocation5 + $0x70] sm:$0xff] }
 0x47a   : > { %7752 = vst.msk [vmem:[#allocation5 + $0x80] sm:$0xff] %vm1504_vm7, %v7732_v25  ;;  %v7733_v45 = vadd.f32 %v7713_v1, %v7684_v18  ;;  %8117 = vst.msk [vmem:[#allocation5 + $0x8] sm:$0xff] %vm1504_vm7, %v8097_v36  ;;  %v14481_v11 = vpop.f32.mrb[236].mxu0  ;;  %v8088_v40 = vld [vmem:[#allocation5 + $0x60] sm:$0xff] }
 0x47b   : > { %7755 = vst.msk [vmem:[#allocation5 + $0x98] sm:$0xff] %vm1504_vm7, %v7735_v4  ;;  %v8304_v31 = vpop.f32.mrb[237].mxu0 }
 0x47c   : > { %7753 = vst.msk [vmem:[#allocation5 + $0x88] sm:$0xff] %vm1504_vm7, %v7733_v45  ;;  %v14457_v56 = vpop.f32.mrb[88].mxu1  ;;  %v14482_v8 = vpop.f32.mrb[238].mxu0 }
 0x47d   : > { %v8102_v0 = vadd.f32 %v14457_v56, %v8082_v62  ;;  %v8013_v13 = vpop.f32.mrb[89].mxu1  ;;  %v8307_v10 = vpop.f32.mrb[239].mxu0 }
 0x47e   : > { %v8369_v16 = vld [vmem:[#allocation5 + $0x10] sm:$0xff]  ;;  %v8100_v17 = vadd.f32 %v8080_v2, %v8013_v13  ;;  %v14458_v21 = vpop.f32.mrb[90].mxu1  ;;  %v8089_v2 = vld [vmem:[#allocation5 + $0x68] sm:$0xff] }
 0x47f   : > { %8122 = vst.msk [vmem:[#allocation5 + $0x30] sm:$0xff] %vm1504_vm7, %v8102_v0  ;;  %v8389_v6 = vadd.f32 %v14477_v27, %v8369_v16  ;;  %v8367_v42 = vld [vmem:[#allocation5] sm:$0xff]  ;;  %v8103_v44 = vadd.f32 %v14458_v21, %v8083_v12  ;;  %v8016_v32 = vpop.f32.mrb[91].mxu1  ;;  %v8091_v27 = vld [vmem:[#allocation5 + $0x78] sm:$0xff] }
 0x480   : > { %8120 = vst.msk [vmem:[#allocation5 + $0x20] sm:$0xff] %vm1504_vm7, %v8100_v17  ;;  %v8387_v14 = vadd.f32 %v8367_v42, %v8288_v63  ;;  %v8370_v54 = vld [vmem:[#allocation5 + $0x18] sm:$0xff]  ;;  %v8101_v50 = vadd.f32 %v8081_v3, %v8016_v32 }
 0x481   : > { %8409 = vst.msk [vmem:[#allocation5 + $0x10] sm:$0xff] %vm1504_vm7, %v8389_v6  ;;  %8123 = vst.msk [vmem:[#allocation5 + $0x38] sm:$0xff] %vm1504_vm7, %v8103_v44  ;;  %v8390_v52 = vadd.f32 %v14478_v57, %v8370_v54  ;;  %v8368_v47 = vld [vmem:[#allocation5 + $0x8] sm:$0xff]  ;;  %v8094_v44 = vld [vmem:[#allocation5 + $0x90] sm:$0xff] }
 0x482   : > { %8407 = vst.msk [vmem:[#allocation5] sm:$0xff] %vm1504_vm7, %v8387_v14  ;;  %8121 = vst.msk [vmem:[#allocation5 + $0x28] sm:$0xff] %vm1504_vm7, %v8101_v50  ;;  %v8388_v34 = vadd.f32 %v8368_v47, %v8291_v61  ;;  %v14485_v58 = vpop.f32.mrb[240].mxu0  ;;  %v8092_v54 = vld [vmem:[#allocation5 + $0x80] sm:$0xff] }
 0x483   : > { %8410 = vst.msk [vmem:[#allocation5 + $0x18] sm:$0xff] %vm1504_vm7, %v8390_v52  ;;  %v8320_v24 = vpop.f32.mrb[241].mxu0 }
 0x484   : > { %8408 = vst.msk [vmem:[#allocation5 + $0x8] sm:$0xff] %vm1504_vm7, %v8388_v34  ;;  %v14461_v26 = vpop.f32.mrb[92].mxu1  ;;  %v14486_v36 = vpop.f32.mrb[242].mxu0 }
 0x485   : > { %v8106_v43 = vadd.f32 %v14461_v26, %v8086_v46  ;;  %v8029_v7 = vpop.f32.mrb[93].mxu1  ;;  %v8323_v56 = vpop.f32.mrb[243].mxu0 }
 0x486   : > { %v8373_v39 = vld [vmem:[#allocation5 + $0x30] sm:$0xff]  ;;  %v8104_v30 = vadd.f32 %v8084_v53, %v8029_v7  ;;  %v14462_v19 = vpop.f32.mrb[94].mxu1  ;;  %v8093_v53 = vld [vmem:[#allocation5 + $0x88] sm:$0xff] }
 0x487   : > { %8126 = vst.msk [vmem:[#allocation5 + $0x50] sm:$0xff] %vm1504_vm7, %v8106_v43  ;;  %v8393_v9 = vadd.f32 %v14481_v11, %v8373_v39  ;;  %v8371_v22 = vld [vmem:[#allocation5 + $0x20] sm:$0xff]  ;;  %v8107_v49 = vadd.f32 %v14462_v19, %v8087_v28  ;;  %v8032_v29 = vpop.f32.mrb[95].mxu1  ;;  %v8095_v11 = vld [vmem:[#allocation5 + $0x98] sm:$0xff] }
 0x488   : > { %8124 = vst.msk [vmem:[#allocation5 + $0x40] sm:$0xff] %vm1504_vm7, %v8104_v30  ;;  %v8391_v15 = vadd.f32 %v8371_v22, %v8304_v31  ;;  %v8374_v23 = vld [vmem:[#allocation5 + $0x38] sm:$0xff]  ;;  %v8105_v5 = vadd.f32 %v8085_v33, %v8032_v29 }
 0x489   : > { %8413 = vst.msk [vmem:[#allocation5 + $0x30] sm:$0xff] %vm1504_vm7, %v8393_v9  ;;  %8127 = vst.msk [vmem:[#allocation5 + $0x58] sm:$0xff] %vm1504_vm7, %v8107_v49  ;;  %v8394_v38 = vadd.f32 %v14482_v8, %v8374_v23  ;;  %v8372_v35 = vld [vmem:[#allocation5 + $0x28] sm:$0xff]  ;;  %v8889_v49 = vld [vmem:[#allocation5 + $0x10] sm:$0xff] }
 0x48a   : > { %8411 = vst.msk [vmem:[#allocation5 + $0x20] sm:$0xff] %vm1504_vm7, %v8391_v15  ;;  %8125 = vst.msk [vmem:[#allocation5 + $0x48] sm:$0xff] %vm1504_vm7, %v8105_v5  ;;  %v8392_v18 = vadd.f32 %v8372_v35, %v8307_v10  ;;  %v14489_v6 = vpop.f32.mrb[244].mxu0  ;;  %v8887_v23 = vld [vmem:[#allocation5] sm:$0xff] }
 0x48b   : > { %8414 = vst.msk [vmem:[#allocation5 + $0x38] sm:$0xff] %vm1504_vm7, %v8394_v38  ;;  %v8336_v32 = vpop.f32.mrb[245].mxu0 }
 0x48c   : > { %8412 = vst.msk [vmem:[#allocation5 + $0x28] sm:$0xff] %vm1504_vm7, %v8392_v18  ;;  %v14465_v41 = vpop.f32.mrb[96].mxu1  ;;  %v14490_v50 = vpop.f32.mrb[246].mxu0 }
 0x48d   : > { %v8110_v37 = vadd.f32 %v14465_v41, %v8090_v55  ;;  %v8045_v25 = vpop.f32.mrb[97].mxu1  ;;  %v8339_v26 = vpop.f32.mrb[247].mxu0 }
 0x48e   : > { %v8377_v4 = vld [vmem:[#allocation5 + $0x50] sm:$0xff]  ;;  %v8108_v1 = vadd.f32 %v8088_v40, %v8045_v25  ;;  %v14466_v45 = vpop.f32.mrb[98].mxu1  ;;  %v8888_v40 = vld [vmem:[#allocation5 + $0x8] sm:$0xff] }
 0x48f   : > { %8130 = vst.msk [vmem:[#allocation5 + $0x70] sm:$0xff] %vm1504_vm7, %v8110_v37  ;;  %v8397_v62 = vadd.f32 %v14485_v58, %v8377_v4  ;;  %v8375_v63 = vld [vmem:[#allocation5 + $0x40] sm:$0xff]  ;;  %v8111_v0 = vadd.f32 %v14466_v45, %v8091_v27  ;;  %v8048_v13 = vpop.f32.mrb[99].mxu1  ;;  %v8890_v58 = vld [vmem:[#allocation5 + $0x18] sm:$0xff] }
 0x490   : > { %8128 = vst.msk [vmem:[#allocation5 + $0x60] sm:$0xff] %vm1504_vm7, %v8108_v1  ;;  %v8395_v57 = vadd.f32 %v8375_v63, %v8320_v24  ;;  %v8378_v16 = vld [vmem:[#allocation5 + $0x58] sm:$0xff]  ;;  %v8109_v17 = vadd.f32 %v8089_v2, %v8048_v13 }
 0x491   : > { %8417 = vst.msk [vmem:[#allocation5 + $0x50] sm:$0xff] %vm1504_vm7, %v8397_v62  ;;  %8131 = vst.msk [vmem:[#allocation5 + $0x78] sm:$0xff] %vm1504_vm7, %v8111_v0  ;;  %v8398_v21 = vadd.f32 %v14486_v36, %v8378_v16  ;;  %v8376_v12 = vld [vmem:[#allocation5 + $0x48] sm:$0xff]  ;;  %v8893_v0 = vld [vmem:[#allocation5 + $0x30] sm:$0xff] }
 0x492   : > { %8415 = vst.msk [vmem:[#allocation5 + $0x40] sm:$0xff] %vm1504_vm7, %v8395_v57  ;;  %8129 = vst.msk [vmem:[#allocation5 + $0x68] sm:$0xff] %vm1504_vm7, %v8109_v17  ;;  %v8396_v61 = vadd.f32 %v8376_v12, %v8323_v56  ;;  %v14493_v9 = vpop.f32.mrb[248].mxu0  ;;  %v8891_v16 = vld [vmem:[#allocation5 + $0x20] sm:$0xff] }
 0x493   : > { %8418 = vst.msk [vmem:[#allocation5 + $0x58] sm:$0xff] %vm1504_vm7, %v8398_v21  ;;  %v8352_v29 = vpop.f32.mrb[249].mxu0 }
 0x494   : > { %8416 = vst.msk [vmem:[#allocation5 + $0x48] sm:$0xff] %vm1504_vm7, %v8396_v61  ;;  %v14469_v42 = vpop.f32.mrb[100].mxu1  ;;  %v14494_v5 = vpop.f32.mrb[250].mxu0 }
 0x495   : > { %v8114_v3 = vadd.f32 %v14469_v42, %v8094_v44  ;;  %v8061_v14 = vpop.f32.mrb[101].mxu1  ;;  %v8355_v41 = vpop.f32.mrb[251].mxu0 }
 0x496   : > { %v8381_v52 = vld [vmem:[#allocation5 + $0x70] sm:$0xff]  ;;  %v8112_v47 = vadd.f32 %v8092_v54, %v8061_v14  ;;  %v14470_v34 = vpop.f32.mrb[102].mxu1  ;;  %v8892_v54 = vld [vmem:[#allocation5 + $0x28] sm:$0xff] }
 0x497   : > { %8134 = vst.msk [vmem:[#allocation5 + $0x90] sm:$0xff] %vm1504_vm7, %v8114_v3  ;;  %v8401_v46 = vadd.f32 %v14489_v6, %v8381_v52  ;;  %v8379_v31 = vld [vmem:[#allocation5 + $0x60] sm:$0xff]  ;;  %v8115_v43 = vadd.f32 %v14470_v34, %v8095_v11  ;;  %v8064_v7 = vpop.f32.mrb[103].mxu1  ;;  %v8894_v6 = vld [vmem:[#allocation5 + $0x38] sm:$0xff] }
 0x498   : > { %8132 = vst.msk [vmem:[#allocation5 + $0x80] sm:$0xff] %vm1504_vm7, %v8112_v47  ;;  %v8399_v8 = vadd.f32 %v8379_v31, %v8336_v32  ;;  %v8382_v39 = vld [vmem:[#allocation5 + $0x78] sm:$0xff]  ;;  %v8113_v30 = vadd.f32 %v8093_v53, %v8064_v7 }
 0x499   : > { %8421 = vst.msk [vmem:[#allocation5 + $0x70] sm:$0xff] %vm1504_vm7, %v8401_v46  ;;  %8135 = vst.msk [vmem:[#allocation5 + $0x98] sm:$0xff] %vm1504_vm7, %v8115_v43  ;;  %v8402_v19 = vadd.f32 %v14490_v50, %v8382_v39  ;;  %v8380_v28 = vld [vmem:[#allocation5 + $0x68] sm:$0xff]  ;;  %v8897_v43 = vld [vmem:[#allocation5 + $0x50] sm:$0xff] }
 0x49a   : > { %8419 = vst.msk [vmem:[#allocation5 + $0x60] sm:$0xff] %vm1504_vm7, %v8399_v8  ;;  %8133 = vst.msk [vmem:[#allocation5 + $0x88] sm:$0xff] %vm1504_vm7, %v8113_v30  ;;  %v8400_v10 = vadd.f32 %v8380_v28, %v8339_v26  ;;  %v14525_v62 = vpop.f32.mrb[252].mxu0  ;;  %v8895_v39 = vld [vmem:[#allocation5 + $0x40] sm:$0xff] }
 0x49b   : > { %8422 = vst.msk [vmem:[#allocation5 + $0x78] sm:$0xff] %vm1504_vm7, %v8402_v19  ;;  %v9188_v13 = vpop.f32.mrb[253].mxu0  ;;  %v17506_v19 = vld [vmem:[%s18189_s6] ss:$0 sm:$0xff] }
 0x49c   : > { %8420 = vst.msk [vmem:[#allocation5 + $0x68] sm:$0xff] %vm1504_vm7, %v8400_v10  ;;  %v14501_v22 = vpop.f32.mrb[104].mxu1  ;;  %v14526_v17 = vpop.f32.mrb[254].mxu0 }
 0x49d   : > { %v8909_v33 = vadd.f32 %v14501_v22, %v8889_v49  ;;  %v8808_v15 = vpop.f32.mrb[105].mxu1  ;;  %v9191_v42 = vpop.f32.mrb[255].mxu0  ;;  %v8898_v22 = vld [vmem:[#allocation5 + $0x58] sm:$0xff] }
 0x49e   : > { %v8385_v38 = vld [vmem:[#allocation5 + $0x90] sm:$0xff]  ;;  %v8907_v35 = vadd.f32 %v8887_v23, %v8808_v15  ;;  %v14502_v18 = vpop.f32.mrb[106].mxu1 }
 0x49f   : > { %v8405_v55 = vadd.f32 %v14493_v9, %v8385_v38  ;;  %8929 = vst.msk [vmem:[#allocation5 + $0x10] sm:$0xff] %vm1504_vm7, %v8909_v33  ;;  %v8383_v24 = vld [vmem:[#allocation5 + $0x80] sm:$0xff]  ;;  %v8910_v37 = vadd.f32 %v14502_v18, %v8890_v58  ;;  %v8811_v25 = vpop.f32.mrb[107].mxu1 }
 0x4a0   : > { %v8403_v36 = vadd.f32 %v8383_v24, %v8352_v29  ;;  %8927 = vst.msk [vmem:[#allocation5] sm:$0xff] %vm1504_vm7, %v8907_v35  ;;  %v8386_v4 = vld [vmem:[#allocation5 + $0x98] sm:$0xff]  ;;  %v8908_v1 = vadd.f32 %v8888_v40, %v8811_v25 }
 0x4a1   : > { %8425 = vst.msk [vmem:[#allocation5 + $0x90] sm:$0xff] %vm1504_vm7, %v8405_v55  ;;  %v8406_v45 = vadd.f32 %v14494_v5, %v8386_v4  ;;  %8930 = vst.msk [vmem:[#allocation5 + $0x18] sm:$0xff] %vm1504_vm7, %v8910_v37  ;;  %v8384_v27 = vld [vmem:[#allocation5 + $0x88] sm:$0xff] }
 0x4a2   : > { %8423 = vst.msk [vmem:[#allocation5 + $0x80] sm:$0xff] %vm1504_vm7, %v8403_v36  ;;  %v8404_v56 = vadd.f32 %v8384_v27, %v8355_v41  ;;  %8928 = vst.msk [vmem:[#allocation5 + $0x8] sm:$0xff] %vm1504_vm7, %v8908_v1  ;;  %v14529_v46 = vpop.f32.mrb[0].mxu0  ;;  %v8896_v5 = vld [vmem:[#allocation5 + $0x48] sm:$0xff] }
 0x4a3   : > { %8426 = vst.msk [vmem:[#allocation5 + $0x98] sm:$0xff] %vm1504_vm7, %v8406_v45  ;;  %v9204_v7 = vpop.f32.mrb[1].mxu0 }
 0x4a4   : > { %8424 = vst.msk [vmem:[#allocation5 + $0x88] sm:$0xff] %vm1504_vm7, %v8404_v56  ;;  %v14505_v63 = vpop.f32.mrb[108].mxu1  ;;  %v14530_v30 = vpop.f32.mrb[2].mxu0 }
 0x4a5   : > { %v8913_v2 = vadd.f32 %v14505_v63, %v8893_v0  ;;  %v8824_v57 = vpop.f32.mrb[109].mxu1  ;;  %v9207_v49 = vpop.f32.mrb[3].mxu0  ;;  %v8901_v0 = vld [vmem:[#allocation5 + $0x70] sm:$0xff] }
 0x4a6   : > { %v9269_v21 = vld [vmem:[#allocation5 + $0x10] sm:$0xff]  ;;  %v8911_v12 = vadd.f32 %v8891_v16, %v8824_v57  ;;  %v14506_v61 = vpop.f32.mrb[110].mxu1 }
 0x4a7   : > { %8933 = vst.msk [vmem:[#allocation5 + $0x30] sm:$0xff] %vm1504_vm7, %v8913_v2  ;;  %v9289_v44 = vadd.f32 %v14525_v62, %v9269_v21  ;;  %v9267_v32 = vld [vmem:[#allocation5] sm:$0xff]  ;;  %v8914_v3 = vadd.f32 %v14506_v61, %v8894_v6  ;;  %v8827_v14 = vpop.f32.mrb[111].mxu1 }
 0x4a8   : > { %8931 = vst.msk [vmem:[#allocation5 + $0x20] sm:$0xff] %vm1504_vm7, %v8911_v12  ;;  %v9287_v50 = vadd.f32 %v9267_v32, %v9188_v13  ;;  %v9270_v52 = vld [vmem:[#allocation5 + $0x18] sm:$0xff]  ;;  %v8912_v47 = vadd.f32 %v8892_v54, %v8827_v14  ;;  %v8899_v21 = vld [vmem:[#allocation5 + $0x60] sm:$0xff] }
 0x4a9   : > { %9309 = vst.msk [vmem:[#allocation5 + $0x10] sm:$0xff] %vm1504_vm7, %v9289_v44  ;;  %8934 = vst.msk [vmem:[#allocation5 + $0x38] sm:$0xff] %vm1504_vm7, %v8914_v3  ;;  %v9290_v34 = vadd.f32 %v14526_v17, %v9270_v52  ;;  %v9268_v11 = vld [vmem:[#allocation5 + $0x8] sm:$0xff] }
 0x4aa   : > { %9307 = vst.msk [vmem:[#allocation5] sm:$0xff] %vm1504_vm7, %v9287_v50  ;;  %8932 = vst.msk [vmem:[#allocation5 + $0x28] sm:$0xff] %vm1504_vm7, %v8912_v47  ;;  %v9288_v26 = vadd.f32 %v9268_v11, %v9191_v42  ;;  %v14533_v27 = vpop.f32.mrb[4].mxu0 }
 0x4ab   : > { %9310 = vst.msk [vmem:[#allocation5 + $0x18] sm:$0xff] %vm1504_vm7, %v9290_v34  ;;  %v9220_v13 = vpop.f32.mrb[5].mxu0 }
 0x4ac   : > { %9308 = vst.msk [vmem:[#allocation5 + $0x8] sm:$0xff] %vm1504_vm7, %v9288_v26  ;;  %v14509_v31 = vpop.f32.mrb[112].mxu1  ;;  %v17520_v12 = vpop.f32.mrb[6].mxu0 }
 0x4ad   : > { %v8917_v53 = vadd.f32 %v14509_v31, %v8897_v43  ;;  %v8840_v8 = vpop.f32.mrb[113].mxu1  ;;  %v17524_v3 = vpop.f32.mrb[7].mxu0 }
 0x4ae   : > { %v9273_v28 = vld [vmem:[#allocation5 + $0x30] sm:$0xff]  ;;  %v8915_v10 = vadd.f32 %v8895_v39, %v8840_v8  ;;  %v14510_v9 = vpop.f32.mrb[114].mxu1 }
 0x4af   : > { %8937 = vst.msk [vmem:[#allocation5 + $0x50] sm:$0xff] %vm1504_vm7, %v8917_v53  ;;  %v9293_v29 = vadd.f32 %v14529_v46, %v9273_v28  ;;  %v9271_v33 = vld [vmem:[#allocation5 + $0x20] sm:$0xff]  ;;  %v8918_v15 = vadd.f32 %v14510_v9, %v8898_v22  ;;  %v8843_v23 = vpop.f32.mrb[115].mxu1  ;;  %v9660_v28 = vld [vmem:[#allocation4 + $0xc] sm:$0xf] }
 0x4b0   : > { %v9329_v38 = vld [vmem:[#allocation5 + $0x10] sm:$0xff]  ;;  %8935 = vst.msk [vmem:[#allocation5 + $0x40] sm:$0xff] %vm1504_vm7, %v8915_v10  ;;  %v9291_v35 = vadd.f32 %v9271_v33, %v9204_v7  ;;  %v9274_v18 = vld [vmem:[#allocation5 + $0x38] sm:$0xff]  ;;  %v8916_v58 = vadd.f32 %v8896_v5, %v8843_v23 }
 0x4b1   : > { %v9355_v41 = vadd.f32 %v17506_v19, %v9329_v38  ;;  %v9327_v55 = vld [vmem:[#allocation5] sm:$0xff]  ;;  %9313 = vst.msk [vmem:[#allocation5 + $0x30] sm:$0xff] %vm1504_vm7, %v9293_v29  ;;  %8938 = vst.msk [vmem:[#allocation5 + $0x58] sm:$0xff] %vm1504_vm7, %v8918_v15  ;;  %v9294_v24 = vadd.f32 %v14530_v30, %v9274_v18  ;;  %v9272_v37 = vld [vmem:[#allocation5 + $0x28] sm:$0xff] }
 0x4b2   : > { %v9353_v25 = vadd.f32 %v17506_v19, %v9327_v55  ;;  %v9330_v40 = vld [vmem:[#allocation5 + $0x18] sm:$0xff]  ;;  %9311 = vst.msk [vmem:[#allocation5 + $0x20] sm:$0xff] %vm1504_vm7, %v9291_v35  ;;  %8936 = vst.msk [vmem:[#allocation5 + $0x48] sm:$0xff] %vm1504_vm7, %v8916_v58  ;;  %v9292_v36 = vadd.f32 %v9272_v37, %v9207_v49  ;;  %v9653_v15 = vld [vmem:[#allocation4] sm:$0xf] }
 0x4b3   : > { %v9375_v4 = vmax.f32 %v9355_v41, 0.0  ;;  %v9356_v1 = vadd.f32 %v17506_v19, %v9330_v40  ;;  %v9328_v45 = vld [vmem:[#allocation5 + $0x8] sm:$0xff]  ;;  %9314 = vst.msk [vmem:[#allocation5 + $0x38] sm:$0xff] %vm1504_vm7, %v9294_v24  ;;  %v9664_v18 = vld [vmem:[#allocation4 + $0x14] sm:$0x1] }
 0x4b4   : > { %v9373_v56 = vmax.f32 %v9353_v25, 0.0  ;;  %v9354_v62 = vadd.f32 %v17506_v19, %v9328_v45  ;;  %9312 = vst.msk [vmem:[#allocation5 + $0x28] sm:$0xff] %vm1504_vm7, %v9292_v36  ;;  %v14513_v63 = vpop.f32.mrb[116].mxu1  ;;  %v9657_v40 = vld [vmem:[#allocation4 + $0x8] sm:$0x1] }
 0x4b5   : > { %v13759_v2 = vpack.c.bf16 %v9375_v4, %v9375_v4  ;;  %v9376_v57 = vmax.f32 %v9356_v1, 0.0  ;;  %v8921_v16 = vadd.f32 %v14513_v63, %v8901_v0  ;;  %v8856_v17 = vpop.f32.mrb[117].mxu1  ;;  %v17538_v4 = vpop.f32.mrb[8].mxu0 }
 0x4b6   : > { %v13757_v61 = vpack.c.bf16 %v9373_v56, %v9373_v56  ;;  %v9374_v6 = vmax.f32 %v9354_v62, 0.0  ;;  %v9277_v42 = vld [vmem:[#allocation5 + $0x50] sm:$0xff]  ;;  %v8919_v44 = vadd.f32 %v8899_v21, %v8856_v17  ;;  %v17522_v32 = vpop.f32.mrb[118].mxu1 }
 0x4b7   : > { %v9471_v14 = vshrl.u32 %v13759_v2, 16  ;;  %v9474_v54 = vshll.u32 %v13759_v2, 16  ;;  %v13760_v50 = vpack.c.bf16 %v9376_v57, %v9376_v57  ;;  %8941 = vst.msk [vmem:[#allocation5 + $0x70] sm:$0xff] %vm1504_vm7, %v8921_v16  ;;  %v9297_v52 = vadd.f32 %v14533_v27, %v9277_v42  ;;  %v9275_v47 = vld [vmem:[#allocation5 + $0x40] sm:$0xff]  ;;  %v17527_v34 = vpop.f32.mrb[119].mxu1 }
 0x4b8   : > { %v9454_v11 = vshrl.u32 %v13757_v61, 16  ;;  %v9457_v26 = vshll.u32 %v13757_v61, 16  ;;  %v13758_v46 = vpack.c.bf16 %v9374_v6, %v9374_v6  ;;  %v9333_v31 = vld [vmem:[#allocation5 + $0x30] sm:$0xff]  ;;  %8939 = vst.msk [vmem:[#allocation5 + $0x60] sm:$0xff] %vm1504_vm7, %v8919_v44  ;;  %v9295_v43 = vadd.f32 %v9275_v47, %v9220_v13  ;;  %v17544_v13 = vpop.f32.mrb[9].mxu0  ;;  %v9278_v61 = vld [vmem:[#allocation5 + $0x58] sm:$0xff] }
 0x4b9   : > { %v9473_v7 = vrot.slane %v9471_v14, 7  ;;  %v9479_v53 = vshrl.u32 %v13760_v50, 16  ;;  %v9482_v8 = vshll.u32 %v13760_v50, 16  ;;  %v9359_v39 = vadd.f32 %v17506_v19, %v9333_v31  ;;  %v9331_v30 = vld [vmem:[#allocation5 + $0x20] sm:$0xff]  ;;  %9317 = vst.msk [vmem:[#allocation5 + $0x50] sm:$0xff] %vm1504_vm7, %v9297_v52  ;;  %v17552_v6 = vpop.f32.mrb[10].mxu0 }
 0x4ba   : > { %v9456_v10 = vrot.slane %v9454_v11, 7  ;;  %v9462_v9 = vshrl.u32 %v13758_v46, 16  ;;  %v9465_v22 = vshll.u32 %v13758_v46, 16  ;;  %v9357_v49 = vadd.f32 %v17506_v19, %v9331_v30  ;;  %9315 = vst.msk [vmem:[#allocation5 + $0x40] sm:$0xff] %vm1504_vm7, %v9295_v43  ;;  %v9334_v63 = vld [vmem:[#allocation5 + $0x38] sm:$0xff]  ;;  %v17561_v47 = vpop.f32.mrb[11].mxu0 }
 0x4bb   : > { %v9476_v29 = vor.u32 %v9474_v54, %v9473_v7  ;;  %v9477_v33 = vrot.slane %v9473_v7, 4  ;;  %v9481_v23 = vrot.slane %v9479_v53, 7  ;;  %v9379_v5 = vmax.f32 %v9359_v39, 0.0  ;;  %v9332_v0 = vld [vmem:[#allocation5 + $0x28] sm:$0xff]  ;;  %v8902_v7 = vld [vmem:[#allocation5 + $0x78] sm:$0xff] }
 0x4bc   : > { %v9459_v38 = vor.u32 %v9457_v26, %v9456_v10  ;;  %v9460_v35 = vrot.slane %v9456_v10, 4  ;;  %v9464_v58 = vrot.slane %v9462_v9, 7  ;;  %v9377_v41 = vmax.f32 %v9357_v49, 0.0  ;;  %v17534_v55 = vpop.f32.mrb[120].mxu1  ;;  %v9674_v53 = vld [vmem:[#allocation4 + $0x24] sm:$0xf] }
 0x4bd   : > { %v9661_v24 = vsel %vm16714_vm9, %v9476_v29, %v9660_v28  ;;  %v9484_v37 = vor.u32 %v9482_v8, %v9481_v23  ;;  %v9486_v25 = vrot.slane %v9481_v23, 4  ;;  %v13763_v36 = vpack.c.bf16 %v9379_v5, %v9379_v5  ;;  %v17540_v1 = vpop.f32.mrb[121].mxu1 }
 0x4be   : > { %9662 = vst [vmem:[#allocation4 + $0xc] sm:$0xf] %v9661_v24  ;;  %v9654_v45 = vsel %vm16714_vm9, %v9459_v38, %v9653_v15  ;;  %v9467_v27 = vor.u32 %v9465_v22, %v9464_v58  ;;  %v9469_v56 = vrot.slane %v9464_v58, 4  ;;  %v13761_v62 = vpack.c.bf16 %v9377_v41, %v9377_v41  ;;  %v17546_v2 = vpop.f32.mrb[122].mxu1  ;;  %v9667_v22 = vld [vmem:[#allocation4 + $0x18] sm:$0xf] }
 0x4bf   : > { %9655 = vst [vmem:[#allocation4] sm:$0xf] %v9654_v45  ;;  %v9485_v57 = vsel %vm15516_vm11, %v9477_v33, %v9484_v37  ;;  %v9665_v16 = vsel %vm15363_vm6, %v9486_v25, %v9664_v18  ;;  %v9505_v17 = vshrl.u32 %v13763_v36, 16  ;;  %v9508_v21 = vshll.u32 %v13763_v36, 16  ;;  %v17554_v42 = vpop.f32.mrb[123].mxu1  ;;  %v9276_v33 = vld [vmem:[#allocation5 + $0x48] sm:$0xff] }
 0x4c0   : > { %9663 = vst.msk [vmem:[#allocation4 + $0x10] sm:$0xf] %vm5687_vm8, %v9485_v57  ;;  %9666 = vst [vmem:[#allocation4 + $0x14] sm:$0x1] %v9665_v16  ;;  %v9468_v44 = vsel %vm15516_vm11, %v9460_v35, %v9467_v27  ;;  %v9658_v14 = vsel %vm15363_vm6, %v9469_v56, %v9657_v40  ;;  %v9488_v54 = vshrl.u32 %v13761_v62, 16  ;;  %v9491_v50 = vshll.u32 %v13761_v62, 16 }
 0x4c1   : > { %v9337_v52 = vld [vmem:[#allocation5 + $0x50] sm:$0xff]  ;;  %9656 = vst.msk [vmem:[#allocation4 + $0x4] sm:$0xf] %vm5687_vm8, %v9468_v44  ;;  %9659 = vst [vmem:[#allocation4 + $0x8] sm:$0x1] %v9658_v14  ;;  %v17564_v11 = vrot.slane %v9505_v17, 7  ;;  %v9360_v26 = vadd.f32 %v17506_v19, %v9334_v63  ;;  %v9358_v46 = vadd.f32 %v17506_v19, %v9332_v0  ;;  %v8922_v30 = vadd.f32 %v17522_v32, %v8902_v7 }
 0x4c2   : > { %v9363_v31 = vadd.f32 %v17506_v19, %v9337_v52  ;;  %v9335_v43 = vld [vmem:[#allocation5 + $0x40] sm:$0xff]  ;;  %v17569_v8 = vrot.slane %v9488_v54, 7  ;;  %v9298_v28 = vadd.f32 %v17520_v12, %v9278_v61  ;;  %v8900_v32 = vld [vmem:[#allocation5 + $0x68] sm:$0xff]  ;;  %v17583_v41 = vpop.f32.mrb[12].mxu0  ;;  %v9296_v40 = vadd.f32 %v9276_v33, %v17524_v3  ;;  %v9281_v36 = vld [vmem:[#allocation5 + $0x70] sm:$0xff] }
 0x4c3   : > { %v9361_v39 = vadd.f32 %v17506_v19, %v9335_v43  ;;  %v9510_v10 = vor.u32 %v9508_v21, %v17564_v11  ;;  %v9511_v9 = vrot.slane %v17564_v11, 4  ;;  %v9380_v49 = vmax.f32 %v9360_v26, 0.0  ;;  %8942 = vst.msk [vmem:[#allocation5 + $0x78] sm:$0xff] %vm1504_vm7, %v8922_v30  ;;  %v17588_v45 = vpop.f32.mrb[13].mxu0  ;;  %v8905_v3 = vld [vmem:[#allocation5 + $0x90] sm:$0xff]  ;;  %v8903_v26 = vld [vmem:[#allocation5 + $0x80] sm:$0xff] }
 0x4c4   : > { %v9378_v29 = vmax.f32 %v9358_v46, 0.0  ;;  %v9493_v15 = vor.u32 %v9491_v50, %v17569_v8  ;;  %v9494_v23 = vrot.slane %v17569_v8, 4  ;;  %v9383_v5 = vmax.f32 %v9363_v31, 0.0  ;;  %9318 = vst.msk [vmem:[#allocation5 + $0x58] sm:$0xff] %vm1504_vm7, %v9298_v28  ;;  %v17591_v0 = vpop.f32.mrb[14].mxu0  ;;  %9316 = vst.msk [vmem:[#allocation5 + $0x48] sm:$0xff] %vm1504_vm7, %v9296_v40 }
 0x4c5   : > { %v9381_v38 = vmax.f32 %v9361_v39, 0.0  ;;  %v9675_v12 = vsel %vm16714_vm9, %v9510_v10, %v9674_v53  ;;  %v13764_v35 = vpack.c.bf16 %v9380_v49, %v9380_v49  ;;  %v8920_v58 = vadd.f32 %v8900_v32, %v17527_v34  ;;  %v9279_v34 = vld [vmem:[#allocation5 + $0x60] sm:$0xff]  ;;  %v17594_v61 = vpop.f32.mrb[15].mxu0  ;;  %v9678_v14 = vld [vmem:[#allocation4 + $0x2c] sm:$0x1]  ;;  %v8904_v32 = vld [vmem:[#allocation5 + $0x88] sm:$0xff] }
 0x4c6   : > { %v13762_v18 = vpack.c.bf16 %v9378_v29, %v9378_v29  ;;  %9676 = vst [vmem:[#allocation4 + $0x24] sm:$0xf] %v9675_v12  ;;  %v9668_v24 = vsel %vm16714_vm9, %v9493_v15, %v9667_v22  ;;  %v13767_v37 = vpack.c.bf16 %v9383_v5, %v9383_v5  ;;  %v8925_v50 = vadd.f32 %v17534_v55, %v8905_v3  ;;  %v9671_v46 = vld [vmem:[#allocation4 + $0x20] sm:$0x1]  ;;  %v9688_v43 = vld [vmem:[#allocation4 + $0x3c] sm:$0xf] }
 0x4c7   : > { %v13765_v25 = vpack.c.bf16 %v9381_v38, %v9381_v38  ;;  %9669 = vst [vmem:[#allocation4 + $0x18] sm:$0xf] %v9668_v24  ;;  %v9513_v27 = vshrl.u32 %v13764_v35, 16  ;;  %v9516_v56 = vshll.u32 %v13764_v35, 16  ;;  %8940 = vst.msk [vmem:[#allocation5 + $0x68] sm:$0xff] %vm1504_vm7, %v8920_v58  ;;  %v9301_v52 = vadd.f32 %v17538_v4, %v9281_v36  ;;  %v8906_v5 = vld [vmem:[#allocation5 + $0x98] sm:$0xff] }
 0x4c8   : > { %v9496_v62 = vshrl.u32 %v13762_v18, 16  ;;  %v9499_v63 = vshll.u32 %v13762_v18, 16  ;;  %v9539_v57 = vshrl.u32 %v13767_v37, 16  ;;  %v9542_v16 = vshll.u32 %v13767_v37, 16  ;;  %v9681_v22 = vld [vmem:[#allocation4 + $0x30] sm:$0xf] }
 0x4c9   : > { %v9522_v17 = vshrl.u32 %v13765_v25, 16  ;;  %v9525_v21 = vshll.u32 %v13765_v25, 16  ;;  %v9515_v44 = vrot.slane %v9513_v27, 7  ;;  %v8923_v53 = vadd.f32 %v8903_v26, %v17540_v1  ;;  %8945 = vst.msk [vmem:[#allocation5 + $0x90] sm:$0xff] %vm1504_vm7, %v8925_v50  ;;  %9321 = vst.msk [vmem:[#allocation5 + $0x70] sm:$0xff] %vm1504_vm7, %v9301_v52 }
 0x4ca   : > { %v9498_v54 = vrot.slane %v9496_v62, 7  ;;  %v17598_v31 = vrot.slane %v9539_v57, 7  ;;  %v9299_v8 = vadd.f32 %v9279_v34, %v17544_v13  ;;  %v9282_v1 = vld [vmem:[#allocation5 + $0x78] sm:$0xff]  ;;  %v8924_v58 = vadd.f32 %v8904_v32, %v17554_v42 }
 0x4cb   : > { %v17600_v7 = vrot.slane %v9522_v17, 7  ;;  %v9518_v39 = vor.u32 %v9516_v56, %v9515_v44  ;;  %v9520_v30 = vrot.slane %v9515_v44, 4  ;;  %v9338_v49 = vld [vmem:[#allocation5 + $0x58] sm:$0xff]  ;;  %8943 = vst.msk [vmem:[#allocation5 + $0x80] sm:$0xff] %vm1504_vm7, %v8923_v53  ;;  %v9336_v35 = vld [vmem:[#allocation5 + $0x48] sm:$0xff]  ;;  %v9302_v18 = vadd.f32 %v17552_v6, %v9282_v1 }
 0x4cc   : > { %v9501_v28 = vor.u32 %v9499_v63, %v9498_v54  ;;  %v9503_v10 = vrot.slane %v9498_v54, 4  ;;  %v9544_v55 = vor.u32 %v9542_v16, %v17598_v31  ;;  %9319 = vst.msk [vmem:[#allocation5 + $0x60] sm:$0xff] %vm1504_vm7, %v9299_v8  ;;  %v9364_v38 = vadd.f32 %v17506_v19, %v9338_v49  ;;  %8944 = vst.msk [vmem:[#allocation5 + $0x88] sm:$0xff] %vm1504_vm7, %v8924_v58  ;;  %v9692_v54 = vld [vmem:[#allocation4 + $0x44] sm:$0x1] }
 0x4cd   : > { %v9527_v4 = vor.u32 %v9525_v21, %v17600_v7  ;;  %v9519_v13 = vsel %vm15516_vm11, %v9511_v9, %v9518_v39  ;;  %v9679_v29 = vsel %vm15363_vm6, %v9520_v30, %v9678_v14  ;;  %v9362_v25 = vadd.f32 %v17506_v19, %v9336_v35  ;;  %9322 = vst.msk [vmem:[#allocation5 + $0x78] sm:$0xff] %vm1504_vm7, %v9302_v18  ;;  %v9695_v58 = vld [vmem:[#allocation4 + $0x48] sm:$0xf] }
 0x4ce   : > { %v9502_v33 = vsel %vm15516_vm11, %v9494_v23, %v9501_v28  ;;  %v9672_v15 = vsel %vm15363_vm6, %v9503_v10, %v9671_v46  ;;  %9677 = vst.msk [vmem:[#allocation4 + $0x28] sm:$0xf] %vm5687_vm8, %v9519_v13  ;;  %9680 = vst [vmem:[#allocation4 + $0x2c] sm:$0x1] %v9679_v29  ;;  %v9689_v11 = vsel %vm16714_vm9, %v9544_v55, %v9688_v43  ;;  %v9280_v12 = vld [vmem:[#allocation5 + $0x68] sm:$0xff]  ;;  %v9384_v37 = vmax.f32 %v9364_v38, 0.0 }
 0x4cf   : > { %9670 = vst.msk [vmem:[#allocation4 + $0x1c] sm:$0xf] %vm5687_vm8, %v9502_v33  ;;  %9673 = vst [vmem:[#allocation4 + $0x20] sm:$0x1] %v9672_v15  ;;  %v9682_v9 = vsel %vm16714_vm9, %v9527_v4, %v9681_v22  ;;  %v8926_v23 = vadd.f32 %v17546_v2, %v8906_v5  ;;  %v9300_v24 = vadd.f32 %v9280_v12, %v17561_v47  ;;  %v9382_v40 = vmax.f32 %v9362_v25, 0.0 }
 0x4d0   : > { %9690 = vst [vmem:[#allocation4 + $0x3c] sm:$0xf] %v9689_v11  ;;  %9683 = vst [vmem:[#allocation4 + $0x30] sm:$0xf] %v9682_v9  ;;  %v13768_v2 = vpack.c.bf16 %v9384_v37, %v9384_v37  ;;  %v9341_v36 = vld [vmem:[#allocation5 + $0x70] sm:$0xff]  ;;  %v9545_v14 = vrot.slane %v17598_v31, 4 }
 0x4d1   : > { %8946 = vst.msk [vmem:[#allocation5 + $0x98] sm:$0xff] %vm1504_vm7, %v8926_v23  ;;  %9320 = vst.msk [vmem:[#allocation5 + $0x68] sm:$0xff] %vm1504_vm7, %v9300_v24  ;;  %v9285_v27 = vld [vmem:[#allocation5 + $0x90] sm:$0xff]  ;;  %v9367_v6 = vadd.f32 %v17506_v19, %v9341_v36  ;;  %v13766_v63 = vpack.c.bf16 %v9382_v40, %v9382_v40  ;;  %v9528_v39 = vrot.slane %v17600_v7, 4  ;;  %v9702_v11 = vld [vmem:[#allocation4 + $0x54] sm:$0xf] }
 0x4d2   : > { %v9305_v47 = vadd.f32 %v17583_v41, %v9285_v27  ;;  %v9283_v56 = vld [vmem:[#allocation5 + $0x80] sm:$0xff]  ;;  %v9547_v62 = vshrl.u32 %v13768_v2, 16  ;;  %v9550_v21 = vshll.u32 %v13768_v2, 16 }
 0x4d3   : > { %v9339_v42 = vld [vmem:[#allocation5 + $0x60] sm:$0xff]  ;;  %v9387_v57 = vmax.f32 %v9367_v6, 0.0  ;;  %v9303_v16 = vadd.f32 %v9283_v56, %v17588_v45  ;;  %v9530_v3 = vshrl.u32 %v13766_v63, 16  ;;  %v9533_v50 = vshll.u32 %v13766_v63, 16  ;;  %v9685_v45 = vld [vmem:[#allocation4 + $0x38] sm:$0x1] }
 0x4d4   : > { %v9365_v34 = vadd.f32 %v17506_v19, %v9339_v42  ;;  %9325 = vst.msk [vmem:[#allocation5 + $0x90] sm:$0xff] %vm1504_vm7, %v9305_v47  ;;  %v9549_v17 = vrot.slane %v9547_v62, 7  ;;  %v9342_v53 = vld [vmem:[#allocation5 + $0x78] sm:$0xff]  ;;  %v9284_v33 = vld [vmem:[#allocation5 + $0x88] sm:$0xff] }
 0x4d5   : > { %v13771_v52 = vpack.c.bf16 %v9387_v57, %v9387_v57  ;;  %9323 = vst.msk [vmem:[#allocation5 + $0x80] sm:$0xff] %vm1504_vm7, %v9303_v16  ;;  %v9532_v46 = vrot.slane %v9530_v3, 7  ;;  %v9368_v28 = vadd.f32 %v17506_v19, %v9342_v53  ;;  %v9304_v2 = vadd.f32 %v9284_v33, %v17594_v61  ;;  %v9706_v63 = vld [vmem:[#allocation4 + $0x5c] sm:$0x1]  ;;  %v9699_v3 = vld [vmem:[#allocation4 + $0x50] sm:$0x1] }
 0x4d6   : > { %v9385_v44 = vmax.f32 %v9365_v34, 0.0  ;;  %v9552_v41 = vor.u32 %v9550_v21, %v9549_v17  ;;  %v9554_v26 = vrot.slane %v9549_v17, 4 }
 0x4d7   : > { %v9573_v30 = vshrl.u32 %v13771_v52, 16  ;;  %v9535_v55 = vor.u32 %v9533_v50, %v9532_v46  ;;  %v9537_v4 = vrot.slane %v9532_v46, 4  ;;  %v9576_v7 = vshll.u32 %v13771_v52, 16  ;;  %9324 = vst.msk [vmem:[#allocation5 + $0x88] sm:$0xff] %vm1504_vm7, %v9304_v2 }
 0x4d8   : > { %v13769_v43 = vpack.c.bf16 %v9385_v44, %v9385_v44  ;;  %v9340_v8 = vld [vmem:[#allocation5 + $0x68] sm:$0xff]  ;;  %v9286_v31 = vld [vmem:[#allocation5 + $0x98] sm:$0xff]  ;;  %v9553_v22 = vsel %vm15516_vm11, %v9545_v14, %v9552_v41  ;;  %v9693_v49 = vsel %vm15363_vm6, %v9554_v26, %v9692_v54  ;;  %v9388_v29 = vmax.f32 %v9368_v28, 0.0 }
 0x4d9   : > { %v9366_v10 = vadd.f32 %v17506_v19, %v9340_v8  ;;  %9691 = vst.msk [vmem:[#allocation4 + $0x40] sm:$0xf] %vm5687_vm8, %v9553_v22  ;;  %9694 = vst [vmem:[#allocation4 + $0x44] sm:$0x1] %v9693_v49  ;;  %v9575_v1 = vrot.slane %v9573_v30, 7  ;;  %v9536_v15 = vsel %vm15516_vm11, %v9528_v39, %v9535_v55  ;;  %v9686_v5 = vsel %vm15363_vm6, %v9537_v4, %v9685_v45 }
 0x4da   : > { %v9556_v13 = vshrl.u32 %v13769_v43, 16  ;;  %v9306_v23 = vadd.f32 %v17591_v0, %v9286_v31  ;;  %9684 = vst.msk [vmem:[#allocation4 + $0x34] sm:$0xf] %vm5687_vm8, %v9536_v15  ;;  %9687 = vst [vmem:[#allocation4 + $0x38] sm:$0x1] %v9686_v5  ;;  %v9559_v35 = vshll.u32 %v13769_v43, 16  ;;  %v13772_v18 = vpack.c.bf16 %v9388_v29, %v9388_v29 }
 0x4db   : > { %v9386_v9 = vmax.f32 %v9366_v10, 0.0  ;;  %v9345_v38 = vld [vmem:[#allocation5 + $0x90] sm:$0xff]  ;;  %v9578_v32 = vor.u32 %v9576_v7, %v9575_v1  ;;  %v9579_v16 = vrot.slane %v9575_v1, 4  ;;  %v9716_v28 = vld [vmem:[#allocation4 + $0x6c] sm:$0xf] }
 0x4dc   : > { %v9558_v12 = vrot.slane %v9556_v13, 7  ;;  %v9371_v37 = vadd.f32 %v17506_v19, %v9345_v38  ;;  %v9343_v25 = vld [vmem:[#allocation5 + $0x80] sm:$0xff]  ;;  %9326 = vst.msk [vmem:[#allocation5 + $0x98] sm:$0xff] %vm1504_vm7, %v9306_v23  ;;  %v9581_v36 = vshrl.u32 %v13772_v18, 16  ;;  %v9584_v56 = vshll.u32 %v13772_v18, 16 }
 0x4dd   : > { %v13770_v24 = vpack.c.bf16 %v9386_v9, %v9386_v9  ;;  %v9703_v40 = vsel %vm16714_vm9, %v9578_v32, %v9702_v11  ;;  %v9369_v62 = vadd.f32 %v17506_v19, %v9343_v25  ;;  %v9709_v13 = vld [vmem:[#allocation4 + $0x60] sm:$0xf]  ;;  %v9713_v25 = vld [vmem:[#allocation4 + $0x68] sm:$0x1] }
 0x4de   : > { %v9561_v0 = vor.u32 %v9559_v35, %v9558_v12  ;;  %9704 = vst [vmem:[#allocation4 + $0x54] sm:$0xf] %v9703_v40  ;;  %v9391_v6 = vmax.f32 %v9371_v37, 0.0  ;;  %v9583_v47 = vrot.slane %v9581_v36, 7  ;;  %v9562_v14 = vrot.slane %v9558_v12, 4  ;;  %v9344_v31 = vld [vmem:[#allocation5 + $0x88] sm:$0xff] }
 0x4df   : > { %v9564_v27 = vshrl.u32 %v13770_v24, 16  ;;  %v9567_v34 = vshll.u32 %v13770_v24, 16  ;;  %v9389_v44 = vmax.f32 %v9369_v62, 0.0  ;;  %v9370_v55 = vadd.f32 %v17506_v19, %v9344_v31  ;;  %v9720_v12 = vld [vmem:[#allocation4 + $0x74] sm:$0x1] }
 0x4e0   : > { %v9696_v42 = vsel %vm16714_vm9, %v9561_v0, %v9695_v58  ;;  %v13775_v57 = vpack.c.bf16 %v9391_v6, %v9391_v6  ;;  %v9586_v17 = vor.u32 %v9584_v56, %v9583_v47  ;;  %v9588_v21 = vrot.slane %v9583_v47, 4 }
 0x4e1   : > { %9697 = vst [vmem:[#allocation4 + $0x48] sm:$0xf] %v9696_v42  ;;  %v9566_v61 = vrot.slane %v9564_v27, 7  ;;  %v13773_v43 = vpack.c.bf16 %v9389_v44, %v9389_v44  ;;  %v9390_v33 = vmax.f32 %v9370_v55, 0.0  ;;  %v15165_v6 = vmov (!%p12907_p5), 0  }
 0x4e2   : > { %v9607_v52 = vshrl.u32 %v13775_v57, 16  ;;  %v9587_v41 = vsel %vm15516_vm11, %v9579_v16, %v9586_v17  ;;  %v9707_v26 = vsel %vm15363_vm6, %v9588_v21, %v9706_v63  ;;  %v9610_v46 = vshll.u32 %v13775_v57, 16  ;;  %9726 = vst.msk [vmem:[#allocation4] sm:$0xf] (!%p12907_p5), %vm5687_vm8, %v15165_v6  ;;  %9727 = vst.msk [vmem:[#allocation4 + $0x4] sm:$0xf] (!%p12907_p5), %vm5687_vm8, %v15165_v6 }
 0x4e3   : > { %v9569_v54 = vor.u32 %v9567_v34, %v9566_v61  ;;  %v9571_v50 = vrot.slane %v9566_v61, 4  ;;  %v9346_v53 = vld [vmem:[#allocation5 + $0x98] sm:$0xff]  ;;  %9705 = vst.msk [vmem:[#allocation4 + $0x58] sm:$0xf] %vm5687_vm8, %v9587_v41  ;;  %9708 = vst [vmem:[#allocation4 + $0x5c] sm:$0x1] %v9707_v26  ;;  %v13774_v11 = vpack.c.bf16 %v9390_v33, %v9390_v33 }
 0x4e4   : > { %v9609_v45 = vrot.slane %v9607_v52, 7  ;;  %v9372_v30 = vadd.f32 %v17506_v19, %v9346_v53  ;;  %v9590_v10 = vshrl.u32 %v13773_v43, 16  ;;  %v9593_v1 = vshll.u32 %v13773_v43, 16  ;;  %9729 = vst.msk [vmem:[#allocation4 + $0x8] sm:$0x1] (!%p12907_p5), %vm575_vm3, %v15165_v6 }
 0x4e5   : > { %v9570_v8 = vsel %vm15516_vm11, %v9562_v14, %v9569_v54  ;;  %v9700_v39 = vsel %vm15363_vm6, %v9571_v50, %v9699_v3  ;;  %v9598_v32 = vshrl.u32 %v13774_v11, 16  ;;  %v9601_v24 = vshll.u32 %v13774_v11, 16 }
 0x4e6   : > { %9698 = vst.msk [vmem:[#allocation4 + $0x4c] sm:$0xf] %vm5687_vm8, %v9570_v8  ;;  %9701 = vst [vmem:[#allocation4 + $0x50] sm:$0x1] %v9700_v39  ;;  %v9612_v22 = vor.u32 %v9610_v46, %v9609_v45  ;;  %v9392_v49 = vmax.f32 %v9372_v30, 0.0  ;;  %v9592_v4 = vrot.slane %v9590_v10, 7 }
 0x4e7   : > { %v9613_v19 = vrot.slane %v9609_v45, 4  ;;  %v9600_v58 = vrot.slane %v9598_v32, 7 }
 0x4e8   : > { %v9717_v7 = vsel %vm16714_vm9, %v9612_v22, %v9716_v28  ;;  %v13776_v29 = vpack.c.bf16 %v9392_v49, %v9392_v49  ;;  %v9595_v15 = vor.u32 %v9593_v1, %v9592_v4  ;;  %v9596_v37 = vrot.slane %v9592_v4, 4 }
 0x4e9   : > { %9718 = vst [vmem:[#allocation4 + $0x6c] sm:$0xf] %v9717_v7  ;;  %v9603_v51 = vor.u32 %v9601_v24, %v9600_v58  ;;  %v9605_v0 = vrot.slane %v9600_v58, 4 }
 0x4ea   : > { %v9615_v5 = vshrl.u32 %v13776_v29, 16  ;;  %v9710_v9 = vsel %vm16714_vm9, %v9595_v15, %v9709_v13  ;;  %v9618_v23 = vshll.u32 %v13776_v29, 16 }
 0x4eb   : > { %9711 = vst [vmem:[#allocation4 + $0x60] sm:$0xf] %v9710_v9  ;;  %v9604_v36 = vsel %vm15516_vm11, %v9596_v37, %v9603_v51  ;;  %v9714_v27 = vsel %vm15363_vm6, %v9605_v0, %v9713_v25  ;;  %9725 = sbr.rel (%p12907_p5) target bundleno = 1266 (0x4f2), region = 76 }
 0x4ec   : > { %v9617_v38 = vrot.slane %v9615_v5, 7  ;;  %9712 = vst.msk [vmem:[#allocation4 + $0x64] sm:$0xf] %vm5687_vm8, %v9604_v36  ;;  %9715 = vst [vmem:[#allocation4 + $0x68] sm:$0x1] %v9714_v27 }
 0x4ee   : > { %v9620_v35 = vor.u32 %v9618_v23, %v9617_v38  ;;  %v9622_v18 = vrot.slane %v9617_v38, 4 }
 0x4f0   : > { %v9621_v2 = vsel %vm15516_vm11, %v9613_v19, %v9620_v35  ;;  %v9721_v40 = vsel %vm15363_vm6, %v9622_v18, %v9720_v12 }
 0x4f1   : > { %9719 = vst.msk [vmem:[#allocation4 + $0x70] sm:$0xf] %vm5687_vm8, %v9621_v2  ;;  %9722 = vst [vmem:[#allocation4 + $0x74] sm:$0x1] %v9721_v40 }
 0x4f2 PF: > { %9732 = sbr.rel (%p12908_p6) target bundleno = 1273 (0x4f9), region = 80  ;;  %v15166_v59 = vmov (!%p12908_p6), 0  }
 0x4f3   : > { %9734 = vst.msk [vmem:[#allocation4 + $0x6c] sm:$0xf] (!%p12908_p6), %vm5687_vm8, %v15166_v59  ;;  %9735 = vst.msk [vmem:[#allocation4 + $0x70] sm:$0xf] (!%p12908_p6), %vm5687_vm8, %v15166_v59 }
 0x4f4   : > { %9737 = vst.msk [vmem:[#allocation4 + $0x74] sm:$0x1] (!%p12908_p6), %vm575_vm3, %v15166_v59 }
 0x4f9 PF: > { %v15023_v48 = vld [vmem:[%s18190_s7] sm:$0xff]   ;;  %v15024_v42 = vld [vmem:[%s18190_s7 + $0x8] sm:$0xff]   ;;  %v15025_v47 = vld [vmem:[#allocation4] sm:$0xff]   ;;  %s13777_s27 = sshll.u32 %s15143_s12, 4  ;;  %s13701_s28 = sshll.u32 %s15147_s13, 5 }
 0x4fa   : > { %14543 = vmatprep.subr.bf16.mxu1 %v15023_v48  ;;  %14547 = vmatprep.mubr.msk.bf16.mxu1 %vm1504_vm7, %v15025_v47  ;;  %v15027_v56 = vld [vmem:[%s18190_s7 + $0x10] sm:$0xff]   ;;  %v15026_v62 = vld [vmem:[#allocation4 + $0xc] sm:$0xff]   ;;  %v15032_v61 = vld [vmem:[%s18190_s7 + $0x18] sm:$0xff]   ;;  %s12722_s15 = sadd.s32 %s13777_s27, %s13701_s28  ;;  %s12725_s24 = sshll.u32 %s15670_s21, 4  ;;  %s18124_s24 = int_to_ptr.vmem [resolvable:$true] %s12725_s24 }
 0x4fb   : > { %14544 = vmatpush3.bf16.msra.mxu1 %v15023_v48  ;;  %v15028_v63 = vld [vmem:[#allocation4 + $0x18] sm:$0xff]   ;;  %v9948_v34 = vld [vmem:[#allocation4] sm:$0xf]  ;;  %v9949_v57 = vld [vmem:[#allocation4 + $0x4] sm:$0xf]  ;;  %s13702_s18 = sshll.u32 %s12722_s15, 7 }
 0x4fc   : > { %14545 = vmatprep.subr.bf16.mxu1 %v15024_v42  ;;  %v9950_v16 = vld [vmem:[#allocation4 + $0x8] sm:$0x1]  ;;  %v9973_v17 = vshrl.u32 %v9948_v34, 16  ;;  %v9976_v21 = vshll.u32 %v9948_v34, 16  ;;  %v9982_v3 = vshll.u32 %v9949_v57, 16  ;;  %v9986_v44 = vshrl.u32 %v9949_v57, 16  ;;  %s18122_s25 = scalar_lea.hbm %s18192_s9, %s13702_s18 }
 0x4fd   : > { %v9951_v14 = vld [vmem:[#allocation4 + $0xc] sm:$0xf]  ;;  %v15029_v54 = vld [vmem:[#allocation4 + $0x24] sm:$0xff]   ;;  %v15030_v50 = vld [vmem:[#allocation4 + $0x30] sm:$0xff]   ;;  %v9992_v52 = vshll.u32 %v9950_v16, 16  ;;  %s18227_s26 = sand.u32 1, %s15135_s10  }
 0x4fe   : > { %v9952_v41 = vld [vmem:[#allocation4 + $0x10] sm:$0xf]  ;;  %v9997_v26 = vshrl.u32 %v9951_v14, 16  ;;  %v9975_v46 = vrot.slane %v9973_v17, 4  ;;  %v9978_v43 = vrot.slane %v9976_v21, 5  ;;  %v9984_v53 = vrot.slane %v9982_v3, 5 }
 0x4ff   : > { %14546 = vmatpush3.bf16.msra.mxu1 %v15024_v42  ;;  %v9988_v8 = vrot.slane %v9986_v44, 4  ;;  %v10000_v45 = vshll.u32 %v9951_v14, 16  ;;  %v10006_v30 = vshll.u32 %v9952_v41, 16  ;;  %v10010_v31 = vshrl.u32 %v9952_v41, 16  ;;  %v17720_v22 = vld [vmem:[%s18190_s7 + $0x20] sm:$0xff]   ;;  %v15031_v35 = vld [vmem:[#allocation4 + $0x3c] sm:$0xff]  }
 0x500   : > { %14563 = vmatprep.subr.bf16.mxu1 %v15027_v56  ;;  %v9999_v39 = vrot.slane %v9997_v26, 4  ;;  %v9979_v28 = vor.u32 %v9978_v43, %v9975_v46  ;;  %v9954_v49 = vld [vmem:[#allocation4 + $0x18] sm:$0xf]  ;;  %v9953_v55 = vld [vmem:[#allocation4 + $0x14] sm:$0x1]  ;;  %v9994_v33 = vrot.slane %v9992_v52, 5 }
 0x501   : > { %v9989_v10 = vor.u32 %v9988_v8, %v9984_v53  ;;  %v10002_v4 = vrot.slane %v10000_v45, 5  ;;  %v17723_v1 = vrot.slane %v10006_v30, 5  ;;  %v9955_v7 = vld [vmem:[#allocation4 + $0x1c] sm:$0xf]  ;;  %v10012_v15 = vrot.slane %v10010_v31, 4  ;;  %v15033_v37 = vld [vmem:[#allocation4 + $0x48] sm:$0xff]  }
 0x502   : > { %14548 = vmatmul.mubr.msk.bf16.vlgmr.msra.gmra.mrb[124].mxu1 %vm1504_vm7, %v15026_v62  ;;  %v9980_v13 = vrot.slane %v9979_v28, 4  ;;  %v10021_v11 = vshrl.u32 %v9954_v49, 16  ;;  %v10024_v9 = vshll.u32 %v9954_v49, 16  ;;  %v10030_v38 = vshll.u32 %v9955_v7, 16  ;;  %v9957_v12 = vld [vmem:[#allocation4 + $0x24] sm:$0xf] }
 0x503   : > { %14564 = vmatpush3.bf16.msra.mxu1 %v15027_v56  ;;  %14551 = vmatprep.mubr.msk.bf16.mxu1 %vm1504_vm7, %v15028_v63  ;;  %v9990_v29 = vrot.slane %v9989_v10, 4  ;;  %v10003_v5 = vor.u32 %v10002_v4, %v9999_v39  ;;  %v10013_v23 = vor.u32 %v10012_v15, %v17723_v1  ;;  %v10016_v32 = vshll.u32 %v9953_v55, 16  ;;  %v9956_v58 = vld [vmem:[#allocation4 + $0x20] sm:$0x1]  ;;  %v9958_v24 = vld [vmem:[#allocation4 + $0x28] sm:$0xf] }
 0x504   : > { %14565 = vmatprep.subr.bf16.mxu1 %v15032_v61  ;;  %v10034_v19 = vshrl.u32 %v9955_v7, 16  ;;  %v9985_v18 = vsel %vm15732_vm0, %v9980_v13, %v9984_v53  ;;  %v10023_v40 = vrot.slane %v10021_v11, 4  ;;  %v10026_v51 = vrot.slane %v10024_v9, 5  ;;  %v9960_v59 = vld [vmem:[#allocation4 + $0x30] sm:$0xf]  ;;  %v15034_v53 = vld [vmem:[#allocation4 + $0x54] sm:$0xff]  }
 0x505   : > { %v9995_v25 = vsel %vm15732_vm0, %v9990_v29, %v9994_v33  ;;  %v10004_v2 = vrot.slane %v10003_v5, 4  ;;  %v17732_v0 = vrot.slane %v10030_v38, 5  ;;  %v10045_v27 = vshrl.u32 %v9957_v12, 16  ;;  %v9959_v16 = vld [vmem:[#allocation4 + $0x2c] sm:$0x1]  ;;  %s18131_s17 = scalar_lea.sflag [#allocation8], %s18227_s26 }
 0x506   : > { %v10036_v36 = vrot.slane %v10034_v19, 4  ;;  %v10048_v6 = vshll.u32 %v9957_v12, 16  ;;  %v10014_v48 = vrot.slane %v10013_v23, 4  ;;  %v10018_v42 = vrot.slane %v10016_v32, 5  ;;  %v9962_v14 = vld [vmem:[#allocation4 + $0x38] sm:$0x1] }
 0x507   : > { %14566 = vmatpush3.bf16.msra.mxu1 %v15032_v61  ;;  %v10040_v47 = vshll.u32 %v9956_v58, 16  ;;  %v10054_v56 = vshll.u32 %v9958_v24, 16  ;;  %v10047_v62 = vrot.slane %v10045_v27, 4  ;;  %v9961_v61 = vld [vmem:[#allocation4 + $0x34] sm:$0xf]  ;;  %v13501_v34 = vcombine.low %v9985_v18, %v9995_v25  ;;  %s15065_s29 = scalar_lea.vmem %s18124_s24, 2048 }
 0x508   : > { %14583 = vmatprep.subr.bf16.mxu1 %v17720_v22  ;;  %v10050_v63 = vrot.slane %v10048_v6, 5  ;;  %v10009_v57 = vsel %vm15732_vm0, %v10004_v2, %v17723_v1  ;;  %v10058_v21 = vshrl.u32 %v9958_v24, 16  ;;  %v10027_v3 = vor.u32 %v10026_v51, %v10023_v40  ;;  %v9963_v43 = vld [vmem:[#allocation4 + $0x3c] sm:$0xf]  ;;  %v9964_v28 = vld [vmem:[#allocation4 + $0x40] sm:$0xf]  ;;  %p15066_p7 = scmp.ne.s32.totalorder %s18124_s24, %s15065_s29 }
 0x509   : > { %v17739_v17 = vrot.slane %v10054_v56, 5  ;;  %v10037_v44 = vor.u32 %v10036_v36, %v17732_v0  ;;  %v10019_v52 = vsel %vm15732_vm0, %v10014_v48, %v10018_v42  ;;  %v10042_v41 = vrot.slane %v10040_v47, 5  ;;  %v9966_v38 = vld [vmem:[#allocation4 + $0x48] sm:$0xf]  ;;  %v9965_v27 = vld [vmem:[#allocation4 + $0x44] sm:$0x1] }
 0x50a   : > { %14552 = vmatmul.mubr.msk.bf16.gmra.mrb[128].mxu1 %vm1504_vm7, %v15029_v54  ;;  %v10069_v54 = vshrl.u32 %v9960_v59, 16  ;;  %v10060_v26 = vrot.slane %v10058_v21, 4  ;;  %v10078_v46 = vshll.u32 %v9961_v61, 16  ;;  %v10051_v8 = vor.u32 %v10050_v63, %v10047_v62  ;;  %v9969_v47 = vld [vmem:[#allocation4 + $0x54] sm:$0xf]  ;;  %p15067_p9 = pnand %p15066_p7, %p15271_p3  ;;  %s15167_s14 = smov [#allocation7]  }
 0x50b   : > { %14555 = vmatprep.mubr.msk.bf16.mxu1 %vm1504_vm7, %v15030_v50  ;;  %v10072_v50 = vshll.u32 %v9960_v59, 16  ;;  %v10064_v39 = vshll.u32 %v9959_v16, 16  ;;  %v10082_v49 = vshrl.u32 %v9961_v61, 16  ;;  %v10088_v55 = vshll.u32 %v9962_v14, 16  ;;  %v9970_v61 = vld [vmem:[#allocation4 + $0x58] sm:$0xf] }
 0x50c   : > { %v10071_v45 = vrot.slane %v10069_v54, 4  ;;  %v10061_v10 = vor.u32 %v10060_v26, %v17739_v17  ;;  %v17745_v31 = vrot.slane %v10078_v46, 5  ;;  %v10028_v4 = vrot.slane %v10027_v3, 4  ;;  %v9968_v21 = vld [vmem:[#allocation4 + $0x50] sm:$0x1]  ;;  %p15068_p10 = pneg %p15067_p9  ;;  %s15069_s11 = sshll.u32 %s15167_s14, 4  ;;  %s15070_s11 = int_to_ptr.vmem [resolvable:$false] %s15069_s11 }
 0x50d   : > { %v10074_v30 = vrot.slane %v10072_v50, 5  ;;  %v10038_v1 = vrot.slane %v10037_v44, 4  ;;  %v10093_v13 = vshrl.u32 %v9963_v43, 16  ;;  %v10084_v29 = vrot.slane %v10082_v49, 4  ;;  %s15071_s19 = scalar_lea.vmem %s15070_s11, 4096  ;;  %p15072_p11 = scmp.lt.s32.totalorder %s18124_s24, %s15070_s11 }
 0x50e   : > { %v10096_v33 = vshll.u32 %v9963_v43, 16  ;;  %v10102_v15 = vshll.u32 %v9964_v28, 16  ;;  %v13502_v5 = vcombine.low %v10009_v57, %v10019_v52  ;;  %v10066_v11 = vrot.slane %v10064_v39, 5  ;;  %p15073_p12 = scmp.lt.s32.totalorder %s15071_s19, %s15065_s29 }
 0x50f   : > { %v10075_v7 = vor.u32 %v10074_v30, %v10071_v45  ;;  %v10106_v9 = vshrl.u32 %v9964_v28, 16  ;;  %v10052_v23 = vrot.slane %v10051_v8, 4  ;;  %v10062_v32 = vrot.slane %v10061_v10, 4  ;;  %v17777_v8 = vld [vmem:[%s18190_s7 + $0x30] sm:$0xff]  }
 0x510   : > { %v10085_v19 = vor.u32 %v10084_v29, %v17745_v31  ;;  %v10090_v12 = vrot.slane %v10088_v55, 5  ;;  %v10033_v18 = vsel %vm15732_vm0, %v10028_v4, %v17732_v0  ;;  %v10043_v58 = vsel %vm15732_vm0, %v10038_v1, %v10042_v41  ;;  %v15036_v0 = vld [vmem:[%s18190_s7 + $0x28] sm:$0xff]   ;;  %v9971_v45 = vld [vmem:[#allocation4 + $0x5c] sm:$0x1]  ;;  %v10375_v29 = vld [vmem:[#allocation4 + $0x4] sm:$0xf]  ;;  %p15074_p13 = por %p15073_p12, %p15072_p11 }
 0x511   : > { %v10076_v24 = vrot.slane %v10075_v7, 4  ;;  %v10098_v25 = vrot.slane %v10096_v33, 5  ;;  %v17755_v2 = vrot.slane %v10102_v15, 5  ;;  %v10117_v40 = vshrl.u32 %v9966_v38, 16 }
 0x512   : > { %14556 = vmatmul.mubr.msk.bf16.gmra.mrb[132].mxu1 %vm1504_vm7, %v15031_v35  ;;  %v9967_v35 = vld [vmem:[#allocation4 + $0x4c] sm:$0xf]  ;;  %v10120_v51 = vshll.u32 %v9966_v38, 16  ;;  %v10086_v36 = vrot.slane %v10085_v19, 4  ;;  %v10108_v6 = vrot.slane %v10106_v9, 4  ;;  %v13503_v42 = vcombine.low %v10033_v18, %v10043_v58  ;;  %p15075_p0 = pnand %p15074_p13, %p15068_p10 }
 0x513   : > { %14559 = vmatprep.mubr.msk.bf16.mxu1 %vm1504_vm7, %v15033_v37  ;;  %v10095_v37 = vrot.slane %v10093_v13, 4  ;;  %v10126_v59 = vshll.u32 %v9967_v35, 16  ;;  %v10130_v48 = vshrl.u32 %v9967_v35, 16  ;;  %v10119_v56 = vrot.slane %v10117_v40, 4  ;;  %v10374_v19 = vld [vmem:[#allocation4] sm:$0xe] }
 0x514   : > { %v10122_v62 = vrot.slane %v10120_v51, 5  ;;  %v10067_v57 = vsel %vm15732_vm0, %v10062_v32, %v10066_v11  ;;  %v10112_v16 = vshll.u32 %v9965_v27, 16  ;;  %v10081_v44 = vsel %vm15732_vm0, %v10076_v24, %v17745_v31  ;;  %v10378_v58 = vld [vmem:[#allocation4 + $0x10] sm:$0xf]  ;;  %v10381_v24 = vld [vmem:[#allocation4 + $0x1c] sm:$0xf] }
 0x515   : > { %v10128_v63 = vrot.slane %v10126_v59, 5  ;;  %v10132_v3 = vrot.slane %v10130_v48, 4  ;;  %v10091_v14 = vsel %vm15732_vm0, %v10086_v36, %v10090_v12  ;;  %v10099_v54 = vor.u32 %v10098_v25, %v10095_v37  ;;  %v10376_v12 = vld [vmem:[#allocation4 + $0x8] sm:$0x1]  ;;  %v10377_v27 = vld [vmem:[#allocation4 + $0xc] sm:$0xe] }
 0x516   : > { %v10109_v50 = vor.u32 %v10108_v6, %v17755_v2  ;;  %v10144_v52 = vshll.u32 %v9969_v47, 16  ;;  %v10150_v41 = vshll.u32 %v9970_v61, 16  ;;  %v10154_v26 = vshrl.u32 %v9970_v61, 16  ;;  %v10379_v6 = vld [vmem:[#allocation4 + $0x14] sm:$0x1] }
 0x517   : > { %v10123_v46 = vor.u32 %v10122_v62, %v10119_v56  ;;  %v10133_v43 = vor.u32 %v10132_v3, %v10128_v63  ;;  %v13505_v30 = vcombine.low %v10081_v44, %v10091_v14  ;;  %v10100_v28 = vrot.slane %v10099_v54, 4  ;;  %v10384_v54 = vld [vmem:[#allocation4 + $0x28] sm:$0xf] }
 0x518   : > { %v10114_v10 = vrot.slane %v10112_v16, 5  ;;  %v10146_v49 = vrot.slane %v10144_v52, 5  ;;  %v10152_v55 = vrot.slane %v10150_v41, 5  ;;  %v10156_v4 = vrot.slane %v10154_v26, 4 }
 0x519   : > { %v10124_v1 = vrot.slane %v10123_v46, 4  ;;  %v10134_v7 = vrot.slane %v10133_v43, 4  ;;  %v10160_v33 = vshll.u32 %v9971_v45, 16  ;;  %v10105_v15 = vsel %vm15732_vm0, %v10100_v28, %v17755_v2  ;;  %v10383_v43 = vld [vmem:[#allocation4 + $0x24] sm:$0xe] }
 0x51a   : > { %14560 = vmatmul.mubr.msk.bf16.gmra.mrb[136].mxu1 %vm1504_vm7, %v15034_v53  ;;  %v10136_v53 = vshll.u32 %v9968_v21, 16  ;;  %v10157_v9 = vor.u32 %v10156_v4, %v10152_v55  ;;  %v10424_v32 = vrot.slane %v10375_v29, 5  ;;  %v13519_v40 = vrot.slane %v10374_v19, 9  ;;  %v10386_v45 = vld [vmem:[#allocation4 + $0x30] sm:$0xe] }
 0x51b   : > { %14567 = vmatprep.mubr.msk.bf16.mxu1 %vm1504_vm7, %v13501_v34  ;;  %v10057_v34 = vsel %vm15732_vm0, %v10052_v23, %v17739_v17  ;;  %v10141_v17 = vshrl.u32 %v9969_v47, 16  ;;  %v10129_v38 = vsel %vm15732_vm0, %v10124_v1, %v10128_v63  ;;  %v10162_v18 = vrot.slane %v10160_v33, 5  ;;  %v10380_v47 = vld [vmem:[#allocation4 + $0x18] sm:$0xe]  ;;  %v10382_v63 = vld [vmem:[#allocation4 + $0x20] sm:$0x1] }
 0x51c   : > { %v13504_v39 = vcombine.low %v10057_v34, %v10067_v57  ;;  %v10138_v13 = vrot.slane %v10136_v53, 5  ;;  %v10158_v2 = vrot.slane %v10157_v9, 4  ;;  %v10426_v51 = vrot.slane %v10424_v32, 4  ;;  %v10385_v53 = vld [vmem:[#allocation4 + $0x2c] sm:$0x1] }
 0x51d   : > { %v10143_v31 = vrot.slane %v10141_v17, 4  ;;  %v10427_v36 = vrot.slane %v10376_v12, 5  ;;  %v10425_v56 = vsel %vm15834_vm5, %v13519_v40, %v10424_v32  ;;  %v13520_v57 = vrot.slane %v10377_v27, 9  ;;  %v10393_v29 = vld [vmem:[#allocation4 + $0x4c] sm:$0xf] }
 0x51e   : > { %v10139_v23 = vsel %vm15732_vm0, %v10134_v7, %v10138_v13  ;;  %v10163_v48 = vsel %vm15732_vm0, %v10158_v2, %v10162_v18  ;;  %v10434_v21 = vrot.slane %v10379_v6, 5  ;;  %v13521_v3 = vrot.slane %v10380_v47, 9  ;;  %v10390_v7 = vld [vmem:[#allocation4 + $0x40] sm:$0xf]  ;;  %v10392_v19 = vld [vmem:[#allocation4 + $0x48] sm:$0xe] }
 0x51f   : > { %v10147_v11 = vor.u32 %v10146_v49, %v10143_v31  ;;  %v13507_v37 = vcombine.low %v10129_v38, %v10139_v23  ;;  %v10428_v62 = vsel %vm15834_vm5, %v10426_v51, %v10427_v36  ;;  %v10441_v14 = vrot.slane %v10382_v63, 5  ;;  %v15038_v13 = vld [vmem:[%s18190_s7 + $0x38] sm:$0xff]   ;;  %v10394_v12 = vld [vmem:[#allocation4 + $0x50] sm:$0x1]  ;;  %v10396_v51 = vld [vmem:[#allocation4 + $0x58] sm:$0xf] }
 0x520   : > { %v13531_v34 = vcombine.low %v10425_v56, %v10428_v62  ;;  %v10445_v41 = vrot.slane %v10384_v54, 5  ;;  %v10448_v49 = vrot.slane %v10385_v53, 5  ;;  %v10391_v23 = vld [vmem:[#allocation4 + $0x44] sm:$0x1]  ;;  %v10466_v32 = vrot.slane %v10393_v29, 5 }
 0x521   : > { %v10148_v25 = vrot.slane %v10147_v11, 4  ;;  %v10459_v11 = vrot.slane %v10390_v7, 5  ;;  %v10469_v40 = vrot.slane %v10394_v12, 5  ;;  %v10473_v6 = vrot.slane %v10396_v51, 5  ;;  %v10397_v47 = vld [vmem:[#allocation4 + $0x5c] sm:$0x1] }
 0x522   : > { %14568 = vmatmul.mubr.msk.bf16.vlgmr.msra.gmra.mrb[124].mxu1 %vm1504_vm7, %v13502_v5  ;;  %v10447_v31 = vrot.slane %v10445_v41, 4  ;;  %v10468_v2 = vrot.slane %v10466_v32, 4  ;;  %v15042_v54 = vld [vmem:[#allocation4 + $0x24] sm:$0xff]   ;;  %v10935_v53 = vld [vmem:[#allocation4 + $0x1c] sm:$0xf] }
 0x523   : > { %14584 = vmatpush3.bf16.msra.mxu1 %v17720_v22  ;;  %14571 = vmatprep.mubr.msk.bf16.mxu1 %vm1504_vm7, %v13503_v42  ;;  %v10110_v22 = vrot.slane %v10109_v50, 4  ;;  %v10153_v59 = vsel %vm15732_vm0, %v10148_v25, %v10152_v55  ;;  %v10431_v42 = vrot.slane %v10378_v58, 5  ;;  %v10387_v50 = vld [vmem:[#allocation4 + $0x34] sm:$0xf]  ;;  %v13523_v55 = vrot.slane %v10386_v45, 9  ;;  %v15044_v7 = vld [vmem:[#allocation4 + $0x3c] sm:$0xff]  }
 0x524   : > { %14585 = vmatprep.subr.bf16.mxu1 %v15036_v0  ;;  %v13508_v61 = vcombine.low %v10153_v59, %v10163_v48  ;;  %v13525_v25 = vrot.slane %v10392_v19, 9  ;;  %v10470_v48 = vsel %vm15834_vm5, %v10468_v2, %v10469_v40  ;;  %v10475_v63 = vrot.slane %v10473_v6, 4  ;;  %v15047_v2 = vld [vmem:[#allocation4 + $0x54] sm:$0xff]  }
 0x525   : > { %v10115_v5 = vsel %vm15732_vm0, %v10110_v22, %v10114_v10  ;;  %v10433_v16 = vrot.slane %v10431_v42, 4  ;;  %v10432_v17 = vsel %vm15834_vm5, %v13520_v57, %v10431_v42  ;;  %v13522_v10 = vrot.slane %v10383_v43, 9  ;;  %v10395_v42 = vld [vmem:[#allocation4 + $0x54] sm:$0xe] }
 0x526   : > { %v13506_v35 = vcombine.low %v10105_v15, %v10115_v5  ;;  %v10449_v15 = vsel %vm15834_vm5, %v10447_v31, %v10448_v49  ;;  %v10389_v5 = vld [vmem:[#allocation4 + $0x3c] sm:$0xe]  ;;  %v10467_v59 = vsel %vm15834_vm5, %v13525_v25, %v10466_v32  ;;  %v13526_v62 = vrot.slane %v10395_v42, 9  ;;  %v10940_v25 = vld [vmem:[#allocation4 + $0x30] sm:$0xf] }
 0x527   : > { %14586 = vmatpush3.bf16.msra.mxu1 %v15036_v0  ;;  %v10438_v0 = vrot.slane %v10381_v24, 5  ;;  %v10435_v52 = vsel %vm15834_vm5, %v10433_v16, %v10434_v21  ;;  %v10446_v33 = vsel %vm15834_vm5, %v13522_v10, %v10445_v41  ;;  %v13524_v58 = vrot.slane %v10389_v5, 9  ;;  %v15039_v21 = vld [vmem:[#allocation4 + $0xc] sm:$0xff]   ;;  %v10934_v41 = vld [vmem:[#allocation4 + $0x18] sm:$0xf] }
 0x528   : > { %14603 = vmatprep.subr.bf16.mxu1 %v17777_v8  ;;  %v13532_v28 = vcombine.low %v10432_v17, %v10435_v52  ;;  %v10461_v24 = vrot.slane %v10459_v11, 4  ;;  %v13537_v56 = vcombine.low %v10467_v59, %v10470_v48  ;;  %v10983_v45 = vshll.u32 %v10934_v41, 16  ;;  %v17853_v10 = vld [vmem:[%s18190_s7 + $0x50] sm:$0xff]   ;;  %v10941_v59 = vld [vmem:[#allocation4 + $0x34] sm:$0xf] }
 0x529   : > { %v10440_v44 = vrot.slane %v10438_v0, 4  ;;  %v10439_v26 = vsel %vm15834_vm5, %v13521_v3, %v10438_v0  ;;  %v10460_v36 = vsel %vm15834_vm5, %v13524_v58, %v10459_v11  ;;  %v10931_v3 = vld [vmem:[#allocation4 + $0xc] sm:$0xf]  ;;  %v10943_v48 = vld [vmem:[#allocation4 + $0x3c] sm:$0xf] }
 0x52a   : > { %14572 = vmatmul.mubr.msk.bf16.gmra.mrb[128].mxu1 %vm1504_vm7, %v13504_v39  ;;  %v10452_v39 = vrot.slane %v10387_v50, 5  ;;  %v15046_v50 = vld [vmem:[%s18190_s7 + $0x48] sm:$0xff]   ;;  %v10956_v17 = vshrl.u32 %v10931_v3, 16  ;;  %v10959_v52 = vshll.u32 %v10931_v3, 16  ;;  %v10985_v29 = vrot.slane %v10983_v45, 5 }
 0x52b   : > { %14575 = vmatprep.mubr.msk.bf16.mxu1 %vm1504_vm7, %v13505_v30  ;;  %v10442_v46 = vsel %vm15834_vm5, %v10440_v44, %v10441_v14  ;;  %v10388_v30 = vld [vmem:[#allocation4 + $0x38] sm:$0x1]  ;;  %v10932_v44 = vld [vmem:[#allocation4 + $0x10] sm:$0xf]  ;;  %v11052_v3 = vshrl.u32 %v10943_v48, 16 }
 0x52c   : > { %v13533_v22 = vcombine.low %v10439_v26, %v10442_v46  ;;  %v10454_v4 = vrot.slane %v10452_v39, 4  ;;  %v10455_v1 = vrot.slane %v10388_v30, 5  ;;  %v10453_v9 = vsel %vm15834_vm5, %v13523_v55, %v10452_v39  ;;  %v15040_v14 = vld [vmem:[#allocation4 + $0x18] sm:$0xff]   ;;  %v10933_v26 = vld [vmem:[#allocation4 + $0x14] sm:$0x1] }
 0x52d   : > { %v10965_v46 = vshll.u32 %v10932_v44, 16  ;;  %v10969_v43 = vshrl.u32 %v10932_v44, 16  ;;  %v10980_v39 = vshrl.u32 %v10934_v41, 16  ;;  %v10958_v30 = vrot.slane %v10956_v17, 4  ;;  %v15043_v55 = vld [vmem:[#allocation4 + $0x30] sm:$0xff]  }
 0x52e   : > { %v10456_v38 = vsel %vm15834_vm5, %v10454_v4, %v10455_v1  ;;  %v10989_v4 = vshll.u32 %v10935_v53, 16  ;;  %v10993_v1 = vshrl.u32 %v10935_v53, 16  ;;  %v11055_v44 = vshll.u32 %v10943_v48, 16 }
 0x52f   : > { %v13535_v18 = vcombine.low %v10453_v9, %v10456_v38  ;;  %v17856_v31 = vrot.slane %v10965_v46, 5  ;;  %v10971_v49 = vrot.slane %v10969_v43, 4  ;;  %v15048_v43 = vld [vmem:[#allocation4 + $0x60] sm:$0xff]  }
 0x530   : > { %v17858_v5 = vrot.slane %v10989_v4, 5  ;;  %v10995_v11 = vrot.slane %v10993_v1, 4  ;;  %v10946_v4 = vld [vmem:[#allocation4 + $0x48] sm:$0xf] }
 0x531   : > { %v10972_v38 = vor.u32 %v10971_v49, %v17856_v31  ;;  %v11054_v49 = vrot.slane %v11052_v3, 4 }
 0x532   : > { %14576 = vmatmul.mubr.msk.bf16.gmra.mrb[132].mxu1 %vm1504_vm7, %v13506_v35  ;;  %v13534_v35 = vcombine.low %v10446_v33, %v10449_v15  ;;  %v10937_v33 = vld [vmem:[#allocation4 + $0x24] sm:$0xf]  ;;  %v10938_v15 = vld [vmem:[#allocation4 + $0x28] sm:$0xf] }
 0x533   : > { %14579 = vmatprep.mubr.msk.bf16.mxu1 %vm1504_vm7, %v13507_v37  ;;  %v10462_v37 = vrot.slane %v10391_v23, 5  ;;  %v10936_v23 = vld [vmem:[#allocation4 + $0x20] sm:$0x1]  ;;  %v11004_v32 = vshrl.u32 %v10937_v33, 16  ;;  %v11013_v19 = vshll.u32 %v10938_v15, 16  ;;  %v11017_v12 = vshrl.u32 %v10938_v15, 16 }
 0x534   : > { %v10973_v51 = vrot.slane %v10972_v38, 4 }
 0x535   : > { %v10463_v27 = vsel %vm15834_vm5, %v10461_v24, %v10462_v37  ;;  %v10996_v24 = vor.u32 %v10995_v11, %v17858_v5  ;;  %v10999_v37 = vshll.u32 %v10936_v23, 16  ;;  %v17865_v42 = vrot.slane %v11013_v19, 5  ;;  %v10949_v19 = vld [vmem:[#allocation4 + $0x54] sm:$0xf] }
 0x536   : > { %v13536_v0 = vcombine.low %v10460_v36, %v10463_v27  ;;  %v10939_v36 = vld [vmem:[#allocation4 + $0x2c] sm:$0x1]  ;;  %v11006_v27 = vrot.slane %v11004_v32, 4 }
 0x53a   : > { %14580 = vmatmul.mubr.msk.bf16.gmra.mrb[136].mxu1 %vm1504_vm7, %v13508_v61  ;;  %v10476_v61 = vrot.slane %v10397_v47, 5  ;;  %v11019_v47 = vrot.slane %v11017_v12, 4  ;;  %v10950_v12 = vld [vmem:[#allocation4 + $0x58] sm:$0xf] }
 0x53b   : > { %14587 = vmatprep.mubr.msk.bf16.mxu1 %vm1504_vm7, %v13531_v34  ;;  %v10474_v34 = vsel %vm15834_vm5, %v13526_v62, %v10473_v6  ;;  %v10944_v62 = vld [vmem:[#allocation4 + $0x40] sm:$0xf] }
 0x53c   : > { %v10477_v57 = vsel %vm15834_vm5, %v10475_v63, %v10476_v61  ;;  %v10997_v61 = vrot.slane %v10996_v24, 4  ;;  %v11065_v17 = vshrl.u32 %v10944_v62, 16  ;;  %v11020_v41 = vor.u32 %v11019_v47, %v17865_v42 }
 0x53d   : > { %v13538_v16 = vcombine.low %v10474_v34, %v10477_v57  ;;  %v11001_v34 = vrot.slane %v10999_v37, 5  ;;  %v11023_v57 = vshll.u32 %v10939_v36, 16  ;;  %v11103_v36 = vshll.u32 %v10949_v19, 16 }
 0x53e   : > { %v11021_v15 = vrot.slane %v11020_v41, 4  ;;  %v10951_v41 = vld [vmem:[#allocation4 + $0x5c] sm:$0x1] }
 0x53f   : > { %v11025_v45 = vrot.slane %v11023_v57, 5  ;;  %v11105_v3 = vrot.slane %v11103_v36, 5 }
 0x542   : > { %14588 = vmatmul.mubr.msk.bf16.vlgmr.msra.gmra.mrb[124].mxu1 %vm1504_vm7, %v13532_v28  ;;  %v10961_v28 = vrot.slane %v10959_v52, 5 }
 0x543   : > { %14604 = vmatpush3.bf16.msra.mxu1 %v17777_v8  ;;  %14591 = vmatprep.mubr.msk.bf16.mxu1 %vm1504_vm7, %v13533_v22  ;;  %v15041_v8 = vld [vmem:[%s18190_s7 + $0x40] sm:$0xff]   ;;  %v10975_v22 = vshll.u32 %v10933_v26, 16 }
 0x544   : > { %14605 = vmatprep.subr.bf16.mxu1 %v15038_v13  ;;  %v10962_v9 = vor.u32 %v10961_v28, %v10958_v30  ;;  %v10942_v30 = vld [vmem:[#allocation4 + $0x38] sm:$0x1]  ;;  %v10945_v28 = vld [vmem:[#allocation4 + $0x44] sm:$0x1] }
 0x545   : > { %v11047_v11 = vshll.u32 %v10942_v30, 16  ;;  %v11071_v32 = vshll.u32 %v10945_v28, 16 }
 0x546   : > { %v10963_v40 = vrot.slane %v10962_v9, 4 }
 0x547   : > { %14606 = vmatpush3.bf16.msra.mxu1 %v15038_v13  ;;  %v10982_v13 = vrot.slane %v10980_v39, 4  ;;  %v11002_v39 = vsel %vm15732_vm0, %v10997_v61, %v11001_v34  ;;  %v11073_v47 = vrot.slane %v11071_v32, 5  ;;  %v11358_v32 = vld [vmem:[#allocation4 + $0x10] sm:$0xf] }
 0x548   : > { %14623 = vmatprep.subr.bf16.mxu1 %v15041_v8 }
 0x549   : > { %v10986_v58 = vor.u32 %v10985_v29, %v10982_v13  ;;  %v11067_v13 = vrot.slane %v11065_v17, 4  ;;  %v10947_v29 = vld [vmem:[#allocation4 + $0x4c] sm:$0xf] }
 0x54a   : > { %14592 = vmatmul.mubr.msk.bf16.gmra.mrb[128].mxu1 %vm1504_vm7, %v13534_v35  ;;  %v15045_v35 = vld [vmem:[#allocation4 + $0x48] sm:$0xff]   ;;  %v11089_v24 = vshrl.u32 %v10947_v29, 16 }
 0x54b   : > { %14595 = vmatprep.mubr.msk.bf16.mxu1 %vm1504_vm7, %v13535_v18  ;;  %v10977_v18 = vrot.slane %v10975_v22, 5  ;;  %v10987_v63 = vrot.slane %v10986_v58, 4  ;;  %v11085_v58 = vshll.u32 %v10947_v29, 16 }
 0x54c   : > { %v11091_v34 = vrot.slane %v11089_v24, 4 }
 0x54d   : > { %v10992_v53 = vsel %vm15732_vm0, %v10987_v63, %v17858_v5  ;;  %v11087_v61 = vrot.slane %v11085_v58, 5 }
 0x54e   : > { %v13576_v9 = vcombine.low %v10992_v53, %v11002_v39 }
 0x54f   : > { %v11092_v53 = vor.u32 %v11091_v34, %v11087_v61 }
 0x552   : > { %14596 = vmatmul.mubr.msk.bf16.gmra.mrb[132].mxu1 %vm1504_vm7, %v13536_v0  ;;  %v11028_v0 = vshrl.u32 %v10940_v25, 16 }
 0x553   : > { %14599 = vmatprep.mubr.msk.bf16.mxu1 %vm1504_vm7, %v13537_v56  ;;  %v11031_v56 = vshll.u32 %v10940_v25, 16  ;;  %v11026_v25 = vsel %vm15732_vm0, %v11021_v15, %v11025_v45 }
 0x554   : > { %v11030_v26 = vrot.slane %v11028_v0, 4 }
 0x555   : > { %v11033_v46 = vrot.slane %v11031_v56, 5 }
 0x557   : > { %v11034_v5 = vor.u32 %v11033_v46, %v11030_v26 }
 0x55a   : > { %14600 = vmatmul.mubr.msk.bf16.gmra.mrb[136].mxu1 %vm1504_vm7, %v13538_v16  ;;  %v11037_v16 = vshll.u32 %v10941_v59, 16 }
 0x55b   : > { %14607 = vmatprep.mubr.msk.bf16.mxu1 %vm1504_vm7, %v15039_v21  ;;  %v11041_v21 = vshrl.u32 %v10941_v59, 16 }
 0x55c   : > { %v17880_v22 = vrot.slane %v11037_v16, 5  ;;  %v10952_v16 = vld [vmem:[#allocation4 + $0x60] sm:$0xf] }
 0x55d   : > { %v11124_v39 = vshrl.u32 %v10952_v16, 16  ;;  %v11127_v45 = vshll.u32 %v10952_v16, 16  ;;  %v11362_v16 = vld [vmem:[#allocation4 + $0x20] sm:$0x1] }
 0x55f   : > { %v11126_v29 = vrot.slane %v11124_v39, 4 }
 0x562   : > { %14608 = vmatmul.mubr.msk.bf16.vlgmr.msra.gmra.mrb[124].mxu1 %vm1504_vm7, %v15040_v14  ;;  %v10968_v14 = vsel %vm15732_vm0, %v10963_v40, %v17856_v31  ;;  %v11043_v31 = vrot.slane %v11041_v21, 4  ;;  %v11049_v40 = vrot.slane %v11047_v11, 5 }
 0x563   : > { %14624 = vmatpush3.bf16.msra.mxu1 %v15041_v8  ;;  %14611 = vmatprep.mubr.msk.bf16.mxu1 %vm1504_vm7, %v15042_v54  ;;  %v11007_v8 = vshll.u32 %v10937_v33, 16  ;;  %v10978_v54 = vsel %vm15732_vm0, %v10973_v51, %v10977_v18  ;;  %v11079_v18 = vshll.u32 %v10946_v4, 16  ;;  %v11100_v51 = vshrl.u32 %v10949_v19, 16 }
 0x564   : > { %14625 = vmatprep.subr.bf16.mxu1 %v15046_v50  ;;  %v13575_v1 = vcombine.low %v10968_v14, %v10978_v54  ;;  %v11044_v38 = vor.u32 %v11043_v31, %v17880_v22  ;;  %v10953_v54 = vld [vmem:[#allocation4 + $0x64] sm:$0xf] }
 0x565   : > { %v11009_v6 = vrot.slane %v11007_v8, 5  ;;  %v11076_v8 = vshrl.u32 %v10946_v4, 16  ;;  %v11081_v63 = vrot.slane %v11079_v18, 5  ;;  %v11102_v21 = vrot.slane %v11100_v51, 4 }
 0x566   : > { %v11045_v59 = vrot.slane %v11044_v38, 4  ;;  %v11133_v30 = vshll.u32 %v10953_v54, 16  ;;  %v11137_v28 = vshrl.u32 %v10953_v54, 16 }
 0x567   : > { %14626 = vmatpush3.bf16.msra.mxu1 %v15046_v50  ;;  %v11061_v50 = vshll.u32 %v10944_v62, 16  ;;  %v11010_v52 = vor.u32 %v11009_v6, %v11006_v27  ;;  %v11109_v27 = vshll.u32 %v10950_v12, 16  ;;  %v11113_v6 = vshrl.u32 %v10950_v12, 16  ;;  %v10948_v62 = vld [vmem:[#allocation4 + $0x50] sm:$0x1] }
 0x568   : > { %14643 = vmatprep.subr.bf16.mxu1 %v17853_v10  ;;  %v11078_v0 = vrot.slane %v11076_v8, 4  ;;  %v11050_v17 = vsel %vm15732_vm0, %v11045_v59, %v11049_v40  ;;  %v11135_v15 = vrot.slane %v11133_v30, 5 }
 0x569   : > { %v11011_v33 = vrot.slane %v11010_v52, 4  ;;  %v11115_v14 = vrot.slane %v11113_v6, 4  ;;  %v11095_v52 = vshll.u32 %v10948_v62, 16 }
 0x56a   : > { %14612 = vmatmul.mubr.msk.bf16.gmra.mrb[128].mxu1 %vm1504_vm7, %v15043_v55  ;;  %v11057_v55 = vrot.slane %v11055_v44, 5  ;;  %v11111_v44 = vrot.slane %v11109_v27, 5 }
 0x56b   : > { %14615 = vmatprep.mubr.msk.bf16.mxu1 %vm1504_vm7, %v15044_v7  ;;  %v17882_v7 = vrot.slane %v11061_v50, 5  ;;  %v11016_v37 = vsel %vm15732_vm0, %v11011_v33, %v17865_v42  ;;  %v15050_v42 = vld [vmem:[%s18190_s7 + $0x58] sm:$0xff]   ;;  %v11129_v33 = vrot.slane %v11127_v45, 5 }
 0x56c   : > { %v11058_v23 = vor.u32 %v11057_v55, %v11054_v49  ;;  %v13577_v57 = vcombine.low %v11016_v37, %v11026_v25  ;;  %v11116_v31 = vor.u32 %v11115_v14, %v11111_v44  ;;  %v11119_v49 = vshll.u32 %v10951_v41, 16  ;;  %v17912_v55 = vld [vmem:[%s18190_s7 + $0x60] sm:$0xff]  }
 0x56d   : > { %v11130_v12 = vor.u32 %v11129_v33, %v11126_v29  ;;  %v11407_v37 = vrot.slane %v11358_v32, 5  ;;  %v11357_v25 = vld [vmem:[#allocation4 + $0xc] sm:$0xe]  ;;  %v11376_v32 = vld [vmem:[#allocation4 + $0x58] sm:$0xf] }
 0x56e   : > { %v11059_v48 = vrot.slane %v11058_v23, 4  ;;  %v11121_v38 = vrot.slane %v11119_v49, 5  ;;  %v10954_v23 = vld [vmem:[#allocation4 + $0x68] sm:$0x1]  ;;  %v13593_v59 = vrot.slane %v11357_v25, 9 }
 0x56f   : > { %v11143_v18 = vshll.u32 %v10954_v23, 16  ;;  %v11131_v36 = vrot.slane %v11130_v12, 4  ;;  %v11368_v49 = vld [vmem:[#allocation4 + $0x38] sm:$0x1]  ;;  %v15052_v23 = vld [vmem:[%s18190_s7 + $0x68] sm:$0xff]  }
 0x570   : > { %v11064_v26 = vsel %vm15732_vm0, %v11059_v48, %v17882_v7  ;;  %v11409_v48 = vrot.slane %v11407_v37, 4  ;;  %v11408_v34 = vsel %vm15834_vm5, %v13593_v59, %v11407_v37  ;;  %v11449_v37 = vrot.slane %v11376_v32, 5  ;;  %v11375_v25 = vld [vmem:[#allocation4 + $0x54] sm:$0xe] }
 0x571   : > { %v11145_v6 = vrot.slane %v11143_v18, 5  ;;  %v11136_v62 = vsel %vm15732_vm0, %v11131_v36, %v11135_v15  ;;  %v13599_v59 = vrot.slane %v11375_v25, 9 }
 0x572   : > { %14616 = vmatmul.mubr.msk.bf16.gmra.mrb[132].mxu1 %vm1504_vm7, %v15045_v35  ;;  %v11068_v35 = vor.u32 %v11067_v13, %v17882_v7  ;;  %v11093_v13 = vrot.slane %v11092_v53, 4  ;;  %v11370_v53 = vld [vmem:[#allocation4 + $0x40] sm:$0xf] }
 0x573   : > { %14619 = vmatprep.mubr.msk.bf16.mxu1 %vm1504_vm7, %v15047_v2  ;;  %v11035_v2 = vrot.slane %v11034_v5, 4  ;;  %v11139_v5 = vrot.slane %v11137_v28, 4 }
 0x574   : > { %v11069_v56 = vrot.slane %v11068_v35, 4 }
 0x575   : > { %v11040_v50 = vsel %vm15732_vm0, %v11035_v2, %v17880_v22  ;;  %v11106_v22 = vor.u32 %v11105_v3, %v11102_v21  ;;  %v11140_v35 = vor.u32 %v11139_v5, %v11135_v15  ;;  %v11359_v2 = vld [vmem:[#allocation4 + $0x14] sm:$0x1]  ;;  %v11363_v3 = vld [vmem:[#allocation4 + $0x24] sm:$0xe]  ;;  %v11431_v15 = vrot.slane %v11368_v49, 5 }
 0x576   : > { %v11074_v46 = vsel %vm15732_vm0, %v11069_v56, %v11073_v47  ;;  %v13578_v4 = vcombine.low %v11040_v50, %v11050_v17  ;;  %v11410_v47 = vrot.slane %v11359_v2, 5  ;;  %v11364_v56 = vld [vmem:[#allocation4 + $0x28] sm:$0xf]  ;;  %v13595_v41 = vrot.slane %v11363_v3, 9  ;;  %v11377_v2 = vld [vmem:[#allocation4 + $0x5c] sm:$0x1] }
 0x577   : > { %v11107_v11 = vrot.slane %v11106_v22, 4  ;;  %v11141_v27 = vrot.slane %v11140_v35, 4  ;;  %v11421_v21 = vrot.slane %v11364_v56, 5 }
 0x579   : > { %v11112_v58 = vsel %vm15732_vm0, %v11107_v11, %v11111_v44  ;;  %v11365_v44 = vld [vmem:[#allocation4 + $0x2c] sm:$0x1]  ;;  %v11422_v28 = vsel %vm15834_vm5, %v13595_v41, %v11421_v21  ;;  %v11914_v41 = vld [vmem:[#allocation4 + $0x18] sm:$0xf] }
 0x57a   : > { %14620 = vmatmul.mubr.msk.bf16.gmra.mrb[136].mxu1 %vm1504_vm7, %v15048_v43  ;;  %v11082_v43 = vor.u32 %v11081_v63, %v11078_v0  ;;  %v11361_v0 = vld [vmem:[#allocation4 + $0x1c] sm:$0xf]  ;;  %v11146_v63 = vsel %vm15732_vm0, %v11141_v27, %v11145_v6 }
 0x57b   : > { %14627 = vmatprep.mubr.msk.bf16.mxu1 %vm1504_vm7, %v13575_v1  ;;  %v13579_v1 = vcombine.low %v11064_v26, %v11074_v46  ;;  %v13582_v14 = vcombine.low %v11136_v62, %v11146_v63  ;;  %v11423_v26 = vrot.slane %v11421_v21, 4  ;;  %v11424_v46 = vrot.slane %v11365_v44, 5 }
 0x57c   : > { %v11083_v7 = vrot.slane %v11082_v43, 4  ;;  %v11367_v43 = vld [vmem:[#allocation4 + $0x34] sm:$0xf] }
 0x57d   : > { %v11428_v30 = vrot.slane %v11367_v43, 5  ;;  %v11425_v22 = vsel %vm15834_vm5, %v11423_v26, %v11424_v46  ;;  %v15054_v26 = vld [vmem:[#allocation4 + $0x24] sm:$0xff]   ;;  %v11915_v46 = vld [vmem:[#allocation4 + $0x1c] sm:$0xf]  ;;  %v15056_v43 = vld [vmem:[#allocation4 + $0x30] sm:$0xff]  }
 0x57e   : > { %v11088_v8 = vsel %vm15732_vm0, %v11083_v7, %v11087_v61  ;;  %v11414_v61 = vrot.slane %v11361_v0, 5  ;;  %v11371_v7 = vld [vmem:[#allocation4 + $0x44] sm:$0x1] }
 0x57f   : > { %v11430_v33 = vrot.slane %v11428_v30, 4  ;;  %v11379_v0 = vld [vmem:[#allocation4 + $0x64] sm:$0xf] }
 0x580   : > { %v11416_v17 = vrot.slane %v11414_v61, 4  ;;  %v11456_v63 = vrot.slane %v11379_v0, 5 }
 0x582   : > { %14628 = vmatmul.mubr.msk.bf16.vlgmr.msra.gmra.mrb[124].mxu1 %vm1504_vm7, %v13576_v9  ;;  %v11117_v9 = vrot.slane %v11116_v31, 4  ;;  %v11366_v31 = vld [vmem:[#allocation4 + $0x30] sm:$0xe]  ;;  %v11458_v44 = vrot.slane %v11456_v63, 4 }
 0x583   : > { %14644 = vmatpush3.bf16.msra.mxu1 %v17853_v10  ;;  %14631 = vmatprep.mubr.msk.bf16.mxu1 %vm1504_vm7, %v13577_v57  ;;  %v11097_v10 = vrot.slane %v11095_v52, 5  ;;  %v11411_v57 = vsel %vm15834_vm5, %v11409_v48, %v11410_v47  ;;  %v11417_v52 = vrot.slane %v11362_v16, 5  ;;  %v13596_v29 = vrot.slane %v11366_v31, 9  ;;  %v11918_v31 = vld [vmem:[#allocation4 + $0x28] sm:$0xf] }
 0x584   : > { %14645 = vmatprep.subr.bf16.mxu1 %v15050_v42  ;;  %v11122_v24 = vsel %vm15732_vm0, %v11117_v9, %v11121_v38  ;;  %v13605_v54 = vcombine.low %v11408_v34, %v11411_v57  ;;  %v11438_v9 = vrot.slane %v11371_v7, 5  ;;  %v11373_v38 = vld [vmem:[#allocation4 + $0x4c] sm:$0xf]  ;;  %v11451_v48 = vrot.slane %v11449_v37, 4  ;;  %v11378_v57 = vld [vmem:[#allocation4 + $0x60] sm:$0xe] }
 0x585   : > { %v11098_v19 = vsel %vm15732_vm0, %v11093_v13, %v11097_v10  ;;  %v13581_v51 = vcombine.low %v11112_v58, %v11122_v24  ;;  %v11418_v45 = vsel %vm15834_vm5, %v11416_v17, %v11417_v52  ;;  %v13607_v10 = vcombine.low %v11422_v28, %v11425_v22  ;;  %v11372_v58 = vld [vmem:[#allocation4 + $0x48] sm:$0xe]  ;;  %v11374_v24 = vld [vmem:[#allocation4 + $0x50] sm:$0x1]  ;;  %v15053_v52 = vld [vmem:[#allocation4 + $0x18] sm:$0xff]  }
 0x586   : > { %v13580_v40 = vcombine.low %v11088_v8, %v11098_v19  ;;  %v11429_v8 = vsel %vm15834_vm5, %v13596_v29, %v11428_v30  ;;  %v11432_v19 = vsel %vm15834_vm5, %v11430_v33, %v11431_v15  ;;  %v11442_v12 = vrot.slane %v11373_v38, 5  ;;  %v11917_v22 = vld [vmem:[#allocation4 + $0x24] sm:$0xf]  ;;  %v17988_v29 = vld [vmem:[%s18190_s7 + $0x80] sm:$0xff]  }
 0x587   : > { %14646 = vmatpush3.bf16.msra.mxu1 %v15050_v42  ;;  %v11360_v42 = vld [vmem:[#allocation4 + $0x18] sm:$0xe]  ;;  %v13598_v36 = vrot.slane %v11372_v58, 9  ;;  %v11445_v6 = vrot.slane %v11374_v24, 5  ;;  %v11452_v47 = vrot.slane %v11377_v2, 5  ;;  %v13600_v3 = vrot.slane %v11378_v57, 9 }
 0x588   : > { %14663 = vmatprep.subr.bf16.mxu1 %v17912_v55  ;;  %v13594_v50 = vrot.slane %v11360_v42, 9  ;;  %v11444_v27 = vrot.slane %v11442_v12, 4  ;;  %v11380_v42 = vld [vmem:[#allocation4 + $0x68] sm:$0x1]  ;;  %v11948_v30 = vshll.u32 %v11915_v46, 16  ;;  %v11952_v28 = vshrl.u32 %v11915_v46, 16 }
 0x589   : > { %v11443_v56 = vsel %vm15834_vm5, %v13598_v36, %v11442_v12  ;;  %v11453_v34 = vsel %vm15834_vm5, %v11451_v48, %v11452_v47  ;;  %v11966_v7 = vshll.u32 %v11917_v22, 16  ;;  %v11919_v24 = vld [vmem:[#allocation4 + $0x2c] sm:$0x1]  ;;  %v15061_v48 = vld [vmem:[#allocation4 + $0x60] sm:$0xff]  }
 0x58a   : > { %14632 = vmatmul.mubr.msk.bf16.gmra.mrb[128].mxu1 %vm1504_vm7, %v13578_v4  ;;  %v11415_v39 = vsel %vm15834_vm5, %v13594_v50, %v11414_v61  ;;  %v11435_v4 = vrot.slane %v11370_v53, 5  ;;  %v11446_v62 = vsel %vm15834_vm5, %v11444_v27, %v11445_v6  ;;  %v11450_v61 = vsel %vm15834_vm5, %v13599_v59, %v11449_v37  ;;  %v11923_v6 = vld [vmem:[#allocation4 + $0x3c] sm:$0xf]  ;;  %v15059_v59 = vld [vmem:[#allocation4 + $0x54] sm:$0xff]  }
 0x58b   : > { %14635 = vmatprep.mubr.msk.bf16.mxu1 %vm1504_vm7, %v13579_v1  ;;  %v11369_v1 = vld [vmem:[#allocation4 + $0x3c] sm:$0xe]  ;;  %v13606_v13 = vcombine.low %v11415_v39, %v11418_v45  ;;  %v13610_v16 = vcombine.low %v11443_v56, %v11446_v62  ;;  %v13611_v21 = vcombine.low %v11450_v61, %v11453_v34  ;;  %v11939_v53 = vshrl.u32 %v11914_v41, 16  ;;  %v15060_v45 = vld [vmem:[%s18190_s7 + $0x78] sm:$0xff]   ;;  %v11926_v61 = vld [vmem:[#allocation4 + $0x48] sm:$0xf] }
 0x58c   : > { %v13597_v5 = vrot.slane %v11369_v1, 9  ;;  %v11437_v11 = vrot.slane %v11435_v4, 4  ;;  %v11942_v39 = vshll.u32 %v11914_v41, 16  ;;  %v11963_v1 = vshrl.u32 %v11917_v22, 16 }
 0x58d   : > { %v11941_v49 = vrot.slane %v11939_v53, 4  ;;  %v17990_v33 = vrot.slane %v11948_v30, 5  ;;  %v11954_v15 = vrot.slane %v11952_v28, 4  ;;  %v11982_v27 = vshll.u32 %v11919_v24, 16 }
 0x58e   : > { %v11436_v35 = vsel %vm15834_vm5, %v13597_v5, %v11435_v4  ;;  %v11439_v18 = vsel %vm15834_vm5, %v11437_v11, %v11438_v9  ;;  %v11944_v4 = vrot.slane %v11942_v39, 5  ;;  %v15057_v5 = vld [vmem:[#allocation4 + $0x3c] sm:$0xff]   ;;  %v15058_v9 = vld [vmem:[#allocation4 + $0x48] sm:$0xff]   ;;  %v11965_v32 = vrot.slane %v11963_v1, 4 }
 0x58f   : > { %v11916_v11 = vld [vmem:[#allocation4 + $0x20] sm:$0x1]  ;;  %v12035_v41 = vshrl.u32 %v11926_v61, 16 }
 0x590   : > { %v11945_v38 = vor.u32 %v11944_v4, %v11941_v49  ;;  %v11958_v58 = vshll.u32 %v11916_v11, 16  ;;  %v11925_v4 = vld [vmem:[#allocation4 + $0x44] sm:$0x1] }
 0x592   : > { %14636 = vmatmul.mubr.msk.bf16.gmra.mrb[132].mxu1 %vm1504_vm7, %v13580_v40  ;;  %v13608_v40 = vcombine.low %v11429_v8, %v11432_v19  ;;  %v11968_v8 = vrot.slane %v11966_v7, 5  ;;  %v11960_v0 = vrot.slane %v11958_v58, 5 }
 0x593   : > { %14639 = vmatprep.mubr.msk.bf16.mxu1 %vm1504_vm7, %v13581_v51  ;;  %v13609_v51 = vcombine.low %v11436_v35, %v11439_v18  ;;  %v11921_v35 = vld [vmem:[#allocation4 + $0x34] sm:$0xf]  ;;  %v11955_v18 = vor.u32 %v11954_v15, %v17990_v33  ;;  %v15062_v15 = vld [vmem:[#allocation4 + $0x6c] sm:$0xff]  }
 0x594   : > { %v11996_v25 = vshll.u32 %v11921_v35, 16  ;;  %v12000_v2 = vshrl.u32 %v11921_v35, 16  ;;  %v11930_v35 = vld [vmem:[#allocation4 + $0x58] sm:$0xf] }
 0x595   : > { %v11956_v47 = vrot.slane %v11955_v18, 4 }
 0x596   : > { %v17999_v34 = vrot.slane %v11996_v25, 5  ;;  %v12002_v57 = vrot.slane %v12000_v2, 4  ;;  %v11932_v25 = vld [vmem:[#allocation4 + $0x60] sm:$0xf]  ;;  %v11933_v2 = vld [vmem:[#allocation4 + $0x64] sm:$0xf] }
 0x597   : > { %v11961_v46 = vsel %vm15732_vm0, %v11956_v47, %v11960_v0  ;;  %v12083_v0 = vshrl.u32 %v11932_v25, 16 }
 0x59a   : > { %14640 = vmatmul.mubr.msk.bf16.gmra.mrb[136].mxu1 %vm1504_vm7, %v13582_v14  ;;  %v11459_v14 = vrot.slane %v11380_v42, 5  ;;  %v12011_v42 = vshrl.u32 %v11923_v6, 16 }
 0x59b   : > { %14647 = vmatprep.mubr.msk.bf16.mxu1 %vm1504_vm7, %v13605_v54  ;;  %v11457_v54 = vsel %vm15834_vm5, %v13600_v3, %v11456_v63  ;;  %v11924_v63 = vld [vmem:[#allocation4 + $0x40] sm:$0xf] }
 0x59c   : > { %v11460_v50 = vsel %vm15834_vm5, %v11458_v44, %v11459_v14  ;;  %v12013_v28 = vrot.slane %v12011_v42, 4 }
 0x59d   : > { %v13612_v17 = vcombine.low %v11457_v54, %v11460_v50  ;;  %v11984_v54 = vrot.slane %v11982_v27, 5  ;;  %v11922_v50 = vld [vmem:[#allocation4 + $0x38] sm:$0x1]  ;;  %v12072_v27 = vshrl.u32 %v11930_v35, 16 }
 0x59e   : > { %v12006_v30 = vshll.u32 %v11922_v50, 16 }
 0x5a2   : > { %14648 = vmatmul.mubr.msk.bf16.vlgmr.msra.gmra.mrb[124].mxu1 %vm1504_vm7, %v13606_v13  ;;  %v11972_v13 = vshll.u32 %v11918_v31, 16 }
 0x5a3   : > { %14664 = vmatpush3.bf16.msra.mxu1 %v17912_v55  ;;  %14651 = vmatprep.mubr.msk.bf16.mxu1 %vm1504_vm7, %v13607_v10  ;;  %v15055_v55 = vld [vmem:[%s18190_s7 + $0x70] sm:$0xff]   ;;  %v11976_v10 = vshrl.u32 %v11918_v31, 16 }
 0x5a4   : > { %14665 = vmatprep.subr.bf16.mxu1 %v15052_v23  ;;  %v17992_v19 = vrot.slane %v11972_v13, 5  ;;  %v11928_v13 = vld [vmem:[#allocation4 + $0x50] sm:$0x1] }
 0x5a5   : > { %v11978_v12 = vrot.slane %v11976_v10, 4  ;;  %v12037_v10 = vrot.slane %v12035_v41, 4 }
 0x5a7   : > { %14666 = vmatpush3.bf16.msra.mxu1 %v15052_v23  ;;  %v11920_v23 = vld [vmem:[#allocation4 + $0x30] sm:$0xf]  ;;  %v11979_v36 = vor.u32 %v11978_v12, %v17992_v19  ;;  %v12030_v12 = vshll.u32 %v11925_v4, 16 }
 0x5a8   : > { %14683 = vmatprep.subr.bf16.mxu1 %v15055_v55  ;;  %v11987_v37 = vshrl.u32 %v11920_v23, 16 }
 0x5a9   : > { %v11980_v14 = vrot.slane %v11979_v36, 4  ;;  %v12068_v36 = vshll.u32 %v11930_v35, 16  ;;  %v12032_v47 = vrot.slane %v12030_v12, 5 }
 0x5aa   : > { %14652 = vmatmul.mubr.msk.bf16.gmra.mrb[128].mxu1 %vm1504_vm7, %v13608_v40  ;;  %v11946_v40 = vrot.slane %v11945_v38, 4  ;;  %v11989_v56 = vrot.slane %v11987_v37, 4  ;;  %v12054_v37 = vshll.u32 %v11928_v13, 16 }
 0x5ab   : > { %14655 = vmatprep.mubr.msk.bf16.mxu1 %vm1504_vm7, %v13609_v51  ;;  %v11969_v51 = vor.u32 %v11968_v8, %v11965_v32  ;;  %v11985_v49 = vsel %vm15732_vm0, %v11980_v14, %v11984_v54  ;;  %v12008_v8 = vrot.slane %v12006_v30, 5  ;;  %v12070_v14 = vrot.slane %v12068_v36, 5  ;;  %v11934_v30 = vld [vmem:[#allocation4 + $0x68] sm:$0x1] }
 0x5ac   : > { %v11951_v3 = vsel %vm15732_vm0, %v11946_v40, %v17990_v33  ;;  %v12056_v42 = vrot.slane %v12054_v37, 5  ;;  %v12074_v54 = vrot.slane %v12072_v27, 4 }
 0x5ad   : > { %v11970_v44 = vrot.slane %v11969_v51, 4 }
 0x5af   : > { %v11975_v31 = vsel %vm15732_vm0, %v11970_v44, %v17992_v19 }
 0x5b0   : > { %v13650_v18 = vcombine.low %v11975_v31, %v11985_v49  ;;  %v12075_v49 = vor.u32 %v12074_v54, %v12070_v14 }
 0x5b2   : > { %14656 = vmatmul.mubr.msk.bf16.gmra.mrb[132].mxu1 %vm1504_vm7, %v13610_v16  ;;  %v12014_v16 = vshll.u32 %v11923_v6, 16 }
 0x5b3   : > { %14659 = vmatprep.mubr.msk.bf16.mxu1 %vm1504_vm7, %v13611_v21  ;;  %v11927_v21 = vld [vmem:[#allocation4 + $0x4c] sm:$0xf] }
 0x5b4   : > { %v12044_v53 = vshll.u32 %v11927_v21, 16  ;;  %v12048_v39 = vshrl.u32 %v11927_v21, 16  ;;  %v12016_v22 = vrot.slane %v12014_v16, 5 }
 0x5b6   : > { %v12050_v38 = vrot.slane %v12048_v39, 4  ;;  %v12017_v19 = vor.u32 %v12016_v22, %v12013_v28 }
 0x5ba   : > { %14660 = vmatmul.mubr.msk.bf16.gmra.mrb[136].mxu1 %vm1504_vm7, %v13612_v17  ;;  %v12020_v17 = vshll.u32 %v11924_v63, 16 }
 0x5bb   : > { %14667 = vmatprep.mubr.msk.bf16.mxu1 %vm1504_vm7, %v15053_v52  ;;  %v12024_v52 = vshrl.u32 %v11924_v63, 16  ;;  %v12096_v63 = vshrl.u32 %v11933_v2, 16 }
 0x5bc   : > { %v18014_v1 = vrot.slane %v12020_v17, 5  ;;  %v11935_v17 = vld [vmem:[#allocation4 + $0x6c] sm:$0xf] }
 0x5bd   : > { %v12026_v7 = vrot.slane %v12024_v52, 4  ;;  %v12085_v52 = vrot.slane %v12083_v0, 4  ;;  %v12107_v4 = vshrl.u32 %v11935_v17, 16 }
 0x5bf   : > { %v12027_v58 = vor.u32 %v12026_v7, %v18014_v1 }
 0x5c2   : > { %14668 = vmatmul.mubr.msk.bf16.vlgmr.msra.gmra.mrb[124].mxu1 %vm1504_vm7, %v15054_v26  ;;  %v12038_v26 = vshll.u32 %v11926_v61, 16  ;;  %v12028_v61 = vrot.slane %v12027_v58, 4  ;;  %v11937_v58 = vld [vmem:[#allocation4 + $0x74] sm:$0x1] }
 0x5c3   : > { %14684 = vmatpush3.bf16.msra.mxu1 %v15055_v55  ;;  %14671 = vmatprep.mubr.msk.bf16.mxu1 %vm1504_vm7, %v15056_v43  ;;  %v11990_v55 = vshll.u32 %v11920_v23, 16  ;;  %v11929_v23 = vld [vmem:[#allocation4 + $0x54] sm:$0xf] }
 0x5c4   : > { %14685 = vmatprep.subr.bf16.mxu1 %v15060_v45  ;;  %v12040_v33 = vrot.slane %v12038_v26, 5  ;;  %v12062_v51 = vshll.u32 %v11929_v23, 16  ;;  %v12033_v39 = vsel %vm15732_vm0, %v12028_v61, %v12032_v47 }
 0x5c5   : > { %v11992_v62 = vrot.slane %v11990_v55, 5  ;;  %v12059_v55 = vshrl.u32 %v11929_v23, 16 }
 0x5c6   : > { %v12041_v24 = vor.u32 %v12040_v33, %v12037_v10  ;;  %v12064_v44 = vrot.slane %v12062_v51, 5 }
 0x5c7   : > { %14686 = vmatpush3.bf16.msra.mxu1 %v15060_v45  ;;  %v11993_v43 = vor.u32 %v11992_v62, %v11989_v56  ;;  %v12003_v45 = vor.u32 %v12002_v57, %v17999_v34  ;;  %v12086_v56 = vshll.u32 %v11932_v25, 16  ;;  %v12092_v62 = vshll.u32 %v11933_v2, 16 }
 0x5c8   : > { %14703 = vmatprep.subr.bf16.mxu1 %v17988_v29  ;;  %v12042_v57 = vrot.slane %v12041_v24, 4  ;;  %v12061_v16 = vrot.slane %v12059_v55, 4  ;;  %v12341_v24 = vld [vmem:[#allocation4 + $0x1c] sm:$0xf] }
 0x5c9   : > { %v11994_v11 = vrot.slane %v11993_v43, 4  ;;  %v12004_v32 = vrot.slane %v12003_v45, 4  ;;  %v12088_v41 = vrot.slane %v12086_v56, 5  ;;  %v12094_v26 = vrot.slane %v12092_v62, 5  ;;  %v11936_v43 = vld [vmem:[#allocation4 + $0x70] sm:$0xf] }
 0x5ca   : > { %14672 = vmatmul.mubr.msk.bf16.gmra.mrb[128].mxu1 %vm1504_vm7, %v15057_v5  ;;  %v13649_v5 = vcombine.low %v11951_v3, %v11961_v46  ;;  %v11931_v3 = vld [vmem:[#allocation4 + $0x5c] sm:$0x1]  ;;  %v12098_v46 = vrot.slane %v12096_v63, 4  ;;  %v12065_v31 = vor.u32 %v12064_v44, %v12061_v16  ;;  %v12116_v7 = vshll.u32 %v11936_v43, 16  ;;  %v12347_v16 = vld [vmem:[#allocation4 + $0x34] sm:$0xf] }
 0x5cb   : > { %14675 = vmatprep.mubr.msk.bf16.mxu1 %vm1504_vm7, %v15058_v9  ;;  %v18016_v9 = vrot.slane %v12044_v53, 5  ;;  %v11999_v6 = vsel %vm15732_vm0, %v11994_v11, %v17999_v34  ;;  %v15064_v34 = vld [vmem:[%s18190_s7 + $0x88] sm:$0xff]   ;;  %v12078_v45 = vshll.u32 %v11931_v3, 16  ;;  %v12120_v13 = vshrl.u32 %v11936_v43, 16 }
 0x5cc   : > { %v12089_v10 = vor.u32 %v12088_v41, %v12085_v52  ;;  %v12099_v33 = vor.u32 %v12098_v46, %v12094_v26  ;;  %v12390_v27 = vrot.slane %v12341_v24, 5  ;;  %v12346_v52 = vld [vmem:[#allocation4 + $0x30] sm:$0xe]  ;;  %v12348_v41 = vld [vmem:[#allocation4 + $0x38] sm:$0x1] }
 0x5cd   : > { %v12051_v40 = vor.u32 %v12050_v38, %v18016_v9  ;;  %v12047_v28 = vsel %vm15732_vm0, %v12042_v57, %v18016_v9  ;;  %v12066_v9 = vrot.slane %v12065_v31, 4  ;;  %v12076_v38 = vrot.slane %v12075_v49, 4 }
 0x5ce   : > { %v12080_v23 = vrot.slane %v12078_v45, 5  ;;  %v12090_v12 = vrot.slane %v12089_v10, 4  ;;  %v12100_v35 = vrot.slane %v12099_v33, 4  ;;  %v12392_v61 = vrot.slane %v12390_v27, 4  ;;  %v12351_v10 = vld [vmem:[#allocation4 + $0x44] sm:$0x1] }
 0x5cf   : > { %v12052_v21 = vrot.slane %v12051_v40, 4  ;;  %v12071_v37 = vsel %vm15732_vm0, %v12066_v9, %v12070_v14  ;;  %v12126_v40 = vshll.u32 %v11937_v58, 16  ;;  %v13669_v45 = vrot.slane %v12346_v52, 9 }
 0x5d0   : > { %v12081_v55 = vsel %vm15732_vm0, %v12076_v38, %v12080_v23  ;;  %v12095_v51 = vsel %vm15732_vm0, %v12090_v12, %v12094_v26  ;;  %v12356_v12 = vld [vmem:[#allocation4 + $0x58] sm:$0xf] }
 0x5d1   : > { %v12057_v22 = vsel %vm15732_vm0, %v12052_v21, %v12056_v42  ;;  %v12128_v62 = vrot.slane %v12126_v40, 5  ;;  %v12344_v42 = vld [vmem:[#allocation4 + $0x28] sm:$0xf]  ;;  %v12425_v24 = vrot.slane %v12356_v12, 5 }
 0x5d2   : > { %14676 = vmatmul.mubr.msk.bf16.gmra.mrb[132].mxu1 %vm1504_vm7, %v15059_v59  ;;  %v12009_v59 = vsel %vm15732_vm0, %v12004_v32, %v12008_v8  ;;  %v13653_v11 = vcombine.low %v12047_v28, %v12057_v22  ;;  %v12109_v32 = vrot.slane %v12107_v4, 4  ;;  %v12397_v44 = vrot.slane %v12344_v42, 5  ;;  %v12350_v28 = vld [vmem:[#allocation4 + $0x40] sm:$0xf]  ;;  %v12353_v22 = vld [vmem:[#allocation4 + $0x4c] sm:$0xf] }
 0x5d3   : > { %14679 = vmatprep.mubr.msk.bf16.mxu1 %vm1504_vm7, %v15061_v48  ;;  %v12018_v48 = vrot.slane %v12017_v19, 4  ;;  %v13651_v50 = vcombine.low %v11999_v6, %v12009_v59  ;;  %v12118_v19 = vrot.slane %v12116_v7, 5  ;;  %v12340_v6 = vld [vmem:[#allocation4 + $0x18] sm:$0xe]  ;;  %v12342_v59 = vld [vmem:[#allocation4 + $0x20] sm:$0x1] }
 0x5d4   : > { %v13667_v63 = vrot.slane %v12340_v6, 9  ;;  %v12393_v57 = vrot.slane %v12342_v59, 5  ;;  %v12411_v4 = vrot.slane %v12350_v28, 5  ;;  %v12418_v33 = vrot.slane %v12353_v22, 5 }
 0x5d5   : > { %v12023_v53 = vsel %vm15732_vm0, %v12018_v48, %v18014_v1  ;;  %v12110_v1 = vshll.u32 %v11935_v17, 16  ;;  %v13654_v48 = vcombine.low %v12071_v37, %v12081_v55  ;;  %v12404_v17 = vrot.slane %v12347_v16, 5 }
 0x5d6   : > { %v12391_v14 = vsel %vm15834_vm5, %v13667_v63, %v12390_v27  ;;  %v12394_v54 = vsel %vm15834_vm5, %v12392_v61, %v12393_v57  ;;  %v12413_v23 = vrot.slane %v12411_v4, 4  ;;  %v12362_v63 = vld [vmem:[#allocation4 + $0x70] sm:$0xf] }
 0x5d7   : > { %v12112_v8 = vrot.slane %v12110_v1, 5  ;;  %v13679_v46 = vcombine.low %v12391_v14, %v12394_v54  ;;  %v12406_v60 = vrot.slane %v12404_v17, 4  ;;  %v12405_v1 = vsel %vm15834_vm5, %v13669_v45, %v12404_v17 }
 0x5d8   : > { %v12439_v42 = vrot.slane %v12362_v63, 5 }
 0x5d9   : > { %v12113_v25 = vor.u32 %v12112_v8, %v12109_v32  ;;  %v12414_v32 = vrot.slane %v12351_v10, 5 }
 0x5da   : > { %14680 = vmatmul.mubr.msk.bf16.gmra.mrb[136].mxu1 %vm1504_vm7, %v15062_v15  ;;  %v12102_v15 = vshll.u32 %v11934_v30, 16  ;;  %v12407_v30 = vrot.slane %v12348_v41, 5 }
 0x5db   : > { %14687 = vmatprep.mubr.msk.bf16.mxu1 %vm1504_vm7, %v13649_v5  ;;  %v13652_v5 = vcombine.low %v12023_v53, %v12033_v39  ;;  %v12114_v0 = vrot.slane %v12113_v25, 4  ;;  %v12399_v53 = vrot.slane %v12397_v44, 4  ;;  %v12415_v58 = vsel %vm15834_vm5, %v12413_v23, %v12414_v32  ;;  %v12355_v25 = vld [vmem:[#allocation4 + $0x54] sm:$0xe] }
 0x5dc   : > { %v12408_v7 = vsel %vm15834_vm5, %v12406_v60, %v12407_v30  ;;  %v13672_v59 = vrot.slane %v12355_v25, 9 }
 0x5dd   : > { %v12119_v21 = vsel %vm15732_vm0, %v12114_v0, %v12118_v19  ;;  %v13681_v9 = vcombine.low %v12405_v1, %v12408_v7 }
 0x5de   : > { %v12426_v61 = vsel %vm15834_vm5, %v13672_v59, %v12425_v24 }
 0x5e2   : > { %14688 = vmatmul.mubr.msk.bf16.vlgmr.msra.gmra.mrb[124].mxu1 %vm1504_vm7, %v13650_v18  ;;  %v12104_v18 = vrot.slane %v12102_v15, 5  ;;  %v12352_v15 = vld [vmem:[#allocation4 + $0x48] sm:$0xe] }
 0x5e3   : > { %14704 = vmatpush3.bf16.msra.mxu1 %v17988_v29  ;;  %14691 = vmatprep.mubr.msk.bf16.mxu1 %vm1504_vm7, %v13651_v50  ;;  %v12122_v29 = vrot.slane %v12120_v13, 4  ;;  %v12343_v50 = vld [vmem:[#allocation4 + $0x24] sm:$0xe]  ;;  %v12349_v13 = vld [vmem:[#allocation4 + $0x3c] sm:$0xe]  ;;  %v13671_v8 = vrot.slane %v12352_v15, 9 }
 0x5e4   : > { %14705 = vmatprep.subr.bf16.mxu1 %v15064_v34  ;;  %v12105_v36 = vsel %vm15732_vm0, %v12100_v35, %v12104_v18  ;;  %v13668_v43 = vrot.slane %v12343_v50, 9  ;;  %v13670_v38 = vrot.slane %v12349_v13, 9  ;;  %v12359_v35 = vld [vmem:[#allocation4 + $0x64] sm:$0xf] }
 0x5e5   : > { %v12123_v2 = vor.u32 %v12122_v29, %v12118_v19  ;;  %v13655_v47 = vcombine.low %v12095_v51, %v12105_v36  ;;  %v12420_v19 = vrot.slane %v12418_v33, 4  ;;  %v12419_v37 = vsel %vm15834_vm5, %v13671_v8, %v12418_v33  ;;  %v12358_v51 = vld [vmem:[#allocation4 + $0x60] sm:$0xe]  ;;  %v12360_v36 = vld [vmem:[#allocation4 + $0x68] sm:$0x1] }
 0x5e6   : > { %v12398_v31 = vsel %vm15834_vm5, %v13668_v43, %v12397_v44  ;;  %v12412_v18 = vsel %vm15834_vm5, %v13670_v38, %v12411_v4  ;;  %v12432_v40 = vrot.slane %v12359_v35, 5  ;;  %v13673_v0 = vrot.slane %v12358_v51, 9  ;;  %v12363_v44 = vld [vmem:[#allocation4 + $0x74] sm:$0x1] }
 0x5e7   : > { %14706 = vmatpush3.bf16.msra.mxu1 %v15064_v34  ;;  %v12124_v56 = vrot.slane %v12123_v2, 4  ;;  %v12345_v34 = vld [vmem:[#allocation4 + $0x2c] sm:$0x1]  ;;  %v12357_v2 = vld [vmem:[#allocation4 + $0x5c] sm:$0x1]  ;;  %v13682_v27 = vcombine.low %v12412_v18, %v12415_v58  ;;  %v12442_v17 = vrot.slane %v12363_v44, 5 }
 0x5e8   : > { %v12400_v39 = vrot.slane %v12345_v34, 5  ;;  %v12433_v16 = vsel %vm15834_vm5, %v13673_v0, %v12432_v40  ;;  %v12441_v34 = vrot.slane %v12439_v42, 4 }
 0x5e9   : > { %v12129_v3 = vsel %vm15732_vm0, %v12124_v56, %v12128_v62  ;;  %v12434_v56 = vrot.slane %v12432_v40, 4  ;;  %v12435_v62 = vrot.slane %v12360_v36, 5 }
 0x5ea   : > { %14692 = vmatmul.mubr.msk.bf16.gmra.mrb[128].mxu1 %vm1504_vm7, %v13652_v5  ;;  %v13656_v26 = vcombine.low %v12119_v21, %v12129_v3  ;;  %v12401_v49 = vsel %vm15834_vm5, %v12399_v53, %v12400_v39  ;;  %v12354_v5 = vld [vmem:[#allocation4 + $0x50] sm:$0x1]  ;;  %v12361_v3 = vld [vmem:[#allocation4 + $0x6c] sm:$0xe]  ;;  %v12443_v41 = vsel %vm15834_vm5, %v12441_v34, %v12442_v17 }
 0x5eb   : > { %14695 = vmatprep.mubr.msk.bf16.mxu1 %vm1504_vm7, %v13653_v11  ;;  %v13680_v11 = vcombine.low %v12398_v31, %v12401_v49  ;;  %v12421_v29 = vrot.slane %v12354_v5, 5  ;;  %v12436_v21 = vsel %vm15834_vm5, %v12434_v56, %v12435_v62  ;;  %v13674_v50 = vrot.slane %v12361_v3, 9 }
 0x5ec   : > { %v13685_v54 = vcombine.low %v12433_v16, %v12436_v21 }
 0x5ed   : > { %v12422_v55 = vsel %vm15834_vm5, %v12420_v19, %v12421_v29  ;;  %v12440_v52 = vsel %vm15834_vm5, %v13674_v50, %v12439_v42 }
 0x5ee   : > { %v13683_v6 = vcombine.low %v12419_v37, %v12422_v55 }
 0x5f2   : > { %14696 = vmatmul.mubr.msk.bf16.gmra.mrb[132].mxu1 %vm1504_vm7, %v13654_v48  ;;  %v12427_v48 = vrot.slane %v12425_v24, 4 }
 0x5f3   : > { %14699 = vmatprep.mubr.msk.bf16.mxu1 %vm1504_vm7, %v13655_v47  ;;  %v12428_v47 = vrot.slane %v12357_v2, 5 }
 0x5f5   : > { %v12429_v57 = vsel %vm15834_vm5, %v12427_v48, %v12428_v47 }
 0x5f6   : > { %v13684_v14 = vcombine.low %v12426_v61, %v12429_v57 }
 0x5fa   : > { %14700 = vmatmul.mubr.msk.bf16.gmra.mrb[136].mxu1 %vm1504_vm7, %v13656_v26  ;;  %v13686_v26 = vcombine.low %v12440_v52, %v12443_v41 }
 0x5fb   : > { %14707 = vmatprep.mubr.msk.bf16.mxu1 %vm1504_vm7, %v13679_v46  ;;  %v13697_v46 = vld [vmem:[%s18191_s8] ss:$0 sm:$0xff] }
 0x602   : > { %14708 = vmatmul.mubr.msk.bf16.vlgmr.msra.gmra.mrb[124].mxu1 %vm1504_vm7, %v13680_v11 }
 0x603   : > { %14711 = vmatprep.mubr.msk.bf16.mxu1 %vm1504_vm7, %v13681_v9 }
 0x60a   : > { %14712 = vmatmul.mubr.msk.bf16.gmra.mrb[128].mxu1 %vm1504_vm7, %v13682_v27 }
 0x60b   : > { %14715 = vmatprep.mubr.msk.bf16.mxu1 %vm1504_vm7, %v13683_v6 }
 0x612   : > { %14716 = vmatmul.mubr.msk.bf16.gmra.mrb[132].mxu1 %vm1504_vm7, %v13684_v14 }
 0x613   : > { %14719 = vmatprep.mubr.msk.bf16.mxu1 %vm1504_vm7, %v13685_v54 }
 0x61a   : > { %14720 = vmatmul.mubr.msk.bf16.gmra.mrb[136].mxu1 %vm1504_vm7, %v13686_v26 }
 0x6d5   : > { %v14709_v43 = vpop.f32.mrb[124].mxu1 }
 0x6d6   : > { %v12678_v53 = vadd.f32 %v14709_v43, %v13697_v46  ;;  %v12543_v39 = vpop.f32.mrb[125].mxu1 }
 0x6d7   : > { %v12676_v45 = vadd.f32 %v13697_v46, %v12543_v39  ;;  %v14710_v60 = vpop.f32.mrb[126].mxu1 }
 0x6d8   : > { %12694 = vst [vmem:[%s15670_s21 + $0x10] sm:$0xff] %v12678_v53  ;;  %v12679_v30 = vadd.f32 %v14710_v60, %v13697_v46  ;;  %v12546_v20 = vpop.f32.mrb[127].mxu1 }
 0x6d9   : > { %12692 = vst [vmem:[%s15670_s21] sm:$0xff] %v12676_v45  ;;  %v12677_v28 = vadd.f32 %v13697_v46, %v12546_v20 }
 0x6da   : > { %12695 = vst [vmem:[%s15670_s21 + $0x18] sm:$0xff] %v12679_v30 }
 0x6db   : > { %12693 = vst [vmem:[%s15670_s21 + $0x8] sm:$0xff] %v12677_v28 }
 0x6dd   : > { %v14713_v22 = vpop.f32.mrb[128].mxu1 }
 0x6de   : > { %v12682_v31 = vadd.f32 %v14713_v22, %v13697_v46  ;;  %v12559_v49 = vpop.f32.mrb[129].mxu1 }
 0x6df   : > { %v12680_v4 = vadd.f32 %v13697_v46, %v12559_v49  ;;  %v14714_v1 = vpop.f32.mrb[130].mxu1 }
 0x6e0   : > { %12698 = vst [vmem:[%s15670_s21 + $0x30] sm:$0xff] %v12682_v31  ;;  %v12683_v7 = vadd.f32 %v14714_v1, %v13697_v46  ;;  %v12562_v13 = vpop.f32.mrb[131].mxu1 }
 0x6e1   : > { %12696 = vst [vmem:[%s15670_s21 + $0x20] sm:$0xff] %v12680_v4  ;;  %v12681_v10 = vadd.f32 %v13697_v46, %v12562_v13 }
 0x6e2   : > { %12699 = vst [vmem:[%s15670_s21 + $0x38] sm:$0xff] %v12683_v7 }
 0x6e3   : > { %12697 = vst [vmem:[%s15670_s21 + $0x28] sm:$0xff] %v12681_v10 }
 0x6e5   : > { %v14717_v33 = vpop.f32.mrb[132].mxu1 }
 0x6e6   : > { %v12686_v15 = vadd.f32 %v14717_v33, %v13697_v46  ;;  %v12575_v5 = vpop.f32.mrb[133].mxu1 }
 0x6e7   : > { %v12684_v11 = vadd.f32 %v13697_v46, %v12575_v5  ;;  %v14718_v9 = vpop.f32.mrb[134].mxu1 }
 0x6e8   : > { %12702 = vst [vmem:[%s15670_s21 + $0x50] sm:$0xff] %v12686_v15  ;;  %v12687_v38 = vadd.f32 %v14718_v9, %v13697_v46  ;;  %v12578_v23 = vpop.f32.mrb[135].mxu1 }
 0x6e9   : > { %12700 = vst [vmem:[%s15670_s21 + $0x40] sm:$0xff] %v12684_v11  ;;  %v12685_v32 = vadd.f32 %v13697_v46, %v12578_v23 }
 0x6ea   : > { %12703 = vst [vmem:[%s15670_s21 + $0x58] sm:$0xff] %v12687_v38 }
 0x6eb   : > { %12701 = vst [vmem:[%s15670_s21 + $0x48] sm:$0xff] %v12685_v32 }
 0x6ed   : > { %v14721_v8 = vpop.f32.mrb[136].mxu1 }
 0x6ee   : > { %v12690_v19 = vadd.f32 %v14721_v8, %v13697_v46  ;;  %v12591_v29 = vpop.f32.mrb[137].mxu1 }
 0x6ef   : > { %v12688_v12 = vadd.f32 %v13697_v46, %v12591_v29  ;;  %v14722_v35 = vpop.f32.mrb[138].mxu1 }
 0x6f0   : > { %12706 = vst [vmem:[%s15670_s21 + $0x70] sm:$0xff] %v12690_v19  ;;  %v12691_v18 = vadd.f32 %v14722_v35, %v13697_v46  ;;  %v12594_v58 = vpop.f32.mrb[139].mxu1 }
 0x6f1   : > { %12704 = vst [vmem:[%s15670_s21 + $0x60] sm:$0xff] %v12688_v12  ;;  %v12689_v24 = vadd.f32 %v13697_v46, %v12594_v58 }
 0x6f2   : > { %12707 = vst [vmem:[%s15670_s21 + $0x78] sm:$0xff] %v12691_v18 }
 0x6f3   : > { %12705 = vst [vmem:[%s15670_s21 + $0x68] sm:$0xff] %v12689_v24 }
 0x6f4   : > { %15078 = shalt.err (!%p15075_p0)
}
 0x6f5   : > { %s15079_s21 = scalar_lea.hbm %s18122_s25, 2048  ;;  %s15083_s28 = scalar_lea.hbm %s18192_s9, 8192 }
 0x6f6   : > { %p15080_p1 = scmp.ne.s32.totalorder %s18122_s25, %s15079_s21  ;;  %p15084_p5 = scmp.lt.u32.totalorder %s18122_s25, %s18192_s9 }
 0x6f7   : > { %p15085_p6 = scmp.lt.u32.totalorder %s15083_s28, %s15079_s21  ;;  %p15087_p9 = scmp.lt.u32.totalorder %s15079_s21, %s18122_s25 }
 0x6f8   : > { %p15081_p2 = pnand %p15080_p1, %p15271_p3 }
 0x6f9   : > { %p15086_p7 = por %p15085_p6, %p15084_p5 }
 0x6fa   : > { %p15082_p4 = pneg %p15081_p2 }
 0x6fb   : > { %p15088_p10 = por %p15087_p9, %p15086_p7 }
 0x6fd   : > { %p15089_p11 = pnand %p15088_p10, %p15082_p4 }
 0x6ff   : > { %15092 = shalt.err (!%p15089_p11)
}
 0x700   : > { %s15168_s12 = smov 128   ;;  %s15169_s13 = smov 8  }
 0x701   : > { %14860 = dma.vmem_to_hbm [thread:$0]  (%p15271_p3), %s18124_s24, 2048, %s18122_s25, %s18131_s17, %s15168_s12, %s15168_s12, %s15169_s13  }
 0x702 PF: > { %p14866_p12 = scmp.ge.s32.totalorder %s15159_s16, 2  ;;  %s12740_s26 = sand.u32 1, %s15131_s30  }
 0x703   : > { %s12741_s29 = scalar_lea.sflag [#allocation8], %s12740_s26 }
 0x704   : > { %p14863_p13 = pnand %p14866_p12, %p15280_p8 }
 0x706   : > { %15126 = dma.done.wait (!%p14863_p13), %s12741_s29, 2048  }
 0x707   : > { %15128 = vsyncadd (!%p14863_p13), %s12741_s29, 4294965248  ;;  %s22_s16 = sadd.s32 1, %s15159_s16   ;;  %s18228_s14 = sld [smem:[#allocation10_spill]] }
 0x708   : > { %p19_p0 = scmp.ge.s32.totalorder %s22_s16, 6   ;;  %s18229_s11 = sld [smem:[#allocation15_spill]] }
 0x709   : > { %s18230_s12 = sld [smem:[#allocation11_spill]]  ;;  %s18231_s13 = sld [smem:[#allocation12_spill]] }
 0x70a   : > { %s18232_s22 = sld [smem:[#allocation13_spill]]  ;;  %s18233_s15 = sld [smem:[#allocation14_spill]] }
 0x70b   : > { %s18234_s30 = smov %s15135_s10  ;;  %21 = sbr.rel (!%p19_p0) target bundleno = 5 (0x5), region = 156 }
 0x70d   : > { %s18235_s10 = smov %s18228_s14 }
 0x710   : > { %s18236_s14 = smov %s18232_s22 }
 0x712   :  { %12746 = vsyncpa [#allocation8], 1 }
 0x713   :  { %12748 = vsyncpa [#allocation8 + $0x1], 1 }

</bundles_post_ra>
